<compile_context>
chip_gen: v5e
topology: v5e:2x2
jax: 0.10.0
libtpu: 0.0.40
codegen_flags: <defaults>
</compile_context>

<pallas_src>
import functools

import jax
import jax.numpy as jnp
import numpy as np
from jax.experimental import pallas as pl
from jax.experimental.pallas import tpu as pltpu


# ---------------------------------------------------------------------------
# Structure matrices (numpy, built at trace time -> VMEM-resident constants)
# ---------------------------------------------------------------------------
def _shift_matrices(H, W):
    """0/1 matrices S_k (HW,HW): (S_k @ x)[h*W+w] = x[(h+dh)*W+(w+dw)] (0 if out of bounds)."""
    HW = H * W
    mats, taps = [], []
    for kh in range(3):
        for kw in range(3):
            dh, dw = kh - 1, kw - 1
            S = np.zeros((HW, HW), np.float32)
            for h in range(H):
                for w in range(W):
                    hh, ww = h + dh, w + dw
                    if 0 <= hh < H and 0 <= ww < W:
                        S[h * W + w, hh * W + ww] = 1.0
            if S.any():                       # drop taps that are entirely out of bounds
                mats.append(S)
                taps.append(kh * 3 + kw)
    return np.stack(mats), taps


def _pool_matrices(H, W):
    """4 gather matrices (HW/4, HW); elementwise max of the 4 gathers == MaxPool2d(2)."""
    H2, W2 = H // 2, W // 2
    mats = []
    for dh in range(2):
        for dw in range(2):
            P = np.zeros((H2 * W2, H * W), np.float32)
            for h2 in range(H2):
                for w2 in range(W2):
                    P[h2 * W2 + w2, (2 * h2 + dh) * W + (2 * w2 + dw)] = 1.0
            mats.append(P)
    return np.stack(mats)


def _upsample_matrix(H, W):
    """(4*HW, HW) 0/1 matrix implementing 2x nearest-neighbour upsampling."""
    U = np.zeros((4 * H * W, H * W), np.float32)
    for h in range(2 * H):
        for w in range(2 * W):
            U[h * (2 * W) + w, (h // 2) * W + (w // 2)] = 1.0
    return U


# ---------------------------------------------------------------------------
# Weight preparation (BN folding, FC re-layout) - done once on the wrapper side
# ---------------------------------------------------------------------------
def _fold_conv(p, taps, bn=True):
    """Fold eval-mode BatchNorm into the conv taps.  Returns ((T,Cin,Cout), (1,Cout))."""
    w, b = p["w"], p["b"]
    if bn:
        s = p["gamma"] / jnp.sqrt(p["var"] + 1e-5)
        w = w * s                                   # scale each output channel
        b = (b - p["mean"]) * s + p["beta"]
    w_taps = jnp.stack([w[k // 3, k % 3] for k in taps], axis=0)
    return w_taps.astype(jnp.float32), b.reshape(1, -1).astype(jnp.float32)


# ---------------------------------------------------------------------------
# In-kernel building blocks (everything stays in VMEM / vregs)
# ---------------------------------------------------------------------------
def _conv_block(x, s_ref, w_ref, b_ref, relu):
    """3x3 'same' conv on a (HW, Cin) activation: sum_k S_k @ x @ W_k + b.

    Matmul ordering is chosen per stage so the expensive (HW,HW) matmul carries the
    smaller of {Cin, Cout} lanes:
      Cin <= Cout :  (S_k @ x) @ W_k     (encoder convs)
      Cout <  Cin :  S_k @ (x @ W_k)     (decoder / final convs)
    """
    n_taps, cin, cout = w_ref.shape
    acc = None
    if cin <= cout:
        for k in range(n_taps):
            shifted = jnp.dot(s_ref[k], x, preferred_element_type=jnp.float32)
            term = jnp.dot(shifted, w_ref[k], preferred_element_type=jnp.float32)
            acc = term if acc is None else acc + term
    else:
        for k in range(n_taps):
            xw = jnp.dot(x, w_ref[k], preferred_element_type=jnp.float32)
            term = jnp.dot(s_ref[k], xw, preferred_element_type=jnp.float32)
            acc = term if acc is None else acc + term
    y = acc + b_ref[...]
    return jnp.maximum(y, 0.0) if relu else y


def _maxpool_block(x, p_ref):
    """MaxPool2d(2): elementwise max of 4 row-gathers (gather == 0/1 matmul)."""
    m = jnp.dot(p_ref[0], x, preferred_element_type=jnp.float32)
    for j in range(1, p_ref.shape[0]):
        m = jnp.maximum(m, jnp.dot(p_ref[j], x, preferred_element_type=jnp.float32))
    return m


def _stock_vae_kernel(
    x_ref, eps_ref,
    s_a, s_b, s_c, s_d, p_a, p_b, p_c, u_d, u_c, u_b,
    e1w, e1b, e2w, e2b, e3w, e3b,
    f1w, f1b, f2w, f2b, f3w, f3b, f4w, f4b,
    d1w, d1b, d2w, d2b, d3w, d3b, fw, fb,
    recon_ref, mu_ref, logvar_ref,
    *, latent_dim, hw3,
):
    # -------------------- encoder --------------------
    h = _conv_block(x_ref[...], s_a, e1w, e1b, relu=True)          # (HW0, 32)
    h = _maxpool_block(h, p_a)                                      # (HW1, 32)
    h = _conv_block(h, s_b, e2w, e2b, relu=True)                    # (HW1, 64)
    h = _maxpool_block(h, p_b)                                      # (HW2, 64)
    h = _conv_block(h, s_c, e3w, e3b, relu=True)                    # (HW2, 128)
    h = _maxpool_block(h, p_c)                                      # (HW3, 128)

    # ---------- bottleneck: fc1, fused fc2_mu|fc2_logvar, reparameterize ----------
    # fc1 consumes the PyTorch NCHW flatten; fc1 weights were pre-split per spatial
    # position p so no in-kernel reshape/transpose is needed.
    hfc = f1b[...]
    for p in range(hw3):
        hfc = hfc + jnp.dot(h[p:p + 1, :], f1w[p], preferred_element_type=jnp.float32)
    hfc = jnp.maximum(hfc, 0.0)                                     # (1, 128)

    ml = jnp.dot(hfc, f2w[...], preferred_element_type=jnp.float32) + f2b[...]
    mu = ml[:, :latent_dim]
    logvar = ml[:, latent_dim:]
    mu_ref[...] = mu
    logvar_ref[...] = logvar
    z = mu + eps_ref[...] * jnp.exp(0.5 * logvar)                   # (1, latent)

    # -------------------- decoder --------------------
    hd = jnp.dot(z, f3w[...], preferred_element_type=jnp.float32) + f3b[...]
    hd = jnp.maximum(hd, 0.0)                                       # (1, 128)

    c3 = f4w.shape[2]
    rows = []
    for p in range(hw3):                                            # fc4, pre-split per p
        r = jnp.dot(hd, f4w[p], preferred_element_type=jnp.float32) + f4b[p:p + 1, :]
        rows.append(jnp.maximum(r, 0.0))                            # (1, 128)
    # assemble (HW3, 128) without any in-kernel reshape (masked sublane broadcasts)
    ridx = jax.lax.broadcasted_iota(jnp.int32, (hw3, c3), 0)
    h = jnp.zeros((hw3, c3), jnp.float32)
    for p in range(hw3):
        h = h + jnp.where(ridx == p, jnp.broadcast_to(rows[p], (hw3, c3)), 0.0)

    h = _conv_block(h, s_d, d1w, d1b, relu=True)                    # (HW3, 128)
    h = jnp.dot(u_d[...], h, preferred_element_type=jnp.float32)    # (HW2, 128)
    h = _conv_block(h, s_c, d2w, d2b, relu=True)                    # (HW2, 64)
    h = jnp.dot(u_c[...], h, preferred_element_type=jnp.float32)    # (HW1, 64)
    h = _conv_block(h, s_b, d3w, d3b, relu=True)                    # (HW1, 32)
    h = jnp.dot(u_b[...], h, preferred_element_type=jnp.float32)    # (HW0, 32)
    h = _conv_block(h, s_a, fw, fb, relu=False)                     # (HW0, in_channels)
    recon_ref[...] = h


# ---------------------------------------------------------------------------
# Public wrapper (NCHW in / NCHW out, like the PyTorch module)
# ---------------------------------------------------------------------------
def stock_vae_forward(params, x_nchw, eps, *, num_tickers=8, seq_len=16,
                      latent_dim=16, in_channels=2):
    B = x_nchw.shape[0]
    H0, W0 = num_tickers, seq_len
    H1, W1 = H0 // 2, W0 // 2
    H2, W2 = H0 // 4, W0 // 4
    H3, W3 = H0 // 8, W0 // 8
    HW0, HW3 = H0 * W0, H3 * W3
    C3 = params["fc1"]["w"].shape[0] // HW3          # channels after encoder3 (128)
    FCH = params["fc1"]["w"].shape[1]                # fc hidden width (128)

    # structural constants (conv shifts / pool gathers / upsample replication)
    S_a, taps_a = _shift_matrices(H0, W0)
    S_b, taps_b = _shift_matrices(H1, W1)
    S_c, taps_c = _shift_matrices(H2, W2)
    S_d, taps_d = _shift_matrices(H3, W3)
    P_a, P_b, P_c = _pool_matrices(H0, W0), _pool_matrices(H1, W1), _pool_matrices(H2, W2)
    U_d, U_c, U_b = _upsample_matrix(H3, W3), _upsample_matrix(H2, W2), _upsample_matrix(H1, W1)

    # BN-folded conv weights
    e1w, e1b = _fold_conv(params["enc1"], taps_a)
    e2w, e2b = _fold_conv(params["enc2"], taps_b)
    e3w, e3b = _fold_conv(params["enc3"], taps_c)
    d1w, d1b = _fold_conv(params["dec1"], taps_d)
    d2w, d2b = _fold_conv(params["dec2"], taps_c)
    d3w, d3b = _fold_conv(params["dec3"], taps_b)
    fw, fb = _fold_conv(params["final"], taps_a, bn=False)

    # FC weights, re-laid-out so the kernel never reshapes activations:
    #  - fc1 rows split by spatial position p of the PyTorch NCHW flatten (index c*HW3+p)
    #  - fc2_mu / fc2_logvar concatenated into one GEMM
    #  - fc4 columns split by spatial position p of the torch .view(B,128,H3,W3)
    f1w = jnp.transpose(params["fc1"]["w"].reshape(C3, HW3, FCH), (1, 0, 2))
    f1b = params["fc1"]["b"].reshape(1, FCH)
    f2w = jnp.concatenate([params["fc2_mu"]["w"], params["fc2_logvar"]["w"]], axis=1)
    f2b = jnp.concatenate([params["fc2_mu"]["b"], params["fc2_logvar"]["b"]]).reshape(1, -1)
    f3w = params["fc3"]["w"]
    f3b = params["fc3"]["b"].reshape(1, FCH)
    f4w = jnp.transpose(params["fc4"]["w"].reshape(FCH, C3, HW3), (2, 0, 1))
    f4b = jnp.transpose(params["fc4"]["b"].reshape(C3, HW3), (1, 0))

    # layout plumbing only: NCHW -> (B, HW0, C) rows in h*W+w order
    x_flat = jnp.transpose(x_nchw, (0, 2, 3, 1)).reshape(B, HW0, in_channels)
    x_flat = x_flat.astype(jnp.float32)
    eps3 = eps.reshape(B, 1, latent_dim).astype(jnp.float32)

    consts = [S_a, S_b, S_c, S_d, P_a, P_b, P_c, U_d, U_c, U_b,
              e1w, e1b, e2w, e2b, e3w, e3b,
              f1w, f1b, f2w, f2b, f3w, f3b, f4w, f4b,
              d1w, d1b, d2w, d2b, d3w, d3b, fw, fb]
    consts = [jnp.asarray(a, jnp.float32) for a in consts]

    def batched_spec(*tail):
        return pl.BlockSpec((None,) + tail, lambda b, _n=len(tail): (b,) + (0,) * _n)

    def const_spec(a):
        # full-array block, constant index_map -> DMA'd once, stays VMEM-resident
        return pl.BlockSpec(a.shape, lambda b, _n=a.ndim: (0,) * _n)

    in_specs = ([batched_spec(HW0, in_channels), batched_spec(1, latent_dim)]
                + [const_spec(a) for a in consts])
    out_specs = (batched_spec(HW0, in_channels),
                 batched_spec(1, latent_dim),
                 batched_spec(1, latent_dim))
    out_shape = (jax.ShapeDtypeStruct((B, HW0, in_channels), jnp.float32),
                 jax.ShapeDtypeStruct((B, 1, latent_dim), jnp.float32),
                 jax.ShapeDtypeStruct((B, 1, latent_dim), jnp.float32))

    kernel = functools.partial(_stock_vae_kernel, latent_dim=latent_dim, hw3=HW3)
    recon_flat, mu, logvar = pl.pallas_call(
        kernel,
        grid=(B,),
        in_specs=in_specs,
        out_specs=out_specs,
        out_shape=out_shape,
        compiler_params=pltpu.CompilerParams(
            dimension_semantics=("parallel",),      # batch across cores on v7x megacore
            vmem_limit_bytes=32 * 1024 * 1024,
        ),
    )(x_flat, eps3, *consts)

    recon = jnp.transpose(recon_flat.reshape(B, H0, W0, in_channels), (0, 3, 1, 2))
    return recon, mu.reshape(B, latent_dim), logvar.reshape(B, latent_dim)


# ---------------------------------------------------------------------------
# Parameter construction (shapes follow StockVAE.__init__, large_model=True)
# ---------------------------------------------------------------------------
def init_params(key, num_tickers=8, seq_len=16, latent_dim=16, in_channels=2):
    keys = iter(jax.random.split(key, 64))

    def conv(cin, cout, bn=True):
        fan_in = 9 * cin
        p = {"w": jax.random.normal(next(keys), (3, 3, cin, cout), jnp.float32)
                  / jnp.sqrt(float(fan_in)),
             "b": 0.1 * jax.random.normal(next(keys), (cout,), jnp.float32)}
        if bn:   # fresh-module running stats (eval mode)
            p.update(gamma=jnp.ones((cout,), jnp.float32),
                     beta=jnp.zeros((cout,), jnp.float32),
                     mean=jnp.zeros((cout,), jnp.float32),
                     var=jnp.ones((cout,), jnp.float32))
        return p

    def lin(fin, fout):
        return {"w": jax.random.normal(next(keys), (fin, fout), jnp.float32)
                     / jnp.sqrt(float(fin)),
                "b": 0.1 * jax.random.normal(next(keys), (fout,), jnp.float32)}

    flat = 128 * (seq_len // 8) * (num_tickers // 8)
    return {
        "enc1": conv(in_channels, 32),
        "enc2": conv(32, 64),
        "enc3": conv(64, 128),
        "fc1": lin(flat, 128),
        "fc2_mu": lin(128, latent_dim),
        "fc2_logvar": lin(128, latent_dim),
        "fc3": lin(latent_dim, 128),
        "fc4": lin(128, flat),
        "dec1": conv(128, 128),
        "dec2": conv(128, 64),
        "dec3": conv(64, 32),
        "final": conv(32, in_channels, bn=False),
    }


# ---------------------------------------------------------------------------
# Plain-JAX/XLA reference (mirrors the PyTorch forward) for numerical checking
# ---------------------------------------------------------------------------
def reference_forward(params, x_nchw, eps, *, num_tickers=8, seq_len=16):
    HI = jax.lax.Precision.HIGHEST
    B = x_nchw.shape[0]

    def conv3x3(x, p, bn=True, relu=True):
        Bb, H, W, _ = x.shape
        w, b = p["w"], p["b"]
        xp = jnp.pad(x, ((0, 0), (1, 1), (1, 1), (0, 0)))
        y = jnp.zeros((Bb, H, W, w.shape[-1]), jnp.float32) + b
        for kh in range(3):
            for kw in range(3):
                y = y + jnp.einsum("bhwc,cd->bhwd", xp[:, kh:kh + H, kw:kw + W, :],
                                   w[kh, kw], precision=HI)
        if bn:
            s = p["gamma"] / jnp.sqrt(p["var"] + 1e-5)
            y = y * s + (p["beta"] - p["mean"] * s)
        return jnp.maximum(y, 0.0) if relu else y

    def pool(x):
        Bb, H, W, C = x.shape
        return x.reshape(Bb, H // 2, 2, W // 2, 2, C).max(axis=(2, 4))

    def up(x):
        return jnp.repeat(jnp.repeat(x, 2, axis=1), 2, axis=2)

    def linear(x, p):
        return jnp.dot(x, p["w"], precision=HI) + p["b"]

    x = jnp.transpose(x_nchw, (0, 2, 3, 1))
    h = pool(conv3x3(x, params["enc1"]))
    h = pool(conv3x3(h, params["enc2"]))
    h = pool(conv3x3(h, params["enc3"]))
    hf = jnp.transpose(h, (0, 3, 1, 2)).reshape(B, -1)          # torch .view(B,-1) order
    hfc = jnp.maximum(linear(hf, params["fc1"]), 0.0)
    mu = linear(hfc, params["fc2_mu"])
    logvar = linear(hfc, params["fc2_logvar"])
    z = mu + eps * jnp.exp(0.5 * logvar)
    h = jnp.maximum(linear(z, params["fc3"]), 0.0)
    h = jnp.maximum(linear(h, params["fc4"]), 0.0)
    h = h.reshape(B, 128, num_tickers // 8, seq_len // 8)
    h = jnp.transpose(h, (0, 2, 3, 1))
    h = up(conv3x3(h, params["dec1"]))
    h = up(conv3x3(h, params["dec2"]))
    h = up(conv3x3(h, params["dec3"]))
    h = conv3x3(h, params["final"], bn=False, relu=False)
    return jnp.transpose(h, (0, 3, 1, 2)), mu, logvar


# ---------------------------------------------------------------------------
if __name__ == "__main__":
    B, in_channels, num_tickers, seq_len, latent_dim = 2, 2, 8, 16, 16

    key = jax.random.PRNGKey(0)
    k_params, k_x, k_eps = jax.random.split(key, 3)

    params = init_params(k_params, num_tickers, seq_len, latent_dim, in_channels)
    # Input follows the PyTorch NCHW convention: (B, in_channels, num_tickers, seq_len)
    x = jax.random.normal(k_x, (B, in_channels, num_tickers, seq_len), jnp.float32)
    # Deterministic stand-in for torch.randn_like(std) in reparameterize()
    eps = jax.random.normal(k_eps, (B, latent_dim), jnp.float32)

    fwd = jax.jit(functools.partial(stock_vae_forward, num_tickers=num_tickers,
                                    seq_len=seq_len, latent_dim=latent_dim,
                                    in_channels=in_channels))
    recon, mu, logvar = fwd(params, x, eps)
    jax.block_until_ready((recon, mu, logvar))

    assert recon.shape == (B, in_channels, num_tickers, seq_len), recon.shape
    assert mu.shape == (B, latent_dim) and logvar.shape == (B, latent_dim)
    assert recon.dtype == jnp.float32

    # numerical cross-check of the fused kernel against a straightforward XLA reference
    r_ref, mu_r, lv_r = reference_forward(params, x, eps,
                                          num_tickers=num_tickers, seq_len=seq_len)
    tol = 5e-2
    assert float(jnp.max(jnp.abs(recon - r_ref))) < tol
    assert float(jnp.max(jnp.abs(mu - mu_r))) < tol
    assert float(jnp.max(jnp.abs(logvar - lv_r))) < tol

    print("KERNEL_OK")
</pallas_src>

<mosaic_0001>
module attributes {stable_mosaic.version = 11 : i64} {
  func.func @_stock_vae_kernel(%arg0: i32, %arg1: memref<1x128x2xf32, #tpu.memory_space<vmem>>, %arg2: memref<1x1x16xf32, #tpu.memory_space<vmem>>, %arg3: memref<9x128x128xf32, #tpu.memory_space<vmem>>, %arg4: memref<9x32x32xf32, #tpu.memory_space<vmem>>, %arg5: memref<9x8x8xf32, #tpu.memory_space<vmem>>, %arg6: memref<3x2x2xf32, #tpu.memory_space<vmem>>, %arg7: memref<4x32x128xf32, #tpu.memory_space<vmem>>, %arg8: memref<4x8x32xf32, #tpu.memory_space<vmem>>, %arg9: memref<4x2x8xf32, #tpu.memory_space<vmem>>, %arg10: memref<8x2xf32, #tpu.memory_space<vmem>>, %arg11: memref<32x8xf32, #tpu.memory_space<vmem>>, %arg12: memref<128x32xf32, #tpu.memory_space<vmem>>, %arg13: memref<9x2x32xf32, #tpu.memory_space<vmem>>, %arg14: memref<1x32xf32, #tpu.memory_space<vmem>>, %arg15: memref<9x32x64xf32, #tpu.memory_space<vmem>>, %arg16: memref<1x64xf32, #tpu.memory_space<vmem>>, %arg17: memref<9x64x128xf32, #tpu.memory_space<vmem>>, %arg18: memref<1x128xf32, #tpu.memory_space<vmem>>, %arg19: memref<2x128x128xf32, #tpu.memory_space<vmem>>, %arg20: memref<1x128xf32, #tpu.memory_space<vmem>>, %arg21: memref<128x32xf32, #tpu.memory_space<vmem>>, %arg22: memref<1x32xf32, #tpu.memory_space<vmem>>, %arg23: memref<16x128xf32, #tpu.memory_space<vmem>>, %arg24: memref<1x128xf32, #tpu.memory_space<vmem>>, %arg25: memref<2x128x128xf32, #tpu.memory_space<vmem>>, %arg26: memref<2x128xf32, #tpu.memory_space<vmem>>, %arg27: memref<3x128x128xf32, #tpu.memory_space<vmem>>, %arg28: memref<1x128xf32, #tpu.memory_space<vmem>>, %arg29: memref<9x128x64xf32, #tpu.memory_space<vmem>>, %arg30: memref<1x64xf32, #tpu.memory_space<vmem>>, %arg31: memref<9x64x32xf32, #tpu.memory_space<vmem>>, %arg32: memref<1x32xf32, #tpu.memory_space<vmem>>, %arg33: memref<9x32x2xf32, #tpu.memory_space<vmem>>, %arg34: memref<1x2xf32, #tpu.memory_space<vmem>>, %arg35: memref<1x128x2xf32, #tpu.memory_space<vmem>>, %arg36: memref<1x1x16xf32, #tpu.memory_space<vmem>>, %arg37: memref<1x1x16xf32, #tpu.memory_space<vmem>>) attributes {dimension_semantics = [#tpu.dimension_semantics<parallel>], iteration_bounds = array<i64: 2>, scalar_prefetch = 0 : i64, scratch_operands = 0 : i64, tpu.core_type = #tpu.core_type<tc>, window_params = [{transform_indices = @transform_0, window_bounds = array<i64: 1, 128, 2>}, {transform_indices = @transform_1, window_bounds = array<i64: 1, 1, 16>}, {pipeline_mode = #tpu.pipeline_mode<synchronous>, transform_indices = @transform_2, window_bounds = array<i64: 9, 128, 128>}, {pipeline_mode = #tpu.pipeline_mode<synchronous>, transform_indices = @transform_3, window_bounds = array<i64: 9, 32, 32>}, {pipeline_mode = #tpu.pipeline_mode<synchronous>, transform_indices = @transform_4, window_bounds = array<i64: 9, 8, 8>}, {pipeline_mode = #tpu.pipeline_mode<synchronous>, transform_indices = @transform_5, window_bounds = array<i64: 3, 2, 2>}, {pipeline_mode = #tpu.pipeline_mode<synchronous>, transform_indices = @transform_6, window_bounds = array<i64: 4, 32, 128>}, {pipeline_mode = #tpu.pipeline_mode<synchronous>, transform_indices = @transform_7, window_bounds = array<i64: 4, 8, 32>}, {pipeline_mode = #tpu.pipeline_mode<synchronous>, transform_indices = @transform_8, window_bounds = array<i64: 4, 2, 8>}, {pipeline_mode = #tpu.pipeline_mode<synchronous>, transform_indices = @transform_9, window_bounds = array<i64: 8, 2>}, {pipeline_mode = #tpu.pipeline_mode<synchronous>, transform_indices = @transform_10, window_bounds = array<i64: 32, 8>}, {pipeline_mode = #tpu.pipeline_mode<synchronous>, transform_indices = @transform_11, window_bounds = array<i64: 128, 32>}, {pipeline_mode = #tpu.pipeline_mode<synchronous>, transform_indices = @transform_12, window_bounds = array<i64: 9, 2, 32>}, {pipeline_mode = #tpu.pipeline_mode<synchronous>, transform_indices = @transform_13, window_bounds = array<i64: 1, 32>}, {pipeline_mode = #tpu.pipeline_mode<synchronous>, transform_indices = @transform_14, window_bounds = array<i64: 9, 32, 64>}, {pipeline_mode = #tpu.pipeline_mode<synchronous>, transform_indices = @transform_15, window_bounds = array<i64: 1, 64>}, {pipeline_mode = #tpu.pipeline_mode<synchronous>, transform_indices = @transform_16, window_bounds = array<i64: 9, 64, 128>}, {pipeline_mode = #tpu.pipeline_mode<synchronous>, transform_indices = @transform_17, window_bounds = array<i64: 1, 128>}, {pipeline_mode = #tpu.pipeline_mode<synchronous>, transform_indices = @transform_18, window_bounds = array<i64: 2, 128, 128>}, {pipeline_mode = #tpu.pipeline_mode<synchronous>, transform_indices = @transform_19, window_bounds = array<i64: 1, 128>}, {pipeline_mode = #tpu.pipeline_mode<synchronous>, transform_indices = @transform_20, window_bounds = array<i64: 128, 32>}, {pipeline_mode = #tpu.pipeline_mode<synchronous>, transform_indices = @transform_21, window_bounds = array<i64: 1, 32>}, {pipeline_mode = #tpu.pipeline_mode<synchronous>, transform_indices = @transform_22, window_bounds = array<i64: 16, 128>}, {pipeline_mode = #tpu.pipeline_mode<synchronous>, transform_indices = @transform_23, window_bounds = array<i64: 1, 128>}, {pipeline_mode = #tpu.pipeline_mode<synchronous>, transform_indices = @transform_24, window_bounds = array<i64: 2, 128, 128>}, {pipeline_mode = #tpu.pipeline_mode<synchronous>, transform_indices = @transform_25, window_bounds = array<i64: 2, 128>}, {pipeline_mode = #tpu.pipeline_mode<synchronous>, transform_indices = @transform_26, window_bounds = array<i64: 3, 128, 128>}, {pipeline_mode = #tpu.pipeline_mode<synchronous>, transform_indices = @transform_27, window_bounds = array<i64: 1, 128>}, {pipeline_mode = #tpu.pipeline_mode<synchronous>, transform_indices = @transform_28, window_bounds = array<i64: 9, 128, 64>}, {pipeline_mode = #tpu.pipeline_mode<synchronous>, transform_indices = @transform_29, window_bounds = array<i64: 1, 64>}, {pipeline_mode = #tpu.pipeline_mode<synchronous>, transform_indices = @transform_30, window_bounds = array<i64: 9, 64, 32>}, {pipeline_mode = #tpu.pipeline_mode<synchronous>, transform_indices = @transform_31, window_bounds = array<i64: 1, 32>}, {pipeline_mode = #tpu.pipeline_mode<synchronous>, transform_indices = @transform_32, window_bounds = array<i64: 9, 32, 2>}, {pipeline_mode = #tpu.pipeline_mode<synchronous>, transform_indices = @transform_33, window_bounds = array<i64: 1, 2>}, {transform_indices = @transform_34, window_bounds = array<i64: 1, 128, 2>}, {transform_indices = @transform_35, window_bounds = array<i64: 1, 1, 16>}, {transform_indices = @transform_36, window_bounds = array<i64: 1, 1, 16>}]} {
    %c0 = arith.constant 0 : index
    %c0_0 = arith.constant 0 : index
    %c0_1 = arith.constant 0 : index
    %0 = vector.load %arg1[%c0, %c0_0, %c0_1] : memref<1x128x2xf32, #tpu.memory_space<vmem>>, vector<1x128x2xf32>
    %1 = vector.shape_cast %0 : vector<1x128x2xf32> to vector<128x2xf32>
    %c0_2 = arith.constant 0 : index
    %c0_3 = arith.constant 0 : index
    %c0_4 = arith.constant 0 : index
    %2 = vector.load %arg3[%c0_2, %c0_3, %c0_4] : memref<9x128x128xf32, #tpu.memory_space<vmem>>, vector<1x128x128xf32>
    %3 = vector.shape_cast %2 : vector<1x128x128xf32> to vector<128x128xf32>
    %cst = arith.constant dense<0.000000e+00> : vector<128x2xf32>
    %4 = tpu.matmul %3, %1, %cst {dimension_numbers = #tpu.dot_dimension_numbers<[1], [0], [0], [1], [0, 0, 1, 1], [], []>} : vector<128x128xf32>, vector<128x2xf32>, vector<128x2xf32> -> vector<128x2xf32>
    %c0_5 = arith.constant 0 : index
    %c0_6 = arith.constant 0 : index
    %c0_7 = arith.constant 0 : index
    %5 = vector.load %arg13[%c0_5, %c0_6, %c0_7] : memref<9x2x32xf32, #tpu.memory_space<vmem>>, vector<1x2x32xf32>
    %6 = vector.shape_cast %5 : vector<1x2x32xf32> to vector<2x32xf32>
    %cst_8 = arith.constant dense<0.000000e+00> : vector<128x32xf32>
    %7 = tpu.matmul %4, %6, %cst_8 {dimension_numbers = #tpu.dot_dimension_numbers<[1], [0], [0], [1], [0, 0, 1, 1], [], []>} : vector<128x2xf32>, vector<2x32xf32>, vector<128x32xf32> -> vector<128x32xf32>
    %c1 = arith.constant 1 : index
    %c0_9 = arith.constant 0 : index
    %c0_10 = arith.constant 0 : index
    %8 = vector.load %arg3[%c1, %c0_9, %c0_10] : memref<9x128x128xf32, #tpu.memory_space<vmem>>, vector<1x128x128xf32>
    %9 = vector.shape_cast %8 : vector<1x128x128xf32> to vector<128x128xf32>
    %cst_11 = arith.constant dense<0.000000e+00> : vector<128x2xf32>
    %10 = tpu.matmul %9, %1, %cst_11 {dimension_numbers = #tpu.dot_dimension_numbers<[1], [0], [0], [1], [0, 0, 1, 1], [], []>} : vector<128x128xf32>, vector<128x2xf32>, vector<128x2xf32> -> vector<128x2xf32>
    %c1_12 = arith.constant 1 : index
    %c0_13 = arith.constant 0 : index
    %c0_14 = arith.constant 0 : index
    %11 = vector.load %arg13[%c1_12, %c0_13, %c0_14] : memref<9x2x32xf32, #tpu.memory_space<vmem>>, vector<1x2x32xf32>
    %12 = vector.shape_cast %11 : vector<1x2x32xf32> to vector<2x32xf32>
    %cst_15 = arith.constant dense<0.000000e+00> : vector<128x32xf32>
    %13 = tpu.matmul %10, %12, %cst_15 {dimension_numbers = #tpu.dot_dimension_numbers<[1], [0], [0], [1], [0, 0, 1, 1], [], []>} : vector<128x2xf32>, vector<2x32xf32>, vector<128x32xf32> -> vector<128x32xf32>
    %14 = arith.addf %7, %13 : vector<128x32xf32>
    %c2 = arith.constant 2 : index
    %c0_16 = arith.constant 0 : index
    %c0_17 = arith.constant 0 : index
    %15 = vector.load %arg3[%c2, %c0_16, %c0_17] : memref<9x128x128xf32, #tpu.memory_space<vmem>>, vector<1x128x128xf32>
    %16 = vector.shape_cast %15 : vector<1x128x128xf32> to vector<128x128xf32>
    %cst_18 = arith.constant dense<0.000000e+00> : vector<128x2xf32>
    %17 = tpu.matmul %16, %1, %cst_18 {dimension_numbers = #tpu.dot_dimension_numbers<[1], [0], [0], [1], [0, 0, 1, 1], [], []>} : vector<128x128xf32>, vector<128x2xf32>, vector<128x2xf32> -> vector<128x2xf32>
    %c2_19 = arith.constant 2 : index
    %c0_20 = arith.constant 0 : index
    %c0_21 = arith.constant 0 : index
    %18 = vector.load %arg13[%c2_19, %c0_20, %c0_21] : memref<9x2x32xf32, #tpu.memory_space<vmem>>, vector<1x2x32xf32>
    %19 = vector.shape_cast %18 : vector<1x2x32xf32> to vector<2x32xf32>
    %cst_22 = arith.constant dense<0.000000e+00> : vector<128x32xf32>
    %20 = tpu.matmul %17, %19, %cst_22 {dimension_numbers = #tpu.dot_dimension_numbers<[1], [0], [0], [1], [0, 0, 1, 1], [], []>} : vector<128x2xf32>, vector<2x32xf32>, vector<128x32xf32> -> vector<128x32xf32>
    %21 = arith.addf %14, %20 : vector<128x32xf32>
    %c3 = arith.constant 3 : index
    %c0_23 = arith.constant 0 : index
    %c0_24 = arith.constant 0 : index
    %22 = vector.load %arg3[%c3, %c0_23, %c0_24] : memref<9x128x128xf32, #tpu.memory_space<vmem>>, vector<1x128x128xf32>
    %23 = vector.shape_cast %22 : vector<1x128x128xf32> to vector<128x128xf32>
    %cst_25 = arith.constant dense<0.000000e+00> : vector<128x2xf32>
    %24 = tpu.matmul %23, %1, %cst_25 {dimension_numbers = #tpu.dot_dimension_numbers<[1], [0], [0], [1], [0, 0, 1, 1], [], []>} : vector<128x128xf32>, vector<128x2xf32>, vector<128x2xf32> -> vector<128x2xf32>
    %c3_26 = arith.constant 3 : index
    %c0_27 = arith.constant 0 : index
    %c0_28 = arith.constant 0 : index
    %25 = vector.load %arg13[%c3_26, %c0_27, %c0_28] : memref<9x2x32xf32, #tpu.memory_space<vmem>>, vector<1x2x32xf32>
    %26 = vector.shape_cast %25 : vector<1x2x32xf32> to vector<2x32xf32>
    %cst_29 = arith.constant dense<0.000000e+00> : vector<128x32xf32>
    %27 = tpu.matmul %24, %26, %cst_29 {dimension_numbers = #tpu.dot_dimension_numbers<[1], [0], [0], [1], [0, 0, 1, 1], [], []>} : vector<128x2xf32>, vector<2x32xf32>, vector<128x32xf32> -> vector<128x32xf32>
    %28 = arith.addf %21, %27 : vector<128x32xf32>
    %c4 = arith.constant 4 : index
    %c0_30 = arith.constant 0 : index
    %c0_31 = arith.constant 0 : index
    %29 = vector.load %arg3[%c4, %c0_30, %c0_31] : memref<9x128x128xf32, #tpu.memory_space<vmem>>, vector<1x128x128xf32>
    %30 = vector.shape_cast %29 : vector<1x128x128xf32> to vector<128x128xf32>
    %cst_32 = arith.constant dense<0.000000e+00> : vector<128x2xf32>
    %31 = tpu.matmul %30, %1, %cst_32 {dimension_numbers = #tpu.dot_dimension_numbers<[1], [0], [0], [1], [0, 0, 1, 1], [], []>} : vector<128x128xf32>, vector<128x2xf32>, vector<128x2xf32> -> vector<128x2xf32>
    %c4_33 = arith.constant 4 : index
    %c0_34 = arith.constant 0 : index
    %c0_35 = arith.constant 0 : index
    %32 = vector.load %arg13[%c4_33, %c0_34, %c0_35] : memref<9x2x32xf32, #tpu.memory_space<vmem>>, vector<1x2x32xf32>
    %33 = vector.shape_cast %32 : vector<1x2x32xf32> to vector<2x32xf32>
    %cst_36 = arith.constant dense<0.000000e+00> : vector<128x32xf32>
    %34 = tpu.matmul %31, %33, %cst_36 {dimension_numbers = #tpu.dot_dimension_numbers<[1], [0], [0], [1], [0, 0, 1, 1], [], []>} : vector<128x2xf32>, vector<2x32xf32>, vector<128x32xf32> -> vector<128x32xf32>
    %35 = arith.addf %28, %34 : vector<128x32xf32>
    %c5 = arith.constant 5 : index
    %c0_37 = arith.constant 0 : index
    %c0_38 = arith.constant 0 : index
    %36 = vector.load %arg3[%c5, %c0_37, %c0_38] : memref<9x128x128xf32, #tpu.memory_space<vmem>>, vector<1x128x128xf32>
    %37 = vector.shape_cast %36 : vector<1x128x128xf32> to vector<128x128xf32>
    %cst_39 = arith.constant dense<0.000000e+00> : vector<128x2xf32>
    %38 = tpu.matmul %37, %1, %cst_39 {dimension_numbers = #tpu.dot_dimension_numbers<[1], [0], [0], [1], [0, 0, 1, 1], [], []>} : vector<128x128xf32>, vector<128x2xf32>, vector<128x2xf32> -> vector<128x2xf32>
    %c5_40 = arith.constant 5 : index
    %c0_41 = arith.constant 0 : index
    %c0_42 = arith.constant 0 : index
    %39 = vector.load %arg13[%c5_40, %c0_41, %c0_42] : memref<9x2x32xf32, #tpu.memory_space<vmem>>, vector<1x2x32xf32>
    %40 = vector.shape_cast %39 : vector<1x2x32xf32> to vector<2x32xf32>
    %cst_43 = arith.constant dense<0.000000e+00> : vector<128x32xf32>
    %41 = tpu.matmul %38, %40, %cst_43 {dimension_numbers = #tpu.dot_dimension_numbers<[1], [0], [0], [1], [0, 0, 1, 1], [], []>} : vector<128x2xf32>, vector<2x32xf32>, vector<128x32xf32> -> vector<128x32xf32>
    %42 = arith.addf %35, %41 : vector<128x32xf32>
    %c6 = arith.constant 6 : index
    %c0_44 = arith.constant 0 : index
    %c0_45 = arith.constant 0 : index
    %43 = vector.load %arg3[%c6, %c0_44, %c0_45] : memref<9x128x128xf32, #tpu.memory_space<vmem>>, vector<1x128x128xf32>
    %44 = vector.shape_cast %43 : vector<1x128x128xf32> to vector<128x128xf32>
    %cst_46 = arith.constant dense<0.000000e+00> : vector<128x2xf32>
    %45 = tpu.matmul %44, %1, %cst_46 {dimension_numbers = #tpu.dot_dimension_numbers<[1], [0], [0], [1], [0, 0, 1, 1], [], []>} : vector<128x128xf32>, vector<128x2xf32>, vector<128x2xf32> -> vector<128x2xf32>
    %c6_47 = arith.constant 6 : index
    %c0_48 = arith.constant 0 : index
    %c0_49 = arith.constant 0 : index
    %46 = vector.load %arg13[%c6_47, %c0_48, %c0_49] : memref<9x2x32xf32, #tpu.memory_space<vmem>>, vector<1x2x32xf32>
    %47 = vector.shape_cast %46 : vector<1x2x32xf32> to vector<2x32xf32>
    %cst_50 = arith.constant dense<0.000000e+00> : vector<128x32xf32>
    %48 = tpu.matmul %45, %47, %cst_50 {dimension_numbers = #tpu.dot_dimension_numbers<[1], [0], [0], [1], [0, 0, 1, 1], [], []>} : vector<128x2xf32>, vector<2x32xf32>, vector<128x32xf32> -> vector<128x32xf32>
    %49 = arith.addf %42, %48 : vector<128x32xf32>
    %c7 = arith.constant 7 : index
    %c0_51 = arith.constant 0 : index
    %c0_52 = arith.constant 0 : index
    %50 = vector.load %arg3[%c7, %c0_51, %c0_52] : memref<9x128x128xf32, #tpu.memory_space<vmem>>, vector<1x128x128xf32>
    %51 = vector.shape_cast %50 : vector<1x128x128xf32> to vector<128x128xf32>
    %cst_53 = arith.constant dense<0.000000e+00> : vector<128x2xf32>
    %52 = tpu.matmul %51, %1, %cst_53 {dimension_numbers = #tpu.dot_dimension_numbers<[1], [0], [0], [1], [0, 0, 1, 1], [], []>} : vector<128x128xf32>, vector<128x2xf32>, vector<128x2xf32> -> vector<128x2xf32>
    %c7_54 = arith.constant 7 : index
    %c0_55 = arith.constant 0 : index
    %c0_56 = arith.constant 0 : index
    %53 = vector.load %arg13[%c7_54, %c0_55, %c0_56] : memref<9x2x32xf32, #tpu.memory_space<vmem>>, vector<1x2x32xf32>
    %54 = vector.shape_cast %53 : vector<1x2x32xf32> to vector<2x32xf32>
    %cst_57 = arith.constant dense<0.000000e+00> : vector<128x32xf32>
    %55 = tpu.matmul %52, %54, %cst_57 {dimension_numbers = #tpu.dot_dimension_numbers<[1], [0], [0], [1], [0, 0, 1, 1], [], []>} : vector<128x2xf32>, vector<2x32xf32>, vector<128x32xf32> -> vector<128x32xf32>
    %56 = arith.addf %49, %55 : vector<128x32xf32>
    %c8 = arith.constant 8 : index
    %c0_58 = arith.constant 0 : index
    %c0_59 = arith.constant 0 : index
    %57 = vector.load %arg3[%c8, %c0_58, %c0_59] : memref<9x128x128xf32, #tpu.memory_space<vmem>>, vector<1x128x128xf32>
    %58 = vector.shape_cast %57 : vector<1x128x128xf32> to vector<128x128xf32>
    %cst_60 = arith.constant dense<0.000000e+00> : vector<128x2xf32>
    %59 = tpu.matmul %58, %1, %cst_60 {dimension_numbers = #tpu.dot_dimension_numbers<[1], [0], [0], [1], [0, 0, 1, 1], [], []>} : vector<128x128xf32>, vector<128x2xf32>, vector<128x2xf32> -> vector<128x2xf32>
    %c8_61 = arith.constant 8 : index
    %c0_62 = arith.constant 0 : index
    %c0_63 = arith.constant 0 : index
    %60 = vector.load %arg13[%c8_61, %c0_62, %c0_63] : memref<9x2x32xf32, #tpu.memory_space<vmem>>, vector<1x2x32xf32>
    %61 = vector.shape_cast %60 : vector<1x2x32xf32> to vector<2x32xf32>
    %cst_64 = arith.constant dense<0.000000e+00> : vector<128x32xf32>
    %62 = tpu.matmul %59, %61, %cst_64 {dimension_numbers = #tpu.dot_dimension_numbers<[1], [0], [0], [1], [0, 0, 1, 1], [], []>} : vector<128x2xf32>, vector<2x32xf32>, vector<128x32xf32> -> vector<128x32xf32>
    %63 = arith.addf %56, %62 : vector<128x32xf32>
    %c0_65 = arith.constant 0 : index
    %c0_66 = arith.constant 0 : index
    %64 = vector.load %arg14[%c0_65, %c0_66] : memref<1x32xf32, #tpu.memory_space<vmem>>, vector<1x32xf32>
    %65 = vector.broadcast %64 : vector<1x32xf32> to vector<128x32xf32>
    %66 = arith.addf %63, %65 : vector<128x32xf32>
    %cst_67 = arith.constant 0.000000e+00 : f32
    %67 = vector.broadcast %cst_67 : f32 to vector<128x32xf32>
    %68 = arith.maximumf %66, %67 : vector<128x32xf32>
    %c0_68 = arith.constant 0 : index
    %c0_69 = arith.constant 0 : index
    %c0_70 = arith.constant 0 : index
    %69 = vector.load %arg7[%c0_68, %c0_69, %c0_70] : memref<4x32x128xf32, #tpu.memory_space<vmem>>, vector<1x32x128xf32>
    %70 = vector.shape_cast %69 : vector<1x32x128xf32> to vector<32x128xf32>
    %cst_71 = arith.constant dense<0.000000e+00> : vector<32x32xf32>
    %71 = tpu.matmul %70, %68, %cst_71 {dimension_numbers = #tpu.dot_dimension_numbers<[1], [0], [0], [1], [0, 0, 1, 1], [], []>} : vector<32x128xf32>, vector<128x32xf32>, vector<32x32xf32> -> vector<32x32xf32>
    %c1_72 = arith.constant 1 : index
    %c0_73 = arith.constant 0 : index
    %c0_74 = arith.constant 0 : index
    %72 = vector.load %arg7[%c1_72, %c0_73, %c0_74] : memref<4x32x128xf32, #tpu.memory_space<vmem>>, vector<1x32x128xf32>
    %73 = vector.shape_cast %72 : vector<1x32x128xf32> to vector<32x128xf32>
    %cst_75 = arith.constant dense<0.000000e+00> : vector<32x32xf32>
    %74 = tpu.matmul %73, %68, %cst_75 {dimension_numbers = #tpu.dot_dimension_numbers<[1], [0], [0], [1], [0, 0, 1, 1], [], []>} : vector<32x128xf32>, vector<128x32xf32>, vector<32x32xf32> -> vector<32x32xf32>
    %75 = arith.maximumf %71, %74 : vector<32x32xf32>
    %c2_76 = arith.constant 2 : index
    %c0_77 = arith.constant 0 : index
    %c0_78 = arith.constant 0 : index
    %76 = vector.load %arg7[%c2_76, %c0_77, %c0_78] : memref<4x32x128xf32, #tpu.memory_space<vmem>>, vector<1x32x128xf32>
    %77 = vector.shape_cast %76 : vector<1x32x128xf32> to vector<32x128xf32>
    %cst_79 = arith.constant dense<0.000000e+00> : vector<32x32xf32>
    %78 = tpu.matmul %77, %68, %cst_79 {dimension_numbers = #tpu.dot_dimension_numbers<[1], [0], [0], [1], [0, 0, 1, 1], [], []>} : vector<32x128xf32>, vector<128x32xf32>, vector<32x32xf32> -> vector<32x32xf32>
    %79 = arith.maximumf %75, %78 : vector<32x32xf32>
    %c3_80 = arith.constant 3 : index
    %c0_81 = arith.constant 0 : index
    %c0_82 = arith.constant 0 : index
    %80 = vector.load %arg7[%c3_80, %c0_81, %c0_82] : memref<4x32x128xf32, #tpu.memory_space<vmem>>, vector<1x32x128xf32>
    %81 = vector.shape_cast %80 : vector<1x32x128xf32> to vector<32x128xf32>
    %cst_83 = arith.constant dense<0.000000e+00> : vector<32x32xf32>
    %82 = tpu.matmul %81, %68, %cst_83 {dimension_numbers = #tpu.dot_dimension_numbers<[1], [0], [0], [1], [0, 0, 1, 1], [], []>} : vector<32x128xf32>, vector<128x32xf32>, vector<32x32xf32> -> vector<32x32xf32>
    %83 = arith.maximumf %79, %82 : vector<32x32xf32>
    %c0_84 = arith.constant 0 : index
    %c0_85 = arith.constant 0 : index
    %c0_86 = arith.constant 0 : index
    %84 = vector.load %arg4[%c0_84, %c0_85, %c0_86] : memref<9x32x32xf32, #tpu.memory_space<vmem>>, vector<1x32x32xf32>
    %85 = vector.shape_cast %84 : vector<1x32x32xf32> to vector<32x32xf32>
    %cst_87 = arith.constant dense<0.000000e+00> : vector<32x32xf32>
    %86 = tpu.matmul %85, %83, %cst_87 {dimension_numbers = #tpu.dot_dimension_numbers<[1], [0], [0], [1], [0, 0, 1, 1], [], []>} : vector<32x32xf32>, vector<32x32xf32>, vector<32x32xf32> -> vector<32x32xf32>
    %c0_88 = arith.constant 0 : index
    %c0_89 = arith.constant 0 : index
    %c0_90 = arith.constant 0 : index
    %87 = vector.load %arg15[%c0_88, %c0_89, %c0_90] : memref<9x32x64xf32, #tpu.memory_space<vmem>>, vector<1x32x64xf32>
    %88 = vector.shape_cast %87 : vector<1x32x64xf32> to vector<32x64xf32>
    %cst_91 = arith.constant dense<0.000000e+00> : vector<32x64xf32>
    %89 = tpu.matmul %86, %88, %cst_91 {dimension_numbers = #tpu.dot_dimension_numbers<[1], [0], [0], [1], [0, 0, 1, 1], [], []>} : vector<32x32xf32>, vector<32x64xf32>, vector<32x64xf32> -> vector<32x64xf32>
    %c1_92 = arith.constant 1 : index
    %c0_93 = arith.constant 0 : index
    %c0_94 = arith.constant 0 : index
    %90 = vector.load %arg4[%c1_92, %c0_93, %c0_94] : memref<9x32x32xf32, #tpu.memory_space<vmem>>, vector<1x32x32xf32>
    %91 = vector.shape_cast %90 : vector<1x32x32xf32> to vector<32x32xf32>
    %cst_95 = arith.constant dense<0.000000e+00> : vector<32x32xf32>
    %92 = tpu.matmul %91, %83, %cst_95 {dimension_numbers = #tpu.dot_dimension_numbers<[1], [0], [0], [1], [0, 0, 1, 1], [], []>} : vector<32x32xf32>, vector<32x32xf32>, vector<32x32xf32> -> vector<32x32xf32>
    %c1_96 = arith.constant 1 : index
    %c0_97 = arith.constant 0 : index
    %c0_98 = arith.constant 0 : index
    %93 = vector.load %arg15[%c1_96, %c0_97, %c0_98] : memref<9x32x64xf32, #tpu.memory_space<vmem>>, vector<1x32x64xf32>
    %94 = vector.shape_cast %93 : vector<1x32x64xf32> to vector<32x64xf32>
    %cst_99 = arith.constant dense<0.000000e+00> : vector<32x64xf32>
    %95 = tpu.matmul %92, %94, %cst_99 {dimension_numbers = #tpu.dot_dimension_numbers<[1], [0], [0], [1], [0, 0, 1, 1], [], []>} : vector<32x32xf32>, vector<32x64xf32>, vector<32x64xf32> -> vector<32x64xf32>
    %96 = arith.addf %89, %95 : vector<32x64xf32>
    %c2_100 = arith.constant 2 : index
    %c0_101 = arith.constant 0 : index
    %c0_102 = arith.constant 0 : index
    %97 = vector.load %arg4[%c2_100, %c0_101, %c0_102] : memref<9x32x32xf32, #tpu.memory_space<vmem>>, vector<1x32x32xf32>
    %98 = vector.shape_cast %97 : vector<1x32x32xf32> to vector<32x32xf32>
    %cst_103 = arith.constant dense<0.000000e+00> : vector<32x32xf32>
    %99 = tpu.matmul %98, %83, %cst_103 {dimension_numbers = #tpu.dot_dimension_numbers<[1], [0], [0], [1], [0, 0, 1, 1], [], []>} : vector<32x32xf32>, vector<32x32xf32>, vector<32x32xf32> -> vector<32x32xf32>
    %c2_104 = arith.constant 2 : index
    %c0_105 = arith.constant 0 : index
    %c0_106 = arith.constant 0 : index
    %100 = vector.load %arg15[%c2_104, %c0_105, %c0_106] : memref<9x32x64xf32, #tpu.memory_space<vmem>>, vector<1x32x64xf32>
    %101 = vector.shape_cast %100 : vector<1x32x64xf32> to vector<32x64xf32>
    %cst_107 = arith.constant dense<0.000000e+00> : vector<32x64xf32>
    %102 = tpu.matmul %99, %101, %cst_107 {dimension_numbers = #tpu.dot_dimension_numbers<[1], [0], [0], [1], [0, 0, 1, 1], [], []>} : vector<32x32xf32>, vector<32x64xf32>, vector<32x64xf32> -> vector<32x64xf32>
    %103 = arith.addf %96, %102 : vector<32x64xf32>
    %c3_108 = arith.constant 3 : index
    %c0_109 = arith.constant 0 : index
    %c0_110 = arith.constant 0 : index
    %104 = vector.load %arg4[%c3_108, %c0_109, %c0_110] : memref<9x32x32xf32, #tpu.memory_space<vmem>>, vector<1x32x32xf32>
    %105 = vector.shape_cast %104 : vector<1x32x32xf32> to vector<32x32xf32>
    %cst_111 = arith.constant dense<0.000000e+00> : vector<32x32xf32>
    %106 = tpu.matmul %105, %83, %cst_111 {dimension_numbers = #tpu.dot_dimension_numbers<[1], [0], [0], [1], [0, 0, 1, 1], [], []>} : vector<32x32xf32>, vector<32x32xf32>, vector<32x32xf32> -> vector<32x32xf32>
    %c3_112 = arith.constant 3 : index
    %c0_113 = arith.constant 0 : index
    %c0_114 = arith.constant 0 : index
    %107 = vector.load %arg15[%c3_112, %c0_113, %c0_114] : memref<9x32x64xf32, #tpu.memory_space<vmem>>, vector<1x32x64xf32>
    %108 = vector.shape_cast %107 : vector<1x32x64xf32> to vector<32x64xf32>
    %cst_115 = arith.constant dense<0.000000e+00> : vector<32x64xf32>
    %109 = tpu.matmul %106, %108, %cst_115 {dimension_numbers = #tpu.dot_dimension_numbers<[1], [0], [0], [1], [0, 0, 1, 1], [], []>} : vector<32x32xf32>, vector<32x64xf32>, vector<32x64xf32> -> vector<32x64xf32>
    %110 = arith.addf %103, %109 : vector<32x64xf32>
    %c4_116 = arith.constant 4 : index
    %c0_117 = arith.constant 0 : index
    %c0_118 = arith.constant 0 : index
    %111 = vector.load %arg4[%c4_116, %c0_117, %c0_118] : memref<9x32x32xf32, #tpu.memory_space<vmem>>, vector<1x32x32xf32>
    %112 = vector.shape_cast %111 : vector<1x32x32xf32> to vector<32x32xf32>
    %cst_119 = arith.constant dense<0.000000e+00> : vector<32x32xf32>
    %113 = tpu.matmul %112, %83, %cst_119 {dimension_numbers = #tpu.dot_dimension_numbers<[1], [0], [0], [1], [0, 0, 1, 1], [], []>} : vector<32x32xf32>, vector<32x32xf32>, vector<32x32xf32> -> vector<32x32xf32>
    %c4_120 = arith.constant 4 : index
    %c0_121 = arith.constant 0 : index
    %c0_122 = arith.constant 0 : index
    %114 = vector.load %arg15[%c4_120, %c0_121, %c0_122] : memref<9x32x64xf32, #tpu.memory_space<vmem>>, vector<1x32x64xf32>
    %115 = vector.shape_cast %114 : vector<1x32x64xf32> to vector<32x64xf32>
    %cst_123 = arith.constant dense<0.000000e+00> : vector<32x64xf32>
    %116 = tpu.matmul %113, %115, %cst_123 {dimension_numbers = #tpu.dot_dimension_numbers<[1], [0], [0], [1], [0, 0, 1, 1], [], []>} : vector<32x32xf32>, vector<32x64xf32>, vector<32x64xf32> -> vector<32x64xf32>
    %117 = arith.addf %110, %116 : vector<32x64xf32>
    %c5_124 = arith.constant 5 : index
    %c0_125 = arith.constant 0 : index
    %c0_126 = arith.constant 0 : index
    %118 = vector.load %arg4[%c5_124, %c0_125, %c0_126] : memref<9x32x32xf32, #tpu.memory_space<vmem>>, vector<1x32x32xf32>
    %119 = vector.shape_cast %118 : vector<1x32x32xf32> to vector<32x32xf32>
    %cst_127 = arith.constant dense<0.000000e+00> : vector<32x32xf32>
    %120 = tpu.matmul %119, %83, %cst_127 {dimension_numbers = #tpu.dot_dimension_numbers<[1], [0], [0], [1], [0, 0, 1, 1], [], []>} : vector<32x32xf32>, vector<32x32xf32>, vector<32x32xf32> -> vector<32x32xf32>
    %c5_128 = arith.constant 5 : index
    %c0_129 = arith.constant 0 : index
    %c0_130 = arith.constant 0 : index
    %121 = vector.load %arg15[%c5_128, %c0_129, %c0_130] : memref<9x32x64xf32, #tpu.memory_space<vmem>>, vector<1x32x64xf32>
    %122 = vector.shape_cast %121 : vector<1x32x64xf32> to vector<32x64xf32>
    %cst_131 = arith.constant dense<0.000000e+00> : vector<32x64xf32>
    %123 = tpu.matmul %120, %122, %cst_131 {dimension_numbers = #tpu.dot_dimension_numbers<[1], [0], [0], [1], [0, 0, 1, 1], [], []>} : vector<32x32xf32>, vector<32x64xf32>, vector<32x64xf32> -> vector<32x64xf32>
    %124 = arith.addf %117, %123 : vector<32x64xf32>
    %c6_132 = arith.constant 6 : index
    %c0_133 = arith.constant 0 : index
    %c0_134 = arith.constant 0 : index
    %125 = vector.load %arg4[%c6_132, %c0_133, %c0_134] : memref<9x32x32xf32, #tpu.memory_space<vmem>>, vector<1x32x32xf32>
    %126 = vector.shape_cast %125 : vector<1x32x32xf32> to vector<32x32xf32>
    %cst_135 = arith.constant dense<0.000000e+00> : vector<32x32xf32>
    %127 = tpu.matmul %126, %83, %cst_135 {dimension_numbers = #tpu.dot_dimension_numbers<[1], [0], [0], [1], [0, 0, 1, 1], [], []>} : vector<32x32xf32>, vector<32x32xf32>, vector<32x32xf32> -> vector<32x32xf32>
    %c6_136 = arith.constant 6 : index
    %c0_137 = arith.constant 0 : index
    %c0_138 = arith.constant 0 : index
    %128 = vector.load %arg15[%c6_136, %c0_137, %c0_138] : memref<9x32x64xf32, #tpu.memory_space<vmem>>, vector<1x32x64xf32>
    %129 = vector.shape_cast %128 : vector<1x32x64xf32> to vector<32x64xf32>
    %cst_139 = arith.constant dense<0.000000e+00> : vector<32x64xf32>
    %130 = tpu.matmul %127, %129, %cst_139 {dimension_numbers = #tpu.dot_dimension_numbers<[1], [0], [0], [1], [0, 0, 1, 1], [], []>} : vector<32x32xf32>, vector<32x64xf32>, vector<32x64xf32> -> vector<32x64xf32>
    %131 = arith.addf %124, %130 : vector<32x64xf32>
    %c7_140 = arith.constant 7 : index
    %c0_141 = arith.constant 0 : index
    %c0_142 = arith.constant 0 : index
    %132 = vector.load %arg4[%c7_140, %c0_141, %c0_142] : memref<9x32x32xf32, #tpu.memory_space<vmem>>, vector<1x32x32xf32>
    %133 = vector.shape_cast %132 : vector<1x32x32xf32> to vector<32x32xf32>
    %cst_143 = arith.constant dense<0.000000e+00> : vector<32x32xf32>
    %134 = tpu.matmul %133, %83, %cst_143 {dimension_numbers = #tpu.dot_dimension_numbers<[1], [0], [0], [1], [0, 0, 1, 1], [], []>} : vector<32x32xf32>, vector<32x32xf32>, vector<32x32xf32> -> vector<32x32xf32>
    %c7_144 = arith.constant 7 : index
    %c0_145 = arith.constant 0 : index
    %c0_146 = arith.constant 0 : index
    %135 = vector.load %arg15[%c7_144, %c0_145, %c0_146] : memref<9x32x64xf32, #tpu.memory_space<vmem>>, vector<1x32x64xf32>
    %136 = vector.shape_cast %135 : vector<1x32x64xf32> to vector<32x64xf32>
    %cst_147 = arith.constant dense<0.000000e+00> : vector<32x64xf32>
    %137 = tpu.matmul %134, %136, %cst_147 {dimension_numbers = #tpu.dot_dimension_numbers<[1], [0], [0], [1], [0, 0, 1, 1], [], []>} : vector<32x32xf32>, vector<32x64xf32>, vector<32x64xf32> -> vector<32x64xf32>
    %138 = arith.addf %131, %137 : vector<32x64xf32>
    %c8_148 = arith.constant 8 : index
    %c0_149 = arith.constant 0 : index
    %c0_150 = arith.constant 0 : index
    %139 = vector.load %arg4[%c8_148, %c0_149, %c0_150] : memref<9x32x32xf32, #tpu.memory_space<vmem>>, vector<1x32x32xf32>
    %140 = vector.shape_cast %139 : vector<1x32x32xf32> to vector<32x32xf32>
    %cst_151 = arith.constant dense<0.000000e+00> : vector<32x32xf32>
    %141 = tpu.matmul %140, %83, %cst_151 {dimension_numbers = #tpu.dot_dimension_numbers<[1], [0], [0], [1], [0, 0, 1, 1], [], []>} : vector<32x32xf32>, vector<32x32xf32>, vector<32x32xf32> -> vector<32x32xf32>
    %c8_152 = arith.constant 8 : index
    %c0_153 = arith.constant 0 : index
    %c0_154 = arith.constant 0 : index
    %142 = vector.load %arg15[%c8_152, %c0_153, %c0_154] : memref<9x32x64xf32, #tpu.memory_space<vmem>>, vector<1x32x64xf32>
    %143 = vector.shape_cast %142 : vector<1x32x64xf32> to vector<32x64xf32>
    %cst_155 = arith.constant dense<0.000000e+00> : vector<32x64xf32>
    %144 = tpu.matmul %141, %143, %cst_155 {dimension_numbers = #tpu.dot_dimension_numbers<[1], [0], [0], [1], [0, 0, 1, 1], [], []>} : vector<32x32xf32>, vector<32x64xf32>, vector<32x64xf32> -> vector<32x64xf32>
    %145 = arith.addf %138, %144 : vector<32x64xf32>
    %c0_156 = arith.constant 0 : index
    %c0_157 = arith.constant 0 : index
    %146 = vector.load %arg16[%c0_156, %c0_157] : memref<1x64xf32, #tpu.memory_space<vmem>>, vector<1x64xf32>
    %147 = vector.broadcast %146 : vector<1x64xf32> to vector<32x64xf32>
    %148 = arith.addf %145, %147 : vector<32x64xf32>
    %cst_158 = arith.constant 0.000000e+00 : f32
    %149 = vector.broadcast %cst_158 : f32 to vector<32x64xf32>
    %150 = arith.maximumf %148, %149 : vector<32x64xf32>
    %c0_159 = arith.constant 0 : index
    %c0_160 = arith.constant 0 : index
    %c0_161 = arith.constant 0 : index
    %151 = vector.load %arg8[%c0_159, %c0_160, %c0_161] : memref<4x8x32xf32, #tpu.memory_space<vmem>>, vector<1x8x32xf32>
    %152 = vector.shape_cast %151 : vector<1x8x32xf32> to vector<8x32xf32>
    %cst_162 = arith.constant dense<0.000000e+00> : vector<8x64xf32>
    %153 = tpu.matmul %152, %150, %cst_162 {dimension_numbers = #tpu.dot_dimension_numbers<[1], [0], [0], [1], [0, 0, 1, 1], [], []>} : vector<8x32xf32>, vector<32x64xf32>, vector<8x64xf32> -> vector<8x64xf32>
    %c1_163 = arith.constant 1 : index
    %c0_164 = arith.constant 0 : index
    %c0_165 = arith.constant 0 : index
    %154 = vector.load %arg8[%c1_163, %c0_164, %c0_165] : memref<4x8x32xf32, #tpu.memory_space<vmem>>, vector<1x8x32xf32>
    %155 = vector.shape_cast %154 : vector<1x8x32xf32> to vector<8x32xf32>
    %cst_166 = arith.constant dense<0.000000e+00> : vector<8x64xf32>
    %156 = tpu.matmul %155, %150, %cst_166 {dimension_numbers = #tpu.dot_dimension_numbers<[1], [0], [0], [1], [0, 0, 1, 1], [], []>} : vector<8x32xf32>, vector<32x64xf32>, vector<8x64xf32> -> vector<8x64xf32>
    %157 = arith.maximumf %153, %156 : vector<8x64xf32>
    %c2_167 = arith.constant 2 : index
    %c0_168 = arith.constant 0 : index
    %c0_169 = arith.constant 0 : index
    %158 = vector.load %arg8[%c2_167, %c0_168, %c0_169] : memref<4x8x32xf32, #tpu.memory_space<vmem>>, vector<1x8x32xf32>
    %159 = vector.shape_cast %158 : vector<1x8x32xf32> to vector<8x32xf32>
    %cst_170 = arith.constant dense<0.000000e+00> : vector<8x64xf32>
    %160 = tpu.matmul %159, %150, %cst_170 {dimension_numbers = #tpu.dot_dimension_numbers<[1], [0], [0], [1], [0, 0, 1, 1], [], []>} : vector<8x32xf32>, vector<32x64xf32>, vector<8x64xf32> -> vector<8x64xf32>
    %161 = arith.maximumf %157, %160 : vector<8x64xf32>
    %c3_171 = arith.constant 3 : index
    %c0_172 = arith.constant 0 : index
    %c0_173 = arith.constant 0 : index
    %162 = vector.load %arg8[%c3_171, %c0_172, %c0_173] : memref<4x8x32xf32, #tpu.memory_space<vmem>>, vector<1x8x32xf32>
    %163 = vector.shape_cast %162 : vector<1x8x32xf32> to vector<8x32xf32>
    %cst_174 = arith.constant dense<0.000000e+00> : vector<8x64xf32>
    %164 = tpu.matmul %163, %150, %cst_174 {dimension_numbers = #tpu.dot_dimension_numbers<[1], [0], [0], [1], [0, 0, 1, 1], [], []>} : vector<8x32xf32>, vector<32x64xf32>, vector<8x64xf32> -> vector<8x64xf32>
    %165 = arith.maximumf %161, %164 : vector<8x64xf32>
    %c0_175 = arith.constant 0 : index
    %c0_176 = arith.constant 0 : index
    %c0_177 = arith.constant 0 : index
    %166 = vector.load %arg5[%c0_175, %c0_176, %c0_177] : memref<9x8x8xf32, #tpu.memory_space<vmem>>, vector<1x8x8xf32>
    %167 = vector.shape_cast %166 : vector<1x8x8xf32> to vector<8x8xf32>
    %cst_178 = arith.constant dense<0.000000e+00> : vector<8x64xf32>
    %168 = tpu.matmul %167, %165, %cst_178 {dimension_numbers = #tpu.dot_dimension_numbers<[1], [0], [0], [1], [0, 0, 1, 1], [], []>} : vector<8x8xf32>, vector<8x64xf32>, vector<8x64xf32> -> vector<8x64xf32>
    %c0_179 = arith.constant 0 : index
    %c0_180 = arith.constant 0 : index
    %c0_181 = arith.constant 0 : index
    %169 = vector.load %arg17[%c0_179, %c0_180, %c0_181] : memref<9x64x128xf32, #tpu.memory_space<vmem>>, vector<1x64x128xf32>
    %170 = vector.shape_cast %169 : vector<1x64x128xf32> to vector<64x128xf32>
    %cst_182 = arith.constant dense<0.000000e+00> : vector<8x128xf32>
    %171 = tpu.matmul %168, %170, %cst_182 {dimension_numbers = #tpu.dot_dimension_numbers<[1], [0], [0], [1], [0, 0, 1, 1], [], []>} : vector<8x64xf32>, vector<64x128xf32>, vector<8x128xf32> -> vector<8x128xf32>
    %c1_183 = arith.constant 1 : index
    %c0_184 = arith.constant 0 : index
    %c0_185 = arith.constant 0 : index
    %172 = vector.load %arg5[%c1_183, %c0_184, %c0_185] : memref<9x8x8xf32, #tpu.memory_space<vmem>>, vector<1x8x8xf32>
    %173 = vector.shape_cast %172 : vector<1x8x8xf32> to vector<8x8xf32>
    %cst_186 = arith.constant dense<0.000000e+00> : vector<8x64xf32>
    %174 = tpu.matmul %173, %165, %cst_186 {dimension_numbers = #tpu.dot_dimension_numbers<[1], [0], [0], [1], [0, 0, 1, 1], [], []>} : vector<8x8xf32>, vector<8x64xf32>, vector<8x64xf32> -> vector<8x64xf32>
    %c1_187 = arith.constant 1 : index
    %c0_188 = arith.constant 0 : index
    %c0_189 = arith.constant 0 : index
    %175 = vector.load %arg17[%c1_187, %c0_188, %c0_189] : memref<9x64x128xf32, #tpu.memory_space<vmem>>, vector<1x64x128xf32>
    %176 = vector.shape_cast %175 : vector<1x64x128xf32> to vector<64x128xf32>
    %cst_190 = arith.constant dense<0.000000e+00> : vector<8x128xf32>
    %177 = tpu.matmul %174, %176, %cst_190 {dimension_numbers = #tpu.dot_dimension_numbers<[1], [0], [0], [1], [0, 0, 1, 1], [], []>} : vector<8x64xf32>, vector<64x128xf32>, vector<8x128xf32> -> vector<8x128xf32>
    %178 = arith.addf %171, %177 : vector<8x128xf32>
    %c2_191 = arith.constant 2 : index
    %c0_192 = arith.constant 0 : index
    %c0_193 = arith.constant 0 : index
    %179 = vector.load %arg5[%c2_191, %c0_192, %c0_193] : memref<9x8x8xf32, #tpu.memory_space<vmem>>, vector<1x8x8xf32>
    %180 = vector.shape_cast %179 : vector<1x8x8xf32> to vector<8x8xf32>
    %cst_194 = arith.constant dense<0.000000e+00> : vector<8x64xf32>
    %181 = tpu.matmul %180, %165, %cst_194 {dimension_numbers = #tpu.dot_dimension_numbers<[1], [0], [0], [1], [0, 0, 1, 1], [], []>} : vector<8x8xf32>, vector<8x64xf32>, vector<8x64xf32> -> vector<8x64xf32>
    %c2_195 = arith.constant 2 : index
    %c0_196 = arith.constant 0 : index
    %c0_197 = arith.constant 0 : index
    %182 = vector.load %arg17[%c2_195, %c0_196, %c0_197] : memref<9x64x128xf32, #tpu.memory_space<vmem>>, vector<1x64x128xf32>
    %183 = vector.shape_cast %182 : vector<1x64x128xf32> to vector<64x128xf32>
    %cst_198 = arith.constant dense<0.000000e+00> : vector<8x128xf32>
    %184 = tpu.matmul %181, %183, %cst_198 {dimension_numbers = #tpu.dot_dimension_numbers<[1], [0], [0], [1], [0, 0, 1, 1], [], []>} : vector<8x64xf32>, vector<64x128xf32>, vector<8x128xf32> -> vector<8x128xf32>
    %185 = arith.addf %178, %184 : vector<8x128xf32>
    %c3_199 = arith.constant 3 : index
    %c0_200 = arith.constant 0 : index
    %c0_201 = arith.constant 0 : index
    %186 = vector.load %arg5[%c3_199, %c0_200, %c0_201] : memref<9x8x8xf32, #tpu.memory_space<vmem>>, vector<1x8x8xf32>
    %187 = vector.shape_cast %186 : vector<1x8x8xf32> to vector<8x8xf32>
    %cst_202 = arith.constant dense<0.000000e+00> : vector<8x64xf32>
    %188 = tpu.matmul %187, %165, %cst_202 {dimension_numbers = #tpu.dot_dimension_numbers<[1], [0], [0], [1], [0, 0, 1, 1], [], []>} : vector<8x8xf32>, vector<8x64xf32>, vector<8x64xf32> -> vector<8x64xf32>
    %c3_203 = arith.constant 3 : index
    %c0_204 = arith.constant 0 : index
    %c0_205 = arith.constant 0 : index
    %189 = vector.load %arg17[%c3_203, %c0_204, %c0_205] : memref<9x64x128xf32, #tpu.memory_space<vmem>>, vector<1x64x128xf32>
    %190 = vector.shape_cast %189 : vector<1x64x128xf32> to vector<64x128xf32>
    %cst_206 = arith.constant dense<0.000000e+00> : vector<8x128xf32>
    %191 = tpu.matmul %188, %190, %cst_206 {dimension_numbers = #tpu.dot_dimension_numbers<[1], [0], [0], [1], [0, 0, 1, 1], [], []>} : vector<8x64xf32>, vector<64x128xf32>, vector<8x128xf32> -> vector<8x128xf32>
    %192 = arith.addf %185, %191 : vector<8x128xf32>
    %c4_207 = arith.constant 4 : index
    %c0_208 = arith.constant 0 : index
    %c0_209 = arith.constant 0 : index
    %193 = vector.load %arg5[%c4_207, %c0_208, %c0_209] : memref<9x8x8xf32, #tpu.memory_space<vmem>>, vector<1x8x8xf32>
    %194 = vector.shape_cast %193 : vector<1x8x8xf32> to vector<8x8xf32>
    %cst_210 = arith.constant dense<0.000000e+00> : vector<8x64xf32>
    %195 = tpu.matmul %194, %165, %cst_210 {dimension_numbers = #tpu.dot_dimension_numbers<[1], [0], [0], [1], [0, 0, 1, 1], [], []>} : vector<8x8xf32>, vector<8x64xf32>, vector<8x64xf32> -> vector<8x64xf32>
    %c4_211 = arith.constant 4 : index
    %c0_212 = arith.constant 0 : index
    %c0_213 = arith.constant 0 : index
    %196 = vector.load %arg17[%c4_211, %c0_212, %c0_213] : memref<9x64x128xf32, #tpu.memory_space<vmem>>, vector<1x64x128xf32>
    %197 = vector.shape_cast %196 : vector<1x64x128xf32> to vector<64x128xf32>
    %cst_214 = arith.constant dense<0.000000e+00> : vector<8x128xf32>
    %198 = tpu.matmul %195, %197, %cst_214 {dimension_numbers = #tpu.dot_dimension_numbers<[1], [0], [0], [1], [0, 0, 1, 1], [], []>} : vector<8x64xf32>, vector<64x128xf32>, vector<8x128xf32> -> vector<8x128xf32>
    %199 = arith.addf %192, %198 : vector<8x128xf32>
    %c5_215 = arith.constant 5 : index
    %c0_216 = arith.constant 0 : index
    %c0_217 = arith.constant 0 : index
    %200 = vector.load %arg5[%c5_215, %c0_216, %c0_217] : memref<9x8x8xf32, #tpu.memory_space<vmem>>, vector<1x8x8xf32>
    %201 = vector.shape_cast %200 : vector<1x8x8xf32> to vector<8x8xf32>
    %cst_218 = arith.constant dense<0.000000e+00> : vector<8x64xf32>
    %202 = tpu.matmul %201, %165, %cst_218 {dimension_numbers = #tpu.dot_dimension_numbers<[1], [0], [0], [1], [0, 0, 1, 1], [], []>} : vector<8x8xf32>, vector<8x64xf32>, vector<8x64xf32> -> vector<8x64xf32>
    %c5_219 = arith.constant 5 : index
    %c0_220 = arith.constant 0 : index
    %c0_221 = arith.constant 0 : index
    %203 = vector.load %arg17[%c5_219, %c0_220, %c0_221] : memref<9x64x128xf32, #tpu.memory_space<vmem>>, vector<1x64x128xf32>
    %204 = vector.shape_cast %203 : vector<1x64x128xf32> to vector<64x128xf32>
    %cst_222 = arith.constant dense<0.000000e+00> : vector<8x128xf32>
    %205 = tpu.matmul %202, %204, %cst_222 {dimension_numbers = #tpu.dot_dimension_numbers<[1], [0], [0], [1], [0, 0, 1, 1], [], []>} : vector<8x64xf32>, vector<64x128xf32>, vector<8x128xf32> -> vector<8x128xf32>
    %206 = arith.addf %199, %205 : vector<8x128xf32>
    %c6_223 = arith.constant 6 : index
    %c0_224 = arith.constant 0 : index
    %c0_225 = arith.constant 0 : index
    %207 = vector.load %arg5[%c6_223, %c0_224, %c0_225] : memref<9x8x8xf32, #tpu.memory_space<vmem>>, vector<1x8x8xf32>
    %208 = vector.shape_cast %207 : vector<1x8x8xf32> to vector<8x8xf32>
    %cst_226 = arith.constant dense<0.000000e+00> : vector<8x64xf32>
    %209 = tpu.matmul %208, %165, %cst_226 {dimension_numbers = #tpu.dot_dimension_numbers<[1], [0], [0], [1], [0, 0, 1, 1], [], []>} : vector<8x8xf32>, vector<8x64xf32>, vector<8x64xf32> -> vector<8x64xf32>
    %c6_227 = arith.constant 6 : index
    %c0_228 = arith.constant 0 : index
    %c0_229 = arith.constant 0 : index
    %210 = vector.load %arg17[%c6_227, %c0_228, %c0_229] : memref<9x64x128xf32, #tpu.memory_space<vmem>>, vector<1x64x128xf32>
    %211 = vector.shape_cast %210 : vector<1x64x128xf32> to vector<64x128xf32>
    %cst_230 = arith.constant dense<0.000000e+00> : vector<8x128xf32>
    %212 = tpu.matmul %209, %211, %cst_230 {dimension_numbers = #tpu.dot_dimension_numbers<[1], [0], [0], [1], [0, 0, 1, 1], [], []>} : vector<8x64xf32>, vector<64x128xf32>, vector<8x128xf32> -> vector<8x128xf32>
    %213 = arith.addf %206, %212 : vector<8x128xf32>
    %c7_231 = arith.constant 7 : index
    %c0_232 = arith.constant 0 : index
    %c0_233 = arith.constant 0 : index
    %214 = vector.load %arg5[%c7_231, %c0_232, %c0_233] : memref<9x8x8xf32, #tpu.memory_space<vmem>>, vector<1x8x8xf32>
    %215 = vector.shape_cast %214 : vector<1x8x8xf32> to vector<8x8xf32>
    %cst_234 = arith.constant dense<0.000000e+00> : vector<8x64xf32>
    %216 = tpu.matmul %215, %165, %cst_234 {dimension_numbers = #tpu.dot_dimension_numbers<[1], [0], [0], [1], [0, 0, 1, 1], [], []>} : vector<8x8xf32>, vector<8x64xf32>, vector<8x64xf32> -> vector<8x64xf32>
    %c7_235 = arith.constant 7 : index
    %c0_236 = arith.constant 0 : index
    %c0_237 = arith.constant 0 : index
    %217 = vector.load %arg17[%c7_235, %c0_236, %c0_237] : memref<9x64x128xf32, #tpu.memory_space<vmem>>, vector<1x64x128xf32>
    %218 = vector.shape_cast %217 : vector<1x64x128xf32> to vector<64x128xf32>
    %cst_238 = arith.constant dense<0.000000e+00> : vector<8x128xf32>
    %219 = tpu.matmul %216, %218, %cst_238 {dimension_numbers = #tpu.dot_dimension_numbers<[1], [0], [0], [1], [0, 0, 1, 1], [], []>} : vector<8x64xf32>, vector<64x128xf32>, vector<8x128xf32> -> vector<8x128xf32>
    %220 = arith.addf %213, %219 : vector<8x128xf32>
    %c8_239 = arith.constant 8 : index
    %c0_240 = arith.constant 0 : index
    %c0_241 = arith.constant 0 : index
    %221 = vector.load %arg5[%c8_239, %c0_240, %c0_241] : memref<9x8x8xf32, #tpu.memory_space<vmem>>, vector<1x8x8xf32>
    %222 = vector.shape_cast %221 : vector<1x8x8xf32> to vector<8x8xf32>
    %cst_242 = arith.constant dense<0.000000e+00> : vector<8x64xf32>
    %223 = tpu.matmul %222, %165, %cst_242 {dimension_numbers = #tpu.dot_dimension_numbers<[1], [0], [0], [1], [0, 0, 1, 1], [], []>} : vector<8x8xf32>, vector<8x64xf32>, vector<8x64xf32> -> vector<8x64xf32>
    %c8_243 = arith.constant 8 : index
    %c0_244 = arith.constant 0 : index
    %c0_245 = arith.constant 0 : index
    %224 = vector.load %arg17[%c8_243, %c0_244, %c0_245] : memref<9x64x128xf32, #tpu.memory_space<vmem>>, vector<1x64x128xf32>
    %225 = vector.shape_cast %224 : vector<1x64x128xf32> to vector<64x128xf32>
    %cst_246 = arith.constant dense<0.000000e+00> : vector<8x128xf32>
    %226 = tpu.matmul %223, %225, %cst_246 {dimension_numbers = #tpu.dot_dimension_numbers<[1], [0], [0], [1], [0, 0, 1, 1], [], []>} : vector<8x64xf32>, vector<64x128xf32>, vector<8x128xf32> -> vector<8x128xf32>
    %227 = arith.addf %220, %226 : vector<8x128xf32>
    %c0_247 = arith.constant 0 : index
    %c0_248 = arith.constant 0 : index
    %228 = vector.load %arg18[%c0_247, %c0_248] : memref<1x128xf32, #tpu.memory_space<vmem>>, vector<1x128xf32>
    %229 = vector.broadcast %228 : vector<1x128xf32> to vector<8x128xf32>
    %230 = arith.addf %227, %229 : vector<8x128xf32>
    %cst_249 = arith.constant 0.000000e+00 : f32
    %231 = vector.broadcast %cst_249 : f32 to vector<8x128xf32>
    %232 = arith.maximumf %230, %231 : vector<8x128xf32>
    %c0_250 = arith.constant 0 : index
    %c0_251 = arith.constant 0 : index
    %c0_252 = arith.constant 0 : index
    %233 = vector.load %arg9[%c0_250, %c0_251, %c0_252] : memref<4x2x8xf32, #tpu.memory_space<vmem>>, vector<1x2x8xf32>
    %234 = vector.shape_cast %233 : vector<1x2x8xf32> to vector<2x8xf32>
    %cst_253 = arith.constant dense<0.000000e+00> : vector<2x128xf32>
    %235 = tpu.matmul %234, %232, %cst_253 {dimension_numbers = #tpu.dot_dimension_numbers<[1], [0], [0], [1], [0, 0, 1, 1], [], []>} : vector<2x8xf32>, vector<8x128xf32>, vector<2x128xf32> -> vector<2x128xf32>
    %c1_254 = arith.constant 1 : index
    %c0_255 = arith.constant 0 : index
    %c0_256 = arith.constant 0 : index
    %236 = vector.load %arg9[%c1_254, %c0_255, %c0_256] : memref<4x2x8xf32, #tpu.memory_space<vmem>>, vector<1x2x8xf32>
    %237 = vector.shape_cast %236 : vector<1x2x8xf32> to vector<2x8xf32>
    %cst_257 = arith.constant dense<0.000000e+00> : vector<2x128xf32>
    %238 = tpu.matmul %237, %232, %cst_257 {dimension_numbers = #tpu.dot_dimension_numbers<[1], [0], [0], [1], [0, 0, 1, 1], [], []>} : vector<2x8xf32>, vector<8x128xf32>, vector<2x128xf32> -> vector<2x128xf32>
    %239 = arith.maximumf %235, %238 : vector<2x128xf32>
    %c2_258 = arith.constant 2 : index
    %c0_259 = arith.constant 0 : index
    %c0_260 = arith.constant 0 : index
    %240 = vector.load %arg9[%c2_258, %c0_259, %c0_260] : memref<4x2x8xf32, #tpu.memory_space<vmem>>, vector<1x2x8xf32>
    %241 = vector.shape_cast %240 : vector<1x2x8xf32> to vector<2x8xf32>
    %cst_261 = arith.constant dense<0.000000e+00> : vector<2x128xf32>
    %242 = tpu.matmul %241, %232, %cst_261 {dimension_numbers = #tpu.dot_dimension_numbers<[1], [0], [0], [1], [0, 0, 1, 1], [], []>} : vector<2x8xf32>, vector<8x128xf32>, vector<2x128xf32> -> vector<2x128xf32>
    %243 = arith.maximumf %239, %242 : vector<2x128xf32>
    %c3_262 = arith.constant 3 : index
    %c0_263 = arith.constant 0 : index
    %c0_264 = arith.constant 0 : index
    %244 = vector.load %arg9[%c3_262, %c0_263, %c0_264] : memref<4x2x8xf32, #tpu.memory_space<vmem>>, vector<1x2x8xf32>
    %245 = vector.shape_cast %244 : vector<1x2x8xf32> to vector<2x8xf32>
    %cst_265 = arith.constant dense<0.000000e+00> : vector<2x128xf32>
    %246 = tpu.matmul %245, %232, %cst_265 {dimension_numbers = #tpu.dot_dimension_numbers<[1], [0], [0], [1], [0, 0, 1, 1], [], []>} : vector<2x8xf32>, vector<8x128xf32>, vector<2x128xf32> -> vector<2x128xf32>
    %247 = arith.maximumf %243, %246 : vector<2x128xf32>
    %c0_266 = arith.constant 0 : index
    %c0_267 = arith.constant 0 : index
    %248 = vector.load %arg20[%c0_266, %c0_267] : memref<1x128xf32, #tpu.memory_space<vmem>>, vector<1x128xf32>
    %249 = vector.extract_strided_slice %247 {offsets = [0, 0], sizes = [1, 128], strides = [1, 1]} : vector<2x128xf32> to vector<1x128xf32>
    %c0_268 = arith.constant 0 : index
    %c0_269 = arith.constant 0 : index
    %c0_270 = arith.constant 0 : index
    %250 = vector.load %arg19[%c0_268, %c0_269, %c0_270] : memref<2x128x128xf32, #tpu.memory_space<vmem>>, vector<1x128x128xf32>
    %251 = vector.shape_cast %250 : vector<1x128x128xf32> to vector<128x128xf32>
    %cst_271 = arith.constant dense<0.000000e+00> : vector<1x128xf32>
    %252 = tpu.matmul %249, %251, %cst_271 {dimension_numbers = #tpu.dot_dimension_numbers<[1], [0], [0], [1], [0, 0, 1, 1], [], []>} : vector<1x128xf32>, vector<128x128xf32>, vector<1x128xf32> -> vector<1x128xf32>
    %253 = arith.addf %248, %252 : vector<1x128xf32>
    %254 = vector.extract_strided_slice %247 {offsets = [1, 0], sizes = [1, 128], strides = [1, 1]} : vector<2x128xf32> to vector<1x128xf32>
    %c1_272 = arith.constant 1 : index
    %c0_273 = arith.constant 0 : index
    %c0_274 = arith.constant 0 : index
    %255 = vector.load %arg19[%c1_272, %c0_273, %c0_274] : memref<2x128x128xf32, #tpu.memory_space<vmem>>, vector<1x128x128xf32>
    %256 = vector.shape_cast %255 : vector<1x128x128xf32> to vector<128x128xf32>
    %cst_275 = arith.constant dense<0.000000e+00> : vector<1x128xf32>
    %257 = tpu.matmul %254, %256, %cst_275 {dimension_numbers = #tpu.dot_dimension_numbers<[1], [0], [0], [1], [0, 0, 1, 1], [], []>} : vector<1x128xf32>, vector<128x128xf32>, vector<1x128xf32> -> vector<1x128xf32>
    %258 = arith.addf %253, %257 : vector<1x128xf32>
    %cst_276 = arith.constant 0.000000e+00 : f32
    %259 = vector.broadcast %cst_276 : f32 to vector<1x128xf32>
    %260 = arith.maximumf %258, %259 : vector<1x128xf32>
    %c0_277 = arith.constant 0 : index
    %c0_278 = arith.constant 0 : index
    %261 = vector.load %arg21[%c0_277, %c0_278] : memref<128x32xf32, #tpu.memory_space<vmem>>, vector<128x32xf32>
    %cst_279 = arith.constant dense<0.000000e+00> : vector<1x32xf32>
    %262 = tpu.matmul %260, %261, %cst_279 {dimension_numbers = #tpu.dot_dimension_numbers<[1], [0], [0], [1], [0, 0, 1, 1], [], []>} : vector<1x128xf32>, vector<128x32xf32>, vector<1x32xf32> -> vector<1x32xf32>
    %c0_280 = arith.constant 0 : index
    %c0_281 = arith.constant 0 : index
    %263 = vector.load %arg22[%c0_280, %c0_281] : memref<1x32xf32, #tpu.memory_space<vmem>>, vector<1x32xf32>
    %264 = arith.addf %262, %263 : vector<1x32xf32>
    %265 = vector.extract_strided_slice %264 {offsets = [0, 0], sizes = [1, 16], strides = [1, 1]} : vector<1x32xf32> to vector<1x16xf32>
    %266 = vector.extract_strided_slice %264 {offsets = [0, 16], sizes = [1, 16], strides = [1, 1]} : vector<1x32xf32> to vector<1x16xf32>
    %c0_282 = arith.constant 0 : index
    %c0_283 = arith.constant 0 : index
    %c0_284 = arith.constant 0 : index
    %267 = vector.load %arg36[%c0_282, %c0_283, %c0_284] : memref<1x1x16xf32, #tpu.memory_space<vmem>>, vector<1x1x16xf32>
    %268 = vector.shape_cast %267 : vector<1x1x16xf32> to vector<1x16xf32>
    %269 = vector.shape_cast %265 : vector<1x16xf32> to vector<1x1x16xf32>
    tpu.vector_store %arg36[%c0_282, %c0_283, %c0_284], %269 {strides = array<i32>} : memref<1x1x16xf32, #tpu.memory_space<vmem>>, vector<1x1x16xf32>,
    %c0_285 = arith.constant 0 : index
    %c0_286 = arith.constant 0 : index
    %c0_287 = arith.constant 0 : index
    %270 = vector.load %arg37[%c0_285, %c0_286, %c0_287] : memref<1x1x16xf32, #tpu.memory_space<vmem>>, vector<1x1x16xf32>
    %271 = vector.shape_cast %270 : vector<1x1x16xf32> to vector<1x16xf32>
    %272 = vector.shape_cast %266 : vector<1x16xf32> to vector<1x1x16xf32>
    tpu.vector_store %arg37[%c0_285, %c0_286, %c0_287], %272 {strides = array<i32>} : memref<1x1x16xf32, #tpu.memory_space<vmem>>, vector<1x1x16xf32>,
    %c0_288 = arith.constant 0 : index
    %c0_289 = arith.constant 0 : index
    %c0_290 = arith.constant 0 : index
    %273 = vector.load %arg2[%c0_288, %c0_289, %c0_290] : memref<1x1x16xf32, #tpu.memory_space<vmem>>, vector<1x1x16xf32>
    %274 = vector.shape_cast %273 : vector<1x1x16xf32> to vector<1x16xf32>
    %cst_291 = arith.constant 5.000000e-01 : f32
    %275 = vector.broadcast %cst_291 : f32 to vector<1x16xf32>
    %276 = arith.mulf %275, %266 : vector<1x16xf32>
    %277 = math.exp %276 : vector<1x16xf32>
    %278 = arith.mulf %274, %277 : vector<1x16xf32>
    %279 = arith.addf %265, %278 : vector<1x16xf32>
    %c0_292 = arith.constant 0 : index
    %c0_293 = arith.constant 0 : index
    %280 = vector.load %arg23[%c0_292, %c0_293] : memref<16x128xf32, #tpu.memory_space<vmem>>, vector<16x128xf32>
    %cst_294 = arith.constant dense<0.000000e+00> : vector<1x128xf32>
    %281 = tpu.matmul %279, %280, %cst_294 {dimension_numbers = #tpu.dot_dimension_numbers<[1], [0], [0], [1], [0, 0, 1, 1], [], []>} : vector<1x16xf32>, vector<16x128xf32>, vector<1x128xf32> -> vector<1x128xf32>
    %c0_295 = arith.constant 0 : index
    %c0_296 = arith.constant 0 : index
    %282 = vector.load %arg24[%c0_295, %c0_296] : memref<1x128xf32, #tpu.memory_space<vmem>>, vector<1x128xf32>
    %283 = arith.addf %281, %282 : vector<1x128xf32>
    %cst_297 = arith.constant 0.000000e+00 : f32
    %284 = vector.broadcast %cst_297 : f32 to vector<1x128xf32>
    %285 = arith.maximumf %283, %284 : vector<1x128xf32>
    %c0_298 = arith.constant 0 : index
    %c0_299 = arith.constant 0 : index
    %c0_300 = arith.constant 0 : index
    %286 = vector.load %arg25[%c0_298, %c0_299, %c0_300] : memref<2x128x128xf32, #tpu.memory_space<vmem>>, vector<1x128x128xf32>
    %287 = vector.shape_cast %286 : vector<1x128x128xf32> to vector<128x128xf32>
    %cst_301 = arith.constant dense<0.000000e+00> : vector<1x128xf32>
    %288 = tpu.matmul %285, %287, %cst_301 {dimension_numbers = #tpu.dot_dimension_numbers<[1], [0], [0], [1], [0, 0, 1, 1], [], []>} : vector<1x128xf32>, vector<128x128xf32>, vector<1x128xf32> -> vector<1x128xf32>
    %c0_302 = arith.constant 0 : index
    %c0_303 = arith.constant 0 : index
    %289 = vector.load %arg26[%c0_302, %c0_303] : memref<2x128xf32, #tpu.memory_space<vmem>>, vector<1x128xf32>
    %290 = arith.addf %288, %289 : vector<1x128xf32>
    %cst_304 = arith.constant 0.000000e+00 : f32
    %291 = vector.broadcast %cst_304 : f32 to vector<1x128xf32>
    %292 = arith.maximumf %290, %291 : vector<1x128xf32>
    %c1_305 = arith.constant 1 : index
    %c0_306 = arith.constant 0 : index
    %c0_307 = arith.constant 0 : index
    %293 = vector.load %arg25[%c1_305, %c0_306, %c0_307] : memref<2x128x128xf32, #tpu.memory_space<vmem>>, vector<1x128x128xf32>
    %294 = vector.shape_cast %293 : vector<1x128x128xf32> to vector<128x128xf32>
    %cst_308 = arith.constant dense<0.000000e+00> : vector<1x128xf32>
    %295 = tpu.matmul %285, %294, %cst_308 {dimension_numbers = #tpu.dot_dimension_numbers<[1], [0], [0], [1], [0, 0, 1, 1], [], []>} : vector<1x128xf32>, vector<128x128xf32>, vector<1x128xf32> -> vector<1x128xf32>
    %c1_309 = arith.constant 1 : index
    %c0_310 = arith.constant 0 : index
    %296 = vector.load %arg26[%c1_309, %c0_310] : memref<2x128xf32, #tpu.memory_space<vmem>>, vector<1x128xf32>
    %297 = arith.addf %295, %296 : vector<1x128xf32>
    %cst_311 = arith.constant 0.000000e+00 : f32
    %298 = vector.broadcast %cst_311 : f32 to vector<1x128xf32>
    %299 = arith.maximumf %297, %298 : vector<1x128xf32>
    %300 = tpu.iota {dimensions = array<i32: 0>} : vector<2x128xi32>
    %cst_312 = arith.constant 0.000000e+00 : f32
    %301 = vector.broadcast %cst_312 : f32 to vector<2x128xf32>
    %c0_i32 = arith.constant 0 : i32
    %302 = vector.broadcast %c0_i32 : i32 to vector<2x128xi32>
    %303 = arith.cmpi eq, %300, %302 : vector<2x128xi32>
    %304 = vector.shape_cast %292 : vector<1x128xf32> to vector<1x128xf32>
    %305 = vector.broadcast %304 : vector<1x128xf32> to vector<2x128xf32>
    %cst_313 = arith.constant 0.000000e+00 : f32
    %306 = vector.broadcast %cst_313 : f32 to vector<2x128xf32>
    %307 = arith.select %303, %305, %306 : vector<2x128xi1>, vector<2x128xf32>
    %308 = arith.addf %301, %307 : vector<2x128xf32>
    %c1_i32 = arith.constant 1 : i32
    %309 = vector.broadcast %c1_i32 : i32 to vector<2x128xi32>
    %310 = arith.cmpi eq, %300, %309 : vector<2x128xi32>
    %311 = vector.shape_cast %299 : vector<1x128xf32> to vector<1x128xf32>
    %312 = vector.broadcast %311 : vector<1x128xf32> to vector<2x128xf32>
    %cst_314 = arith.constant 0.000000e+00 : f32
    %313 = vector.broadcast %cst_314 : f32 to vector<2x128xf32>
    %314 = arith.select %310, %312, %313 : vector<2x128xi1>, vector<2x128xf32>
    %315 = arith.addf %308, %314 : vector<2x128xf32>
    %c0_315 = arith.constant 0 : index
    %c0_316 = arith.constant 0 : index
    %c0_317 = arith.constant 0 : index
    %316 = vector.load %arg6[%c0_315, %c0_316, %c0_317] : memref<3x2x2xf32, #tpu.memory_space<vmem>>, vector<1x2x2xf32>
    %317 = vector.shape_cast %316 : vector<1x2x2xf32> to vector<2x2xf32>
    %cst_318 = arith.constant dense<0.000000e+00> : vector<2x128xf32>
    %318 = tpu.matmul %317, %315, %cst_318 {dimension_numbers = #tpu.dot_dimension_numbers<[1], [0], [0], [1], [0, 0, 1, 1], [], []>} : vector<2x2xf32>, vector<2x128xf32>, vector<2x128xf32> -> vector<2x128xf32>
    %c0_319 = arith.constant 0 : index
    %c0_320 = arith.constant 0 : index
    %c0_321 = arith.constant 0 : index
    %319 = vector.load %arg27[%c0_319, %c0_320, %c0_321] : memref<3x128x128xf32, #tpu.memory_space<vmem>>, vector<1x128x128xf32>
    %320 = vector.shape_cast %319 : vector<1x128x128xf32> to vector<128x128xf32>
    %cst_322 = arith.constant dense<0.000000e+00> : vector<2x128xf32>
    %321 = tpu.matmul %318, %320, %cst_322 {dimension_numbers = #tpu.dot_dimension_numbers<[1], [0], [0], [1], [0, 0, 1, 1], [], []>} : vector<2x128xf32>, vector<128x128xf32>, vector<2x128xf32> -> vector<2x128xf32>
    %c1_323 = arith.constant 1 : index
    %c0_324 = arith.constant 0 : index
    %c0_325 = arith.constant 0 : index
    %322 = vector.load %arg6[%c1_323, %c0_324, %c0_325] : memref<3x2x2xf32, #tpu.memory_space<vmem>>, vector<1x2x2xf32>
    %323 = vector.shape_cast %322 : vector<1x2x2xf32> to vector<2x2xf32>
    %cst_326 = arith.constant dense<0.000000e+00> : vector<2x128xf32>
    %324 = tpu.matmul %323, %315, %cst_326 {dimension_numbers = #tpu.dot_dimension_numbers<[1], [0], [0], [1], [0, 0, 1, 1], [], []>} : vector<2x2xf32>, vector<2x128xf32>, vector<2x128xf32> -> vector<2x128xf32>
    %c1_327 = arith.constant 1 : index
    %c0_328 = arith.constant 0 : index
    %c0_329 = arith.constant 0 : index
    %325 = vector.load %arg27[%c1_327, %c0_328, %c0_329] : memref<3x128x128xf32, #tpu.memory_space<vmem>>, vector<1x128x128xf32>
    %326 = vector.shape_cast %325 : vector<1x128x128xf32> to vector<128x128xf32>
    %cst_330 = arith.constant dense<0.000000e+00> : vector<2x128xf32>
    %327 = tpu.matmul %324, %326, %cst_330 {dimension_numbers = #tpu.dot_dimension_numbers<[1], [0], [0], [1], [0, 0, 1, 1], [], []>} : vector<2x128xf32>, vector<128x128xf32>, vector<2x128xf32> -> vector<2x128xf32>
    %328 = arith.addf %321, %327 : vector<2x128xf32>
    %c2_331 = arith.constant 2 : index
    %c0_332 = arith.constant 0 : index
    %c0_333 = arith.constant 0 : index
    %329 = vector.load %arg6[%c2_331, %c0_332, %c0_333] : memref<3x2x2xf32, #tpu.memory_space<vmem>>, vector<1x2x2xf32>
    %330 = vector.shape_cast %329 : vector<1x2x2xf32> to vector<2x2xf32>
    %cst_334 = arith.constant dense<0.000000e+00> : vector<2x128xf32>
    %331 = tpu.matmul %330, %315, %cst_334 {dimension_numbers = #tpu.dot_dimension_numbers<[1], [0], [0], [1], [0, 0, 1, 1], [], []>} : vector<2x2xf32>, vector<2x128xf32>, vector<2x128xf32> -> vector<2x128xf32>
    %c2_335 = arith.constant 2 : index
    %c0_336 = arith.constant 0 : index
    %c0_337 = arith.constant 0 : index
    %332 = vector.load %arg27[%c2_335, %c0_336, %c0_337] : memref<3x128x128xf32, #tpu.memory_space<vmem>>, vector<1x128x128xf32>
    %333 = vector.shape_cast %332 : vector<1x128x128xf32> to vector<128x128xf32>
    %cst_338 = arith.constant dense<0.000000e+00> : vector<2x128xf32>
    %334 = tpu.matmul %331, %333, %cst_338 {dimension_numbers = #tpu.dot_dimension_numbers<[1], [0], [0], [1], [0, 0, 1, 1], [], []>} : vector<2x128xf32>, vector<128x128xf32>, vector<2x128xf32> -> vector<2x128xf32>
    %335 = arith.addf %328, %334 : vector<2x128xf32>
    %c0_339 = arith.constant 0 : index
    %c0_340 = arith.constant 0 : index
    %336 = vector.load %arg28[%c0_339, %c0_340] : memref<1x128xf32, #tpu.memory_space<vmem>>, vector<1x128xf32>
    %337 = vector.broadcast %336 : vector<1x128xf32> to vector<2x128xf32>
    %338 = arith.addf %335, %337 : vector<2x128xf32>
    %cst_341 = arith.constant 0.000000e+00 : f32
    %339 = vector.broadcast %cst_341 : f32 to vector<2x128xf32>
    %340 = arith.maximumf %338, %339 : vector<2x128xf32>
    %c0_342 = arith.constant 0 : index
    %c0_343 = arith.constant 0 : index
    %341 = vector.load %arg10[%c0_342, %c0_343] : memref<8x2xf32, #tpu.memory_space<vmem>>, vector<8x2xf32>
    %cst_344 = arith.constant dense<0.000000e+00> : vector<8x128xf32>
    %342 = tpu.matmul %341, %340, %cst_344 {dimension_numbers = #tpu.dot_dimension_numbers<[1], [0], [0], [1], [0, 0, 1, 1], [], []>} : vector<8x2xf32>, vector<2x128xf32>, vector<8x128xf32> -> vector<8x128xf32>
    %c0_345 = arith.constant 0 : index
    %c0_346 = arith.constant 0 : index
    %c0_347 = arith.constant 0 : index
    %343 = vector.load %arg29[%c0_345, %c0_346, %c0_347] : memref<9x128x64xf32, #tpu.memory_space<vmem>>, vector<1x128x64xf32>
    %344 = vector.shape_cast %343 : vector<1x128x64xf32> to vector<128x64xf32>
    %cst_348 = arith.constant dense<0.000000e+00> : vector<8x64xf32>
    %345 = tpu.matmul %342, %344, %cst_348 {dimension_numbers = #tpu.dot_dimension_numbers<[1], [0], [0], [1], [0, 0, 1, 1], [], []>} : vector<8x128xf32>, vector<128x64xf32>, vector<8x64xf32> -> vector<8x64xf32>
    %c0_349 = arith.constant 0 : index
    %c0_350 = arith.constant 0 : index
    %c0_351 = arith.constant 0 : index
    %346 = vector.load %arg5[%c0_349, %c0_350, %c0_351] : memref<9x8x8xf32, #tpu.memory_space<vmem>>, vector<1x8x8xf32>
    %347 = vector.shape_cast %346 : vector<1x8x8xf32> to vector<8x8xf32>
    %cst_352 = arith.constant dense<0.000000e+00> : vector<8x64xf32>
    %348 = tpu.matmul %347, %345, %cst_352 {dimension_numbers = #tpu.dot_dimension_numbers<[1], [0], [0], [1], [0, 0, 1, 1], [], []>} : vector<8x8xf32>, vector<8x64xf32>, vector<8x64xf32> -> vector<8x64xf32>
    %c1_353 = arith.constant 1 : index
    %c0_354 = arith.constant 0 : index
    %c0_355 = arith.constant 0 : index
    %349 = vector.load %arg29[%c1_353, %c0_354, %c0_355] : memref<9x128x64xf32, #tpu.memory_space<vmem>>, vector<1x128x64xf32>
    %350 = vector.shape_cast %349 : vector<1x128x64xf32> to vector<128x64xf32>
    %cst_356 = arith.constant dense<0.000000e+00> : vector<8x64xf32>
    %351 = tpu.matmul %342, %350, %cst_356 {dimension_numbers = #tpu.dot_dimension_numbers<[1], [0], [0], [1], [0, 0, 1, 1], [], []>} : vector<8x128xf32>, vector<128x64xf32>, vector<8x64xf32> -> vector<8x64xf32>
    %c1_357 = arith.constant 1 : index
    %c0_358 = arith.constant 0 : index
    %c0_359 = arith.constant 0 : index
    %352 = vector.load %arg5[%c1_357, %c0_358, %c0_359] : memref<9x8x8xf32, #tpu.memory_space<vmem>>, vector<1x8x8xf32>
    %353 = vector.shape_cast %352 : vector<1x8x8xf32> to vector<8x8xf32>
    %cst_360 = arith.constant dense<0.000000e+00> : vector<8x64xf32>
    %354 = tpu.matmul %353, %351, %cst_360 {dimension_numbers = #tpu.dot_dimension_numbers<[1], [0], [0], [1], [0, 0, 1, 1], [], []>} : vector<8x8xf32>, vector<8x64xf32>, vector<8x64xf32> -> vector<8x64xf32>
    %355 = arith.addf %348, %354 : vector<8x64xf32>
    %c2_361 = arith.constant 2 : index
    %c0_362 = arith.constant 0 : index
    %c0_363 = arith.constant 0 : index
    %356 = vector.load %arg29[%c2_361, %c0_362, %c0_363] : memref<9x128x64xf32, #tpu.memory_space<vmem>>, vector<1x128x64xf32>
    %357 = vector.shape_cast %356 : vector<1x128x64xf32> to vector<128x64xf32>
    %cst_364 = arith.constant dense<0.000000e+00> : vector<8x64xf32>
    %358 = tpu.matmul %342, %357, %cst_364 {dimension_numbers = #tpu.dot_dimension_numbers<[1], [0], [0], [1], [0, 0, 1, 1], [], []>} : vector<8x128xf32>, vector<128x64xf32>, vector<8x64xf32> -> vector<8x64xf32>
    %c2_365 = arith.constant 2 : index
    %c0_366 = arith.constant 0 : index
    %c0_367 = arith.constant 0 : index
    %359 = vector.load %arg5[%c2_365, %c0_366, %c0_367] : memref<9x8x8xf32, #tpu.memory_space<vmem>>, vector<1x8x8xf32>
    %360 = vector.shape_cast %359 : vector<1x8x8xf32> to vector<8x8xf32>
    %cst_368 = arith.constant dense<0.000000e+00> : vector<8x64xf32>
    %361 = tpu.matmul %360, %358, %cst_368 {dimension_numbers = #tpu.dot_dimension_numbers<[1], [0], [0], [1], [0, 0, 1, 1], [], []>} : vector<8x8xf32>, vector<8x64xf32>, vector<8x64xf32> -> vector<8x64xf32>
    %362 = arith.addf %355, %361 : vector<8x64xf32>
    %c3_369 = arith.constant 3 : index
    %c0_370 = arith.constant 0 : index
    %c0_371 = arith.constant 0 : index
    %363 = vector.load %arg29[%c3_369, %c0_370, %c0_371] : memref<9x128x64xf32, #tpu.memory_space<vmem>>, vector<1x128x64xf32>
    %364 = vector.shape_cast %363 : vector<1x128x64xf32> to vector<128x64xf32>
    %cst_372 = arith.constant dense<0.000000e+00> : vector<8x64xf32>
    %365 = tpu.matmul %342, %364, %cst_372 {dimension_numbers = #tpu.dot_dimension_numbers<[1], [0], [0], [1], [0, 0, 1, 1], [], []>} : vector<8x128xf32>, vector<128x64xf32>, vector<8x64xf32> -> vector<8x64xf32>
    %c3_373 = arith.constant 3 : index
    %c0_374 = arith.constant 0 : index
    %c0_375 = arith.constant 0 : index
    %366 = vector.load %arg5[%c3_373, %c0_374, %c0_375] : memref<9x8x8xf32, #tpu.memory_space<vmem>>, vector<1x8x8xf32>
    %367 = vector.shape_cast %366 : vector<1x8x8xf32> to vector<8x8xf32>
    %cst_376 = arith.constant dense<0.000000e+00> : vector<8x64xf32>
    %368 = tpu.matmul %367, %365, %cst_376 {dimension_numbers = #tpu.dot_dimension_numbers<[1], [0], [0], [1], [0, 0, 1, 1], [], []>} : vector<8x8xf32>, vector<8x64xf32>, vector<8x64xf32> -> vector<8x64xf32>
    %369 = arith.addf %362, %368 : vector<8x64xf32>
    %c4_377 = arith.constant 4 : index
    %c0_378 = arith.constant 0 : index
    %c0_379 = arith.constant 0 : index
    %370 = vector.load %arg29[%c4_377, %c0_378, %c0_379] : memref<9x128x64xf32, #tpu.memory_space<vmem>>, vector<1x128x64xf32>
    %371 = vector.shape_cast %370 : vector<1x128x64xf32> to vector<128x64xf32>
    %cst_380 = arith.constant dense<0.000000e+00> : vector<8x64xf32>
    %372 = tpu.matmul %342, %371, %cst_380 {dimension_numbers = #tpu.dot_dimension_numbers<[1], [0], [0], [1], [0, 0, 1, 1], [], []>} : vector<8x128xf32>, vector<128x64xf32>, vector<8x64xf32> -> vector<8x64xf32>
    %c4_381 = arith.constant 4 : index
    %c0_382 = arith.constant 0 : index
    %c0_383 = arith.constant 0 : index
    %373 = vector.load %arg5[%c4_381, %c0_382, %c0_383] : memref<9x8x8xf32, #tpu.memory_space<vmem>>, vector<1x8x8xf32>
    %374 = vector.shape_cast %373 : vector<1x8x8xf32> to vector<8x8xf32>
    %cst_384 = arith.constant dense<0.000000e+00> : vector<8x64xf32>
    %375 = tpu.matmul %374, %372, %cst_384 {dimension_numbers = #tpu.dot_dimension_numbers<[1], [0], [0], [1], [0, 0, 1, 1], [], []>} : vector<8x8xf32>, vector<8x64xf32>, vector<8x64xf32> -> vector<8x64xf32>
    %376 = arith.addf %369, %375 : vector<8x64xf32>
    %c5_385 = arith.constant 5 : index
    %c0_386 = arith.constant 0 : index
    %c0_387 = arith.constant 0 : index
    %377 = vector.load %arg29[%c5_385, %c0_386, %c0_387] : memref<9x128x64xf32, #tpu.memory_space<vmem>>, vector<1x128x64xf32>
    %378 = vector.shape_cast %377 : vector<1x128x64xf32> to vector<128x64xf32>
    %cst_388 = arith.constant dense<0.000000e+00> : vector<8x64xf32>
    %379 = tpu.matmul %342, %378, %cst_388 {dimension_numbers = #tpu.dot_dimension_numbers<[1], [0], [0], [1], [0, 0, 1, 1], [], []>} : vector<8x128xf32>, vector<128x64xf32>, vector<8x64xf32> -> vector<8x64xf32>
    %c5_389 = arith.constant 5 : index
    %c0_390 = arith.constant 0 : index
    %c0_391 = arith.constant 0 : index
    %380 = vector.load %arg5[%c5_389, %c0_390, %c0_391] : memref<9x8x8xf32, #tpu.memory_space<vmem>>, vector<1x8x8xf32>
    %381 = vector.shape_cast %380 : vector<1x8x8xf32> to vector<8x8xf32>
    %cst_392 = arith.constant dense<0.000000e+00> : vector<8x64xf32>
    %382 = tpu.matmul %381, %379, %cst_392 {dimension_numbers = #tpu.dot_dimension_numbers<[1], [0], [0], [1], [0, 0, 1, 1], [], []>} : vector<8x8xf32>, vector<8x64xf32>, vector<8x64xf32> -> vector<8x64xf32>
    %383 = arith.addf %376, %382 : vector<8x64xf32>
    %c6_393 = arith.constant 6 : index
    %c0_394 = arith.constant 0 : index
    %c0_395 = arith.constant 0 : index
    %384 = vector.load %arg29[%c6_393, %c0_394, %c0_395] : memref<9x128x64xf32, #tpu.memory_space<vmem>>, vector<1x128x64xf32>
    %385 = vector.shape_cast %384 : vector<1x128x64xf32> to vector<128x64xf32>
    %cst_396 = arith.constant dense<0.000000e+00> : vector<8x64xf32>
    %386 = tpu.matmul %342, %385, %cst_396 {dimension_numbers = #tpu.dot_dimension_numbers<[1], [0], [0], [1], [0, 0, 1, 1], [], []>} : vector<8x128xf32>, vector<128x64xf32>, vector<8x64xf32> -> vector<8x64xf32>
    %c6_397 = arith.constant 6 : index
    %c0_398 = arith.constant 0 : index
    %c0_399 = arith.constant 0 : index
    %387 = vector.load %arg5[%c6_397, %c0_398, %c0_399] : memref<9x8x8xf32, #tpu.memory_space<vmem>>, vector<1x8x8xf32>
    %388 = vector.shape_cast %387 : vector<1x8x8xf32> to vector<8x8xf32>
    %cst_400 = arith.constant dense<0.000000e+00> : vector<8x64xf32>
    %389 = tpu.matmul %388, %386, %cst_400 {dimension_numbers = #tpu.dot_dimension_numbers<[1], [0], [0], [1], [0, 0, 1, 1], [], []>} : vector<8x8xf32>, vector<8x64xf32>, vector<8x64xf32> -> vector<8x64xf32>
    %390 = arith.addf %383, %389 : vector<8x64xf32>
    %c7_401 = arith.constant 7 : index
    %c0_402 = arith.constant 0 : index
    %c0_403 = arith.constant 0 : index
    %391 = vector.load %arg29[%c7_401, %c0_402, %c0_403] : memref<9x128x64xf32, #tpu.memory_space<vmem>>, vector<1x128x64xf32>
    %392 = vector.shape_cast %391 : vector<1x128x64xf32> to vector<128x64xf32>
    %cst_404 = arith.constant dense<0.000000e+00> : vector<8x64xf32>
    %393 = tpu.matmul %342, %392, %cst_404 {dimension_numbers = #tpu.dot_dimension_numbers<[1], [0], [0], [1], [0, 0, 1, 1], [], []>} : vector<8x128xf32>, vector<128x64xf32>, vector<8x64xf32> -> vector<8x64xf32>
    %c7_405 = arith.constant 7 : index
    %c0_406 = arith.constant 0 : index
    %c0_407 = arith.constant 0 : index
    %394 = vector.load %arg5[%c7_405, %c0_406, %c0_407] : memref<9x8x8xf32, #tpu.memory_space<vmem>>, vector<1x8x8xf32>
    %395 = vector.shape_cast %394 : vector<1x8x8xf32> to vector<8x8xf32>
    %cst_408 = arith.constant dense<0.000000e+00> : vector<8x64xf32>
    %396 = tpu.matmul %395, %393, %cst_408 {dimension_numbers = #tpu.dot_dimension_numbers<[1], [0], [0], [1], [0, 0, 1, 1], [], []>} : vector<8x8xf32>, vector<8x64xf32>, vector<8x64xf32> -> vector<8x64xf32>
    %397 = arith.addf %390, %396 : vector<8x64xf32>
    %c8_409 = arith.constant 8 : index
    %c0_410 = arith.constant 0 : index
    %c0_411 = arith.constant 0 : index
    %398 = vector.load %arg29[%c8_409, %c0_410, %c0_411] : memref<9x128x64xf32, #tpu.memory_space<vmem>>, vector<1x128x64xf32>
    %399 = vector.shape_cast %398 : vector<1x128x64xf32> to vector<128x64xf32>
    %cst_412 = arith.constant dense<0.000000e+00> : vector<8x64xf32>
    %400 = tpu.matmul %342, %399, %cst_412 {dimension_numbers = #tpu.dot_dimension_numbers<[1], [0], [0], [1], [0, 0, 1, 1], [], []>} : vector<8x128xf32>, vector<128x64xf32>, vector<8x64xf32> -> vector<8x64xf32>
    %c8_413 = arith.constant 8 : index
    %c0_414 = arith.constant 0 : index
    %c0_415 = arith.constant 0 : index
    %401 = vector.load %arg5[%c8_413, %c0_414, %c0_415] : memref<9x8x8xf32, #tpu.memory_space<vmem>>, vector<1x8x8xf32>
    %402 = vector.shape_cast %401 : vector<1x8x8xf32> to vector<8x8xf32>
    %cst_416 = arith.constant dense<0.000000e+00> : vector<8x64xf32>
    %403 = tpu.matmul %402, %400, %cst_416 {dimension_numbers = #tpu.dot_dimension_numbers<[1], [0], [0], [1], [0, 0, 1, 1], [], []>} : vector<8x8xf32>, vector<8x64xf32>, vector<8x64xf32> -> vector<8x64xf32>
    %404 = arith.addf %397, %403 : vector<8x64xf32>
    %c0_417 = arith.constant 0 : index
    %c0_418 = arith.constant 0 : index
    %405 = vector.load %arg30[%c0_417, %c0_418] : memref<1x64xf32, #tpu.memory_space<vmem>>, vector<1x64xf32>
    %406 = vector.broadcast %405 : vector<1x64xf32> to vector<8x64xf32>
    %407 = arith.addf %404, %406 : vector<8x64xf32>
    %cst_419 = arith.constant 0.000000e+00 : f32
    %408 = vector.broadcast %cst_419 : f32 to vector<8x64xf32>
    %409 = arith.maximumf %407, %408 : vector<8x64xf32>
    %c0_420 = arith.constant 0 : index
    %c0_421 = arith.constant 0 : index
    %410 = vector.load %arg11[%c0_420, %c0_421] : memref<32x8xf32, #tpu.memory_space<vmem>>, vector<32x8xf32>
    %cst_422 = arith.constant dense<0.000000e+00> : vector<32x64xf32>
    %411 = tpu.matmul %410, %409, %cst_422 {dimension_numbers = #tpu.dot_dimension_numbers<[1], [0], [0], [1], [0, 0, 1, 1], [], []>} : vector<32x8xf32>, vector<8x64xf32>, vector<32x64xf32> -> vector<32x64xf32>
    %c0_423 = arith.constant 0 : index
    %c0_424 = arith.constant 0 : index
    %c0_425 = arith.constant 0 : index
    %412 = vector.load %arg31[%c0_423, %c0_424, %c0_425] : memref<9x64x32xf32, #tpu.memory_space<vmem>>, vector<1x64x32xf32>
    %413 = vector.shape_cast %412 : vector<1x64x32xf32> to vector<64x32xf32>
    %cst_426 = arith.constant dense<0.000000e+00> : vector<32x32xf32>
    %414 = tpu.matmul %411, %413, %cst_426 {dimension_numbers = #tpu.dot_dimension_numbers<[1], [0], [0], [1], [0, 0, 1, 1], [], []>} : vector<32x64xf32>, vector<64x32xf32>, vector<32x32xf32> -> vector<32x32xf32>
    %c0_427 = arith.constant 0 : index
    %c0_428 = arith.constant 0 : index
    %c0_429 = arith.constant 0 : index
    %415 = vector.load %arg4[%c0_427, %c0_428, %c0_429] : memref<9x32x32xf32, #tpu.memory_space<vmem>>, vector<1x32x32xf32>
    %416 = vector.shape_cast %415 : vector<1x32x32xf32> to vector<32x32xf32>
    %cst_430 = arith.constant dense<0.000000e+00> : vector<32x32xf32>
    %417 = tpu.matmul %416, %414, %cst_430 {dimension_numbers = #tpu.dot_dimension_numbers<[1], [0], [0], [1], [0, 0, 1, 1], [], []>} : vector<32x32xf32>, vector<32x32xf32>, vector<32x32xf32> -> vector<32x32xf32>
    %c1_431 = arith.constant 1 : index
    %c0_432 = arith.constant 0 : index
    %c0_433 = arith.constant 0 : index
    %418 = vector.load %arg31[%c1_431, %c0_432, %c0_433] : memref<9x64x32xf32, #tpu.memory_space<vmem>>, vector<1x64x32xf32>
    %419 = vector.shape_cast %418 : vector<1x64x32xf32> to vector<64x32xf32>
    %cst_434 = arith.constant dense<0.000000e+00> : vector<32x32xf32>
    %420 = tpu.matmul %411, %419, %cst_434 {dimension_numbers = #tpu.dot_dimension_numbers<[1], [0], [0], [1], [0, 0, 1, 1], [], []>} : vector<32x64xf32>, vector<64x32xf32>, vector<32x32xf32> -> vector<32x32xf32>
    %c1_435 = arith.constant 1 : index
    %c0_436 = arith.constant 0 : index
    %c0_437 = arith.constant 0 : index
    %421 = vector.load %arg4[%c1_435, %c0_436, %c0_437] : memref<9x32x32xf32, #tpu.memory_space<vmem>>, vector<1x32x32xf32>
    %422 = vector.shape_cast %421 : vector<1x32x32xf32> to vector<32x32xf32>
    %cst_438 = arith.constant dense<0.000000e+00> : vector<32x32xf32>
    %423 = tpu.matmul %422, %420, %cst_438 {dimension_numbers = #tpu.dot_dimension_numbers<[1], [0], [0], [1], [0, 0, 1, 1], [], []>} : vector<32x32xf32>, vector<32x32xf32>, vector<32x32xf32> -> vector<32x32xf32>
    %424 = arith.addf %417, %423 : vector<32x32xf32>
    %c2_439 = arith.constant 2 : index
    %c0_440 = arith.constant 0 : index
    %c0_441 = arith.constant 0 : index
    %425 = vector.load %arg31[%c2_439, %c0_440, %c0_441] : memref<9x64x32xf32, #tpu.memory_space<vmem>>, vector<1x64x32xf32>
    %426 = vector.shape_cast %425 : vector<1x64x32xf32> to vector<64x32xf32>
    %cst_442 = arith.constant dense<0.000000e+00> : vector<32x32xf32>
    %427 = tpu.matmul %411, %426, %cst_442 {dimension_numbers = #tpu.dot_dimension_numbers<[1], [0], [0], [1], [0, 0, 1, 1], [], []>} : vector<32x64xf32>, vector<64x32xf32>, vector<32x32xf32> -> vector<32x32xf32>
    %c2_443 = arith.constant 2 : index
    %c0_444 = arith.constant 0 : index
    %c0_445 = arith.constant 0 : index
    %428 = vector.load %arg4[%c2_443, %c0_444, %c0_445] : memref<9x32x32xf32, #tpu.memory_space<vmem>>, vector<1x32x32xf32>
    %429 = vector.shape_cast %428 : vector<1x32x32xf32> to vector<32x32xf32>
    %cst_446 = arith.constant dense<0.000000e+00> : vector<32x32xf32>
    %430 = tpu.matmul %429, %427, %cst_446 {dimension_numbers = #tpu.dot_dimension_numbers<[1], [0], [0], [1], [0, 0, 1, 1], [], []>} : vector<32x32xf32>, vector<32x32xf32>, vector<32x32xf32> -> vector<32x32xf32>
    %431 = arith.addf %424, %430 : vector<32x32xf32>
    %c3_447 = arith.constant 3 : index
    %c0_448 = arith.constant 0 : index
    %c0_449 = arith.constant 0 : index
    %432 = vector.load %arg31[%c3_447, %c0_448, %c0_449] : memref<9x64x32xf32, #tpu.memory_space<vmem>>, vector<1x64x32xf32>
    %433 = vector.shape_cast %432 : vector<1x64x32xf32> to vector<64x32xf32>
    %cst_450 = arith.constant dense<0.000000e+00> : vector<32x32xf32>
    %434 = tpu.matmul %411, %433, %cst_450 {dimension_numbers = #tpu.dot_dimension_numbers<[1], [0], [0], [1], [0, 0, 1, 1], [], []>} : vector<32x64xf32>, vector<64x32xf32>, vector<32x32xf32> -> vector<32x32xf32>
    %c3_451 = arith.constant 3 : index
    %c0_452 = arith.constant 0 : index
    %c0_453 = arith.constant 0 : index
    %435 = vector.load %arg4[%c3_451, %c0_452, %c0_453] : memref<9x32x32xf32, #tpu.memory_space<vmem>>, vector<1x32x32xf32>
    %436 = vector.shape_cast %435 : vector<1x32x32xf32> to vector<32x32xf32>
    %cst_454 = arith.constant dense<0.000000e+00> : vector<32x32xf32>
    %437 = tpu.matmul %436, %434, %cst_454 {dimension_numbers = #tpu.dot_dimension_numbers<[1], [0], [0], [1], [0, 0, 1, 1], [], []>} : vector<32x32xf32>, vector<32x32xf32>, vector<32x32xf32> -> vector<32x32xf32>
    %438 = arith.addf %431, %437 : vector<32x32xf32>
    %c4_455 = arith.constant 4 : index
    %c0_456 = arith.constant 0 : index
    %c0_457 = arith.constant 0 : index
    %439 = vector.load %arg31[%c4_455, %c0_456, %c0_457] : memref<9x64x32xf32, #tpu.memory_space<vmem>>, vector<1x64x32xf32>
    %440 = vector.shape_cast %439 : vector<1x64x32xf32> to vector<64x32xf32>
    %cst_458 = arith.constant dense<0.000000e+00> : vector<32x32xf32>
    %441 = tpu.matmul %411, %440, %cst_458 {dimension_numbers = #tpu.dot_dimension_numbers<[1], [0], [0], [1], [0, 0, 1, 1], [], []>} : vector<32x64xf32>, vector<64x32xf32>, vector<32x32xf32> -> vector<32x32xf32>
    %c4_459 = arith.constant 4 : index
    %c0_460 = arith.constant 0 : index
    %c0_461 = arith.constant 0 : index
    %442 = vector.load %arg4[%c4_459, %c0_460, %c0_461] : memref<9x32x32xf32, #tpu.memory_space<vmem>>, vector<1x32x32xf32>
    %443 = vector.shape_cast %442 : vector<1x32x32xf32> to vector<32x32xf32>
    %cst_462 = arith.constant dense<0.000000e+00> : vector<32x32xf32>
    %444 = tpu.matmul %443, %441, %cst_462 {dimension_numbers = #tpu.dot_dimension_numbers<[1], [0], [0], [1], [0, 0, 1, 1], [], []>} : vector<32x32xf32>, vector<32x32xf32>, vector<32x32xf32> -> vector<32x32xf32>
    %445 = arith.addf %438, %444 : vector<32x32xf32>
    %c5_463 = arith.constant 5 : index
    %c0_464 = arith.constant 0 : index
    %c0_465 = arith.constant 0 : index
    %446 = vector.load %arg31[%c5_463, %c0_464, %c0_465] : memref<9x64x32xf32, #tpu.memory_space<vmem>>, vector<1x64x32xf32>
    %447 = vector.shape_cast %446 : vector<1x64x32xf32> to vector<64x32xf32>
    %cst_466 = arith.constant dense<0.000000e+00> : vector<32x32xf32>
    %448 = tpu.matmul %411, %447, %cst_466 {dimension_numbers = #tpu.dot_dimension_numbers<[1], [0], [0], [1], [0, 0, 1, 1], [], []>} : vector<32x64xf32>, vector<64x32xf32>, vector<32x32xf32> -> vector<32x32xf32>
    %c5_467 = arith.constant 5 : index
    %c0_468 = arith.constant 0 : index
    %c0_469 = arith.constant 0 : index
    %449 = vector.load %arg4[%c5_467, %c0_468, %c0_469] : memref<9x32x32xf32, #tpu.memory_space<vmem>>, vector<1x32x32xf32>
    %450 = vector.shape_cast %449 : vector<1x32x32xf32> to vector<32x32xf32>
    %cst_470 = arith.constant dense<0.000000e+00> : vector<32x32xf32>
    %451 = tpu.matmul %450, %448, %cst_470 {dimension_numbers = #tpu.dot_dimension_numbers<[1], [0], [0], [1], [0, 0, 1, 1], [], []>} : vector<32x32xf32>, vector<32x32xf32>, vector<32x32xf32> -> vector<32x32xf32>
    %452 = arith.addf %445, %451 : vector<32x32xf32>
    %c6_471 = arith.constant 6 : index
    %c0_472 = arith.constant 0 : index
    %c0_473 = arith.constant 0 : index
    %453 = vector.load %arg31[%c6_471, %c0_472, %c0_473] : memref<9x64x32xf32, #tpu.memory_space<vmem>>, vector<1x64x32xf32>
    %454 = vector.shape_cast %453 : vector<1x64x32xf32> to vector<64x32xf32>
    %cst_474 = arith.constant dense<0.000000e+00> : vector<32x32xf32>
    %455 = tpu.matmul %411, %454, %cst_474 {dimension_numbers = #tpu.dot_dimension_numbers<[1], [0], [0], [1], [0, 0, 1, 1], [], []>} : vector<32x64xf32>, vector<64x32xf32>, vector<32x32xf32> -> vector<32x32xf32>
    %c6_475 = arith.constant 6 : index
    %c0_476 = arith.constant 0 : index
    %c0_477 = arith.constant 0 : index
    %456 = vector.load %arg4[%c6_475, %c0_476, %c0_477] : memref<9x32x32xf32, #tpu.memory_space<vmem>>, vector<1x32x32xf32>
    %457 = vector.shape_cast %456 : vector<1x32x32xf32> to vector<32x32xf32>
    %cst_478 = arith.constant dense<0.000000e+00> : vector<32x32xf32>
    %458 = tpu.matmul %457, %455, %cst_478 {dimension_numbers = #tpu.dot_dimension_numbers<[1], [0], [0], [1], [0, 0, 1, 1], [], []>} : vector<32x32xf32>, vector<32x32xf32>, vector<32x32xf32> -> vector<32x32xf32>
    %459 = arith.addf %452, %458 : vector<32x32xf32>
    %c7_479 = arith.constant 7 : index
    %c0_480 = arith.constant 0 : index
    %c0_481 = arith.constant 0 : index
    %460 = vector.load %arg31[%c7_479, %c0_480, %c0_481] : memref<9x64x32xf32, #tpu.memory_space<vmem>>, vector<1x64x32xf32>
    %461 = vector.shape_cast %460 : vector<1x64x32xf32> to vector<64x32xf32>
    %cst_482 = arith.constant dense<0.000000e+00> : vector<32x32xf32>
    %462 = tpu.matmul %411, %461, %cst_482 {dimension_numbers = #tpu.dot_dimension_numbers<[1], [0], [0], [1], [0, 0, 1, 1], [], []>} : vector<32x64xf32>, vector<64x32xf32>, vector<32x32xf32> -> vector<32x32xf32>
    %c7_483 = arith.constant 7 : index
    %c0_484 = arith.constant 0 : index
    %c0_485 = arith.constant 0 : index
    %463 = vector.load %arg4[%c7_483, %c0_484, %c0_485] : memref<9x32x32xf32, #tpu.memory_space<vmem>>, vector<1x32x32xf32>
    %464 = vector.shape_cast %463 : vector<1x32x32xf32> to vector<32x32xf32>
    %cst_486 = arith.constant dense<0.000000e+00> : vector<32x32xf32>
    %465 = tpu.matmul %464, %462, %cst_486 {dimension_numbers = #tpu.dot_dimension_numbers<[1], [0], [0], [1], [0, 0, 1, 1], [], []>} : vector<32x32xf32>, vector<32x32xf32>, vector<32x32xf32> -> vector<32x32xf32>
    %466 = arith.addf %459, %465 : vector<32x32xf32>
    %c8_487 = arith.constant 8 : index
    %c0_488 = arith.constant 0 : index
    %c0_489 = arith.constant 0 : index
    %467 = vector.load %arg31[%c8_487, %c0_488, %c0_489] : memref<9x64x32xf32, #tpu.memory_space<vmem>>, vector<1x64x32xf32>
    %468 = vector.shape_cast %467 : vector<1x64x32xf32> to vector<64x32xf32>
    %cst_490 = arith.constant dense<0.000000e+00> : vector<32x32xf32>
    %469 = tpu.matmul %411, %468, %cst_490 {dimension_numbers = #tpu.dot_dimension_numbers<[1], [0], [0], [1], [0, 0, 1, 1], [], []>} : vector<32x64xf32>, vector<64x32xf32>, vector<32x32xf32> -> vector<32x32xf32>
    %c8_491 = arith.constant 8 : index
    %c0_492 = arith.constant 0 : index
    %c0_493 = arith.constant 0 : index
    %470 = vector.load %arg4[%c8_491, %c0_492, %c0_493] : memref<9x32x32xf32, #tpu.memory_space<vmem>>, vector<1x32x32xf32>
    %471 = vector.shape_cast %470 : vector<1x32x32xf32> to vector<32x32xf32>
    %cst_494 = arith.constant dense<0.000000e+00> : vector<32x32xf32>
    %472 = tpu.matmul %471, %469, %cst_494 {dimension_numbers = #tpu.dot_dimension_numbers<[1], [0], [0], [1], [0, 0, 1, 1], [], []>} : vector<32x32xf32>, vector<32x32xf32>, vector<32x32xf32> -> vector<32x32xf32>
    %473 = arith.addf %466, %472 : vector<32x32xf32>
    %c0_495 = arith.constant 0 : index
    %c0_496 = arith.constant 0 : index
    %474 = vector.load %arg32[%c0_495, %c0_496] : memref<1x32xf32, #tpu.memory_space<vmem>>, vector<1x32xf32>
    %475 = vector.broadcast %474 : vector<1x32xf32> to vector<32x32xf32>
    %476 = arith.addf %473, %475 : vector<32x32xf32>
    %cst_497 = arith.constant 0.000000e+00 : f32
    %477 = vector.broadcast %cst_497 : f32 to vector<32x32xf32>
    %478 = arith.maximumf %476, %477 : vector<32x32xf32>
    %c0_498 = arith.constant 0 : index
    %c0_499 = arith.constant 0 : index
    %479 = vector.load %arg12[%c0_498, %c0_499] : memref<128x32xf32, #tpu.memory_space<vmem>>, vector<128x32xf32>
    %cst_500 = arith.constant dense<0.000000e+00> : vector<128x32xf32>
    %480 = tpu.matmul %479, %478, %cst_500 {dimension_numbers = #tpu.dot_dimension_numbers<[1], [0], [0], [1], [0, 0, 1, 1], [], []>} : vector<128x32xf32>, vector<32x32xf32>, vector<128x32xf32> -> vector<128x32xf32>
    %c0_501 = arith.constant 0 : index
    %c0_502 = arith.constant 0 : index
    %c0_503 = arith.constant 0 : index
    %481 = vector.load %arg33[%c0_501, %c0_502, %c0_503] : memref<9x32x2xf32, #tpu.memory_space<vmem>>, vector<1x32x2xf32>
    %482 = vector.shape_cast %481 : vector<1x32x2xf32> to vector<32x2xf32>
    %cst_504 = arith.constant dense<0.000000e+00> : vector<128x2xf32>
    %483 = tpu.matmul %480, %482, %cst_504 {dimension_numbers = #tpu.dot_dimension_numbers<[1], [0], [0], [1], [0, 0, 1, 1], [], []>} : vector<128x32xf32>, vector<32x2xf32>, vector<128x2xf32> -> vector<128x2xf32>
    %c0_505 = arith.constant 0 : index
    %c0_506 = arith.constant 0 : index
    %c0_507 = arith.constant 0 : index
    %484 = vector.load %arg3[%c0_505, %c0_506, %c0_507] : memref<9x128x128xf32, #tpu.memory_space<vmem>>, vector<1x128x128xf32>
    %485 = vector.shape_cast %484 : vector<1x128x128xf32> to vector<128x128xf32>
    %cst_508 = arith.constant dense<0.000000e+00> : vector<128x2xf32>
    %486 = tpu.matmul %485, %483, %cst_508 {dimension_numbers = #tpu.dot_dimension_numbers<[1], [0], [0], [1], [0, 0, 1, 1], [], []>} : vector<128x128xf32>, vector<128x2xf32>, vector<128x2xf32> -> vector<128x2xf32>
    %c1_509 = arith.constant 1 : index
    %c0_510 = arith.constant 0 : index
    %c0_511 = arith.constant 0 : index
    %487 = vector.load %arg33[%c1_509, %c0_510, %c0_511] : memref<9x32x2xf32, #tpu.memory_space<vmem>>, vector<1x32x2xf32>
    %488 = vector.shape_cast %487 : vector<1x32x2xf32> to vector<32x2xf32>
    %cst_512 = arith.constant dense<0.000000e+00> : vector<128x2xf32>
    %489 = tpu.matmul %480, %488, %cst_512 {dimension_numbers = #tpu.dot_dimension_numbers<[1], [0], [0], [1], [0, 0, 1, 1], [], []>} : vector<128x32xf32>, vector<32x2xf32>, vector<128x2xf32> -> vector<128x2xf32>
    %c1_513 = arith.constant 1 : index
    %c0_514 = arith.constant 0 : index
    %c0_515 = arith.constant 0 : index
    %490 = vector.load %arg3[%c1_513, %c0_514, %c0_515] : memref<9x128x128xf32, #tpu.memory_space<vmem>>, vector<1x128x128xf32>
    %491 = vector.shape_cast %490 : vector<1x128x128xf32> to vector<128x128xf32>
    %cst_516 = arith.constant dense<0.000000e+00> : vector<128x2xf32>
    %492 = tpu.matmul %491, %489, %cst_516 {dimension_numbers = #tpu.dot_dimension_numbers<[1], [0], [0], [1], [0, 0, 1, 1], [], []>} : vector<128x128xf32>, vector<128x2xf32>, vector<128x2xf32> -> vector<128x2xf32>
    %493 = arith.addf %486, %492 : vector<128x2xf32>
    %c2_517 = arith.constant 2 : index
    %c0_518 = arith.constant 0 : index
    %c0_519 = arith.constant 0 : index
    %494 = vector.load %arg33[%c2_517, %c0_518, %c0_519] : memref<9x32x2xf32, #tpu.memory_space<vmem>>, vector<1x32x2xf32>
    %495 = vector.shape_cast %494 : vector<1x32x2xf32> to vector<32x2xf32>
    %cst_520 = arith.constant dense<0.000000e+00> : vector<128x2xf32>
    %496 = tpu.matmul %480, %495, %cst_520 {dimension_numbers = #tpu.dot_dimension_numbers<[1], [0], [0], [1], [0, 0, 1, 1], [], []>} : vector<128x32xf32>, vector<32x2xf32>, vector<128x2xf32> -> vector<128x2xf32>
    %c2_521 = arith.constant 2 : index
    %c0_522 = arith.constant 0 : index
    %c0_523 = arith.constant 0 : index
    %497 = vector.load %arg3[%c2_521, %c0_522, %c0_523] : memref<9x128x128xf32, #tpu.memory_space<vmem>>, vector<1x128x128xf32>
    %498 = vector.shape_cast %497 : vector<1x128x128xf32> to vector<128x128xf32>
    %cst_524 = arith.constant dense<0.000000e+00> : vector<128x2xf32>
    %499 = tpu.matmul %498, %496, %cst_524 {dimension_numbers = #tpu.dot_dimension_numbers<[1], [0], [0], [1], [0, 0, 1, 1], [], []>} : vector<128x128xf32>, vector<128x2xf32>, vector<128x2xf32> -> vector<128x2xf32>
    %500 = arith.addf %493, %499 : vector<128x2xf32>
    %c3_525 = arith.constant 3 : index
    %c0_526 = arith.constant 0 : index
    %c0_527 = arith.constant 0 : index
    %501 = vector.load %arg33[%c3_525, %c0_526, %c0_527] : memref<9x32x2xf32, #tpu.memory_space<vmem>>, vector<1x32x2xf32>
    %502 = vector.shape_cast %501 : vector<1x32x2xf32> to vector<32x2xf32>
    %cst_528 = arith.constant dense<0.000000e+00> : vector<128x2xf32>
    %503 = tpu.matmul %480, %502, %cst_528 {dimension_numbers = #tpu.dot_dimension_numbers<[1], [0], [0], [1], [0, 0, 1, 1], [], []>} : vector<128x32xf32>, vector<32x2xf32>, vector<128x2xf32> -> vector<128x2xf32>
    %c3_529 = arith.constant 3 : index
    %c0_530 = arith.constant 0 : index
    %c0_531 = arith.constant 0 : index
    %504 = vector.load %arg3[%c3_529, %c0_530, %c0_531] : memref<9x128x128xf32, #tpu.memory_space<vmem>>, vector<1x128x128xf32>
    %505 = vector.shape_cast %504 : vector<1x128x128xf32> to vector<128x128xf32>
    %cst_532 = arith.constant dense<0.000000e+00> : vector<128x2xf32>
    %506 = tpu.matmul %505, %503, %cst_532 {dimension_numbers = #tpu.dot_dimension_numbers<[1], [0], [0], [1], [0, 0, 1, 1], [], []>} : vector<128x128xf32>, vector<128x2xf32>, vector<128x2xf32> -> vector<128x2xf32>
    %507 = arith.addf %500, %506 : vector<128x2xf32>
    %c4_533 = arith.constant 4 : index
    %c0_534 = arith.constant 0 : index
    %c0_535 = arith.constant 0 : index
    %508 = vector.load %arg33[%c4_533, %c0_534, %c0_535] : memref<9x32x2xf32, #tpu.memory_space<vmem>>, vector<1x32x2xf32>
    %509 = vector.shape_cast %508 : vector<1x32x2xf32> to vector<32x2xf32>
    %cst_536 = arith.constant dense<0.000000e+00> : vector<128x2xf32>
    %510 = tpu.matmul %480, %509, %cst_536 {dimension_numbers = #tpu.dot_dimension_numbers<[1], [0], [0], [1], [0, 0, 1, 1], [], []>} : vector<128x32xf32>, vector<32x2xf32>, vector<128x2xf32> -> vector<128x2xf32>
    %c4_537 = arith.constant 4 : index
    %c0_538 = arith.constant 0 : index
    %c0_539 = arith.constant 0 : index
    %511 = vector.load %arg3[%c4_537, %c0_538, %c0_539] : memref<9x128x128xf32, #tpu.memory_space<vmem>>, vector<1x128x128xf32>
    %512 = vector.shape_cast %511 : vector<1x128x128xf32> to vector<128x128xf32>
    %cst_540 = arith.constant dense<0.000000e+00> : vector<128x2xf32>
    %513 = tpu.matmul %512, %510, %cst_540 {dimension_numbers = #tpu.dot_dimension_numbers<[1], [0], [0], [1], [0, 0, 1, 1], [], []>} : vector<128x128xf32>, vector<128x2xf32>, vector<128x2xf32> -> vector<128x2xf32>
    %514 = arith.addf %507, %513 : vector<128x2xf32>
    %c5_541 = arith.constant 5 : index
    %c0_542 = arith.constant 0 : index
    %c0_543 = arith.constant 0 : index
    %515 = vector.load %arg33[%c5_541, %c0_542, %c0_543] : memref<9x32x2xf32, #tpu.memory_space<vmem>>, vector<1x32x2xf32>
    %516 = vector.shape_cast %515 : vector<1x32x2xf32> to vector<32x2xf32>
    %cst_544 = arith.constant dense<0.000000e+00> : vector<128x2xf32>
    %517 = tpu.matmul %480, %516, %cst_544 {dimension_numbers = #tpu.dot_dimension_numbers<[1], [0], [0], [1], [0, 0, 1, 1], [], []>} : vector<128x32xf32>, vector<32x2xf32>, vector<128x2xf32> -> vector<128x2xf32>
    %c5_545 = arith.constant 5 : index
    %c0_546 = arith.constant 0 : index
    %c0_547 = arith.constant 0 : index
    %518 = vector.load %arg3[%c5_545, %c0_546, %c0_547] : memref<9x128x128xf32, #tpu.memory_space<vmem>>, vector<1x128x128xf32>
    %519 = vector.shape_cast %518 : vector<1x128x128xf32> to vector<128x128xf32>
    %cst_548 = arith.constant dense<0.000000e+00> : vector<128x2xf32>
    %520 = tpu.matmul %519, %517, %cst_548 {dimension_numbers = #tpu.dot_dimension_numbers<[1], [0], [0], [1], [0, 0, 1, 1], [], []>} : vector<128x128xf32>, vector<128x2xf32>, vector<128x2xf32> -> vector<128x2xf32>
    %521 = arith.addf %514, %520 : vector<128x2xf32>
    %c6_549 = arith.constant 6 : index
    %c0_550 = arith.constant 0 : index
    %c0_551 = arith.constant 0 : index
    %522 = vector.load %arg33[%c6_549, %c0_550, %c0_551] : memref<9x32x2xf32, #tpu.memory_space<vmem>>, vector<1x32x2xf32>
    %523 = vector.shape_cast %522 : vector<1x32x2xf32> to vector<32x2xf32>
    %cst_552 = arith.constant dense<0.000000e+00> : vector<128x2xf32>
    %524 = tpu.matmul %480, %523, %cst_552 {dimension_numbers = #tpu.dot_dimension_numbers<[1], [0], [0], [1], [0, 0, 1, 1], [], []>} : vector<128x32xf32>, vector<32x2xf32>, vector<128x2xf32> -> vector<128x2xf32>
    %c6_553 = arith.constant 6 : index
    %c0_554 = arith.constant 0 : index
    %c0_555 = arith.constant 0 : index
    %525 = vector.load %arg3[%c6_553, %c0_554, %c0_555] : memref<9x128x128xf32, #tpu.memory_space<vmem>>, vector<1x128x128xf32>
    %526 = vector.shape_cast %525 : vector<1x128x128xf32> to vector<128x128xf32>
    %cst_556 = arith.constant dense<0.000000e+00> : vector<128x2xf32>
    %527 = tpu.matmul %526, %524, %cst_556 {dimension_numbers = #tpu.dot_dimension_numbers<[1], [0], [0], [1], [0, 0, 1, 1], [], []>} : vector<128x128xf32>, vector<128x2xf32>, vector<128x2xf32> -> vector<128x2xf32>
    %528 = arith.addf %521, %527 : vector<128x2xf32>
    %c7_557 = arith.constant 7 : index
    %c0_558 = arith.constant 0 : index
    %c0_559 = arith.constant 0 : index
    %529 = vector.load %arg33[%c7_557, %c0_558, %c0_559] : memref<9x32x2xf32, #tpu.memory_space<vmem>>, vector<1x32x2xf32>
    %530 = vector.shape_cast %529 : vector<1x32x2xf32> to vector<32x2xf32>
    %cst_560 = arith.constant dense<0.000000e+00> : vector<128x2xf32>
    %531 = tpu.matmul %480, %530, %cst_560 {dimension_numbers = #tpu.dot_dimension_numbers<[1], [0], [0], [1], [0, 0, 1, 1], [], []>} : vector<128x32xf32>, vector<32x2xf32>, vector<128x2xf32> -> vector<128x2xf32>
    %c7_561 = arith.constant 7 : index
    %c0_562 = arith.constant 0 : index
    %c0_563 = arith.constant 0 : index
    %532 = vector.load %arg3[%c7_561, %c0_562, %c0_563] : memref<9x128x128xf32, #tpu.memory_space<vmem>>, vector<1x128x128xf32>
    %533 = vector.shape_cast %532 : vector<1x128x128xf32> to vector<128x128xf32>
    %cst_564 = arith.constant dense<0.000000e+00> : vector<128x2xf32>
    %534 = tpu.matmul %533, %531, %cst_564 {dimension_numbers = #tpu.dot_dimension_numbers<[1], [0], [0], [1], [0, 0, 1, 1], [], []>} : vector<128x128xf32>, vector<128x2xf32>, vector<128x2xf32> -> vector<128x2xf32>
    %535 = arith.addf %528, %534 : vector<128x2xf32>
    %c8_565 = arith.constant 8 : index
    %c0_566 = arith.constant 0 : index
    %c0_567 = arith.constant 0 : index
    %536 = vector.load %arg33[%c8_565, %c0_566, %c0_567] : memref<9x32x2xf32, #tpu.memory_space<vmem>>, vector<1x32x2xf32>
    %537 = vector.shape_cast %536 : vector<1x32x2xf32> to vector<32x2xf32>
    %cst_568 = arith.constant dense<0.000000e+00> : vector<128x2xf32>
    %538 = tpu.matmul %480, %537, %cst_568 {dimension_numbers = #tpu.dot_dimension_numbers<[1], [0], [0], [1], [0, 0, 1, 1], [], []>} : vector<128x32xf32>, vector<32x2xf32>, vector<128x2xf32> -> vector<128x2xf32>
    %c8_569 = arith.constant 8 : index
    %c0_570 = arith.constant 0 : index
    %c0_571 = arith.constant 0 : index
    %539 = vector.load %arg3[%c8_569, %c0_570, %c0_571] : memref<9x128x128xf32, #tpu.memory_space<vmem>>, vector<1x128x128xf32>
    %540 = vector.shape_cast %539 : vector<1x128x128xf32> to vector<128x128xf32>
    %cst_572 = arith.constant dense<0.000000e+00> : vector<128x2xf32>
    %541 = tpu.matmul %540, %538, %cst_572 {dimension_numbers = #tpu.dot_dimension_numbers<[1], [0], [0], [1], [0, 0, 1, 1], [], []>} : vector<128x128xf32>, vector<128x2xf32>, vector<128x2xf32> -> vector<128x2xf32>
    %542 = arith.addf %535, %541 : vector<128x2xf32>
    %c0_573 = arith.constant 0 : index
    %c0_574 = arith.constant 0 : index
    %543 = vector.load %arg34[%c0_573, %c0_574] : memref<1x2xf32, #tpu.memory_space<vmem>>, vector<1x2xf32>
    %544 = vector.broadcast %543 : vector<1x2xf32> to vector<128x2xf32>
    %545 = arith.addf %542, %544 : vector<128x2xf32>
    %c0_575 = arith.constant 0 : index
    %c0_576 = arith.constant 0 : index
    %c0_577 = arith.constant 0 : index
    %546 = vector.load %arg35[%c0_575, %c0_576, %c0_577] : memref<1x128x2xf32, #tpu.memory_space<vmem>>, vector<1x128x2xf32>
    %547 = vector.shape_cast %546 : vector<1x128x2xf32> to vector<128x2xf32>
    %548 = vector.shape_cast %545 : vector<128x2xf32> to vector<1x128x2xf32>
    tpu.vector_store %arg35[%c0_575, %c0_576, %c0_577], %548 {strides = array<i32>} : memref<1x128x2xf32, #tpu.memory_space<vmem>>, vector<1x128x2xf32>,
    return
  }
  func.func @transform_0(%arg0: i32) -> (i32, i32, i32) {
    %c0_i32 = arith.constant 0 : i32
    %c0_i32_0 = arith.constant 0 : i32
    %c0_i32_1 = arith.constant 0 : i32
    return %arg0, %c0_i32, %c0_i32_0 : i32, i32, i32
  }
  func.func @transform_1(%arg0: i32) -> (i32, i32, i32) {
    %c0_i32 = arith.constant 0 : i32
    %c0_i32_0 = arith.constant 0 : i32
    %c0_i32_1 = arith.constant 0 : i32
    return %arg0, %c0_i32, %c0_i32_0 : i32, i32, i32
  }
  func.func @transform_2(%arg0: i32) -> (i32, i32, i32) {
    %c0_i32 = arith.constant 0 : i32
    %c0_i32_0 = arith.constant 0 : i32
    %c0_i32_1 = arith.constant 0 : i32
    %c0_i32_2 = arith.constant 0 : i32
    return %c0_i32, %c0_i32_0, %c0_i32_1 : i32, i32, i32
  }
  func.func @transform_3(%arg0: i32) -> (i32, i32, i32) {
    %c0_i32 = arith.constant 0 : i32
    %c0_i32_0 = arith.constant 0 : i32
    %c0_i32_1 = arith.constant 0 : i32
    %c0_i32_2 = arith.constant 0 : i32
    return %c0_i32, %c0_i32_0, %c0_i32_1 : i32, i32, i32
  }
  func.func @transform_4(%arg0: i32) -> (i32, i32, i32) {
    %c0_i32 = arith.constant 0 : i32
    %c0_i32_0 = arith.constant 0 : i32
    %c0_i32_1 = arith.constant 0 : i32
    %c0_i32_2 = arith.constant 0 : i32
    return %c0_i32, %c0_i32_0, %c0_i32_1 : i32, i32, i32
  }
  func.func @transform_5(%arg0: i32) -> (i32, i32, i32) {
    %c0_i32 = arith.constant 0 : i32
    %c0_i32_0 = arith.constant 0 : i32
    %c0_i32_1 = arith.constant 0 : i32
    %c0_i32_2 = arith.constant 0 : i32
    return %c0_i32, %c0_i32_0, %c0_i32_1 : i32, i32, i32
  }
  func.func @transform_6(%arg0: i32) -> (i32, i32, i32) {
    %c0_i32 = arith.constant 0 : i32
    %c0_i32_0 = arith.constant 0 : i32
    %c0_i32_1 = arith.constant 0 : i32
    %c0_i32_2 = arith.constant 0 : i32
    return %c0_i32, %c0_i32_0, %c0_i32_1 : i32, i32, i32
  }
  func.func @transform_7(%arg0: i32) -> (i32, i32, i32) {
    %c0_i32 = arith.constant 0 : i32
    %c0_i32_0 = arith.constant 0 : i32
    %c0_i32_1 = arith.constant 0 : i32
    %c0_i32_2 = arith.constant 0 : i32
    return %c0_i32, %c0_i32_0, %c0_i32_1 : i32, i32, i32
  }
  func.func @transform_8(%arg0: i32) -> (i32, i32, i32) {
    %c0_i32 = arith.constant 0 : i32
    %c0_i32_0 = arith.constant 0 : i32
    %c0_i32_1 = arith.constant 0 : i32
    %c0_i32_2 = arith.constant 0 : i32
    return %c0_i32, %c0_i32_0, %c0_i32_1 : i32, i32, i32
  }
  func.func @transform_9(%arg0: i32) -> (i32, i32) {
    %c0_i32 = arith.constant 0 : i32
    %c0_i32_0 = arith.constant 0 : i32
    %c0_i32_1 = arith.constant 0 : i32
    return %c0_i32, %c0_i32_0 : i32, i32
  }
  func.func @transform_10(%arg0: i32) -> (i32, i32) {
    %c0_i32 = arith.constant 0 : i32
    %c0_i32_0 = arith.constant 0 : i32
    %c0_i32_1 = arith.constant 0 : i32
    return %c0_i32, %c0_i32_0 : i32, i32
  }
  func.func @transform_11(%arg0: i32) -> (i32, i32) {
    %c0_i32 = arith.constant 0 : i32
    %c0_i32_0 = arith.constant 0 : i32
    %c0_i32_1 = arith.constant 0 : i32
    return %c0_i32, %c0_i32_0 : i32, i32
  }
  func.func @transform_12(%arg0: i32) -> (i32, i32, i32) {
    %c0_i32 = arith.constant 0 : i32
    %c0_i32_0 = arith.constant 0 : i32
    %c0_i32_1 = arith.constant 0 : i32
    %c0_i32_2 = arith.constant 0 : i32
    return %c0_i32, %c0_i32_0, %c0_i32_1 : i32, i32, i32
  }
  func.func @transform_13(%arg0: i32) -> (i32, i32) {
    %c0_i32 = arith.constant 0 : i32
    %c0_i32_0 = arith.constant 0 : i32
    %c0_i32_1 = arith.constant 0 : i32
    return %c0_i32, %c0_i32_0 : i32, i32
  }
  func.func @transform_14(%arg0: i32) -> (i32, i32, i32) {
    %c0_i32 = arith.constant 0 : i32
    %c0_i32_0 = arith.constant 0 : i32
    %c0_i32_1 = arith.constant 0 : i32
    %c0_i32_2 = arith.constant 0 : i32
    return %c0_i32, %c0_i32_0, %c0_i32_1 : i32, i32, i32
  }
  func.func @transform_15(%arg0: i32) -> (i32, i32) {
    %c0_i32 = arith.constant 0 : i32
    %c0_i32_0 = arith.constant 0 : i32
    %c0_i32_1 = arith.constant 0 : i32
    return %c0_i32, %c0_i32_0 : i32, i32
  }
  func.func @transform_16(%arg0: i32) -> (i32, i32, i32) {
    %c0_i32 = arith.constant 0 : i32
    %c0_i32_0 = arith.constant 0 : i32
    %c0_i32_1 = arith.constant 0 : i32
    %c0_i32_2 = arith.constant 0 : i32
    return %c0_i32, %c0_i32_0, %c0_i32_1 : i32, i32, i32
  }
  func.func @transform_17(%arg0: i32) -> (i32, i32) {
    %c0_i32 = arith.constant 0 : i32
    %c0_i32_0 = arith.constant 0 : i32
    %c0_i32_1 = arith.constant 0 : i32
    return %c0_i32, %c0_i32_0 : i32, i32
  }
  func.func @transform_18(%arg0: i32) -> (i32, i32, i32) {
    %c0_i32 = arith.constant 0 : i32
    %c0_i32_0 = arith.constant 0 : i32
    %c0_i32_1 = arith.constant 0 : i32
    %c0_i32_2 = arith.constant 0 : i32
    return %c0_i32, %c0_i32_0, %c0_i32_1 : i32, i32, i32
  }
  func.func @transform_19(%arg0: i32) -> (i32, i32) {
    %c0_i32 = arith.constant 0 : i32
    %c0_i32_0 = arith.constant 0 : i32
    %c0_i32_1 = arith.constant 0 : i32
    return %c0_i32, %c0_i32_0 : i32, i32
  }
  func.func @transform_20(%arg0: i32) -> (i32, i32) {
    %c0_i32 = arith.constant 0 : i32
    %c0_i32_0 = arith.constant 0 : i32
    %c0_i32_1 = arith.constant 0 : i32
    return %c0_i32, %c0_i32_0 : i32, i32
  }
  func.func @transform_21(%arg0: i32) -> (i32, i32) {
    %c0_i32 = arith.constant 0 : i32
    %c0_i32_0 = arith.constant 0 : i32
    %c0_i32_1 = arith.constant 0 : i32
    return %c0_i32, %c0_i32_0 : i32, i32
  }
  func.func @transform_22(%arg0: i32) -> (i32, i32) {
    %c0_i32 = arith.constant 0 : i32
    %c0_i32_0 = arith.constant 0 : i32
    %c0_i32_1 = arith.constant 0 : i32
    return %c0_i32, %c0_i32_0 : i32, i32
  }
  func.func @transform_23(%arg0: i32) -> (i32, i32) {
    %c0_i32 = arith.constant 0 : i32
    %c0_i32_0 = arith.constant 0 : i32
    %c0_i32_1 = arith.constant 0 : i32
    return %c0_i32, %c0_i32_0 : i32, i32
  }
  func.func @transform_24(%arg0: i32) -> (i32, i32, i32) {
    %c0_i32 = arith.constant 0 : i32
    %c0_i32_0 = arith.constant 0 : i32
    %c0_i32_1 = arith.constant 0 : i32
    %c0_i32_2 = arith.constant 0 : i32
    return %c0_i32, %c0_i32_0, %c0_i32_1 : i32, i32, i32
  }
  func.func @transform_25(%arg0: i32) -> (i32, i32) {
    %c0_i32 = arith.constant 0 : i32
    %c0_i32_0 = arith.constant 0 : i32
    %c0_i32_1 = arith.constant 0 : i32
    return %c0_i32, %c0_i32_0 : i32, i32
  }
  func.func @transform_26(%arg0: i32) -> (i32, i32, i32) {
    %c0_i32 = arith.constant 0 : i32
    %c0_i32_0 = arith.constant 0 : i32
    %c0_i32_1 = arith.constant 0 : i32
    %c0_i32_2 = arith.constant 0 : i32
    return %c0_i32, %c0_i32_0, %c0_i32_1 : i32, i32, i32
  }
  func.func @transform_27(%arg0: i32) -> (i32, i32) {
    %c0_i32 = arith.constant 0 : i32
    %c0_i32_0 = arith.constant 0 : i32
    %c0_i32_1 = arith.constant 0 : i32
    return %c0_i32, %c0_i32_0 : i32, i32
  }
  func.func @transform_28(%arg0: i32) -> (i32, i32, i32) {
    %c0_i32 = arith.constant 0 : i32
    %c0_i32_0 = arith.constant 0 : i32
    %c0_i32_1 = arith.constant 0 : i32
    %c0_i32_2 = arith.constant 0 : i32
    return %c0_i32, %c0_i32_0, %c0_i32_1 : i32, i32, i32
  }
  func.func @transform_29(%arg0: i32) -> (i32, i32) {
    %c0_i32 = arith.constant 0 : i32
    %c0_i32_0 = arith.constant 0 : i32
    %c0_i32_1 = arith.constant 0 : i32
    return %c0_i32, %c0_i32_0 : i32, i32
  }
  func.func @transform_30(%arg0: i32) -> (i32, i32, i32) {
    %c0_i32 = arith.constant 0 : i32
    %c0_i32_0 = arith.constant 0 : i32
    %c0_i32_1 = arith.constant 0 : i32
    %c0_i32_2 = arith.constant 0 : i32
    return %c0_i32, %c0_i32_0, %c0_i32_1 : i32, i32, i32
  }
  func.func @transform_31(%arg0: i32) -> (i32, i32) {
    %c0_i32 = arith.constant 0 : i32
    %c0_i32_0 = arith.constant 0 : i32
    %c0_i32_1 = arith.constant 0 : i32
    return %c0_i32, %c0_i32_0 : i32, i32
  }
  func.func @transform_32(%arg0: i32) -> (i32, i32, i32) {
    %c0_i32 = arith.constant 0 : i32
    %c0_i32_0 = arith.constant 0 : i32
    %c0_i32_1 = arith.constant 0 : i32
    %c0_i32_2 = arith.constant 0 : i32
    return %c0_i32, %c0_i32_0, %c0_i32_1 : i32, i32, i32
  }
  func.func @transform_33(%arg0: i32) -> (i32, i32) {
    %c0_i32 = arith.constant 0 : i32
    %c0_i32_0 = arith.constant 0 : i32
    %c0_i32_1 = arith.constant 0 : i32
    return %c0_i32, %c0_i32_0 : i32, i32
  }
  func.func @transform_34(%arg0: i32) -> (i32, i32, i32) {
    %c0_i32 = arith.constant 0 : i32
    %c0_i32_0 = arith.constant 0 : i32
    %c0_i32_1 = arith.constant 0 : i32
    return %arg0, %c0_i32, %c0_i32_0 : i32, i32, i32
  }
  func.func @transform_35(%arg0: i32) -> (i32, i32, i32) {
    %c0_i32 = arith.constant 0 : i32
    %c0_i32_0 = arith.constant 0 : i32
    %c0_i32_1 = arith.constant 0 : i32
    return %arg0, %c0_i32, %c0_i32_0 : i32, i32, i32
  }
  func.func @transform_36(%arg0: i32) -> (i32, i32, i32) {
    %c0_i32 = arith.constant 0 : i32
    %c0_i32_0 = arith.constant 0 : i32
    %c0_i32_1 = arith.constant 0 : i32
    return %arg0, %c0_i32, %c0_i32_0 : i32, i32, i32
  }
}

</mosaic_0001>

<bundles_post_ra>
// kernel: stock_vae_forward.1
= control target key start
LH: loop header
LB: loop body
LE: loop exit
PB: predicated region body
PF: predicated region fallthrough
CT: control target
= control target key end

     0   :  { %s10056_s6 = smov 1   ;;  %s10057_s10 = smov 2   ;;  %s13308_s0 = inlined_call_operand.smem [shape: u32[37], index: -1, kind: input, shape index: {}] }
   0x1   :  { %s10101_s5 = sld [smem:[%s13308_s0]]   ;;  %s10058_s14 = smov 3  }
   0x2   :  { %s10106_s9 = sld [smem:[%s13308_s0 + %s10056_s6]]   ;;  %s10059_s18 = smov 4  }
   0x3   :  { %s10111_s13 = sld [smem:[%s13308_s0 + %s10057_s10]]   ;;  %s10060_s22 = smov 5  }
   0x4   :  { %s10116_s17 = sld [smem:[%s13308_s0 + %s10058_s14]]   ;;  %s10061_s26 = smov 6  }
   0x5   :  { %s10121_s21 = sld [smem:[%s13308_s0 + %s10059_s18]]   ;;  %s10062_s30 = smov 7  }
   0x6   :  { %s10126_s25 = sld [smem:[%s13308_s0 + %s10060_s22]]   ;;  %s10063_s4 = smov 8  }
   0x7   :  { %13338 = sst [smem:[#allocation8_spill]] %s10101_s5  ;;  %s10064_s10 = smov 9  }
   0x8   :  { %13339 = sst [smem:[#allocation9_spill]] %s10106_s9  ;;  %s10065_s15 = smov 10  }
   0x9   :  { %13340 = sst [smem:[#allocation10_spill]] %s10111_s13  ;;  %s10066_s20 = smov 11  }
   0xa   :  { %s10131_s29 = sld [smem:[%s13308_s0 + %s10061_s26]]   ;;  %s10067_s26 = smov 12  }
   0xb   :  { %s10136_s3 = sld [smem:[%s13308_s0 + %s10062_s30]]   ;;  %s10068_s1 = smov 13  }
   0xc   :  { %13341 = sst [smem:[#allocation11_spill]] %s10126_s25  ;;  %s10069_s7 = smov 14  }
   0xd   :  { %s10141_s8 = sld [smem:[%s13308_s0 + %s10063_s4]]   ;;  %s10071_s22 = smov 16  }
   0xe   :  { %s10146_s14 = sld [smem:[%s13308_s0 + %s10064_s10]]   ;;  %s10072_s28 = smov 17  }
   0xf   :  { %s10151_s19 = sld [smem:[%s13308_s0 + %s10065_s15]]   ;;  %s10070_s15 = smov 15  }
  0x10   :  { %s10156_s24 = sld [smem:[%s13308_s0 + %s10066_s20]]  }
  0x11   :  { %13342 = sst [smem:[#allocation12_spill]] %s10136_s3 }
  0x12   :  { %s10161_s30 = sld [smem:[%s13308_s0 + %s10067_s26]]  }
  0x13   :  { %13343 = sst [smem:[#allocation13_spill]] %s10141_s8 }
  0x14   :  { %13344 = sst [smem:[#allocation14_spill]] %s10146_s14 }
  0x15   :  { %13345 = sst [smem:[#allocation15_spill]] %s10151_s19 }
  0x16   :  { %13346 = sst [smem:[#allocation16_spill]] %s10156_s24 }
  0x17   :  { %s10166_s6 = sld [smem:[%s13308_s0 + %s10068_s1]]  }
  0x18   :  { %s10171_s12 = sld [smem:[%s13308_s0 + %s10069_s7]]   ;;  %s10073_s7 = smov 18  }
  0x19   :  { %s10176_s20 = sld [smem:[%s13308_s0 + %s10070_s15]]   ;;  %s10074_s15 = smov 19  }
  0x1a   :  { %s10181_s27 = sld [smem:[%s13308_s0 + %s10071_s22]]   ;;  %s10075_s22 = smov 20  }
  0x1b   :  { %s10186_s4 = sld [smem:[%s13308_s0 + %s10072_s28]]   ;;  %s10076_s28 = smov 21  }
  0x1c   :  { %s10191_s24 = sld [smem:[%s13308_s0 + %s10073_s7]]   ;;  %s10077_s7 = smov 22  }
  0x1d   :  { %13347 = sst [smem:[#allocation17_spill]] %s10166_s6 }
  0x1e   :  { %13348 = sst [smem:[#allocation18_spill]] %s10171_s12 }
  0x1f   :  { %s10196_s19 = sld [smem:[%s13308_s0 + %s10074_s15]]   ;;  %s10078_s15 = smov 23  }
  0x20   :  { %s10201_s14 = sld [smem:[%s13308_s0 + %s10075_s22]]   ;;  %s10079_s22 = smov 24  }
  0x21   :  { %13349 = sst [smem:[#allocation19_spill]] %s10186_s4 }
  0x22   :  { %s10206_s25 = sld [smem:[%s13308_s0 + %s10076_s28]]   ;;  %s10080_s28 = smov 25  }
  0x23   :  { %s10211_s9 = sld [smem:[%s13308_s0 + %s10077_s7]]   ;;  %s10081_s7 = smov 26  }
  0x25   :  { %13350 = sst [smem:[#allocation20_spill]] %s10196_s19 }
  0x26   :  { %13351 = sst [smem:[#allocation21_spill]] %s10201_s14 }
  0x27   :  { %s10216_s19 = sld [smem:[%s13308_s0 + %s10078_s15]]   ;;  %s10082_s15 = smov 27  }
  0x28   :  { %13352 = sst [smem:[#allocation22_spill]] %s10206_s25 }
  0x29   :  { %13353 = sst [smem:[#allocation23_spill]] %s10211_s9 }
  0x2a   :  { %s10221_s14 = sld [smem:[%s13308_s0 + %s10079_s22]]   ;;  %s10083_s22 = smov 28  }
  0x2b   :  { %s10226_s25 = sld [smem:[%s13308_s0 + %s10080_s28]]   ;;  %s10084_s28 = smov 29  }
  0x2c   :  { %s10231_s9 = sld [smem:[%s13308_s0 + %s10081_s7]]   ;;  %s10085_s7 = smov 30  }
  0x2d   :  { %13354 = sst [smem:[#allocation24_spill]] %s10216_s19 }
  0x2e   :  { %s10236_s19 = sld [smem:[%s13308_s0 + %s10082_s15]]   ;;  %s10086_s15 = smov 31  }
  0x30   :  { %13355 = sst [smem:[#allocation25_spill]] %s10221_s14 }
  0x31   :  { %13356 = sst [smem:[#allocation26_spill]] %s10226_s25 }
  0x32   :  { %13357 = sst [smem:[#allocation27_spill]] %s10231_s9 }
  0x33   :  { %s10241_s14 = sld [smem:[%s13308_s0 + %s10083_s22]]   ;;  %s10087_s22 = smov 32  }
  0x34   :  { %13358 = sst [smem:[#allocation28_spill]] %s10236_s19 }
  0x35   :  { %s10246_s25 = sld [smem:[%s13308_s0 + %s10084_s28]]   ;;  %s10088_s28 = smov 33  }
  0x36   :  { %s10251_s9 = sld [smem:[%s13308_s0 + %s10085_s7]]   ;;  %s10089_s7 = smov 34  }
  0x37   :  { %s10256_s19 = sld [smem:[%s13308_s0 + %s10086_s15]]   ;;  %s10090_s15 = smov 35  }
  0x39   :  { %13359 = sst [smem:[#allocation29_spill]] %s10241_s14 }
  0x3a   :  { %s10261_s14 = sld [smem:[%s13308_s0 + %s10087_s22]]   ;;  %s10091_s22 = smov 36  }
  0x3b   :  { %13360 = sst [smem:[#allocation30_spill]] %s10246_s25 }
  0x3c   :  { %13361 = sst [smem:[#allocation31_spill]] %s10251_s9 }
  0x3d   :  { %13362 = sst [smem:[#allocation32_spill]] %s10256_s19 }
  0x3e   :  { %s10266_s25 = sld [smem:[%s13308_s0 + %s10088_s28]]  }
  0x3f   :  { %s10271_s9 = sld [smem:[%s13308_s0 + %s10089_s7]]  }
  0x40   :  { %13363 = sst [smem:[#allocation33_spill]] %s10261_s14 }
  0x41   :  { %s10276_s19 = sld [smem:[%s13308_s0 + %s10090_s15]]  }
  0x42   :  { %s10281_s14 = sld [smem:[%s13308_s0 + %s10091_s22]]  }
  0x43   :  { %79 = vsyncpa [#allocation3], 0 }
  0x44   :  { %81 = vsyncpa [#allocation3 + $0x1], 0 }
  0x45   :  { %82 = vsyncpa [#allocation5], 0 }
  0x46   :  { %84 = vsyncpa [#allocation5 + $0x1], 0  ;;  %s10283_s28 = smov 0   ;;  %s10285_s1 = smov 0  }
  0x47   :  { %s10287_s2 = smov 0   ;;  %s10289_s7 = smov 0  }
  0x48 LB: > { %s13364_s13 = sld [smem:[#allocation10_spill]]  ;;  %s10304_s0 = sadd.s32 4294967295, %s10054_s7   ;;  %s10054_s7 = sphi %s10289_s7, %s13490_s7   ;;  %s10050_s2 = sphi %s10287_s2, %s13489_s2   ;;  %s10046_s1 = sphi %s10285_s1, %s13488_s1   ;;  %s10042_s28 = sphi %s10283_s28, %s13487_s28  }
  0x49   : > { %s13365_s12 = sld [smem:[#allocation18_spill]]  ;;  %s8588_s10 = sadd.s32 4294967294, %s10054_s7  }
  0x4a   : > { %s13366_s8 = sld [smem:[#allocation13_spill]]  ;;  %s10308_s11 = sadd.s32 1, %s10054_s7  }
  0x4b   : > { %s13367_s3 = sld [smem:[#allocation12_spill]]  ;;  %s847_s15 = sadd.s32 1, %s10050_s2 }
  0x4c   : > { %s844_s16 = ssub.s32 %s10054_s7, %s10308_s11  ;;  %p857_p0 = scmp.ne.s32.totalorder %s10050_s2, %s10046_s1 }
  0x4d   : > { %p845_p1 = scmp.eq.s32.totalorder %s844_s16, 0  ;;  %p858_p2 = scmp.eq.s32.totalorder %s10304_s0, 1 }
  0x4e   : > { %p863_p3 = scmp.ne.s32.totalorder %s10046_s1, %s10042_s28  ;;  %p864_p4 = scmp.eq.s32.totalorder %s8588_s10, 1 }
  0x4f   : > { %s10319_s18 = scalar_select %p845_p1, %s10050_s2, %s847_s15  }
  0x50   : > { %p10321_p5 = por %p858_p2, %p857_p0  ;;  %p10325_p6 = por %p864_p4, %p863_p3 }
  0x51   : > { %p8591_p7 = scmp.ge.s32.totalorder %s10054_s7, 1  ;;  %p1018_p8 = scmp.lt.s32.totalorder %s10054_s7, 3 }
  0x53   : > { %p1019_p9 = pnand %p8591_p7, %p1018_p8 }
  0x55   : > { %1022 = sbr.rel (%p1019_p9) target bundleno = 6770 (0x1a72), region = 156 }
  0x5a   : > { %s13370_s5 = sld [smem:[#allocation8_spill]]  ;;  %p1119_p10 = scmp.lt.s32.totalorder %s10304_s0, 1  ;;  %v1148_v16 = vld [vmem:[%s13364_s13] sm:$0xff]  ;;  %v1149_v17 = vld [vmem:[%s13364_s13 + $0x8] sm:$0xff]  ;;  %v1150_v18 = vld [vmem:[%s13364_s13 + $0x10] sm:$0xff]  ;;  %vm1363_vm0 = vcmask 1041408  }
  0x5b   : > { %v1151_v19 = vld [vmem:[%s13364_s13 + $0x18] sm:$0xff]  ;;  %v1152_v20 = vld [vmem:[%s13364_s13 + $0x20] sm:$0xff]  ;;  %v1153_v21 = vld [vmem:[%s13364_s13 + $0x28] sm:$0xff]  ;;  %vm1314_vm1 = vcmask 15360   ;;  %s13380_s6 = sld [smem:[#allocation17_spill]]  ;;  %vm3247_vm2 = vcmask 261120  }
  0x5c   : > { %s10333_s26 = scalar_select %p1119_p10, %s10304_s0, 1  ;;  %v1154_v22 = vld [vmem:[%s13364_s13 + $0x30] sm:$0xff]  ;;  %v1155_v23 = vld [vmem:[%s13364_s13 + $0x38] sm:$0xff]  ;;  %v1156_v24 = vld [vmem:[%s13364_s13 + $0x40] sm:$0xff]  ;;  %vm4213_vm3 = vcmask 64512   ;;  %vm4279_vm4 = vcmask 523264  }
  0x5d   : > { %v1157_v25 = vld [vmem:[%s13364_s13 + $0x48] sm:$0xff]  ;;  %v1158_v26 = vld [vmem:[%s13364_s13 + $0x50] sm:$0xff]  ;;  %v1159_v27 = vld [vmem:[%s13364_s13 + $0x58] sm:$0xff]  ;;  %s13390_s4 = sld [smem:[#allocation19_spill]]  ;;  %vm4957_vm5 = vcmask 122880   ;;  %vm4977_vm6 = vcmask 130048  }
  0x5e   : > { %s13320_s10 = sshll.u32 %s10333_s26, 7  ;;  %v1160_v28 = vld [vmem:[%s13364_s13 + $0x60] sm:$0xff]  ;;  %v1161_v29 = vld [vmem:[%s13364_s13 + $0x68] sm:$0xff]  ;;  %v1162_v30 = vld [vmem:[%s13364_s13 + $0x70] sm:$0xff]  ;;  %s13391_s16 = sld [smem:[#allocation21_spill]] }
  0x5f   : > { %v1229_v31 = vld [vmem:[%s10161_s30] sm:$0x3]  ;;  %v8598_v32 = vld [vmem:[%s13364_s13 + $0x90] sm:$0xff]  ;;  %v1163_v33 = vld [vmem:[%s13364_s13 + $0x78] sm:$0xff] }
  0x60   : > { %s10339_s15 = scalar_lea.vmem %s13370_s5, %s13320_s10  ;;  %9869 = vmatpush.msk.msra.mxu3 %vm1363_vm0, %v1229_v31  ;;  %v8599_v34 = vld [vmem:[%s13364_s13 + $0x98] sm:$0xff]  ;;  %v8596_v36 = vld [vmem:[%s13364_s13 + $0x80] sm:$0xff]  ;;  %v8597_v39 = vld [vmem:[%s13364_s13 + $0x88] sm:$0xff]  ;;  %s13393_s10 = sld [smem:[#allocation22_spill]] }
  0x61   : > { %v10342_v0 = vld [vmem:[%s10339_s15 + $0x78] sm:$0xff]  ;;  %v10345_v1 = vld [vmem:[%s10339_s15 + $0x70] sm:$0xff]  ;;  %v10350_v2 = vld [vmem:[%s10339_s15 + $0x68] sm:$0xff]  ;;  %s13395_s5 = sld [smem:[#allocation25_spill]] }
  0x62   : > { %1164 = vmatpush.msra.mxu0 %v10342_v0  ;;  %9853 = vmatpush.msra.mxu1 %v10342_v0  ;;  %v10355_v3 = vld [vmem:[%s10339_s15 + $0x60] sm:$0xff]  ;;  %v10360_v4 = vld [vmem:[%s10339_s15 + $0x58] sm:$0xff]  ;;  %v10365_v5 = vld [vmem:[%s10339_s15 + $0x50] sm:$0xff] }
  0x63   : > { %v10370_v6 = vld [vmem:[%s10339_s15 + $0x48] sm:$0xff]  ;;  %v10375_v7 = vld [vmem:[%s10339_s15 + $0x40] sm:$0xff]  ;;  %v10380_v8 = vld [vmem:[%s10339_s15 + $0x38] sm:$0xff] }
  0x64   : > { %1165 = vmatpush.msra.mxu0 %v10345_v1  ;;  %9854 = vmatpush.msra.mxu1 %v10345_v1  ;;  %v10385_v9 = vld [vmem:[%s10339_s15 + $0x30] sm:$0xff]  ;;  %v10390_v10 = vld [vmem:[%s10339_s15 + $0x28] sm:$0xff]  ;;  %v10395_v11 = vld [vmem:[%s10339_s15 + $0x20] sm:$0xff] }
  0x65   : > { %v10400_v12 = vld [vmem:[%s10339_s15 + $0x18] sm:$0xff]  ;;  %v10405_v13 = vld [vmem:[%s10339_s15 + $0x10] sm:$0xff]  ;;  %v10410_v14 = vld [vmem:[%s10339_s15 + $0x8] sm:$0xff] }
  0x66   : > { %1166 = vmatpush.msra.mxu0 %v10350_v2  ;;  %9855 = vmatpush.msra.mxu1 %v10350_v2  ;;  %v10415_v15 = vld [vmem:[%s10339_s15] sm:$0xff]  ;;  %v8601_v40 = vld [vmem:[%s13364_s13 + $0xa8] sm:$0xff]  ;;  %v8602_v42 = vld [vmem:[%s13364_s13 + $0xb0] sm:$0xff]  ;;  %s13392_s15 = sld [smem:[#allocation20_spill]] }
  0x67   : > { %v8600_v37 = vld [vmem:[%s13364_s13 + $0xa0] sm:$0xff]  ;;  %v8603_v44 = vld [vmem:[%s13364_s13 + $0xb8] sm:$0xff]  ;;  %v8605_v48 = vld [vmem:[%s13364_s13 + $0xc8] sm:$0xff] }
  0x68   : > { %1167 = vmatpush.msra.mxu0 %v10355_v3  ;;  %9856 = vmatpush.msra.mxu1 %v10355_v3  ;;  %v8604_v46 = vld [vmem:[%s13364_s13 + $0xc0] sm:$0xff]  ;;  %v8606_v50 = vld [vmem:[%s13364_s13 + $0xd0] sm:$0xff]  ;;  %v8607_v52 = vld [vmem:[%s13364_s13 + $0xd8] sm:$0xff] }
  0x69   : > { %v8608_v54 = vld [vmem:[%s13364_s13 + $0xe0] sm:$0xff]  ;;  %v8609_v56 = vld [vmem:[%s13364_s13 + $0xe8] sm:$0xff]  ;;  %v8610_v58 = vld [vmem:[%s13364_s13 + $0xf0] sm:$0xff] }
  0x6a   : > { %1168 = vmatpush.msra.mxu0 %v10360_v4  ;;  %9857 = vmatpush.msra.mxu1 %v10360_v4  ;;  %v8611_v60 = vld [vmem:[%s13364_s13 + $0xf8] sm:$0xff]  ;;  %v8612_v61 = vld [vmem:[%s10161_s30 + $0x2] sm:$0x3] }
  0x6b   : > { %8613 = vmatpush.msk.msra.mxu2 %vm1363_vm0, %v8612_v61  ;;  %v8655_v61 = vld [vmem:[%s13364_s13 + $0x140] sm:$0xff] }
  0x6c   : > { %1169 = vmatpush.msra.mxu0 %v10365_v5  ;;  %9858 = vmatpush.msra.mxu1 %v10365_v5 }
  0x6d   : > { %1565 = vmatpush.msrb.mxu2 %v10342_v0 }
  0x6e   : > { %1170 = vmatpush.msra.mxu0 %v10370_v6  ;;  %9859 = vmatpush.msra.mxu1 %v10370_v6 }
  0x6f   : > { %1566 = vmatpush.msrb.mxu2 %v10345_v1 }
  0x70   : > { %1171 = vmatpush.msra.mxu0 %v10375_v7  ;;  %9860 = vmatpush.msra.mxu1 %v10375_v7 }
  0x71   : > { %1567 = vmatpush.msrb.mxu2 %v10350_v2 }
  0x72   : > { %1172 = vmatpush.msra.mxu0 %v10380_v8  ;;  %9861 = vmatpush.msra.mxu1 %v10380_v8 }
  0x73   : > { %1568 = vmatpush.msrb.mxu2 %v10355_v3 }
  0x74   : > { %1173 = vmatpush.msra.mxu0 %v10385_v9  ;;  %9862 = vmatpush.msra.mxu1 %v10385_v9 }
  0x75   : > { %1569 = vmatpush.msrb.mxu2 %v10360_v4 }
  0x76   : > { %1174 = vmatpush.msra.mxu0 %v10390_v10  ;;  %9863 = vmatpush.msra.mxu1 %v10390_v10 }
  0x77   : > { %1570 = vmatpush.msrb.mxu2 %v10365_v5 }
  0x78   : > { %1175 = vmatpush.msra.mxu0 %v10395_v11  ;;  %9864 = vmatpush.msra.mxu1 %v10395_v11 }
  0x79   : > { %1571 = vmatpush.msrb.mxu2 %v10370_v6 }
  0x7a   : > { %1176 = vmatpush.msra.mxu0 %v10400_v12  ;;  %9865 = vmatpush.msra.mxu1 %v10400_v12 }
  0x7b   : > { %1572 = vmatpush.msrb.mxu2 %v10375_v7 }
  0x7c   : > { %1177 = vmatpush.msra.mxu0 %v10405_v13  ;;  %9866 = vmatpush.msra.mxu1 %v10405_v13 }
  0x7d   : > { %1573 = vmatpush.msrb.mxu2 %v10380_v8 }
  0x7e   : > { %1178 = vmatpush.msra.mxu0 %v10410_v14  ;;  %9867 = vmatpush.msra.mxu1 %v10410_v14 }
  0x7f   : > { %1574 = vmatpush.msrb.mxu2 %v10385_v9 }
  0x80   : > { %1179 = vmatpush.msra.mxu0 %v10415_v15  ;;  %9868 = vmatpush.msra.mxu1 %v10415_v15 }
  0x81   : > { %1180 = vmatmul.f32.vlgmr.msra.gmra.mxu0 %v1148_v16  ;;  %1269 = vmatmul.f32.vlgmr.msra.gmra.mxu1 %v8598_v32 }
  0x82   : > { %1247 = vmatpush.msrb.mxu0 %v10342_v0  ;;  %1575 = vmatpush.msrb.mxu2 %v10390_v10 }
  0x84   : > { %1248 = vmatpush.msrb.mxu0 %v10345_v1  ;;  %1576 = vmatpush.msrb.mxu2 %v10395_v11 }
  0x86   : > { %1249 = vmatpush.msrb.mxu0 %v10350_v2  ;;  %1577 = vmatpush.msrb.mxu2 %v10400_v12 }
  0x88   : > { %1250 = vmatpush.msrb.mxu0 %v10355_v3  ;;  %1578 = vmatpush.msrb.mxu2 %v10405_v13 }
  0x89   : > { %1183 = vmatmul.f32.gmra.mxu0 %v1149_v17  ;;  %1272 = vmatmul.f32.gmra.mxu1 %v8599_v34  ;;  %v8682_v34 = vld [vmem:[%s13364_s13 + $0x188] sm:$0xff] }
  0x8a   : > { %1251 = vmatpush.msrb.mxu0 %v10360_v4  ;;  %1579 = vmatpush.msrb.mxu2 %v10410_v14 }
  0x8c   : > { %1252 = vmatpush.msrb.mxu0 %v10365_v5  ;;  %1580 = vmatpush.msrb.mxu2 %v10415_v15 }
  0x8e   : > { %1253 = vmatpush.msrb.mxu0 %v10370_v6 }
  0x90   : > { %1254 = vmatpush.msrb.mxu0 %v10375_v7 }
  0x91   : > { %1186 = vmatmul.f32.gmra.mxu0 %v1150_v18  ;;  %1275 = vmatmul.f32.gmra.mxu1 %v8600_v37  ;;  %v8647_v37 = vld [vmem:[%s13364_s13 + $0x100] sm:$0xff] }
  0x92   : > { %1255 = vmatpush.msrb.mxu0 %v10380_v8 }
  0x94   : > { %1256 = vmatpush.msrb.mxu0 %v10385_v9 }
  0x96   : > { %1257 = vmatpush.msrb.mxu0 %v10390_v10 }
  0x98   : > { %1258 = vmatpush.msrb.mxu0 %v10395_v11 }
  0x99   : > { %1189 = vmatmul.f32.gmra.mxu0 %v1151_v19  ;;  %1278 = vmatmul.f32.gmra.mxu1 %v8601_v40  ;;  %v8648_v40 = vld [vmem:[%s13364_s13 + $0x108] sm:$0xff] }
  0x9a   : > { %1259 = vmatpush.msrb.mxu0 %v10400_v12 }
  0x9c   : > { %1260 = vmatpush.msrb.mxu0 %v10405_v13 }
  0x9e   : > { %1261 = vmatpush.msrb.mxu0 %v10410_v14 }
  0xa0   : > { %1262 = vmatpush.msrb.mxu0 %v10415_v15 }
  0xa1   : > { %1192 = vmatmul.f32.gmra.mxu0 %v1152_v20  ;;  %1281 = vmatmul.f32.gmra.mxu1 %v8602_v42  ;;  %v8685_v42 = vld [vmem:[%s13364_s13 + $0x1a0] sm:$0xff] }
  0xa2   : > { %8630 = vmatpush.msk.msra.mxu0 %vm1363_vm0, %v1229_v31 }
  0xa9   : > { %1195 = vmatmul.f32.gmra.mxu0 %v1153_v21  ;;  %1284 = vmatmul.f32.gmra.mxu1 %v8603_v44 }
  0xb1   : > { %1198 = vmatmul.f32.gmra.mxu0 %v1154_v22  ;;  %1287 = vmatmul.f32.gmra.mxu1 %v8604_v46  ;;  %v8650_v46 = vld [vmem:[%s13364_s13 + $0x118] sm:$0xff] }
  0xb9   : > { %1201 = vmatmul.f32.gmra.mxu0 %v1155_v23  ;;  %1290 = vmatmul.f32.gmra.mxu1 %v8605_v48  ;;  %v8687_v48 = vld [vmem:[%s13364_s13 + $0x1b0] sm:$0xff] }
  0xc1   : > { %1204 = vmatmul.f32.gmra.mxu0 %v1156_v24  ;;  %1293 = vmatmul.f32.gmra.mxu1 %v8606_v50 }
  0xc9   : > { %1207 = vmatmul.f32.gmra.mxu0 %v1157_v25  ;;  %1296 = vmatmul.f32.gmra.mxu1 %v8607_v52  ;;  %v8652_v52 = vld [vmem:[%s13364_s13 + $0x128] sm:$0xff] }
  0xd1   : > { %1210 = vmatmul.f32.gmra.mxu0 %v1158_v26  ;;  %1299 = vmatmul.f32.gmra.mxu1 %v8608_v54  ;;  %v8689_v54 = vld [vmem:[%s13364_s13 + $0x1c0] sm:$0xff] }
  0xd9   : > { %1213 = vmatmul.f32.gmra.mxu0 %v1159_v27  ;;  %1302 = vmatmul.f32.gmra.mxu1 %v8609_v56 }
  0xe1   : > { %1216 = vmatmul.f32.gmra.mxu0 %v1160_v28  ;;  %1305 = vmatmul.f32.gmra.mxu1 %v8610_v58  ;;  %v8654_v58 = vld [vmem:[%s13364_s13 + $0x138] sm:$0xff] }
  0xe9   : > { %1219 = vmatmul.f32.gmra.mxu0 %v1161_v29  ;;  %1308 = vmatmul.f32.gmra.mxu1 %v8611_v60  ;;  %v8691_v60 = vld [vmem:[%s13364_s13 + $0x1d0] sm:$0xff] }
  0xf1   : > { %1222 = vmatmul.f32.gmra.mxu0 %v1162_v30 }
  0xf9   : > { %1225 = vmatmul.f32.gmra.mxu0 %v1163_v33  ;;  %v8681_v33 = vld [vmem:[%s13364_s13 + $0x180] sm:$0xff] }
  0xfe   : > { %v1181_v35 = vpop.f32.mrf.mxu0  ;;  %v1270_v17 = vpop.f32.mrf.mxu1 }
 0x101   : > { %1263 = vmatmul.f32.vlgmr.msrb.gmra.mxu0 %v8596_v36  ;;  %v8683_v36 = vld [vmem:[%s13364_s13 + $0x190] sm:$0xff] }
 0x102   : > { %1781 = vmatpush.msrb.mxu0 %v10342_v0 }
 0x104   : > { %1782 = vmatpush.msrb.mxu0 %v10345_v1 }
 0x106   : > { %v1184_v38 = vpop.f32.mrf.mxu0  ;;  %1783 = vmatpush.msrb.mxu0 %v10350_v2  ;;  %v1273_v19 = vpop.f32.mrf.mxu1 }
 0x108   : > { %1784 = vmatpush.msrb.mxu0 %v10355_v3 }
 0x109   : > { %1266 = vmatmul.f32.gmra.mxu0 %v8597_v39  ;;  %v8684_v39 = vld [vmem:[%s13364_s13 + $0x198] sm:$0xff] }
 0x10a   : > { %1785 = vmatpush.msrb.mxu0 %v10360_v4 }
 0x10c   : > { %1786 = vmatpush.msrb.mxu0 %v10365_v5 }
 0x10e   : > { %v1187_v41 = vpop.f32.mrf.mxu0  ;;  %1787 = vmatpush.msrb.mxu0 %v10370_v6  ;;  %v1276_v22 = vpop.f32.mrf.mxu1 }
 0x110   : > { %1788 = vmatpush.msrb.mxu0 %v10375_v7 }
 0x111   : > { %8631 = vmatmul.msk.f32.vlgmr.msra.gmra.mxu0 %vm1314_vm1, %v1181_v35 }
 0x112   : > { %1789 = vmatpush.msrb.mxu0 %v10380_v8 }
 0x114   : > { %1790 = vmatpush.msrb.mxu0 %v10385_v9 }
 0x116   : > { %v1190_v43 = vpop.f32.mrf.mxu0  ;;  %1791 = vmatpush.msrb.mxu0 %v10390_v10  ;;  %v1279_v23 = vpop.f32.mrf.mxu1 }
 0x118   : > { %1792 = vmatpush.msrb.mxu0 %v10395_v11 }
 0x119   : > { %8632 = vmatmul.msk.f32.gmra.mxu0 %vm1314_vm1, %v1184_v38 }
 0x11a   : > { %1793 = vmatpush.msrb.mxu0 %v10400_v12 }
 0x11c   : > { %1794 = vmatpush.msrb.mxu0 %v10405_v13 }
 0x11e   : > { %v1193_v45 = vpop.f32.mrf.mxu0  ;;  %1795 = vmatpush.msrb.mxu0 %v10410_v14  ;;  %v1282_v24 = vpop.f32.mrf.mxu1 }
 0x11f   : > { %8635 = vmatmul.msk.f32.vlgmr.msra.gmra.mxu3 %vm1314_vm1, %v1193_v45  ;;  %v8686_v45 = vld [vmem:[%s13364_s13 + $0x1a8] sm:$0xff] }
 0x120   : > { %1796 = vmatpush.msrb.mxu0 %v10415_v15 }
 0x121   : > { %8633 = vmatmul.msk.f32.gmra.mxu0 %vm1314_vm1, %v1187_v41 }
 0x122   : > { %2213 = vmatpush.msra.mxu0 %v10342_v0 }
 0x124   : > { %2214 = vmatpush.msra.mxu0 %v10345_v1 }
 0x126   : > { %v1196_v47 = vpop.f32.mrf.mxu0  ;;  %2215 = vmatpush.msra.mxu0 %v10350_v2  ;;  %v1285_v25 = vpop.f32.mrf.mxu1 }
 0x127   : > { %8636 = vmatmul.msk.f32.gmra.mxu3 %vm1314_vm1, %v1196_v47 }
 0x128   : > { %2216 = vmatpush.msra.mxu0 %v10355_v3 }
 0x129   : > { %8634 = vmatmul.msk.f32.gmra.mxu0 %vm1314_vm1, %v1190_v43  ;;  %v8649_v43 = vld [vmem:[%s13364_s13 + $0x110] sm:$0xff] }
 0x12a   : > { %2217 = vmatpush.msra.mxu0 %v10360_v4 }
 0x12c   : > { %2218 = vmatpush.msra.mxu0 %v10365_v5 }
 0x12e   : > { %v1199_v49 = vpop.f32.mrf.mxu0  ;;  %2219 = vmatpush.msra.mxu0 %v10370_v6  ;;  %v1288_v26 = vpop.f32.mrf.mxu1 }
 0x12f   : > { %8637 = vmatmul.msk.f32.gmra.mxu3 %vm1314_vm1, %v1199_v49  ;;  %v8651_v49 = vld [vmem:[%s13364_s13 + $0x120] sm:$0xff] }
 0x130   : > { %2220 = vmatpush.msra.mxu0 %v10375_v7 }
 0x131   : > { %1797 = vmatmul.f32.vlgmr.msrb.gmra.mxu0 %v8681_v33  ;;  %v8660_v33 = vld [vmem:[%s13364_s13 + $0x168] sm:$0xff] }
 0x132   : > { %2221 = vmatpush.msra.mxu0 %v10380_v8 }
 0x134   : > { %2222 = vmatpush.msra.mxu0 %v10385_v9 }
 0x136   : > { %v1202_v51 = vpop.f32.mrf.mxu0  ;;  %2223 = vmatpush.msra.mxu0 %v10390_v10  ;;  %v1291_v27 = vpop.f32.mrf.mxu1 }
 0x137   : > { %8638 = vmatmul.msk.f32.gmra.mxu3 %vm1314_vm1, %v1202_v51  ;;  %v8688_v51 = vld [vmem:[%s13364_s13 + $0x1b8] sm:$0xff] }
 0x138   : > { %2224 = vmatpush.msra.mxu0 %v10395_v11 }
 0x139   : > { %1800 = vmatmul.f32.gmra.mxu0 %v8682_v34  ;;  %v8697_v34 = vld [vmem:[%s10161_s30 + $0x6] sm:$0x3] }
 0x13a   : > { %2225 = vmatpush.msra.mxu0 %v10400_v12  ;;  %8698 = vmatpush.msk.msrb.mxu1 %vm1363_vm0, %v8697_v34 }
 0x13c   : > { %2226 = vmatpush.msra.mxu0 %v10405_v13 }
 0x13e   : > { %v1205_v53 = vpop.f32.mrf.mxu0  ;;  %2227 = vmatpush.msra.mxu0 %v10410_v14  ;;  %v1294_v28 = vpop.f32.mrf.mxu1 }
 0x13f   : > { %8639 = vmatmul.msk.f32.gmra.mxu3 %vm1314_vm1, %v1205_v53 }
 0x140   : > { %2228 = vmatpush.msra.mxu0 %v10415_v15 }
 0x141   : > { %1803 = vmatmul.f32.gmra.mxu0 %v8683_v36 }
 0x142   : > { %2645 = vmatpush.msrb.mxu0 %v10342_v0 }
 0x144   : > { %2646 = vmatpush.msrb.mxu0 %v10345_v1 }
 0x146   : > { %v1208_v55 = vpop.f32.mrf.mxu0  ;;  %v1297_v29 = vpop.f32.mrf.mxu1  ;;  %2647 = vmatpush.msrb.mxu0 %v10350_v2 }
 0x147   : > { %8640 = vmatmul.msk.f32.gmra.mxu3 %vm1314_vm1, %v1208_v55  ;;  %v8653_v55 = vld [vmem:[%s13364_s13 + $0x130] sm:$0xff] }
 0x148   : > { %2648 = vmatpush.msrb.mxu0 %v10355_v3 }
 0x149   : > { %1806 = vmatmul.f32.gmra.mxu0 %v8684_v39  ;;  %v8661_v39 = vld [vmem:[%s13364_s13 + $0x170] sm:$0xff] }
 0x14a   : > { %2649 = vmatpush.msrb.mxu0 %v10360_v4 }
 0x14c   : > { %2650 = vmatpush.msrb.mxu0 %v10365_v5 }
 0x14e   : > { %v1211_v57 = vpop.f32.mrf.mxu0  ;;  %v1300_v30 = vpop.f32.mrf.mxu1  ;;  %2651 = vmatpush.msrb.mxu0 %v10370_v6 }
 0x14f   : > { %8641 = vmatmul.msk.f32.gmra.mxu3 %vm1314_vm1, %v1211_v57  ;;  %v8690_v57 = vld [vmem:[%s13364_s13 + $0x1c8] sm:$0xff] }
 0x150   : > { %2652 = vmatpush.msrb.mxu0 %v10375_v7 }
 0x151   : > { %1809 = vmatmul.f32.gmra.mxu0 %v8685_v42 }
 0x152   : > { %2653 = vmatpush.msrb.mxu0 %v10380_v8 }
 0x154   : > { %2654 = vmatpush.msrb.mxu0 %v10385_v9 }
 0x156   : > { %v1214_v59 = vpop.f32.mrf.mxu0  ;;  %v1303_v31 = vpop.f32.mrf.mxu1  ;;  %2655 = vmatpush.msrb.mxu0 %v10390_v10 }
 0x157   : > { %8642 = vmatmul.msk.f32.gmra.mxu3 %vm1314_vm1, %v1214_v59 }
 0x158   : > { %2656 = vmatpush.msrb.mxu0 %v10395_v11 }
 0x159   : > { %1812 = vmatmul.f32.gmra.mxu0 %v8686_v45  ;;  %v8662_v45 = vld [vmem:[%s13364_s13 + $0x178] sm:$0xff] }
 0x15a   : > { %2657 = vmatpush.msrb.mxu0 %v10400_v12 }
 0x15c   : > { %2658 = vmatpush.msrb.mxu0 %v10405_v13 }
 0x15e   : > { %v1217_v62 = vpop.f32.mrf.mxu0  ;;  %v1306_v32 = vpop.f32.mrf.mxu1  ;;  %2659 = vmatpush.msrb.mxu0 %v10410_v14 }
 0x15f   : > { %8643 = vmatmul.msk.f32.gmra.mxu3 %vm1314_vm1, %v1217_v62 }
 0x160   : > { %2660 = vmatpush.msrb.mxu0 %v10415_v15 }
 0x161   : > { %1815 = vmatmul.f32.gmra.mxu0 %v8687_v48 }
 0x166   : > { %v1220_v63 = vpop.f32.mrf.mxu0  ;;  %v1309_v35 = vpop.f32.mrf.mxu1 }
 0x167   : > { %8644 = vmatmul.msk.f32.gmra.mxu3 %vm1314_vm1, %v1220_v63  ;;  %v8692_v63 = vld [vmem:[%s13364_s13 + $0x1d8] sm:$0xff] }
 0x169   : > { %1818 = vmatmul.f32.gmra.mxu0 %v8688_v51  ;;  %v8715_v51 = vld [vmem:[%s13364_s13 + $0x200] sm:$0xff] }
 0x16e   : > { %v1223_v16 = vpop.f32.mrf.mxu0 }
 0x16f   : > { %8645 = vmatmul.msk.f32.gmra.mxu3 %vm1314_vm1, %v1223_v16 }
 0x171   : > { %1821 = vmatmul.f32.gmra.mxu0 %v8689_v54 }
 0x176   : > { %v1226_v18 = vpop.f32.mrf.mxu0 }
 0x177   : > { %8646 = vmatmul.msk.f32.gmra.mxu3 %vm1314_vm1, %v1226_v18 }
 0x179   : > { %1824 = vmatmul.f32.gmra.mxu0 %v8690_v57  ;;  %v8716_v57 = vld [vmem:[%s13364_s13 + $0x208] sm:$0xff] }
 0x17e   : > { %v1264_v20 = vpop.f32.mrf.mxu0 }
 0x17f   : > { %8614 = vmatmul.msk.f32.vlgmr.msra.gmra.mxu2 %vm1314_vm1, %v1264_v20  ;;  %v8657_v20 = vld [vmem:[%s13364_s13 + $0x150] sm:$0xff] }
 0x180   : > { %1997 = vmatpush.msra.mxu2 %v10342_v0 }
 0x181   : > { %1827 = vmatmul.f32.gmra.mxu0 %v8691_v60  ;;  %v8717_v60 = vld [vmem:[%s13364_s13 + $0x210] sm:$0xff] }
 0x182   : > { %1998 = vmatpush.msra.mxu2 %v10345_v1 }
 0x184   : > { %1999 = vmatpush.msra.mxu2 %v10350_v2 }
 0x186   : > { %v1267_v21 = vpop.f32.mrf.mxu0  ;;  %2000 = vmatpush.msra.mxu2 %v10355_v3 }
 0x187   : > { %8615 = vmatmul.msk.f32.gmra.mxu2 %vm1314_vm1, %v1267_v21 }
 0x188   : > { %2001 = vmatpush.msra.mxu2 %v10360_v4 }
 0x189   : > { %1830 = vmatmul.f32.gmra.mxu0 %v8692_v63  ;;  %v8719_v63 = vld [vmem:[%s13364_s13 + $0x220] sm:$0xff] }
 0x18a   : > { %2002 = vmatpush.msra.mxu2 %v10365_v5 }
 0x18c   : > { %2003 = vmatpush.msra.mxu2 %v10370_v6 }
 0x18e   : > { %2004 = vmatpush.msra.mxu2 %v10375_v7  ;;  %v10641_v16 = vpop.f32.mrf.mxu0 }
 0x18f   : > { %8616 = vmatmul.msk.f32.gmra.mxu2 %vm1314_vm1, %v1270_v17  ;;  %v8656_v17 = vld [vmem:[%s13364_s13 + $0x148] sm:$0xff] }
 0x190   : > { %2005 = vmatpush.msra.mxu2 %v10380_v8 }
 0x192   : > { %2006 = vmatpush.msra.mxu2 %v10385_v9 }
 0x194   : > { %2007 = vmatpush.msra.mxu2 %v10390_v10 }
 0x196   : > { %2008 = vmatpush.msra.mxu2 %v10395_v11  ;;  %v10648_v21 = vpop.f32.mrf.mxu0 }
 0x197   : > { %8617 = vmatmul.msk.f32.gmra.mxu2 %vm1314_vm1, %v1273_v19  ;;  %v8693_v19 = vld [vmem:[%s13364_s13 + $0x1e0] sm:$0xff] }
 0x198   : > { %2009 = vmatpush.msra.mxu2 %v10400_v12  ;;  %1833 = vmatmul.f32.gmra.mxu0 %v8693_v19 }
 0x19a   : > { %2010 = vmatpush.msra.mxu2 %v10405_v13 }
 0x19c   : > { %2011 = vmatpush.msra.mxu2 %v10410_v14 }
 0x19e   : > { %2012 = vmatpush.msra.mxu2 %v10415_v15 }
 0x19f   : > { %8618 = vmatmul.msk.f32.gmra.mxu2 %vm1314_vm1, %v1276_v22 }
 0x1a7   : > { %8619 = vmatmul.msk.f32.gmra.mxu2 %vm1314_vm1, %v1279_v23  ;;  %v8694_v23 = vld [vmem:[%s13364_s13 + $0x1e8] sm:$0xff] }
 0x1a8   : > { %1836 = vmatmul.f32.gmra.mxu0 %v8694_v23 }
 0x1af   : > { %8620 = vmatmul.msk.f32.gmra.mxu2 %vm1314_vm1, %v1282_v24  ;;  %v8658_v24 = vld [vmem:[%s13364_s13 + $0x158] sm:$0xff] }
 0x1b7   : > { %8621 = vmatmul.msk.f32.gmra.mxu2 %vm1314_vm1, %v1285_v25  ;;  %v10654_v25 = vpop.f32.mrf.mxu0 }
 0x1bf   : > { %8622 = vmatmul.msk.f32.gmra.mxu2 %vm1314_vm1, %v1288_v26 }
 0x1c7   : > { %8623 = vmatmul.msk.f32.gmra.mxu2 %vm1314_vm1, %v1291_v27  ;;  %v8695_v27 = vld [vmem:[%s13364_s13 + $0x1f0] sm:$0xff] }
 0x1c8   : > { %1839 = vmatmul.f32.gmra.mxu0 %v8695_v27 }
 0x1cf   : > { %8624 = vmatmul.msk.f32.gmra.mxu2 %vm1314_vm1, %v1294_v28  ;;  %v8659_v28 = vld [vmem:[%s13364_s13 + $0x160] sm:$0xff] }
 0x1d7   : > { %8625 = vmatmul.msk.f32.gmra.mxu2 %vm1314_vm1, %v1297_v29  ;;  %v8663_v29 = vld [vmem:[%s10161_s30 + $0x4] sm:$0x3] }
 0x1d8   : > { %8664 = vmatpush.msk.msrb.mxu3 %vm1363_vm0, %v8663_v29  ;;  %v8722_v29 = vld [vmem:[%s13364_s13 + $0x238] sm:$0xff] }
 0x1df   : > { %8626 = vmatmul.msk.f32.gmra.mxu2 %vm1314_vm1, %v1300_v30  ;;  %v10661_v30 = vpop.f32.mrf.mxu0 }
 0x1e7   : > { %8627 = vmatmul.msk.f32.gmra.mxu2 %vm1314_vm1, %v1303_v31  ;;  %v1798_v36 = vpop.f32.mrf.mxu0 }
 0x1e8   : > { %8699 = vmatmul.msk.f32.vlgmr.msrb.gmra.mxu1 %vm1314_vm1, %v1798_v36  ;;  %v8759_v36 = vld [vmem:[%s13364_s13 + $0x2d0] sm:$0xff] }
 0x1ef   : > { %8628 = vmatmul.msk.f32.gmra.mxu2 %vm1314_vm1, %v1306_v32  ;;  %v8696_v32 = vld [vmem:[%s13364_s13 + $0x1f8] sm:$0xff]  ;;  %v1801_v42 = vpop.f32.mrf.mxu0 }
 0x1f0   : > { %1842 = vmatmul.f32.gmra.mxu0 %v8696_v32  ;;  %8700 = vmatmul.msk.f32.gmra.mxu1 %vm1314_vm1, %v1801_v42 }
 0x1f7   : > { %8629 = vmatmul.msk.f32.gmra.mxu2 %vm1314_vm1, %v1309_v35  ;;  %v1804_v48 = vpop.f32.mrf.mxu0 }
 0x1f8   : > { %8701 = vmatmul.msk.f32.gmra.mxu1 %vm1314_vm1, %v1804_v48  ;;  %v8760_v48 = vld [vmem:[%s13364_s13 + $0x2d8] sm:$0xff] }
 0x1ff   : > { %1581 = vmatmul.f32.vlgmr.msrb.gmra.mxu2 %v8647_v37  ;;  %v8749_v37 = vld [vmem:[%s13364_s13 + $0x280] sm:$0xff]  ;;  %v1807_v54 = vpop.f32.mrf.mxu0 }
 0x200   : > { %2429 = vmatpush.msrb.mxu2 %v10342_v0  ;;  %2229 = vmatmul.f32.vlgmr.msra.gmra.mxu0 %v8749_v37  ;;  %v8723_v37 = vld [vmem:[%s13364_s13 + $0x240] sm:$0xff] }
 0x201   : > { %8702 = vmatmul.msk.f32.gmra.mxu1 %vm1314_vm1, %v1807_v54 }
 0x202   : > { %v10586_v38 = vpop.f32.mrf.mxu2  ;;  %2430 = vmatpush.msrb.mxu2 %v10345_v1 }
 0x204   : > { %2431 = vmatpush.msrb.mxu2 %v10350_v2 }
 0x206   : > { %2432 = vmatpush.msrb.mxu2 %v10355_v3 }
 0x207   : > { %1584 = vmatmul.f32.gmra.mxu2 %v8648_v40 }
 0x208   : > { %2433 = vmatpush.msrb.mxu2 %v10360_v4 }
 0x20a   : > { %v10598_v41 = vpop.f32.mrf.mxu2  ;;  %2434 = vmatpush.msrb.mxu2 %v10365_v5 }
 0x20c   : > { %2435 = vmatpush.msrb.mxu2 %v10370_v6 }
 0x20e   : > { %2436 = vmatpush.msrb.mxu2 %v10375_v7 }
 0x20f   : > { %1587 = vmatmul.f32.gmra.mxu2 %v8649_v43  ;;  %v8750_v43 = vld [vmem:[%s13364_s13 + $0x288] sm:$0xff] }
 0x210   : > { %2437 = vmatpush.msrb.mxu2 %v10380_v8  ;;  %2232 = vmatmul.f32.gmra.mxu0 %v8750_v43 }
 0x212   : > { %v10607_v44 = vpop.f32.mrf.mxu2  ;;  %2438 = vmatpush.msrb.mxu2 %v10385_v9 }
 0x214   : > { %2439 = vmatpush.msrb.mxu2 %v10390_v10 }
 0x216   : > { %2440 = vmatpush.msrb.mxu2 %v10395_v11 }
 0x217   : > { %1590 = vmatmul.f32.gmra.mxu2 %v8650_v46 }
 0x218   : > { %2441 = vmatpush.msrb.mxu2 %v10400_v12 }
 0x21a   : > { %v10615_v47 = vpop.f32.mrf.mxu2  ;;  %2442 = vmatpush.msrb.mxu2 %v10405_v13 }
 0x21c   : > { %2443 = vmatpush.msrb.mxu2 %v10410_v14 }
 0x21e   : > { %2444 = vmatpush.msrb.mxu2 %v10415_v15 }
 0x21f   : > { %1593 = vmatmul.f32.gmra.mxu2 %v8651_v49  ;;  %v8751_v49 = vld [vmem:[%s13364_s13 + $0x290] sm:$0xff] }
 0x220   : > { %2235 = vmatmul.f32.gmra.mxu0 %v8751_v49  ;;  %v8724_v49 = vld [vmem:[%s13364_s13 + $0x248] sm:$0xff] }
 0x222   : > { %v10622_v50 = vpop.f32.mrf.mxu2 }
 0x227   : > { %1596 = vmatmul.f32.gmra.mxu2 %v8652_v52 }
 0x22a   : > { %v10626_v53 = vpop.f32.mrf.mxu2 }
 0x22f   : > { %1599 = vmatmul.f32.gmra.mxu2 %v8653_v55  ;;  %v8752_v55 = vld [vmem:[%s13364_s13 + $0x298] sm:$0xff] }
 0x230   : > { %2238 = vmatmul.f32.gmra.mxu0 %v8752_v55  ;;  %v8761_v55 = vld [vmem:[%s13364_s13 + $0x2e0] sm:$0xff] }
 0x232   : > { %v10630_v56 = vpop.f32.mrf.mxu2 }
 0x237   : > { %1602 = vmatmul.f32.gmra.mxu2 %v8654_v58  ;;  %v1810_v58 = vpop.f32.mrf.mxu0 }
 0x238   : > { %8703 = vmatmul.msk.f32.gmra.mxu1 %vm1314_vm1, %v1810_v58 }
 0x23a   : > { %v10634_v59 = vpop.f32.mrf.mxu2 }
 0x23f   : > { %1605 = vmatmul.f32.gmra.mxu2 %v8655_v61  ;;  %v8718_v61 = vld [vmem:[%s13364_s13 + $0x218] sm:$0xff] }
 0x242   : > { %v10638_v62 = vpop.f32.mrf.mxu2 }
 0x247   : > { %1608 = vmatmul.f32.gmra.mxu2 %v8656_v17  ;;  %v8720_v17 = vld [vmem:[%s13364_s13 + $0x228] sm:$0xff] }
 0x24a   : > { %v10644_v18 = vpop.f32.mrf.mxu2 }
 0x24f   : > { %1611 = vmatmul.f32.gmra.mxu2 %v8657_v20  ;;  %v8721_v20 = vld [vmem:[%s13364_s13 + $0x230] sm:$0xff] }
 0x252   : > { %v10650_v22 = vpop.f32.mrf.mxu2 }
 0x257   : > { %1614 = vmatmul.f32.gmra.mxu2 %v8658_v24 }
 0x25a   : > { %v10656_v26 = vpop.f32.mrf.mxu2 }
 0x25f   : > { %1617 = vmatmul.f32.gmra.mxu2 %v8659_v28  ;;  %v8758_v28 = vld [vmem:[%s13364_s13 + $0x2c8] sm:$0xff] }
 0x262   : > { %v10663_v31 = vpop.f32.mrf.mxu2 }
 0x267   : > { %1620 = vmatmul.f32.gmra.mxu2 %v8660_v33 }
 0x26a   : > { %v10669_v35 = vpop.f32.mrf.mxu2 }
 0x26f   : > { %1623 = vmatmul.f32.gmra.mxu2 %v8661_v39 }
 0x272   : > { %v10675_v40 = vpop.f32.mrf.mxu2 }
 0x277   : > { %1626 = vmatmul.f32.gmra.mxu2 %v8662_v45  ;;  %v8731_v45 = vld [vmem:[%s10161_s30 + $0x8] sm:$0x3] }
 0x278   : > { %8732 = vmatpush.msk.msra.mxu3 %vm1363_vm0, %v8731_v45  ;;  %v8819_v45 = vld [vmem:[%s13364_s13 + $0x390] sm:$0xff] }
 0x27a   : > { %v10680_v46 = vpop.f32.mrf.mxu2 }
 0x27f   : > { %2013 = vmatmul.f32.vlgmr.msra.gmra.mxu2 %v8715_v51 }
 0x280   : > { %2861 = vmatpush.msra.mxu2 %v10342_v0 }
 0x282   : > { %v1582_v52 = vpop.f32.mrf.mxu2  ;;  %2862 = vmatpush.msra.mxu2 %v10345_v1  ;;  %v8753_v1 = vld [vmem:[%s13364_s13 + $0x2a0] sm:$0xff] }
 0x283   : > { %8665 = vmatmul.msk.f32.vlgmr.msrb.gmra.mxu3 %vm1314_vm1, %v1582_v52  ;;  %2241 = vmatmul.f32.gmra.mxu0 %v8753_v1  ;;  %v8762_v1 = vld [vmem:[%s13364_s13 + $0x2e8] sm:$0xff] }
 0x284   : > { %2863 = vmatpush.msra.mxu2 %v10350_v2  ;;  %v10701_v2 = vpop.f32.mrf.mxu3 }
 0x286   : > { %2864 = vmatpush.msra.mxu2 %v10355_v3 }
 0x287   : > { %2016 = vmatmul.f32.gmra.mxu2 %v8716_v57  ;;  %v8725_v57 = vld [vmem:[%s13364_s13 + $0x250] sm:$0xff] }
 0x288   : > { %2865 = vmatpush.msra.mxu2 %v10360_v4  ;;  %v1813_v4 = vpop.f32.mrf.mxu0 }
 0x289   : > { %8704 = vmatmul.msk.f32.gmra.mxu1 %vm1314_vm1, %v1813_v4 }
 0x28a   : > { %v1585_v0 = vpop.f32.mrf.mxu2  ;;  %2866 = vmatpush.msra.mxu2 %v10365_v5  ;;  %v8754_v5 = vld [vmem:[%s13364_s13 + $0x2a8] sm:$0xff] }
 0x28b   : > { %8666 = vmatmul.msk.f32.gmra.mxu3 %vm1314_vm1, %v1585_v0  ;;  %2244 = vmatmul.f32.gmra.mxu0 %v8754_v5 }
 0x28c   : > { %2867 = vmatpush.msra.mxu2 %v10370_v6  ;;  %v10712_v6 = vpop.f32.mrf.mxu3 }
 0x28e   : > { %2868 = vmatpush.msra.mxu2 %v10375_v7 }
 0x28f   : > { %2019 = vmatmul.f32.gmra.mxu2 %v8717_v60  ;;  %v8726_v60 = vld [vmem:[%s13364_s13 + $0x258] sm:$0xff] }
 0x290   : > { %2869 = vmatpush.msra.mxu2 %v10380_v8  ;;  %v1816_v8 = vpop.f32.mrf.mxu0 }
 0x291   : > { %8705 = vmatmul.msk.f32.gmra.mxu1 %vm1314_vm1, %v1816_v8 }
 0x292   : > { %v1588_v3 = vpop.f32.mrf.mxu2  ;;  %2870 = vmatpush.msra.mxu2 %v10385_v9  ;;  %v8755_v9 = vld [vmem:[%s13364_s13 + $0x2b0] sm:$0xff] }
 0x293   : > { %8667 = vmatmul.msk.f32.gmra.mxu3 %vm1314_vm1, %v1588_v3  ;;  %2247 = vmatmul.f32.gmra.mxu0 %v8755_v9 }
 0x294   : > { %2871 = vmatpush.msra.mxu2 %v10390_v10 }
 0x296   : > { %2872 = vmatpush.msra.mxu2 %v10395_v11 }
 0x297   : > { %2022 = vmatmul.f32.gmra.mxu2 %v8718_v61  ;;  %v8763_v61 = vld [vmem:[%s13364_s13 + $0x2f0] sm:$0xff] }
 0x298   : > { %2873 = vmatpush.msra.mxu2 %v10400_v12  ;;  %v1819_v11 = vpop.f32.mrf.mxu0  ;;  %v10721_v12 = vpop.f32.mrf.mxu3 }
 0x299   : > { %8706 = vmatmul.msk.f32.gmra.mxu1 %vm1314_vm1, %v1819_v11  ;;  %v8728_v11 = vld [vmem:[%s13364_s13 + $0x268] sm:$0xff] }
 0x29a   : > { %v1591_v7 = vpop.f32.mrf.mxu2  ;;  %2874 = vmatpush.msra.mxu2 %v10405_v13  ;;  %v8756_v13 = vld [vmem:[%s13364_s13 + $0x2b8] sm:$0xff] }
 0x29b   : > { %8668 = vmatmul.msk.f32.gmra.mxu3 %vm1314_vm1, %v1591_v7  ;;  %2250 = vmatmul.f32.gmra.mxu0 %v8756_v13  ;;  %v8727_v7 = vld [vmem:[%s13364_s13 + $0x260] sm:$0xff]  ;;  %v1916_v13 = vpop.f32.mrf.mxu1 }
 0x29c   : > { %2875 = vmatpush.msra.mxu2 %v10410_v14 }
 0x29e   : > { %2876 = vmatpush.msra.mxu2 %v10415_v15  ;;  %v8757_v15 = vld [vmem:[%s13364_s13 + $0x2c0] sm:$0xff] }
 0x29f   : > { %2025 = vmatmul.f32.gmra.mxu2 %v8719_v63 }
 0x2a0   : > { %v1822_v19 = vpop.f32.mrf.mxu0  ;;  %v10731_v23 = vpop.f32.mrf.mxu3 }
 0x2a1   : > { %8707 = vmatmul.msk.f32.gmra.mxu1 %vm1314_vm1, %v1822_v19 }
 0x2a2   : > { %v1594_v10 = vpop.f32.mrf.mxu2 }
 0x2a3   : > { %8669 = vmatmul.msk.f32.gmra.mxu3 %vm1314_vm1, %v1594_v10  ;;  %2253 = vmatmul.f32.gmra.mxu0 %v8757_v15  ;;  %v8764_v10 = vld [vmem:[%s13364_s13 + $0x2f8] sm:$0xff] }
 0x2a7   : > { %2028 = vmatmul.f32.gmra.mxu2 %v8720_v17 }
 0x2a8   : > { %v1825_v27 = vpop.f32.mrf.mxu0  ;;  %v10737_v32 = vpop.f32.mrf.mxu3 }
 0x2a9   : > { %8708 = vmatmul.msk.f32.gmra.mxu1 %vm1314_vm1, %v1825_v27  ;;  %v1919_v27 = vpop.f32.mrf.mxu1 }
 0x2aa   : > { %v1597_v14 = vpop.f32.mrf.mxu2 }
 0x2ab   : > { %8670 = vmatmul.msk.f32.gmra.mxu3 %vm1314_vm1, %v1597_v14  ;;  %2256 = vmatmul.f32.gmra.mxu0 %v8758_v28  ;;  %v8765_v14 = vld [vmem:[%s10161_s30 + $0xa] sm:$0x3] }
 0x2ac   : > { %8766 = vmatpush.msk.msra.mxu1 %vm1363_vm0, %v8765_v14 }
 0x2af   : > { %2031 = vmatmul.f32.gmra.mxu2 %v8721_v20  ;;  %v8817_v20 = vld [vmem:[%s13364_s13 + $0x380] sm:$0xff] }
 0x2b0   : > { %v1828_v34 = vpop.f32.mrf.mxu0  ;;  %v10743_v39 = vpop.f32.mrf.mxu3 }
 0x2b1   : > { %8709 = vmatmul.msk.f32.gmra.mxu1 %vm1314_vm1, %v1828_v34 }
 0x2b2   : > { %v1600_v24 = vpop.f32.mrf.mxu2 }
 0x2b3   : > { %8671 = vmatmul.msk.f32.gmra.mxu3 %vm1314_vm1, %v1600_v24  ;;  %2259 = vmatmul.f32.gmra.mxu0 %v8759_v36  ;;  %v8729_v24 = vld [vmem:[%s13364_s13 + $0x270] sm:$0xff]  ;;  %v8730_v36 = vld [vmem:[%s13364_s13 + $0x278] sm:$0xff] }
 0x2b7   : > { %2034 = vmatmul.f32.gmra.mxu2 %v8722_v29 }
 0x2b8   : > { %v1831_v43 = vpop.f32.mrf.mxu0  ;;  %v10751_v54 = vpop.f32.mrf.mxu3 }
 0x2b9   : > { %8710 = vmatmul.msk.f32.gmra.mxu1 %vm1314_vm1, %v1831_v43 }
 0x2ba   : > { %v1603_v33 = vpop.f32.mrf.mxu2 }
 0x2bb   : > { %8672 = vmatmul.msk.f32.gmra.mxu3 %vm1314_vm1, %v1603_v33  ;;  %2262 = vmatmul.f32.gmra.mxu0 %v8760_v48  ;;  %v8818_v33 = vld [vmem:[%s13364_s13 + $0x388] sm:$0xff]  ;;  %v8783_v48 = vld [vmem:[%s13364_s13 + $0x300] sm:$0xff] }
 0x2bf   : > { %2037 = vmatmul.f32.gmra.mxu2 %v8723_v37  ;;  %v1922_v37 = vpop.f32.mrf.mxu1 }
 0x2c0   : > { %v1834_v52 = vpop.f32.mrf.mxu0  ;;  %v10761_v3 = vpop.f32.mrf.mxu3 }
 0x2c1   : > { %8711 = vmatmul.msk.f32.gmra.mxu1 %vm1314_vm1, %v1834_v52 }
 0x2c2   : > { %v1606_v42 = vpop.f32.mrf.mxu2 }
 0x2c3   : > { %8673 = vmatmul.msk.f32.gmra.mxu3 %vm1314_vm1, %v1606_v42  ;;  %2265 = vmatmul.f32.gmra.mxu0 %v8761_v55 }
 0x2c7   : > { %2040 = vmatmul.f32.gmra.mxu2 %v8724_v49 }
 0x2c8   : > { %v1837_v58 = vpop.f32.mrf.mxu0  ;;  %v10767_v8 = vpop.f32.mrf.mxu3 }
 0x2c9   : > { %8712 = vmatmul.msk.f32.gmra.mxu1 %vm1314_vm1, %v1837_v58  ;;  %v1501_v58 = vadd.f32 %v10641_v16, %v10586_v38  ;;  %v1504_v38 = vadd.f32 %v10648_v21, %v10598_v41  ;;  %v1507_v41 = vadd.f32 %v10654_v25, %v10607_v44  ;;  %v1510_v44 = vadd.f32 %v10661_v30, %v10615_v47 }
 0x2ca   : > { %v1609_v51 = vpop.f32.mrf.mxu2  ;;  %v1513_v47 = vadd.f32 %v10701_v2, %v10622_v50  ;;  %v1516_v50 = vadd.f32 %v10712_v6, %v10626_v53  ;;  %v1519_v53 = vadd.f32 %v10721_v12, %v10630_v56  ;;  %v1522_v56 = vadd.f32 %v10731_v23, %v10634_v59 }
 0x2cb   : > { %8674 = vmatmul.msk.f32.gmra.mxu3 %vm1314_vm1, %v1609_v51  ;;  %2268 = vmatmul.f32.gmra.mxu0 %v8762_v1  ;;  %v1925_v51 = vpop.f32.mrf.mxu1  ;;  %v1525_v59 = vadd.f32 %v10737_v32, %v10638_v62  ;;  %v1528_v62 = vadd.f32 %v10743_v39, %v10644_v18  ;;  %v1531_v18 = vadd.f32 %v10751_v54, %v10650_v22 }
 0x2cc   : > { %v1534_v22 = vadd.f32 %v10761_v3, %v10656_v26  ;;  %v1537_v26 = vadd.f32 %v10767_v8, %v10663_v31 }
 0x2cf   : > { %2043 = vmatmul.f32.gmra.mxu2 %v8725_v57  ;;  %v8820_v57 = vld [vmem:[%s13364_s13 + $0x398] sm:$0xff] }
 0x2d0   : > { %v1840_v5 = vpop.f32.mrf.mxu0  ;;  %v10773_v17 = vpop.f32.mrf.mxu3 }
 0x2d1   : > { %8713 = vmatmul.msk.f32.gmra.mxu1 %vm1314_vm1, %v1840_v5 }
 0x2d2   : > { %v1612_v0 = vpop.f32.mrf.mxu2 }
 0x2d3   : > { %8675 = vmatmul.msk.f32.gmra.mxu3 %vm1314_vm1, %v1612_v0  ;;  %2271 = vmatmul.f32.gmra.mxu0 %v8763_v61  ;;  %v8784_v0 = vld [vmem:[%s13364_s13 + $0x308] sm:$0xff] }
 0x2d7   : > { %2046 = vmatmul.f32.gmra.mxu2 %v8726_v60 }
 0x2d8   : > { %v1843_v63 = vpop.f32.mrf.mxu0  ;;  %v10784_v34 = vpop.f32.mrf.mxu3 }
 0x2d9   : > { %8714 = vmatmul.msk.f32.gmra.mxu1 %vm1314_vm1, %v1843_v63  ;;  %v8785_v63 = vld [vmem:[%s13364_s13 + $0x310] sm:$0xff] }
 0x2da   : > { %v1615_v4 = vpop.f32.mrf.mxu2 }
 0x2db   : > { %8676 = vmatmul.msk.f32.gmra.mxu3 %vm1314_vm1, %v1615_v4  ;;  %2274 = vmatmul.f32.gmra.mxu0 %v8764_v10  ;;  %v1928_v4 = vpop.f32.mrf.mxu1 }
 0x2df   : > { %2049 = vmatmul.f32.gmra.mxu2 %v8727_v7 }
 0x2e0   : > { %v2230_v15 = vpop.f32.mrf.mxu0  ;;  %v10791_v49 = vpop.f32.mrf.mxu3 }
 0x2e1   : > { %8767 = vmatmul.msk.f32.vlgmr.msra.gmra.mxu1 %vm1314_vm1, %v2230_v15  ;;  %v8822_v15 = vld [vmem:[%s13364_s13 + $0x3a8] sm:$0xff] }
 0x2e2   : > { %v1618_v9 = vpop.f32.mrf.mxu2 }
 0x2e3   : > { %8677 = vmatmul.msk.f32.gmra.mxu3 %vm1314_vm1, %v1618_v9  ;;  %2661 = vmatmul.f32.vlgmr.msrb.gmra.mxu0 %v8817_v20  ;;  %v8821_v9 = vld [vmem:[%s13364_s13 + $0x3a0] sm:$0xff]  ;;  %v8786_v20 = vld [vmem:[%s13364_s13 + $0x318] sm:$0xff] }
 0x2e7   : > { %2052 = vmatmul.f32.gmra.mxu2 %v8728_v11 }
 0x2e8   : > { %v2233_v29 = vpop.f32.mrf.mxu0 }
 0x2e9   : > { %8768 = vmatmul.msk.f32.gmra.mxu1 %vm1314_vm1, %v2233_v29 }
 0x2ea   : > { %v1621_v19 = vpop.f32.mrf.mxu2 }
 0x2eb   : > { %8678 = vmatmul.msk.f32.gmra.mxu3 %vm1314_vm1, %v1621_v19  ;;  %2664 = vmatmul.f32.gmra.mxu0 %v8818_v33 }
 0x2ef   : > { %2055 = vmatmul.f32.gmra.mxu2 %v8729_v24 }
 0x2f0   : > { %v2236_v43 = vpop.f32.mrf.mxu0 }
 0x2f1   : > { %8769 = vmatmul.msk.f32.gmra.mxu1 %vm1314_vm1, %v2236_v43 }
 0x2f2   : > { %v1624_v28 = vpop.f32.mrf.mxu2 }
 0x2f3   : > { %8679 = vmatmul.msk.f32.gmra.mxu3 %vm1314_vm1, %v1624_v28  ;;  %2667 = vmatmul.f32.gmra.mxu0 %v8819_v45 }
 0x2f7   : > { %2058 = vmatmul.f32.gmra.mxu2 %v8730_v36  ;;  %v8823_v36 = vld [vmem:[%s13364_s13 + $0x3b0] sm:$0xff] }
 0x2f8   : > { %v2239_v55 = vpop.f32.mrf.mxu0 }
 0x2f9   : > { %8770 = vmatmul.msk.f32.gmra.mxu1 %vm1314_vm1, %v2239_v55  ;;  %v8824_v55 = vld [vmem:[%s13364_s13 + $0x3b8] sm:$0xff] }
 0x2fa   : > { %v1627_v42 = vpop.f32.mrf.mxu2 }
 0x2fb   : > { %8680 = vmatmul.msk.f32.gmra.mxu3 %vm1314_vm1, %v1627_v42  ;;  %2670 = vmatmul.f32.gmra.mxu0 %v8820_v57  ;;  %v8787_v42 = vld [vmem:[%s13364_s13 + $0x320] sm:$0xff]  ;;  %v8788_v57 = vld [vmem:[%s13364_s13 + $0x328] sm:$0xff] }
 0x2ff   : > { %2445 = vmatmul.f32.vlgmr.msrb.gmra.mxu2 %v8783_v48 }
 0x300   : > { %v2242_v7 = vpop.f32.mrf.mxu0 }
 0x301   : > { %8771 = vmatmul.msk.f32.gmra.mxu1 %vm1314_vm1, %v2242_v7  ;;  %v8789_v7 = vld [vmem:[%s13364_s13 + $0x330] sm:$0xff] }
 0x302   : > { %v2014_v52 = vpop.f32.mrf.mxu2 }
 0x303   : > { %8733 = vmatmul.msk.f32.vlgmr.msra.gmra.mxu3 %vm1314_vm1, %v2014_v52  ;;  %2673 = vmatmul.f32.gmra.mxu0 %v8821_v9 }
 0x306   : > { %v1700_v1 = vpop.f32.mrf.mxu3  ;;  %v1931_v11 = vpop.f32.mrf.mxu1 }
 0x307   : > { %v1748_v60 = vadd.f32 %v1700_v1, %v1501_v58  ;;  %2448 = vmatmul.f32.gmra.mxu2 %v8784_v0 }
 0x308   : > { %v2245_v19 = vpop.f32.mrf.mxu0 }
 0x309   : > { %v10799_v5 = vadd.f32 %v1916_v13, %v1748_v60  ;;  %8772 = vmatmul.msk.f32.gmra.mxu1 %vm1314_vm1, %v2245_v19 }
 0x30a   : > { %v2017_v61 = vpop.f32.mrf.mxu2 }
 0x30b   : > { %8734 = vmatmul.msk.f32.gmra.mxu3 %vm1314_vm1, %v2017_v61  ;;  %2676 = vmatmul.f32.gmra.mxu0 %v8822_v15  ;;  %v8825_v61 = vld [vmem:[%s13364_s13 + $0x3c0] sm:$0xff] }
 0x30e   : > { %v1703_v16 = vpop.f32.mrf.mxu3  ;;  %v1934_v28 = vpop.f32.mrf.mxu1 }
 0x30f   : > { %v1749_v10 = vadd.f32 %v1703_v16, %v1504_v38  ;;  %2451 = vmatmul.f32.gmra.mxu2 %v8785_v63 }
 0x310   : > { %v2248_v33 = vpop.f32.mrf.mxu0 }
 0x311   : > { %v10807_v13 = vadd.f32 %v1919_v27, %v1749_v10  ;;  %8773 = vmatmul.msk.f32.gmra.mxu1 %vm1314_vm1, %v2248_v33  ;;  %v8826_v10 = vld [vmem:[%s13364_s13 + $0x3c8] sm:$0xff] }
 0x312   : > { %v2020_v14 = vpop.f32.mrf.mxu2 }
 0x313   : > { %8735 = vmatmul.msk.f32.gmra.mxu3 %vm1314_vm1, %v2020_v14  ;;  %2679 = vmatmul.f32.gmra.mxu0 %v8823_v36  ;;  %v8790_v14 = vld [vmem:[%s13364_s13 + $0x338] sm:$0xff] }
 0x316   : > { %v1706_v21 = vpop.f32.mrf.mxu3  ;;  %v1937_v45 = vpop.f32.mrf.mxu1 }
 0x317   : > { %v1750_v24 = vadd.f32 %v1706_v21, %v1507_v41  ;;  %2454 = vmatmul.f32.gmra.mxu2 %v8786_v20  ;;  %v8827_v21 = vld [vmem:[%s13364_s13 + $0x3d0] sm:$0xff] }
 0x318   : > { %v2251_v52 = vpop.f32.mrf.mxu0 }
 0x319   : > { %v10815_v27 = vadd.f32 %v1922_v37, %v1750_v24  ;;  %8774 = vmatmul.msk.f32.gmra.mxu1 %vm1314_vm1, %v2251_v52  ;;  %v8791_v24 = vld [vmem:[%s13364_s13 + $0x340] sm:$0xff] }
 0x31a   : > { %v2023_v29 = vpop.f32.mrf.mxu2 }
 0x31b   : > { %8736 = vmatmul.msk.f32.gmra.mxu3 %vm1314_vm1, %v2023_v29  ;;  %2682 = vmatmul.f32.gmra.mxu0 %v8824_v55 }
 0x31e   : > { %v1709_v25 = vpop.f32.mrf.mxu3  ;;  %v1940_v58 = vpop.f32.mrf.mxu1 }
 0x31f   : > { %v1751_v43 = vadd.f32 %v1709_v25, %v1510_v44  ;;  %2457 = vmatmul.f32.gmra.mxu2 %v8787_v42  ;;  %v8799_v42 = vld [vmem:[%s10161_s30 + $0xc] sm:$0x3]  ;;  %v8828_v44 = vld [vmem:[%s13364_s13 + $0x3d8] sm:$0xff] }
 0x320   : > { %v2254_v60 = vpop.f32.mrf.mxu0  ;;  %v8792_v25 = vld [vmem:[%s13364_s13 + $0x348] sm:$0xff]  ;;  %8800 = vmatpush.msk.msrb.mxu3 %vm1363_vm0, %v8799_v42 }
 0x321   : > { %v10823_v37 = vadd.f32 %v1925_v51, %v1751_v43  ;;  %8775 = vmatmul.msk.f32.gmra.mxu1 %vm1314_vm1, %v2254_v60 }
 0x322   : > { %v2026_v48 = vpop.f32.mrf.mxu2 }
 0x323   : > { %8737 = vmatmul.msk.f32.gmra.mxu3 %vm1314_vm1, %v2026_v48  ;;  %2685 = vmatmul.f32.gmra.mxu0 %v8825_v61  ;;  %v8830_v61 = vld [vmem:[%s13364_s13 + $0x3e8] sm:$0xff] }
 0x326   : > { %v1712_v30 = vpop.f32.mrf.mxu3 }
 0x327   : > { %v1752_v0 = vadd.f32 %v1712_v30, %v1513_v47  ;;  %2460 = vmatmul.f32.gmra.mxu2 %v8788_v57  ;;  %v8829_v57 = vld [vmem:[%s13364_s13 + $0x3e0] sm:$0xff]  ;;  %v8793_v47 = vld [vmem:[%s13364_s13 + $0x350] sm:$0xff] }
 0x328   : > { %v2257_v16 = vpop.f32.mrf.mxu0 }
 0x329   : > { %v10831_v51 = vadd.f32 %v1928_v4, %v1752_v0  ;;  %v1943_v4 = vpop.f32.mrf.mxu1  ;;  %8776 = vmatmul.msk.f32.gmra.mxu1 %vm1314_vm1, %v2257_v16  ;;  %v8831_v16 = vld [vmem:[%s13364_s13 + $0x3f0] sm:$0xff] }
 0x32a   : > { %v2029_v1 = vpop.f32.mrf.mxu2 }
 0x32b   : > { %8738 = vmatmul.msk.f32.gmra.mxu3 %vm1314_vm1, %v2029_v1  ;;  %2688 = vmatmul.f32.gmra.mxu0 %v8826_v10  ;;  %v8795_v10 = vld [vmem:[%s13364_s13 + $0x360] sm:$0xff] }
 0x32e   : > { %v1715_v2 = vpop.f32.mrf.mxu3 }
 0x32f   : > { %v1753_v9 = vadd.f32 %v1715_v2, %v1516_v50  ;;  %2463 = vmatmul.f32.gmra.mxu2 %v8789_v7  ;;  %v8794_v7 = vld [vmem:[%s13364_s13 + $0x358] sm:$0xff] }
 0x330   : > { %v2260_v20 = vpop.f32.mrf.mxu0 }
 0x331   : > { %v10839_v63 = vadd.f32 %v1931_v11, %v1753_v9  ;;  %v1946_v41 = vpop.f32.mrf.mxu1  ;;  %8777 = vmatmul.msk.f32.gmra.mxu1 %vm1314_vm1, %v2260_v20  ;;  %v8832_v20 = vld [vmem:[%s13364_s13 + $0x3f8] sm:$0xff] }
 0x332   : > { %v2032_v38 = vpop.f32.mrf.mxu2 }
 0x333   : > { %8739 = vmatmul.msk.f32.gmra.mxu3 %vm1314_vm1, %v2032_v38  ;;  %2691 = vmatmul.f32.gmra.mxu0 %v8827_v21 }
 0x336   : > { %v1718_v6 = vpop.f32.mrf.mxu3 }
 0x337   : > { %v1754_v19 = vadd.f32 %v1718_v6, %v1519_v53  ;;  %2466 = vmatmul.f32.gmra.mxu2 %v8790_v14 }
 0x338   : > { %v2263_v36 = vpop.f32.mrf.mxu0 }
 0x339   : > { %v10847_v11 = vadd.f32 %v1934_v28, %v1754_v19  ;;  %8778 = vmatmul.msk.f32.gmra.mxu1 %vm1314_vm1, %v2263_v36  ;;  %v1949_v23 = vpop.f32.mrf.mxu1  ;;  %v1540_v36 = vadd.f32 %v10773_v17, %v10669_v35 }
 0x33a   : > { %v2035_v15 = vpop.f32.mrf.mxu2 }
 0x33b   : > { %8740 = vmatmul.msk.f32.gmra.mxu3 %vm1314_vm1, %v2035_v15  ;;  %2694 = vmatmul.f32.gmra.mxu0 %v8828_v44 }
 0x33e   : > { %v1721_v12 = vpop.f32.mrf.mxu3 }
 0x33f   : > { %v1755_v29 = vadd.f32 %v1721_v12, %v1522_v56  ;;  %2469 = vmatmul.f32.gmra.mxu2 %v8791_v24  ;;  %v8833_v56 = vld [vmem:[%s10161_s30 + $0xe] sm:$0x3] }
 0x340   : > { %v2266_v55 = vpop.f32.mrf.mxu0  ;;  %8834 = vmatpush.msk.msrb.mxu1 %vm1363_vm0, %v8833_v56  ;;  %v8856_v56 = vld [vmem:[%s13364_s13 + $0x428] sm:$0xff] }
 0x341   : > { %v10855_v28 = vadd.f32 %v1937_v45, %v1755_v29  ;;  %8779 = vmatmul.msk.f32.gmra.mxu1 %vm1314_vm1, %v2266_v55  ;;  %v1952_v0 = vpop.f32.mrf.mxu1 }
 0x342   : > { %v2038_v33 = vpop.f32.mrf.mxu2 }
 0x343   : > { %8741 = vmatmul.msk.f32.gmra.mxu3 %vm1314_vm1, %v2038_v33  ;;  %2697 = vmatmul.f32.gmra.mxu0 %v8829_v57  ;;  %v8797_v33 = vld [vmem:[%s13364_s13 + $0x370] sm:$0xff] }
 0x346   : > { %v1724_v43 = vpop.f32.mrf.mxu3 }
 0x347   : > { %v1756_v45 = vadd.f32 %v1724_v43, %v1525_v59  ;;  %2472 = vmatmul.f32.gmra.mxu2 %v8792_v25  ;;  %v1543_v43 = vadd.f32 %v10784_v34, %v10675_v40 }
 0x348   : > { %v2269_v60 = vpop.f32.mrf.mxu0 }
 0x349   : > { %v10865_v48 = vadd.f32 %v1940_v58, %v1756_v45  ;;  %8780 = vmatmul.msk.f32.gmra.mxu1 %vm1314_vm1, %v2269_v60  ;;  %v1955_v9 = vpop.f32.mrf.mxu1  ;;  %v8852_v60 = vld [vmem:[%s13364_s13 + $0x408] sm:$0xff] }
 0x34a   : > { %v2041_v52 = vpop.f32.mrf.mxu2 }
 0x34b   : > { %8742 = vmatmul.msk.f32.gmra.mxu3 %vm1314_vm1, %v2041_v52  ;;  %2700 = vmatmul.f32.gmra.mxu0 %v8830_v61 }
 0x34e   : > { %v1727_v32 = vpop.f32.mrf.mxu3 }
 0x34f   : > { %v1757_v30 = vadd.f32 %v1727_v32, %v1528_v62  ;;  %2475 = vmatmul.f32.gmra.mxu2 %v8793_v47  ;;  %v8851_v47 = vld [vmem:[%s13364_s13 + $0x400] sm:$0xff]  ;;  %v1546_v62 = vadd.f32 %v10791_v49, %v10680_v46 }
 0x350   : > { %v2272_v38 = vpop.f32.mrf.mxu0 }
 0x351   : > { %v10873_v58 = vadd.f32 %v1943_v4, %v1757_v30  ;;  %8781 = vmatmul.msk.f32.gmra.mxu1 %vm1314_vm1, %v2272_v38  ;;  %v1958_v15 = vpop.f32.mrf.mxu1 }
 0x352   : > { %v2044_v1 = vpop.f32.mrf.mxu2 }
 0x353   : > { %8743 = vmatmul.msk.f32.gmra.mxu3 %vm1314_vm1, %v2044_v1  ;;  %2703 = vmatmul.f32.gmra.mxu0 %v8831_v16 }
 0x356   : > { %v1730_v39 = vpop.f32.mrf.mxu3 }
 0x357   : > { %v1758_v50 = vadd.f32 %v1730_v39, %v1531_v18  ;;  %2478 = vmatmul.f32.gmra.mxu2 %v8794_v7 }
 0x358   : > { %v2275_v19 = vpop.f32.mrf.mxu0 }
 0x359   : > { %v10881_v2 = vadd.f32 %v1946_v41, %v1758_v50  ;;  %8782 = vmatmul.msk.f32.gmra.mxu1 %vm1314_vm1, %v2275_v19  ;;  %v8796_v41 = vld [vmem:[%s13364_s13 + $0x368] sm:$0xff]  ;;  %v1961_v31 = vpop.f32.mrf.mxu1  ;;  %v8853_v50 = vld [vmem:[%s13364_s13 + $0x410] sm:$0xff] }
 0x35a   : > { %v2047_v4 = vpop.f32.mrf.mxu2 }
 0x35b   : > { %8744 = vmatmul.msk.f32.gmra.mxu3 %vm1314_vm1, %v2047_v4  ;;  %2706 = vmatmul.f32.gmra.mxu0 %v8832_v20 }
 0x35e   : > { %v1733_v54 = vpop.f32.mrf.mxu3 }
 0x35f   : > { %v1759_v14 = vadd.f32 %v1733_v54, %v1534_v22  ;;  %2481 = vmatmul.f32.gmra.mxu2 %v8795_v10  ;;  %v8854_v10 = vld [vmem:[%s13364_s13 + $0x418] sm:$0xff] }
 0x360   : > { %v2662_v29 = vpop.f32.mrf.mxu0 }
 0x361   : > { %v10889_v53 = vadd.f32 %v1949_v23, %v1759_v14  ;;  %8835 = vmatmul.msk.f32.vlgmr.msrb.gmra.mxu1 %vm1314_vm1, %v2662_v29  ;;  %v8798_v23 = vld [vmem:[%s13364_s13 + $0x378] sm:$0xff]  ;;  %v2348_v35 = vpop.f32.mrf.mxu1 }
 0x362   : > { %v2050_v6 = vpop.f32.mrf.mxu2 }
 0x363   : > { %8745 = vmatmul.msk.f32.gmra.mxu3 %vm1314_vm1, %v2050_v6 }
 0x366   : > { %v1736_v3 = vpop.f32.mrf.mxu3 }
 0x367   : > { %v1760_v21 = vadd.f32 %v1736_v3, %v1537_v26  ;;  %2484 = vmatmul.f32.gmra.mxu2 %v8796_v41 }
 0x368   : > { %v2665_v59 = vpop.f32.mrf.mxu0 }
 0x369   : > { %v10897_v24 = vadd.f32 %v1952_v0, %v1760_v21  ;;  %8836 = vmatmul.msk.f32.gmra.mxu1 %vm1314_vm1, %v2665_v59  ;;  %v2351_v34 = vpop.f32.mrf.mxu1 }
 0x36a   : > { %v2053_v12 = vpop.f32.mrf.mxu2 }
 0x36b   : > { %8746 = vmatmul.msk.f32.gmra.mxu3 %vm1314_vm1, %v2053_v12 }
 0x36e   : > { %v1739_v8 = vpop.f32.mrf.mxu3 }
 0x36f   : > { %v1761_v42 = vadd.f32 %v1739_v8, %v1540_v36  ;;  %2487 = vmatmul.f32.gmra.mxu2 %v8797_v33  ;;  %v8857_v8 = vld [vmem:[%s13364_s13 + $0x430] sm:$0xff] }
 0x370   : > { %v2668_v57 = vpop.f32.mrf.mxu0 }
 0x371   : > { %v10906_v44 = vadd.f32 %v1955_v9, %v1761_v42  ;;  %8837 = vmatmul.msk.f32.gmra.mxu1 %vm1314_vm1, %v2668_v57  ;;  %v2354_v39 = vpop.f32.mrf.mxu1 }
 0x372   : > { %v2056_v25 = vpop.f32.mrf.mxu2 }
 0x373   : > { %8747 = vmatmul.msk.f32.gmra.mxu3 %vm1314_vm1, %v2056_v25 }
 0x376   : > { %v1742_v45 = vpop.f32.mrf.mxu3 }
 0x377   : > { %v1762_v52 = vadd.f32 %v1742_v45, %v1543_v43  ;;  %2490 = vmatmul.f32.gmra.mxu2 %v8798_v23  ;;  %v8858_v43 = vld [vmem:[%s13364_s13 + $0x438] sm:$0xff] }
 0x378   : > { %v2671_v1 = vpop.f32.mrf.mxu0 }
 0x379   : > { %v10913_v17 = vadd.f32 %v1958_v15, %v1762_v52  ;;  %8838 = vmatmul.msk.f32.gmra.mxu1 %vm1314_vm1, %v2671_v1  ;;  %v2357_v22 = vpop.f32.mrf.mxu1  ;;  %v8855_v15 = vld [vmem:[%s13364_s13 + $0x420] sm:$0xff]  ;;  %v8867_v1 = vld [vmem:[%s10161_s30 + $0x10] sm:$0x3] }
 0x37a   : > { %v2059_v55 = vpop.f32.mrf.mxu2  ;;  %8868 = vmatpush.msk.msra.mxu3 %vm1363_vm0, %v8867_v1 }
 0x37b   : > { %8748 = vmatmul.msk.f32.gmra.mxu3 %vm1314_vm1, %v2059_v55 }
 0x37e   : > { %v1745_v32 = vpop.f32.mrf.mxu3 }
 0x37f   : > { %v1763_v30 = vadd.f32 %v1745_v32, %v1546_v62  ;;  %2877 = vmatmul.f32.vlgmr.msra.gmra.mxu2 %v8851_v47  ;;  %v8859_v47 = vld [vmem:[%s13364_s13 + $0x440] sm:$0xff] }
 0x380   : > { %v2674_v18 = vpop.f32.mrf.mxu0 }
 0x381   : > { %v10920_v40 = vadd.f32 %v1961_v31, %v1763_v30  ;;  %8839 = vmatmul.msk.f32.gmra.mxu1 %vm1314_vm1, %v2674_v18  ;;  %v2360_v26 = vpop.f32.mrf.mxu1  ;;  %v8861_v18 = vld [vmem:[%s13364_s13 + $0x450] sm:$0xff] }
 0x382   : > { %v2446_v0 = vpop.f32.mrf.mxu2 }
 0x383   : > { %8801 = vmatmul.msk.f32.vlgmr.msrb.gmra.mxu3 %vm1314_vm1, %v2446_v0 }
 0x386   : > { %v2132_v61 = vpop.f32.mrf.mxu3 }
 0x387   : > { %v2180_v7 = vadd.f32 %v2132_v61, %v10799_v5  ;;  %2880 = vmatmul.f32.gmra.mxu2 %v8852_v60  ;;  %v8860_v60 = vld [vmem:[%s13364_s13 + $0x448] sm:$0xff] }
 0x388   : > { %v2677_v16 = vpop.f32.mrf.mxu0 }
 0x389   : > { %v10926_v46 = vadd.f32 %v2348_v35, %v2180_v7  ;;  %8840 = vmatmul.msk.f32.gmra.mxu1 %vm1314_vm1, %v2677_v16 }
 0x38a   : > { %v2449_v49 = vpop.f32.mrf.mxu2 }
 0x38b   : > { %8802 = vmatmul.msk.f32.gmra.mxu3 %vm1314_vm1, %v2449_v49 }
 0x38e   : > { %v2135_v9 = vpop.f32.mrf.mxu3 }
 0x38f   : > { %v2181_v4 = vadd.f32 %v2135_v9, %v10807_v13  ;;  %2883 = vmatmul.f32.gmra.mxu2 %v8853_v50 }
 0x390   : > { %v2680_v19 = vpop.f32.mrf.mxu0 }
 0x391   : > { %v10932_v38 = vadd.f32 %v2351_v34, %v2181_v4  ;;  %8841 = vmatmul.msk.f32.gmra.mxu1 %vm1314_vm1, %v2680_v19 }
 0x392   : > { %v2452_v5 = vpop.f32.mrf.mxu2 }
 0x393   : > { %8803 = vmatmul.msk.f32.gmra.mxu3 %vm1314_vm1, %v2452_v5 }
 0x396   : > { %v2138_v54 = vpop.f32.mrf.mxu3 }
 0x397   : > { %v2182_v14 = vadd.f32 %v2138_v54, %v10815_v27  ;;  %2886 = vmatmul.f32.gmra.mxu2 %v8854_v10 }
 0x398   : > { %v2683_v21 = vpop.f32.mrf.mxu0 }
 0x399   : > { %v10938_v6 = vadd.f32 %v2354_v39, %v2182_v14  ;;  %8842 = vmatmul.msk.f32.gmra.mxu1 %vm1314_vm1, %v2683_v21 }
 0x39a   : > { %v2455_v13 = vpop.f32.mrf.mxu2 }
 0x39b   : > { %8804 = vmatmul.msk.f32.gmra.mxu3 %vm1314_vm1, %v2455_v13 }
 0x39e   : > { %v2141_v20 = vpop.f32.mrf.mxu3 }
 0x39f   : > { %v2183_v41 = vadd.f32 %v2141_v20, %v10823_v37  ;;  %2889 = vmatmul.f32.gmra.mxu2 %v8855_v15  ;;  %v2363_v37 = vpop.f32.mrf.mxu1 }
 0x3a0   : > { %v2686_v31 = vpop.f32.mrf.mxu0 }
 0x3a1   : > { %v10944_v3 = vadd.f32 %v2357_v22, %v2183_v41  ;;  %8843 = vmatmul.msk.f32.gmra.mxu1 %vm1314_vm1, %v2686_v31 }
 0x3a2   : > { %v2458_v27 = vpop.f32.mrf.mxu2 }
 0x3a3   : > { %8805 = vmatmul.msk.f32.gmra.mxu3 %vm1314_vm1, %v2458_v27 }
 0x3a6   : > { %v2144_v12 = vpop.f32.mrf.mxu3 }
 0x3a7   : > { %v2184_v29 = vadd.f32 %v2144_v12, %v10831_v51  ;;  %2892 = vmatmul.f32.gmra.mxu2 %v8856_v56  ;;  %v2366_v45 = vpop.f32.mrf.mxu1  ;;  %v8866_v56 = vld [vmem:[%s13364_s13 + $0x478] sm:$0xff] }
 0x3a8   : > { %v2689_v23 = vpop.f32.mrf.mxu0 }
 0x3a9   : > { %v10950_v33 = vadd.f32 %v2360_v26, %v2184_v29  ;;  %8844 = vmatmul.msk.f32.gmra.mxu1 %vm1314_vm1, %v2689_v23  ;;  %v8865_v26 = vld [vmem:[%s13364_s13 + $0x470] sm:$0xff] }
 0x3aa   : > { %v2461_v36 = vpop.f32.mrf.mxu2 }
 0x3ab   : > { %8806 = vmatmul.msk.f32.gmra.mxu3 %vm1314_vm1, %v2461_v36 }
 0x3ae   : > { %v2147_v42 = vpop.f32.mrf.mxu3 }
 0x3af   : > { %v2185_v25 = vadd.f32 %v2147_v42, %v10839_v63  ;;  %2895 = vmatmul.f32.gmra.mxu2 %v8857_v8  ;;  %v2369_v32 = vpop.f32.mrf.mxu1 }
 0x3b0   : > { %v2692_v57 = vpop.f32.mrf.mxu0 }
 0x3b1   : > { %v10956_v59 = vadd.f32 %v2363_v37, %v2185_v25  ;;  %8845 = vmatmul.msk.f32.gmra.mxu1 %vm1314_vm1, %v2692_v57 }
 0x3b2   : > { %v2464_v51 = vpop.f32.mrf.mxu2 }
 0x3b3   : > { %8807 = vmatmul.msk.f32.gmra.mxu3 %vm1314_vm1, %v2464_v51 }
 0x3b6   : > { %v2150_v52 = vpop.f32.mrf.mxu3 }
 0x3b7   : > { %v2186_v35 = vadd.f32 %v2150_v52, %v10847_v11  ;;  %2898 = vmatmul.f32.gmra.mxu2 %v8858_v43  ;;  %v11025_v23 = vpop.f32.mrf.mxu1 }
 0x3b8   : > { %v2695_v0 = vpop.f32.mrf.mxu0 }
 0x3b9   : > { %v10962_v55 = vadd.f32 %v2366_v45, %v2186_v35  ;;  %8846 = vmatmul.msk.f32.gmra.mxu1 %vm1314_vm1, %v2695_v0 }
 0x3ba   : > { %v2467_v63 = vpop.f32.mrf.mxu2 }
 0x3bb   : > { %8808 = vmatmul.msk.f32.gmra.mxu3 %vm1314_vm1, %v2467_v63 }
 0x3be   : > { %v2153_v62 = vpop.f32.mrf.mxu3 }
 0x3bf   : > { %v2187_v30 = vadd.f32 %v2153_v62, %v10855_v28  ;;  %2901 = vmatmul.f32.gmra.mxu2 %v8859_v47 }
 0x3c0   : > { %v2698_v49 = vpop.f32.mrf.mxu0 }
 0x3c1   : > { %v10968_v34 = vadd.f32 %v2369_v32, %v2187_v30  ;;  %8847 = vmatmul.msk.f32.gmra.mxu1 %vm1314_vm1, %v2698_v49 }
 0x3c2   : > { %v2470_v11 = vpop.f32.mrf.mxu2 }
 0x3c3   : > { %8809 = vmatmul.msk.f32.gmra.mxu3 %vm1314_vm1, %v2470_v11 }
 0x3c6   : > { %v2156_v61 = vpop.f32.mrf.mxu3 }
 0x3c7   : > { %v10976_v7 = vadd.f32 %v2156_v61, %v10865_v48  ;;  %2904 = vmatmul.f32.gmra.mxu2 %v8860_v60  ;;  %v8862_v48 = vld [vmem:[%s13364_s13 + $0x458] sm:$0xff] }
 0x3c8   : > { %v2701_v4 = vpop.f32.mrf.mxu0 }
 0x3c9   : > { %8848 = vmatmul.msk.f32.gmra.mxu1 %vm1314_vm1, %v2701_v4 }
 0x3ca   : > { %v2473_v28 = vpop.f32.mrf.mxu2 }
 0x3cb   : > { %8810 = vmatmul.msk.f32.gmra.mxu3 %vm1314_vm1, %v2473_v28 }
 0x3ce   : > { %v2159_v39 = vpop.f32.mrf.mxu3 }
 0x3cf   : > { %v10982_v50 = vadd.f32 %v2159_v39, %v10873_v58  ;;  %2907 = vmatmul.f32.gmra.mxu2 %v8861_v18  ;;  %v8863_v58 = vld [vmem:[%s13364_s13 + $0x460] sm:$0xff] }
 0x3d0   : > { %v2704_v22 = vpop.f32.mrf.mxu0 }
 0x3d1   : > { %8849 = vmatmul.msk.f32.gmra.mxu1 %vm1314_vm1, %v2704_v22 }
 0x3d2   : > { %v2476_v9 = vpop.f32.mrf.mxu2 }
 0x3d3   : > { %8811 = vmatmul.msk.f32.gmra.mxu3 %vm1314_vm1, %v2476_v9 }
 0x3d6   : > { %v2162_v5 = vpop.f32.mrf.mxu3 }
 0x3d7   : > { %v10988_v16 = vadd.f32 %v2162_v5, %v10881_v2  ;;  %2910 = vmatmul.f32.gmra.mxu2 %v8862_v48  ;;  %v8864_v2 = vld [vmem:[%s13364_s13 + $0x468] sm:$0xff] }
 0x3d8   : > { %v2707_v19 = vpop.f32.mrf.mxu0 }
 0x3d9   : > { %8850 = vmatmul.msk.f32.gmra.mxu1 %vm1314_vm1, %v2707_v19 }
 0x3da   : > { %v2479_v10 = vpop.f32.mrf.mxu2 }
 0x3db   : > { %8812 = vmatmul.msk.f32.gmra.mxu3 %vm1314_vm1, %v2479_v10 }
 0x3de   : > { %v2165_v54 = vpop.f32.mrf.mxu3 }
 0x3df   : > { %v10994_v14 = vadd.f32 %v2165_v54, %v10889_v53  ;;  %2913 = vmatmul.f32.gmra.mxu2 %v8863_v58 }
 0x3e2   : > { %v2482_v13 = vpop.f32.mrf.mxu2 }
 0x3e3   : > { %8813 = vmatmul.msk.f32.gmra.mxu3 %vm1314_vm1, %v2482_v13 }
 0x3e6   : > { %v2168_v15 = vpop.f32.mrf.mxu3 }
 0x3e7   : > { %v11000_v20 = vadd.f32 %v2168_v15, %v10897_v24  ;;  %2916 = vmatmul.f32.gmra.mxu2 %v8864_v2 }
 0x3ea   : > { %v2485_v41 = vpop.f32.mrf.mxu2 }
 0x3eb   : > { %8814 = vmatmul.msk.f32.gmra.mxu3 %vm1314_vm1, %v2485_v41 }
 0x3ee   : > { %v2171_v53 = vpop.f32.mrf.mxu3 }
 0x3ef   : > { %v11005_v27 = vadd.f32 %v2171_v53, %v10906_v44  ;;  %2919 = vmatmul.f32.gmra.mxu2 %v8865_v26 }
 0x3f2   : > { %v2488_v21 = vpop.f32.mrf.mxu2 }
 0x3f3   : > { %8815 = vmatmul.msk.f32.gmra.mxu3 %vm1314_vm1, %v2488_v21 }
 0x3f6   : > { %v2174_v12 = vpop.f32.mrf.mxu3 }
 0x3f7   : > { %v11010_v29 = vadd.f32 %v2174_v12, %v10913_v17  ;;  %2922 = vmatmul.f32.gmra.mxu2 %v8866_v56 }
 0x3fa   : > { %v2491_v24 = vpop.f32.mrf.mxu2 }
 0x3fb   : > { %8816 = vmatmul.msk.f32.gmra.mxu3 %vm1314_vm1, %v2491_v24 }
 0x3fe   : > { %v2177_v37 = vpop.f32.mrf.mxu3 }
 0x3ff   : > { %v11014_v36 = vadd.f32 %v2177_v37, %v10920_v40 }
 0x402   : > { %v2878_v31 = vpop.f32.mrf.mxu2 }
 0x403   : > { %8869 = vmatmul.msk.f32.vlgmr.msra.gmra.mxu3 %vm1314_vm1, %v2878_v31 }
 0x406   : > { %v2564_v44 = vpop.f32.mrf.mxu3 }
 0x407   : > { %v11018_v8 = vadd.f32 %v2564_v44, %v10926_v46  ;;  %v11031_v46 = vpop.f32.mrf.mxu1 }
 0x409   : > { %13371 = vst [vmem:[#allocation34_spill] sm:$0xff] %v11018_v8 }
 0x40a   : > { %v2881_v42 = vpop.f32.mrf.mxu2 }
 0x40b   : > { %8870 = vmatmul.msk.f32.gmra.mxu3 %vm1314_vm1, %v2881_v42 }
 0x40e   : > { %v2567_v17 = vpop.f32.mrf.mxu3 }
 0x40f   : > { %v11022_v25 = vadd.f32 %v2567_v17, %v10932_v38  ;;  %v11040_v47 = vpop.f32.mrf.mxu1 }
 0x411   : > { %13372 = vst [vmem:[#allocation35_spill] sm:$0xff] %v11022_v25 }
 0x412   : > { %v2884_v51 = vpop.f32.mrf.mxu2 }
 0x413   : > { %8871 = vmatmul.msk.f32.gmra.mxu3 %vm1314_vm1, %v2884_v51 }
 0x416   : > { %v2570_v40 = vpop.f32.mrf.mxu3 }
 0x417   : > { %v11028_v43 = vadd.f32 %v2570_v40, %v10938_v6  ;;  %v11046_v30 = vpop.f32.mrf.mxu1 }
 0x418   : > { %v2407_v25 = vadd.f32 %v11046_v30, %v10994_v14  ;;  %v2404_v30 = vadd.f32 %v11025_v23, %v10976_v7 }
 0x41a   : > { %v2887_v45 = vpop.f32.mrf.mxu2 }
 0x41b   : > { %8872 = vmatmul.msk.f32.gmra.mxu3 %vm1314_vm1, %v2887_v45 }
 0x41e   : > { %v2573_v52 = vpop.f32.mrf.mxu3 }
 0x41f   : > { %v11034_v35 = vadd.f32 %v2573_v52, %v10944_v3  ;;  %v11053_v1 = vpop.f32.mrf.mxu1 }
 0x422   : > { %v2890_v38 = vpop.f32.mrf.mxu2 }
 0x423   : > { %8873 = vmatmul.msk.f32.gmra.mxu3 %vm1314_vm1, %v2890_v38 }
 0x426   : > { %v2576_v63 = vpop.f32.mrf.mxu3 }
 0x427   : > { %v11038_v57 = vadd.f32 %v2576_v63, %v10950_v33  ;;  %v2387_v28 = vpop.f32.mrf.mxu1 }
 0x42a   : > { %v2893_v6 = vpop.f32.mrf.mxu2 }
 0x42b   : > { %8874 = vmatmul.msk.f32.gmra.mxu3 %vm1314_vm1, %v2893_v6 }
 0x42e   : > { %v2579_v62 = vpop.f32.mrf.mxu3 }
 0x42f   : > { %v11044_v32 = vadd.f32 %v2579_v62, %v10956_v59  ;;  %v2390_v39 = vpop.f32.mrf.mxu1 }
 0x432   : > { %v2896_v3 = vpop.f32.mrf.mxu2 }
 0x433   : > { %8875 = vmatmul.msk.f32.gmra.mxu3 %vm1314_vm1, %v2896_v3 }
 0x436   : > { %v2582_v11 = vpop.f32.mrf.mxu3 }
 0x437   : > { %v11050_v0 = vadd.f32 %v2582_v11, %v10962_v55  ;;  %v2393_v48 = vpop.f32.mrf.mxu1 }
 0x43a   : > { %v2899_v33 = vpop.f32.mrf.mxu2 }
 0x43b   : > { %8876 = vmatmul.msk.f32.gmra.mxu3 %vm1314_vm1, %v2899_v33 }
 0x43e   : > { %v2585_v60 = vpop.f32.mrf.mxu3 }
 0x43f   : > { %v11056_v61 = vadd.f32 %v2585_v60, %v10968_v34  ;;  %v11069_v22 = vpop.f32.mrf.mxu1 }
 0x440   : > { %13373 = vst [vmem:[#allocation36_spill] sm:$0xff] %v11069_v22  ;;  %v2408_v22 = vadd.f32 %v11053_v1, %v11000_v20 }
 0x442   : > { %v2902_v59 = vpop.f32.mrf.mxu2 }
 0x443   : > { %8877 = vmatmul.msk.f32.gmra.mxu3 %vm1314_vm1, %v2902_v59 }
 0x446   : > { %v11059_v49 = vpop.f32.mrf.mxu3 }
 0x447   : > { %v11072_v13 = vpop.f32.mrf.mxu1 }
 0x448   : > { %13374 = vst [vmem:[#allocation37_spill] sm:$0xff] %v11072_v13 }
 0x44a   : > { %v2905_v18 = vpop.f32.mrf.mxu2 }
 0x44b   : > { %8878 = vmatmul.msk.f32.gmra.mxu3 %vm1314_vm1, %v2905_v18 }
 0x44e   : > { %v11062_v55 = vpop.f32.mrf.mxu3 }
 0x44f   : > { %v11075_v41 = vpop.f32.mrf.mxu1 }
 0x450   : > { %13375 = vst [vmem:[#allocation38_spill] sm:$0xff] %v11075_v41 }
 0x452   : > { %v2908_v9 = vpop.f32.mrf.mxu2 }
 0x453   : > { %8879 = vmatmul.msk.f32.gmra.mxu3 %vm1314_vm1, %v2908_v9 }
 0x456   : > { %v11065_v4 = vpop.f32.mrf.mxu3 }
 0x457   : > { %v11078_v21 = vpop.f32.mrf.mxu1 }
 0x45a   : > { %v2911_v34 = vpop.f32.mrf.mxu2 }
 0x45b   : > { %8880 = vmatmul.msk.f32.gmra.mxu3 %vm1314_vm1, %v2911_v34 }
 0x45e   : > { %v2597_v5 = vpop.f32.mrf.mxu3 }
 0x45f   : > { %v11082_v12 = vpop.f32.mrf.mxu1 }
 0x462   : > { %v2914_v10 = vpop.f32.mrf.mxu2 }
 0x463   : > { %8881 = vmatmul.msk.f32.gmra.mxu3 %vm1314_vm1, %v2914_v10 }
 0x466   : > { %v2600_v58 = vpop.f32.mrf.mxu3 }
 0x467   : > { %v11086_v37 = vpop.f32.mrf.mxu1 }
 0x46a   : > { %v2917_v54 = vpop.f32.mrf.mxu2 }
 0x46b   : > { %8882 = vmatmul.msk.f32.gmra.mxu3 %vm1314_vm1, %v2917_v54  ;;  %v2410_v54 = vadd.f32 %v2390_v39, %v11010_v29  ;;  %v2406_v29 = vadd.f32 %v11040_v47, %v10988_v16  ;;  %v2623_v39 = vadd.f32 %v2597_v5, %v2407_v25 }
 0x46d   : > { %v2622_v1 = vadd.f32 %v11065_v4, %v2406_v29 }
 0x46e   : > { %v2603_v19 = vpop.f32.mrf.mxu3 }
 0x46f   : > { %v11092_v42 = vpop.f32.mrf.mxu1 }
 0x472   : > { %v2920_v2 = vpop.f32.mrf.mxu2 }
 0x473   : > { %8883 = vmatmul.msk.f32.gmra.mxu3 %vm1314_vm1, %v2920_v2 }
 0x476   : > { %v2606_v15 = vpop.f32.mrf.mxu3 }
 0x477   : > { %v11096_v51 = vpop.f32.mrf.mxu1 }
 0x47a   : > { %v2923_v26 = vpop.f32.mrf.mxu2 }
 0x47b   : > { %8884 = vmatmul.msk.f32.gmra.mxu3 %vm1314_vm1, %v2923_v26  ;;  %v2409_v26 = vadd.f32 %v2387_v28, %v11005_v27 }
 0x47d   : > { %v2625_v8 = vadd.f32 %v2603_v19, %v2409_v26 }
 0x47e   : > { %v2609_v53 = vpop.f32.mrf.mxu3 }
 0x47f   : > { %v2804_v45 = vpop.f32.mrf.mxu1 }
 0x486   : > { %v11080_v56 = vpop.f32.mrf.mxu3 }
 0x487   : > { %13376 = vst [vmem:[#allocation39_spill] sm:$0xff] %v11080_v56  ;;  %v2807_v38 = vpop.f32.mrf.mxu1  ;;  %v2411_v56 = vadd.f32 %v2393_v48, %v11014_v36  ;;  %v2405_v48 = vadd.f32 %v11031_v46, %v10982_v50  ;;  %v2620_v50 = vadd.f32 %v11059_v49, %v2404_v30 }
 0x489   : > { %v2621_v16 = vadd.f32 %v11062_v55, %v2405_v48  ;;  %v2836_v55 = vadd.f32 %v2804_v45, %v2620_v50  ;;  %v2834_v45 = vadd.f32 %v11092_v42, %v11050_v0  ;;  %v2832_v0 = vadd.f32 %v11082_v12, %v11038_v57  ;;  %v13381_v57 = vld [vmem:[#allocation38_spill] sm:$0xff] }
 0x48a   : > { %v2830_v12 = vadd.f32 %v13381_v57, %v11028_v43  ;;  %v13386_v43 = vld [vmem:[#allocation34_spill] sm:$0xff] }
 0x48b   : > { %v3096_v50 = vld [vmem:[%s10131_s29] sm:$0xff] }
 0x48e   : > { %v11084_v24 = vpop.f32.mrf.mxu3 }
 0x48f   : > { %13377 = vst [vmem:[#allocation40_spill] sm:$0xff] %v11084_v24  ;;  %v2810_v62 = vpop.f32.mrf.mxu1  ;;  %v2626_v24 = vadd.f32 %v2606_v15, %v2410_v54  ;;  %v11117_v15 = vld [vmem:[%s13380_s6] ss:$0 sm:$0xff]  ;;  %s13400_s6 = sld [smem:[#allocation27_spill]] }
 0x490   : > { %v2838_v46 = vadd.f32 %v2810_v62, %v2622_v1  ;;  %v13389_v1 = vld [vmem:[#allocation39_spill] sm:$0xff] }
 0x496   : > { %v11088_v31 = vpop.f32.mrf.mxu3 }
 0x497   : > { %13378 = vst [vmem:[#allocation41_spill] sm:$0xff] %v11088_v31  ;;  %v2813_v11 = vpop.f32.mrf.mxu1  ;;  %v2627_v31 = vadd.f32 %v2609_v53, %v2411_v56 }
 0x498   : > { %v2839_v25 = vadd.f32 %v2813_v11, %v2623_v39  ;;  %v13387_v39 = vld [vmem:[#allocation36_spill] sm:$0xff] }
 0x49e   : > { %v11090_v44 = vpop.f32.mrf.mxu3  ;;  %v13385_v54 = vld [vmem:[#allocation41_spill] sm:$0xff] }
 0x49f   : > { %13379 = vst [vmem:[#allocation42_spill] sm:$0xff] %v11090_v44  ;;  %v2816_v60 = vpop.f32.mrf.mxu1  ;;  %v2624_v44 = vadd.f32 %v2600_v58, %v2408_v22 }
 0x4a1   : > { %v2840_v19 = vadd.f32 %v2816_v60, %v2624_v44 }
 0x4a6   : > { %v11094_v17 = vpop.f32.mrf.mxu3 }
 0x4a7   : > { %v2819_v18 = vpop.f32.mrf.mxu1 }
 0x4a8   : > { %v2841_v27 = vadd.f32 %v2819_v18, %v2625_v8 }
 0x4ae   : > { %v11098_v40 = vpop.f32.mrf.mxu3 }
 0x4af   : > { %v2822_v10 = vpop.f32.mrf.mxu1 }
 0x4b0   : > { %v2842_v41 = vadd.f32 %v2822_v10, %v2626_v24 }
 0x4b6   : > { %v11100_v52 = vpop.f32.mrf.mxu3 }
 0x4b7   : > { %v2825_v13 = vpop.f32.mrf.mxu1 }
 0x4b8   : > { %v2843_v28 = vadd.f32 %v2825_v13, %v2627_v31  ;;  %v2837_v13 = vadd.f32 %v2807_v38, %v2621_v16  ;;  %v2835_v31 = vadd.f32 %v11096_v51, %v11056_v61  ;;  %v2833_v61 = vadd.f32 %v11086_v37, %v11044_v32 }
 0x4b9   : > { %v3050_v51 = vadd.f32 %v11100_v52, %v2834_v45  ;;  %v2831_v32 = vadd.f32 %v11078_v21, %v11034_v35  ;;  %v3048_v37 = vadd.f32 %v11094_v17, %v2832_v0  ;;  %v13383_v35 = vld [vmem:[#allocation35_spill] sm:$0xff]  ;;  %v13384_v21 = vld [vmem:[#allocation37_spill] sm:$0xff] }
 0x4ba   : > { %v3049_v42 = vadd.f32 %v11098_v40, %v2833_v61  ;;  %v13382_v40 = vld [vmem:[#allocation42_spill] sm:$0xff]  ;;  %v2829_v17 = vadd.f32 %v13384_v21, %v13383_v35 }
 0x4bb   : > { %v3070_v52 = vadd.f32 %v11117_v15, %v3050_v51  ;;  %v3068_v26 = vadd.f32 %v11117_v15, %v3048_v37 }
 0x4bd   : > { %v3086_v29 = vmax.f32 %v3070_v52, 0.0 }
 0x4be   : > { %v11102_v63 = vpop.f32.mrf.mxu3 }
 0x4c6   : > { %v3020_v6 = vpop.f32.mrf.mxu3 }
 0x4c7   : > { %v3052_v44 = vadd.f32 %v3020_v6, %v2836_v55  ;;  %v8890_v55 = vld [vmem:[%s10131_s29 + $0x48] sm:$0xff] }
 0x4c9   : > { %v3072_v6 = vadd.f32 %v11117_v15, %v3052_v44  ;;  %v8896_v44 = vld [vmem:[%s10131_s29 + $0x78] sm:$0xff] }
 0x4cb   : > { %v11173_v18 = vmax.f32 %v3072_v6, 0.0 }
 0x4ce   : > { %v3023_v3 = vpop.f32.mrf.mxu3 }
 0x4cf   : > { %v3053_v56 = vadd.f32 %v3023_v3, %v2837_v13  ;;  %v3051_v3 = vadd.f32 %v11102_v63, %v2835_v31  ;;  %v3099_v13 = vld [vmem:[%s10131_s29 + $0x18] sm:$0xff] }
 0x4d0   : > { %v8892_v31 = vld [vmem:[%s10131_s29 + $0x58] sm:$0xff] }
 0x4d1   : > { %v3073_v11 = vadd.f32 %v11117_v15, %v3053_v56  ;;  %v3071_v63 = vadd.f32 %v11117_v15, %v3051_v3  ;;  %v8894_v56 = vld [vmem:[%s10131_s29 + $0x68] sm:$0xff] }
 0x4d3   : > { %v11181_v10 = vmax.f32 %v3071_v63, 0.0 }
 0x4d6   : > { %v3026_v33 = vpop.f32.mrf.mxu3 }
 0x4de   : > { %v3029_v59 = vpop.f32.mrf.mxu3 }
 0x4df   : > { %v3055_v4 = vadd.f32 %v3029_v59, %v2839_v25  ;;  %v11165_v59 = vmax.f32 %v3073_v11, 0.0 }
 0x4e1   : > { %v3075_v49 = vadd.f32 %v11117_v15, %v3055_v4  ;;  %v8886_v4 = vld [vmem:[%s10131_s29 + $0x28] sm:$0xff] }
 0x4e6   : > { %v3032_v9 = vpop.f32.mrf.mxu3 }
 0x4e7   : > { %v3056_v8 = vadd.f32 %v3032_v9, %v2840_v19  ;;  %v3047_v9 = vadd.f32 %v13382_v40, %v2831_v32 }
 0x4e9   : > { %v3076_v7 = vadd.f32 %v11117_v15, %v3056_v8  ;;  %v3067_v48 = vadd.f32 %v11117_v15, %v3047_v9 }
 0x4eb   : > { %v11141_v62 = vmax.f32 %v3076_v7, 0.0  ;;  %v3083_v16 = vmax.f32 %v3067_v48, 0.0  ;;  %v8889_v7 = vld [vmem:[%s10131_s29 + $0x40] sm:$0xff]  ;;  %v3290_v48 = vld [vmem:[%s13365_s12 + $0x8] sm:$0xff] }
 0x4ee   : > { %v3035_v34 = vpop.f32.mrf.mxu3 }
 0x4ef   : > { %v3057_v53 = vadd.f32 %v3035_v34, %v2841_v27  ;;  %v3069_v34 = vadd.f32 %v11117_v15, %v3049_v42  ;;  %v2828_v27 = vadd.f32 %v13387_v39, %v13386_v43  ;;  %v3292_v43 = vld [vmem:[%s13365_s12 + $0x18] sm:$0xff]  ;;  %v8911_v39 = vld [vmem:[%s13365_s12 + $0x30] sm:$0xff] }
 0x4f1   : > { %v3077_v22 = vadd.f32 %v11117_v15, %v3057_v53  ;;  %v3044_v19 = vadd.f32 %v13389_v1, %v2828_v27  ;;  %v8953_v27 = vld [vmem:[%s10116_s17 + $0x80] sm:$0xff]  ;;  %v3244_v1 = vld [vmem:[%s10116_s17 + $0x8] sm:$0xff] }
 0x4f3   : > { %v11134_v24 = vmax.f32 %v3077_v22, 0.0  ;;  %v3064_v25 = vadd.f32 %v11117_v15, %v3044_v19  ;;  %v3098_v22 = vld [vmem:[%s10131_s29 + $0x10] sm:$0xff]  ;;  %v8902_v19 = vld [vmem:[%s10116_s17 + $0x28] sm:$0xff] }
 0x4f6   : > { %v3038_v2 = vpop.f32.mrf.mxu3 }
 0x4f7   : > { %v3058_v36 = vadd.f32 %v3038_v2, %v2842_v41  ;;  %v3054_v41 = vadd.f32 %v3026_v33, %v2838_v46  ;;  %v11149_v33 = vmax.f32 %v3075_v49, 0.0  ;;  %v3046_v2 = vadd.f32 %v13385_v54, %v2830_v12  ;;  %v8885_v46 = vld [vmem:[%s10131_s29 + $0x20] sm:$0xff]  ;;  %v8891_v49 = vld [vmem:[%s10131_s29 + $0x50] sm:$0xff] }
 0x4f9   : > { %v3078_v47 = vadd.f32 %v11117_v15, %v3058_v36  ;;  %v3074_v38 = vadd.f32 %v11117_v15, %v3054_v41  ;;  %v3066_v53 = vadd.f32 %v11117_v15, %v3046_v2  ;;  %v8888_v41 = vld [vmem:[%s10131_s29 + $0x38] sm:$0xff]  ;;  %v3243_v2 = vld [vmem:[%s10116_s17] sm:$0xff] }
 0x4fb   : > { %v11129_v23 = vmax.f32 %v3078_v47, 0.0  ;;  %v11157_v60 = vmax.f32 %v3074_v38, 0.0  ;;  %v3082_v8 = vmax.f32 %v3066_v53, 0.0  ;;  %v3245_v53 = vld [vmem:[%s10116_s17 + $0x10] sm:$0xff] }
 0x4fe   : > { %v3041_v20 = vpop.f32.mrf.mxu3 }
 0x4ff   : > { %v3059_v14 = vadd.f32 %v3041_v20, %v2843_v28  ;;  %v13388_v28 = vld [vmem:[#allocation40_spill] sm:$0xff]  ;;  %v3085_v20 = vmax.f32 %v3069_v34, 0.0 }
 0x500   : > { %v3045_v36 = vadd.f32 %v13388_v28, %v2829_v17  ;;  %v3291_v28 = vld [vmem:[%s13365_s12 + $0x10] sm:$0xff] }
 0x501   : > { %v3079_v5 = vadd.f32 %v11117_v15, %v3059_v14  ;;  %v3084_v14 = vmax.f32 %v3068_v26, 0.0  ;;  %v8901_v26 = vld [vmem:[%s10116_s17 + $0x20] sm:$0xff] }
 0x502   : > { %v3065_v30 = vadd.f32 %v11117_v15, %v3045_v36  ;;  %v3097_v15 = vld [vmem:[%s10131_s29 + $0x8] sm:$0xff] }
 0x503   : > { %v11126_v58 = vmax.f32 %v3079_v5, 0.0  ;;  %v3080_v5 = vmax.f32 %v3064_v25, 0.0  ;;  %v8910_v36 = vld [vmem:[%s13365_s12 + $0x28] sm:$0xff]  ;;  %v3289_v25 = vld [vmem:[%s13365_s12] sm:$0xff] }
 0x504   : > { %v3081_v47 = vmax.f32 %v3065_v30, 0.0  ;;  %v3246_v30 = vld [vmem:[%s10116_s17 + $0x18] sm:$0xff] }
 0x505   : > { %3100 = vmatpush.msra.mxu0 %v11126_v58  ;;  %3134 = vmatpush.msra.mxu1 %v11126_v58 }
 0x507   : > { %3101 = vmatpush.msra.mxu0 %v11129_v23  ;;  %3135 = vmatpush.msra.mxu1 %v11129_v23 }
 0x509   : > { %3102 = vmatpush.msra.mxu0 %v11134_v24  ;;  %3136 = vmatpush.msra.mxu1 %v11134_v24 }
 0x50b   : > { %3103 = vmatpush.msra.mxu0 %v11141_v62  ;;  %3137 = vmatpush.msra.mxu1 %v11141_v62 }
 0x50d   : > { %3104 = vmatpush.msra.mxu0 %v11149_v33  ;;  %3138 = vmatpush.msra.mxu1 %v11149_v33 }
 0x50f   : > { %3105 = vmatpush.msra.mxu0 %v11157_v60  ;;  %3139 = vmatpush.msra.mxu1 %v11157_v60 }
 0x511   : > { %3106 = vmatpush.msra.mxu0 %v11165_v59  ;;  %3140 = vmatpush.msra.mxu1 %v11165_v59 }
 0x513   : > { %3107 = vmatpush.msra.mxu0 %v11173_v18  ;;  %3141 = vmatpush.msra.mxu1 %v11173_v18 }
 0x515   : > { %3108 = vmatpush.msra.mxu0 %v11181_v10  ;;  %3142 = vmatpush.msra.mxu1 %v11181_v10 }
 0x517   : > { %3109 = vmatpush.msra.mxu0 %v3086_v29  ;;  %3143 = vmatpush.msra.mxu1 %v3086_v29 }
 0x519   : > { %3110 = vmatpush.msra.mxu0 %v3085_v20  ;;  %3144 = vmatpush.msra.mxu1 %v3085_v20 }
 0x51b   : > { %3111 = vmatpush.msra.mxu0 %v3084_v14  ;;  %3145 = vmatpush.msra.mxu1 %v3084_v14 }
 0x51d   : > { %3112 = vmatpush.msra.mxu0 %v3083_v16  ;;  %3146 = vmatpush.msra.mxu1 %v3083_v16 }
 0x51f   : > { %3113 = vmatpush.msra.mxu0 %v3082_v8  ;;  %3147 = vmatpush.msra.mxu1 %v3082_v8 }
 0x521   : > { %3114 = vmatpush.msra.mxu0 %v3081_v47  ;;  %3148 = vmatpush.msra.mxu1 %v3081_v47 }
 0x523   : > { %3115 = vmatpush.msra.mxu0 %v3080_v5  ;;  %3149 = vmatpush.msra.mxu1 %v3080_v5 }
 0x524   : > { %3116 = vmatmul.f32.vlgmr.msra.gmra.mxu0 %v3096_v50  ;;  %3150 = vmatmul.f32.vlgmr.msra.gmra.mxu1 %v8885_v46 }
 0x525   : > { %3172 = vmatpush.msrb.mxu0 %v11126_v58  ;;  %3210 = vmatpush.msrb.mxu1 %v11126_v58  ;;  %v8887_v58 = vld [vmem:[%s10131_s29 + $0x30] sm:$0xff] }
 0x527   : > { %3173 = vmatpush.msrb.mxu0 %v11129_v23  ;;  %3211 = vmatpush.msrb.mxu1 %v11129_v23  ;;  %v8893_v23 = vld [vmem:[%s10131_s29 + $0x60] sm:$0xff] }
 0x529   : > { %3174 = vmatpush.msrb.mxu0 %v11134_v24  ;;  %3212 = vmatpush.msrb.mxu1 %v11134_v24  ;;  %v8895_v24 = vld [vmem:[%s10131_s29 + $0x70] sm:$0xff] }
 0x52b   : > { %3175 = vmatpush.msrb.mxu0 %v11141_v62  ;;  %3213 = vmatpush.msrb.mxu1 %v11141_v62 }
 0x52c   : > { %3119 = vmatmul.f32.gmra.mxu0 %v3097_v15  ;;  %3153 = vmatmul.f32.gmra.mxu1 %v8886_v4 }
 0x52d   : > { %3176 = vmatpush.msrb.mxu0 %v11149_v33  ;;  %3214 = vmatpush.msrb.mxu1 %v11149_v33 }
 0x52f   : > { %3177 = vmatpush.msrb.mxu0 %v11157_v60  ;;  %3215 = vmatpush.msrb.mxu1 %v11157_v60 }
 0x531   : > { %3178 = vmatpush.msrb.mxu0 %v11165_v59  ;;  %3216 = vmatpush.msrb.mxu1 %v11165_v59 }
 0x533   : > { %3179 = vmatpush.msrb.mxu0 %v11173_v18  ;;  %3217 = vmatpush.msrb.mxu1 %v11173_v18 }
 0x534   : > { %3122 = vmatmul.f32.gmra.mxu0 %v3098_v22  ;;  %3156 = vmatmul.f32.gmra.mxu1 %v8887_v58  ;;  %v8921_v58 = vld [vmem:[%s10116_s17 + $0x40] sm:$0xff] }
 0x535   : > { %3180 = vmatpush.msrb.mxu0 %v11181_v10  ;;  %3218 = vmatpush.msrb.mxu1 %v11181_v10 }
 0x537   : > { %3181 = vmatpush.msrb.mxu0 %v3086_v29  ;;  %3219 = vmatpush.msrb.mxu1 %v3086_v29  ;;  %v8912_v29 = vld [vmem:[%s13365_s12 + $0x38] sm:$0xff] }
 0x539   : > { %3182 = vmatpush.msrb.mxu0 %v3085_v20  ;;  %3220 = vmatpush.msrb.mxu1 %v3085_v20  ;;  %v8909_v20 = vld [vmem:[%s13365_s12 + $0x20] sm:$0xff] }
 0x53b   : > { %3183 = vmatpush.msrb.mxu0 %v3084_v14  ;;  %3221 = vmatpush.msrb.mxu1 %v3084_v14  ;;  %v8903_v14 = vld [vmem:[%s10116_s17 + $0x30] sm:$0xff] }
 0x53c   : > { %3125 = vmatmul.f32.gmra.mxu0 %v3099_v13  ;;  %3159 = vmatmul.f32.gmra.mxu1 %v8888_v41  ;;  %v8954_v13 = vld [vmem:[%s10116_s17 + $0x88] sm:$0xff] }
 0x53d   : > { %3184 = vmatpush.msrb.mxu0 %v3083_v16  ;;  %3222 = vmatpush.msrb.mxu1 %v3083_v16  ;;  %v8904_v16 = vld [vmem:[%s10116_s17 + $0x38] sm:$0xff]  ;;  %v8922_v41 = vld [vmem:[%s10116_s17 + $0x48] sm:$0xff] }
 0x53f   : > { %3185 = vmatpush.msrb.mxu0 %v3082_v8  ;;  %3223 = vmatpush.msrb.mxu1 %v3082_v8 }
 0x541   : > { %3186 = vmatpush.msrb.mxu0 %v3081_v47  ;;  %3224 = vmatpush.msrb.mxu1 %v3081_v47 }
 0x543   : > { %3187 = vmatpush.msrb.mxu0 %v3080_v5  ;;  %3225 = vmatpush.msrb.mxu1 %v3080_v5 }
 0x544   : > { %3188 = vmatmul.f32.vlgmr.msrb.gmra.mxu0 %v8889_v7  ;;  %3226 = vmatmul.f32.vlgmr.msrb.gmra.mxu1 %v8893_v23  ;;  %v8955_v7 = vld [vmem:[%s10116_s17 + $0x90] sm:$0xff] }
 0x545   : > { %v8923_v23 = vld [vmem:[%s10116_s17 + $0x50] sm:$0xff] }
 0x54c   : > { %3191 = vmatmul.f32.gmra.mxu0 %v8890_v55  ;;  %3229 = vmatmul.f32.gmra.mxu1 %v8894_v56  ;;  %v8956_v55 = vld [vmem:[%s10116_s17 + $0x98] sm:$0xff] }
 0x54d   : > { %v8924_v56 = vld [vmem:[%s10116_s17 + $0x58] sm:$0xff] }
 0x554   : > { %3194 = vmatmul.f32.gmra.mxu0 %v8891_v49  ;;  %3232 = vmatmul.f32.gmra.mxu1 %v8895_v24  ;;  %v8985_v49 = vld [vmem:[%s10116_s17 + $0xc0] sm:$0xff] }
 0x555   : > { %v8937_v24 = vld [vmem:[%s10116_s17 + $0x60] sm:$0xff] }
 0x55c   : > { %3197 = vmatmul.f32.gmra.mxu0 %v8892_v31  ;;  %3235 = vmatmul.f32.gmra.mxu1 %v8896_v44  ;;  %v8986_v31 = vld [vmem:[%s10116_s17 + $0xc8] sm:$0xff] }
 0x55d   : > { %v8938_v44 = vld [vmem:[%s10116_s17 + $0x68] sm:$0xff] }
 0x5a1   : > { %v3117_v38 = vpop.f32.mrf.mxu0  ;;  %v3151_v62 = vpop.f32.mrf.mxu1 }
 0x5a2   : > { %v3163_v9 = vmax.f32 %v3117_v38, %v3151_v62  ;;  %v8987_v38 = vld [vmem:[%s10116_s17 + $0xd0] sm:$0xff] }
 0x5a3   : > { %v8939_v62 = vld [vmem:[%s10116_s17 + $0x70] sm:$0xff] }
 0x5a9   : > { %v3120_v45 = vpop.f32.mrf.mxu0  ;;  %v3154_v3 = vpop.f32.mrf.mxu1 }
 0x5aa   : > { %v3164_v57 = vmax.f32 %v3120_v45, %v3154_v3  ;;  %v8988_v45 = vld [vmem:[%s10116_s17 + $0xd8] sm:$0xff] }
 0x5ab   : > { %v8940_v3 = vld [vmem:[%s10116_s17 + $0x78] sm:$0xff] }
 0x5b1   : > { %v3123_v11 = vpop.f32.mrf.mxu0  ;;  %v3157_v33 = vpop.f32.mrf.mxu1 }
 0x5b2   : > { %v3165_v32 = vmax.f32 %v3123_v11, %v3157_v33  ;;  %v9017_v11 = vld [vmem:[%s10116_s17 + $0x100] sm:$0xff] }
 0x5b3   : > { %v8969_v33 = vld [vmem:[%s10116_s17 + $0xa0] sm:$0xff] }
 0x5b9   : > { %v3126_v61 = vpop.f32.mrf.mxu0  ;;  %v3160_v51 = vpop.f32.mrf.mxu1 }
 0x5ba   : > { %v3166_v37 = vmax.f32 %v3126_v61, %v3160_v51  ;;  %v8932_v61 = vld [vmem:[%s13365_s12 + $0x58] sm:$0xff]  ;;  %v9018_v51 = vld [vmem:[%s10116_s17 + $0x108] sm:$0xff] }
 0x5bb   : > { %3501 = vmatpush.msrb.mxu3 %v8932_v61 }
 0x5c1   : > { %v3189_v6 = vpop.f32.mrf.mxu0  ;;  %v3227_v60 = vpop.f32.mrf.mxu1 }
 0x5c2   : > { %v3201_v35 = vmax.f32 %v3163_v9, %v3189_v6  ;;  %v8970_v6 = vld [vmem:[%s10116_s17 + $0xa8] sm:$0xff]  ;;  %v9003_v9 = vld [vmem:[%s10116_s17 + $0xf0] sm:$0xff] }
 0x5c4   : > { %v11245_v54 = vmax.f32 %v3201_v35, %v3227_v60  ;;  %v9019_v60 = vld [vmem:[%s10116_s17 + $0x110] sm:$0xff]  ;;  %v8948_v35 = vld [vmem:[%s13365_s12 + $0x78] sm:$0xff] }
 0x5c9   : > { %v3192_v0 = vpop.f32.mrf.mxu0  ;;  %v3230_v42 = vpop.f32.mrf.mxu1 }
 0x5ca   : > { %v3202_v34 = vmax.f32 %v3164_v57, %v3192_v0  ;;  %v8971_v0 = vld [vmem:[%s10116_s17 + $0xb0] sm:$0xff] }
 0x5cc   : > { %v11240_v17 = vmax.f32 %v3202_v34, %v3230_v42  ;;  %v9020_v42 = vld [vmem:[%s10116_s17 + $0x118] sm:$0xff] }
 0x5d1   : > { %v3195_v63 = vpop.f32.mrf.mxu0  ;;  %v3233_v59 = vpop.f32.mrf.mxu1 }
 0x5d2   : > { %v3203_v12 = vmax.f32 %v3165_v32, %v3195_v63  ;;  %v8972_v63 = vld [vmem:[%s10116_s17 + $0xb8] sm:$0xff]  ;;  %v8930_v32 = vld [vmem:[%s13365_s12 + $0x48] sm:$0xff] }
 0x5d4   : > { %v11235_v21 = vmax.f32 %v3203_v12, %v3233_v59  ;;  %v8931_v59 = vld [vmem:[%s13365_s12 + $0x50] sm:$0xff]  ;;  %v9002_v12 = vld [vmem:[%s10116_s17 + $0xe8] sm:$0xff] }
 0x5d5   : > { %3502 = vmatpush.msrb.mxu3 %v8931_v59 }
 0x5d7   : > { %3503 = vmatpush.msrb.mxu3 %v8930_v32 }
 0x5d9   : > { %v3198_v52 = vpop.f32.mrf.mxu0  ;;  %v3236_v18 = vpop.f32.mrf.mxu1 }
 0x5da   : > { %v3204_v40 = vmax.f32 %v3166_v37, %v3198_v52  ;;  %v9001_v52 = vld [vmem:[%s10116_s17 + $0xe0] sm:$0xff] }
 0x5dc   : > { %v11233_v10 = vmax.f32 %v3204_v40, %v3236_v18  ;;  %v8929_v18 = vld [vmem:[%s13365_s12 + $0x40] sm:$0xff] }
 0x5dd   : > { %3504 = vmatpush.msrb.mxu3 %v8929_v18 }
 0x5de   : > { %3272 = vmatpush.msra.mxu0 %v11233_v10  ;;  %3322 = vmatpush.msra.mxu1 %v11233_v10 }
 0x5df   : > { %3647 = vmatpush.msrb.mxu2 %v11233_v10 }
 0x5e0   : > { %3273 = vmatpush.msra.mxu0 %v11235_v21  ;;  %3323 = vmatpush.msra.mxu1 %v11235_v21 }
 0x5e1   : > { %3648 = vmatpush.msrb.mxu2 %v11235_v21 }
 0x5e2   : > { %3274 = vmatpush.msra.mxu0 %v11240_v17  ;;  %3324 = vmatpush.msra.mxu1 %v11240_v17 }
 0x5e3   : > { %3649 = vmatpush.msrb.mxu2 %v11240_v17 }
 0x5e4   : > { %3275 = vmatpush.msra.mxu0 %v11245_v54  ;;  %3325 = vmatpush.msra.mxu1 %v11245_v54 }
 0x5e5   : > { %3650 = vmatpush.msrb.mxu2 %v11245_v54  ;;  %8897 = vmatmul.msk.f32.vlgmr.msra.gmra.mxu0 %vm3247_vm2, %v3243_v2  ;;  %v8946_v2 = vld [vmem:[%s13365_s12 + $0x68] sm:$0xff] }
 0x5e6   : > { %8905 = vmatmul.msk.f32.vlgmr.msra.gmra.mxu1 %vm3247_vm2, %v8901_v26  ;;  %3368 = vmatpush.msrb.mxu0 %v8912_v29  ;;  %v8962_v26 = vld [vmem:[%s13365_s12 + $0x88] sm:$0xff] }
 0x5e7   : > { %3839 = vmatpush.msra.mxu2 %v11233_v10  ;;  %3409 = vmatpush.msrb.mxu1 %v3292_v43  ;;  %v8945_v43 = vld [vmem:[%s13365_s12 + $0x60] sm:$0xff] }
 0x5e8   : > { %3369 = vmatpush.msrb.mxu0 %v8911_v39  ;;  %8957 = vmatmul.msk.f32.vlgmr.msrb.gmra.mxu2 %vm3247_vm2, %v8953_v27  ;;  %v8961_v39 = vld [vmem:[%s13365_s12 + $0x80] sm:$0xff] }
 0x5e9   : > { %3840 = vmatpush.msra.mxu2 %v11235_v21  ;;  %3410 = vmatpush.msrb.mxu1 %v3291_v28 }
 0x5ea   : > { %3370 = vmatpush.msrb.mxu0 %v8910_v36 }
 0x5eb   : > { %3841 = vmatpush.msra.mxu2 %v11240_v17  ;;  %3411 = vmatpush.msrb.mxu1 %v3290_v48 }
 0x5ec   : > { %3371 = vmatpush.msrb.mxu0 %v8909_v20 }
 0x5ed   : > { %3842 = vmatpush.msra.mxu2 %v11245_v54  ;;  %8898 = vmatmul.msk.f32.gmra.mxu0 %vm3247_vm2, %v3244_v1  ;;  %v8980_v1 = vld [vmem:[%s13365_s12 + $0xb8] sm:$0xff] }
 0x5ee   : > { %3455 = vmatpush.msra.mxu0 %v11233_v10  ;;  %8906 = vmatmul.msk.f32.gmra.mxu1 %vm3247_vm2, %v8902_v19  ;;  %v8996_v19 = vld [vmem:[%s13365_s12 + $0xd8] sm:$0xff] }
 0x5ef   : > { %4031 = vmatpush.msrb.mxu2 %v11233_v10  ;;  %3412 = vmatpush.msrb.mxu1 %v3289_v25 }
 0x5f0   : > { %3456 = vmatpush.msra.mxu0 %v11235_v21  ;;  %8958 = vmatmul.msk.f32.gmra.mxu2 %vm3247_vm2, %v8954_v13  ;;  %v9028_v13 = vld [vmem:[%s13365_s12 + $0x118] sm:$0xff] }
 0x5f1   : > { %4032 = vmatpush.msrb.mxu2 %v11235_v21  ;;  %3597 = vmatpush.msra.mxu1 %v8948_v35 }
 0x5f2   : > { %3457 = vmatpush.msra.mxu0 %v11240_v17 }
 0x5f3   : > { %4033 = vmatpush.msrb.mxu2 %v11240_v17 }
 0x5f4   : > { %3458 = vmatpush.msra.mxu0 %v11245_v54 }
 0x5f5   : > { %4034 = vmatpush.msrb.mxu2 %v11245_v54  ;;  %8899 = vmatmul.msk.f32.gmra.mxu0 %vm3247_vm2, %v3245_v53  ;;  %v8979_v53 = vld [vmem:[%s13365_s12 + $0xb0] sm:$0xff] }
 0x5f6   : > { %8907 = vmatmul.msk.f32.gmra.mxu1 %vm3247_vm2, %v8903_v14  ;;  %v8995_v14 = vld [vmem:[%s13365_s12 + $0xd0] sm:$0xff] }
 0x5f8   : > { %8959 = vmatmul.msk.f32.gmra.mxu2 %vm3247_vm2, %v8955_v7 }
 0x5fd   : > { %8900 = vmatmul.msk.f32.gmra.mxu0 %vm3247_vm2, %v3246_v30  ;;  %v8978_v30 = vld [vmem:[%s13365_s12 + $0xa8] sm:$0xff] }
 0x5fe   : > { %8908 = vmatmul.msk.f32.gmra.mxu1 %vm3247_vm2, %v8904_v16  ;;  %v8994_v16 = vld [vmem:[%s13365_s12 + $0xc8] sm:$0xff] }
 0x600   : > { %8960 = vmatmul.msk.f32.gmra.mxu2 %vm3247_vm2, %v8956_v55  ;;  %v9010_v55 = vld [vmem:[%s13365_s12 + $0xe8] sm:$0xff] }
 0x608   : > { %8989 = vmatmul.msk.f32.vlgmr.msra.gmra.mxu2 %vm3247_vm2, %v8985_v49 }
 0x610   : > { %8990 = vmatmul.msk.f32.gmra.mxu2 %vm3247_vm2, %v8986_v31  ;;  %v9025_v31 = vld [vmem:[%s13365_s12 + $0x100] sm:$0xff] }
 0x618   : > { %8991 = vmatmul.msk.f32.gmra.mxu2 %vm3247_vm2, %v8987_v38 }
 0x620   : > { %8992 = vmatmul.msk.f32.gmra.mxu2 %vm3247_vm2, %v8988_v45 }
 0x628   : > { %9021 = vmatmul.msk.f32.vlgmr.msrb.gmra.mxu2 %vm3247_vm2, %v9017_v11 }
 0x630   : > { %9022 = vmatmul.msk.f32.gmra.mxu2 %vm3247_vm2, %v9018_v51 }
 0x638   : > { %9023 = vmatmul.msk.f32.gmra.mxu2 %vm3247_vm2, %v9019_v60 }
 0x640   : > { %9024 = vmatmul.msk.f32.gmra.mxu2 %vm3247_vm2, %v9020_v42 }
 0x662   : > { %v3277_v8 = vpop.f32.mrf.mxu0 }
 0x663   : > { %v3327_v47 = vpop.f32.mrf.mxu1  ;;  %8917 = vmatmul.msk.f32.vlgmr.msrb.gmra.mxu1 %vm3247_vm2, %v3277_v8 }
 0x664   : > { %8913 = vmatmul.msk.f32.vlgmr.msrb.gmra.mxu0 %vm3247_vm2, %v3327_v47  ;;  %v8977_v47 = vld [vmem:[%s13365_s12 + $0xa0] sm:$0xff] }
 0x665   : > { %3551 = vmatpush.msrb.mxu0 %v11233_v10 }
 0x667   : > { %3552 = vmatpush.msrb.mxu0 %v11235_v21 }
 0x669   : > { %3553 = vmatpush.msrb.mxu0 %v11240_v17 }
 0x66a   : > { %v3280_v5 = vpop.f32.mrf.mxu0 }
 0x66b   : > { %3554 = vmatpush.msrb.mxu0 %v11245_v54  ;;  %v3330_v50 = vpop.f32.mrf.mxu1  ;;  %8918 = vmatmul.msk.f32.gmra.mxu1 %vm3247_vm2, %v3280_v5  ;;  %v3652_v28 = vpop.f32.mrf.mxu2  ;;  %v8993_v5 = vld [vmem:[%s13365_s12 + $0xc0] sm:$0xff] }
 0x66c   : > { %8914 = vmatmul.msk.f32.gmra.mxu0 %vm3247_vm2, %v3330_v50 }
 0x672   : > { %v3283_v46 = vpop.f32.mrf.mxu0 }
 0x673   : > { %v3333_v15 = vpop.f32.mrf.mxu1  ;;  %8919 = vmatmul.msk.f32.gmra.mxu1 %vm3247_vm2, %v3283_v46  ;;  %v3655_v48 = vpop.f32.mrf.mxu2 }
 0x674   : > { %8915 = vmatmul.msk.f32.gmra.mxu0 %vm3247_vm2, %v3333_v15 }
 0x67a   : > { %v3286_v4 = vpop.f32.mrf.mxu0 }
 0x67b   : > { %v3336_v22 = vpop.f32.mrf.mxu1  ;;  %8920 = vmatmul.msk.f32.gmra.mxu1 %vm3247_vm2, %v3286_v4  ;;  %v3658_v25 = vpop.f32.mrf.mxu2 }
 0x67c   : > { %8916 = vmatmul.msk.f32.gmra.mxu0 %vm3247_vm2, %v3336_v22 }
 0x683   : > { %v3661_v50 = vpop.f32.mrf.mxu2 }
 0x684   : > { %8925 = vmatmul.msk.f32.vlgmr.msra.gmra.mxu0 %vm3247_vm2, %v8921_v58  ;;  %v9012_v58 = vld [vmem:[%s13365_s12 + $0xf8] sm:$0xff] }
 0x685   : > { %3743 = vmatpush.msra.mxu0 %v11233_v10 }
 0x687   : > { %3744 = vmatpush.msra.mxu0 %v11235_v21 }
 0x689   : > { %3745 = vmatpush.msra.mxu0 %v11240_v17 }
 0x68b   : > { %3746 = vmatpush.msra.mxu0 %v11245_v54  ;;  %v3844_v4 = vpop.f32.mrf.mxu2 }
 0x68c   : > { %8926 = vmatmul.msk.f32.gmra.mxu0 %vm3247_vm2, %v8922_v41  ;;  %v9011_v41 = vld [vmem:[%s13365_s12 + $0xf0] sm:$0xff] }
 0x693   : > { %v3847_v7 = vpop.f32.mrf.mxu2 }
 0x694   : > { %8927 = vmatmul.msk.f32.gmra.mxu0 %vm3247_vm2, %v8923_v23  ;;  %v9027_v23 = vld [vmem:[%s13365_s12 + $0x110] sm:$0xff] }
 0x69c   : > { %8928 = vmatmul.msk.f32.gmra.mxu0 %vm3247_vm2, %v8924_v56  ;;  %v9026_v56 = vld [vmem:[%s13365_s12 + $0x108] sm:$0xff] }
 0x6a4   : > { %8941 = vmatmul.msk.f32.vlgmr.msrb.gmra.mxu0 %vm3247_vm2, %v8937_v24  ;;  %v9009_v24 = vld [vmem:[%s13365_s12 + $0xe0] sm:$0xff] }
 0x6a5   : > { %3935 = vmatpush.msrb.mxu0 %v11233_v10  ;;  %v9004_v10 = vld [vmem:[%s10116_s17 + $0xf8] sm:$0xff] }
 0x6a7   : > { %3936 = vmatpush.msrb.mxu0 %v11235_v21  ;;  %v8964_v21 = vld [vmem:[%s13365_s12 + $0x98] sm:$0xff] }
 0x6a8   : > { %3693 = vmatpush.msra.mxu3 %v8964_v21 }
 0x6a9   : > { %3937 = vmatpush.msrb.mxu0 %v11240_v17  ;;  %v8947_v17 = vld [vmem:[%s13365_s12 + $0x70] sm:$0xff] }
 0x6aa   : > { %3598 = vmatpush.msra.mxu1 %v8947_v17 }
 0x6ab   : > { %3938 = vmatpush.msrb.mxu0 %v11245_v54  ;;  %v8963_v54 = vld [vmem:[%s13365_s12 + $0x90] sm:$0xff] }
 0x6ac   : > { %8942 = vmatmul.msk.f32.gmra.mxu0 %vm3247_vm2, %v8938_v44  ;;  %3694 = vmatpush.msra.mxu3 %v8963_v54  ;;  %v3850_v44 = vpop.f32.mrf.mxu2 }
 0x6ad   : > { %3599 = vmatpush.msra.mxu1 %v8946_v2 }
 0x6ae   : > { %3695 = vmatpush.msra.mxu3 %v8962_v26 }
 0x6af   : > { %3600 = vmatpush.msra.mxu1 %v8945_v43 }
 0x6b0   : > { %3696 = vmatpush.msra.mxu3 %v8961_v39 }
 0x6b1   : > { %3789 = vmatpush.msrb.mxu1 %v8980_v1 }
 0x6b3   : > { %3790 = vmatpush.msrb.mxu1 %v8979_v53 }
 0x6b4   : > { %8943 = vmatmul.msk.f32.gmra.mxu0 %vm3247_vm2, %v8939_v62  ;;  %v3853_v62 = vpop.f32.mrf.mxu2 }
 0x6b5   : > { %3791 = vmatpush.msrb.mxu1 %v8978_v30 }
 0x6b7   : > { %3792 = vmatpush.msrb.mxu1 %v8977_v47 }
 0x6bc   : > { %8944 = vmatmul.msk.f32.gmra.mxu0 %vm3247_vm2, %v8940_v3  ;;  %v4036_v11 = vpop.f32.mrf.mxu2 }
 0x6c4   : > { %8973 = vmatmul.msk.f32.vlgmr.msra.gmra.mxu0 %vm3247_vm2, %v8969_v33  ;;  %v4039_v61 = vpop.f32.mrf.mxu2 }
 0x6cc   : > { %8974 = vmatmul.msk.f32.gmra.mxu0 %vm3247_vm2, %v8970_v6  ;;  %v4042_v6 = vpop.f32.mrf.mxu2 }
 0x6d4   : > { %8975 = vmatmul.msk.f32.gmra.mxu0 %vm3247_vm2, %v8971_v0  ;;  %v4045_v0 = vpop.f32.mrf.mxu2 }
 0x6dc   : > { %8976 = vmatmul.msk.f32.gmra.mxu0 %vm3247_vm2, %v8972_v63 }
 0x6e0   : > { %v3414_v42 = vpop.f32.mrf.mxu1 }
 0x6e1   : > { %v11360_v37 = vpop.f32.mrf.mxu0 }
 0x6e4   : > { %9005 = vmatmul.msk.f32.vlgmr.msrb.gmra.mxu0 %vm3247_vm2, %v9001_v52 }
 0x6e8   : > { %v3417_v59 = vpop.f32.mrf.mxu1 }
 0x6e9   : > { %v11365_v57 = vpop.f32.mrf.mxu0 }
 0x6ea   : > { %v3418_v47 = vadd.f32 %v3417_v59, %v11365_v57 }
 0x6ec   : > { %9006 = vmatmul.msk.f32.gmra.mxu0 %vm3247_vm2, %v9002_v12 }
 0x6f0   : > { %v3420_v52 = vpop.f32.mrf.mxu1 }
 0x6f1   : > { %v11369_v40 = vpop.f32.mrf.mxu0 }
 0x6f4   : > { %9007 = vmatmul.msk.f32.gmra.mxu0 %vm3247_vm2, %v9003_v9 }
 0x6f8   : > { %v3423_v9 = vpop.f32.mrf.mxu1 }
 0x6f9   : > { %v11373_v34 = vpop.f32.mrf.mxu0 }
 0x6fc   : > { %9008 = vmatmul.msk.f32.gmra.mxu0 %vm3247_vm2, %v9004_v10 }
 0x701   : > { %v3460_v29 = vpop.f32.mrf.mxu0 }
 0x702   : > { %8933 = vmatmul.msk.f32.vlgmr.msrb.gmra.mxu3 %vm3247_vm2, %v3460_v29 }
 0x703   : > { %3885 = vmatpush.msrb.mxu3 %v8996_v19 }
 0x705   : > { %3886 = vmatpush.msrb.mxu3 %v8995_v14 }
 0x707   : > { %3887 = vmatpush.msrb.mxu3 %v8994_v16 }
 0x709   : > { %v3463_v27 = vpop.f32.mrf.mxu0  ;;  %3888 = vmatpush.msrb.mxu3 %v8993_v5  ;;  %v3424_v5 = vadd.f32 %v3423_v9, %v11373_v34 }
 0x70a   : > { %8934 = vmatmul.msk.f32.gmra.mxu3 %vm3247_vm2, %v3463_v27 }
 0x711   : > { %v3466_v36 = vpop.f32.mrf.mxu0 }
 0x712   : > { %8935 = vmatmul.msk.f32.gmra.mxu3 %vm3247_vm2, %v3466_v36 }
 0x719   : > { %v3469_v20 = vpop.f32.mrf.mxu0 }
 0x71a   : > { %8936 = vmatmul.msk.f32.gmra.mxu3 %vm3247_vm2, %v3469_v20 }
 0x721   : > { %v3556_v8 = vpop.f32.mrf.mxu0 }
 0x722   : > { %8949 = vmatmul.msk.f32.vlgmr.msra.gmra.mxu1 %vm3247_vm2, %v3556_v8  ;;  %8965 = vmatmul.msk.f32.vlgmr.msra.gmra.mxu3 %vm3247_vm2, %v3652_v28 }
 0x723   : > { %3981 = vmatpush.msra.mxu1 %v9012_v58  ;;  %4077 = vmatpush.msra.mxu3 %v9028_v13 }
 0x725   : > { %3982 = vmatpush.msra.mxu1 %v9011_v41  ;;  %4078 = vmatpush.msra.mxu3 %v9027_v23 }
 0x727   : > { %3983 = vmatpush.msra.mxu1 %v9010_v55  ;;  %4079 = vmatpush.msra.mxu3 %v9026_v56 }
 0x729   : > { %v3559_v46 = vpop.f32.mrf.mxu0  ;;  %3984 = vmatpush.msra.mxu1 %v9009_v24  ;;  %4080 = vmatpush.msra.mxu3 %v9025_v31 }
 0x72a   : > { %8950 = vmatmul.msk.f32.gmra.mxu1 %vm3247_vm2, %v3559_v46  ;;  %8966 = vmatmul.msk.f32.gmra.mxu3 %vm3247_vm2, %v3655_v48  ;;  %v3415_v46 = vadd.f32 %v3414_v42, %v11360_v37 }
 0x731   : > { %v3562_v15 = vpop.f32.mrf.mxu0 }
 0x732   : > { %8951 = vmatmul.msk.f32.gmra.mxu1 %vm3247_vm2, %v3562_v15  ;;  %8967 = vmatmul.msk.f32.gmra.mxu3 %vm3247_vm2, %v3658_v25  ;;  %v3421_v25 = vadd.f32 %v3420_v52, %v11369_v40 }
 0x739   : > { %v3565_v22 = vpop.f32.mrf.mxu0 }
 0x73a   : > { %8952 = vmatmul.msk.f32.gmra.mxu1 %vm3247_vm2, %v3565_v22  ;;  %8968 = vmatmul.msk.f32.gmra.mxu3 %vm3247_vm2, %v3661_v50 }
 0x741   : > { %v3748_v49 = vpop.f32.mrf.mxu0 }
 0x742   : > { %8981 = vmatmul.msk.f32.vlgmr.msrb.gmra.mxu1 %vm3247_vm2, %v3748_v49  ;;  %8997 = vmatmul.msk.f32.vlgmr.msrb.gmra.mxu3 %vm3247_vm2, %v3844_v4 }
 0x749   : > { %v3751_v38 = vpop.f32.mrf.mxu0 }
 0x74a   : > { %8982 = vmatmul.msk.f32.gmra.mxu1 %vm3247_vm2, %v3751_v38  ;;  %8998 = vmatmul.msk.f32.gmra.mxu3 %vm3247_vm2, %v3847_v7 }
 0x751   : > { %v3754_v45 = vpop.f32.mrf.mxu0 }
 0x752   : > { %8983 = vmatmul.msk.f32.gmra.mxu1 %vm3247_vm2, %v3754_v45  ;;  %8999 = vmatmul.msk.f32.gmra.mxu3 %vm3247_vm2, %v3850_v44 }
 0x759   : > { %v3757_v3 = vpop.f32.mrf.mxu0 }
 0x75a   : > { %8984 = vmatmul.msk.f32.gmra.mxu1 %vm3247_vm2, %v3757_v3  ;;  %9000 = vmatmul.msk.f32.gmra.mxu3 %vm3247_vm2, %v3853_v62 }
 0x761   : > { %v3940_v33 = vpop.f32.mrf.mxu0 }
 0x762   : > { %9013 = vmatmul.msk.f32.vlgmr.msra.gmra.mxu1 %vm3247_vm2, %v3940_v33  ;;  %9029 = vmatmul.msk.f32.vlgmr.msra.gmra.mxu3 %vm3247_vm2, %v4036_v11 }
 0x769   : > { %v3943_v51 = vpop.f32.mrf.mxu0 }
 0x76a   : > { %9014 = vmatmul.msk.f32.gmra.mxu1 %vm3247_vm2, %v3943_v51  ;;  %9030 = vmatmul.msk.f32.gmra.mxu3 %vm3247_vm2, %v4039_v61 }
 0x771   : > { %v3946_v60 = vpop.f32.mrf.mxu0 }
 0x772   : > { %9015 = vmatmul.msk.f32.gmra.mxu1 %vm3247_vm2, %v3946_v60  ;;  %9031 = vmatmul.msk.f32.gmra.mxu3 %vm3247_vm2, %v4042_v6  ;;  %v9952_v60 = vld [vmem:[%s10176_s20] ss:$0 sm:$0xff] }
 0x779   : > { %v3949_v63 = vpop.f32.mrf.mxu0 }
 0x77a   : > { %9016 = vmatmul.msk.f32.gmra.mxu1 %vm3247_vm2, %v3949_v63  ;;  %9032 = vmatmul.msk.f32.gmra.mxu3 %vm3247_vm2, %v4045_v0 }
 0x785   : > { %v3506_v32 = vpop.f32.mrf.mxu3 }
 0x786   : > { %v3518_v58 = vadd.f32 %v3506_v32, %v3415_v46  ;;  %v9062_v46 = vld [vmem:[%s10181_s27 + $0xb8] sm:$0xff] }
 0x78d   : > { %v3509_v18 = vpop.f32.mrf.mxu3 }
 0x78e   : > { %v3519_v15 = vadd.f32 %v3509_v18, %v3418_v47 }
 0x795   : > { %v3512_v12 = vpop.f32.mrf.mxu3 }
 0x796   : > { %v3520_v50 = vadd.f32 %v3512_v12, %v3421_v25  ;;  %v9048_v25 = vld [vmem:[%s10181_s27 + $0x68] sm:$0xff] }
 0x79d   : > { %v3515_v10 = vpop.f32.mrf.mxu3 }
 0x79e   : > { %v3521_v4 = vadd.f32 %v3515_v10, %v3424_v5  ;;  %v4212_v5 = vld [vmem:[%s10121_s21] sm:$0xff] }
 0x79f   : > { %v3602_v35 = vpop.f32.mrf.mxu1 }
 0x7a0   : > { %v3614_v55 = vadd.f32 %v3602_v35, %v3518_v58  ;;  %v9060_v58 = vld [vmem:[%s10181_s27 + $0xa8] sm:$0xff] }
 0x7a5   : > { %v3698_v21 = vpop.f32.mrf.mxu3 }
 0x7a6   : > { %v3710_v24 = vadd.f32 %v3698_v21, %v3614_v55  ;;  %v9036_v21 = vld [vmem:[%s13367_s3 + $0x10] sm:$0xff]  ;;  %v9044_v55 = vld [vmem:[%s10181_s27 + $0x48] sm:$0xff] }
 0x7a7   : > { %v3605_v17 = vpop.f32.mrf.mxu1 }
 0x7a8   : > { %v3615_v13 = vadd.f32 %v3605_v17, %v3519_v15  ;;  %v9038_v17 = vld [vmem:[%s13367_s3 + $0x18] sm:$0xff]  ;;  %v9047_v15 = vld [vmem:[%s10181_s27 + $0x60] sm:$0xff] }
 0x7ad   : > { %v3701_v54 = vpop.f32.mrf.mxu3 }
 0x7ae   : > { %v3711_v56 = vadd.f32 %v3701_v54, %v3615_v13  ;;  %v4110_v54 = vld [vmem:[%s13367_s3] sm:$0xff]  ;;  %v9045_v13 = vld [vmem:[%s10181_s27 + $0x50] sm:$0xff] }
 0x7af   : > { %v3608_v2 = vpop.f32.mrf.mxu1 }
 0x7b0   : > { %v3616_v22 = vadd.f32 %v3608_v2, %v3520_v50  ;;  %v9034_v2 = vld [vmem:[%s13367_s3 + $0x8] sm:$0xff]  ;;  %s13394_s3 = sld [smem:[#allocation23_spill]] }
 0x7b1   : > { %v9041_v50 = vld [vmem:[%s10121_s21 + $0x8] sm:$0xff] }
 0x7b5   : > { %v3704_v26 = vpop.f32.mrf.mxu3 }
 0x7b6   : > { %v3712_v41 = vadd.f32 %v3704_v26, %v3616_v22  ;;  %v4244_v26 = vld [vmem:[%s10181_s27 + $0x38] sm:$0xff] }
 0x7b7   : > { %v3611_v29 = vpop.f32.mrf.mxu1  ;;  %v9046_v22 = vld [vmem:[%s10181_s27 + $0x58] sm:$0xff] }
 0x7b8   : > { %v3617_v7 = vadd.f32 %v3611_v29, %v3521_v4  ;;  %v4243_v29 = vld [vmem:[%s10181_s27 + $0x30] sm:$0xff] }
 0x7b9   : > { %v9061_v4 = vld [vmem:[%s10181_s27 + $0xb0] sm:$0xff] }
 0x7bd   : > { %v3707_v43 = vpop.f32.mrf.mxu3 }
 0x7be   : > { %v3713_v49 = vadd.f32 %v3707_v43, %v3617_v7  ;;  %v4242_v43 = vld [vmem:[%s10181_s27 + $0x28] sm:$0xff]  ;;  %v9053_v7 = vld [vmem:[%s10121_s21 + $0x10] sm:$0xff] }
 0x7bf   : > { %v3794_v39 = vpop.f32.mrf.mxu1 }
 0x7c0   : > { %v3806_v38 = vadd.f32 %v3794_v39, %v3710_v24  ;;  %v4241_v39 = vld [vmem:[%s10181_s27 + $0x20] sm:$0xff]  ;;  %v9082_v24 = vld [vmem:[%s10181_s27 + $0x128] sm:$0xff] }
 0x7c5   : > { %v3890_v27 = vpop.f32.mrf.mxu3 }
 0x7c6   : > { %v3902_v3 = vadd.f32 %v3890_v27, %v3806_v38  ;;  %v4240_v27 = vld [vmem:[%s10181_s27 + $0x18] sm:$0xff] }
 0x7c7   : > { %v3797_v28 = vpop.f32.mrf.mxu1  ;;  %v9080_v38 = vld [vmem:[%s10181_s27 + $0x118] sm:$0xff] }
 0x7c8   : > { %v3807_v57 = vadd.f32 %v3797_v28, %v3711_v56  ;;  %v4239_v28 = vld [vmem:[%s10181_s27 + $0x10] sm:$0xff]  ;;  %v9058_v56 = vld [vmem:[%s10181_s27 + $0x98] sm:$0xff] }
 0x7cd   : > { %v3893_v36 = vpop.f32.mrf.mxu3 }
 0x7ce   : > { %v3903_v37 = vadd.f32 %v3893_v36, %v3807_v57  ;;  %v4238_v36 = vld [vmem:[%s10181_s27 + $0x8] sm:$0xff] }
 0x7cf   : > { %v3800_v48 = vpop.f32.mrf.mxu1  ;;  %v9056_v57 = vld [vmem:[%s10181_s27 + $0x88] sm:$0xff] }
 0x7d0   : > { %v3808_v40 = vadd.f32 %v3800_v48, %v3712_v41  ;;  %v4237_v48 = vld [vmem:[%s10181_s27] sm:$0xff] }
 0x7d1   : > { %v9059_v41 = vld [vmem:[%s10181_s27 + $0xa0] sm:$0xff] }
 0x7d5   : > { %v3896_v20 = vpop.f32.mrf.mxu3 }
 0x7d6   : > { %v3904_v31 = vadd.f32 %v3896_v20, %v3808_v40  ;;  %v9057_v40 = vld [vmem:[%s10181_s27 + $0x90] sm:$0xff] }
 0x7d7   : > { %v3803_v1 = vpop.f32.mrf.mxu1 }
 0x7d8   : > { %v3809_v34 = vadd.f32 %v3803_v1, %v3713_v49  ;;  %v9083_v49 = vld [vmem:[%s10181_s27 + $0x130] sm:$0xff] }
 0x7dd   : > { %v3899_v19 = vpop.f32.mrf.mxu3 }
 0x7de   : > { %v3905_v62 = vadd.f32 %v3899_v19, %v3809_v34  ;;  %v9055_v34 = vld [vmem:[%s10181_s27 + $0x80] sm:$0xff] }
 0x7df   : > { %v3986_v53 = vpop.f32.mrf.mxu1 }
 0x7e0   : > { %v3998_v6 = vadd.f32 %v3986_v53, %v3902_v3  ;;  %v9050_v53 = vld [vmem:[%s10181_s27 + $0x78] sm:$0xff]  ;;  %v9043_v3 = vld [vmem:[%s10181_s27 + $0x40] sm:$0xff] }
 0x7e5   : > { %v4082_v14 = vpop.f32.mrf.mxu3 }
 0x7e6   : > { %v4094_v63 = vadd.f32 %v4082_v14, %v3998_v6  ;;  %v9049_v14 = vld [vmem:[%s10181_s27 + $0x70] sm:$0xff]  ;;  %v9069_v6 = vld [vmem:[%s10181_s27 + $0xd8] sm:$0xff] }
 0x7e7   : > { %v3989_v30 = vpop.f32.mrf.mxu1 }
 0x7e8   : > { %v3999_v11 = vadd.f32 %v3989_v30, %v3903_v37  ;;  %v4102_v12 = vadd.f32 %v9952_v60, %v4094_v63  ;;  %v9079_v37 = vld [vmem:[%s10181_s27 + $0x110] sm:$0xff]  ;;  %v9095_v63 = vld [vmem:[%s10181_s27 + $0x178] sm:$0xff] }
 0x7ea   : > { %v4106_v35 = vmax.f32 %v4102_v12, 0.0  ;;  %v9092_v12 = vld [vmem:[%s10181_s27 + $0x160] sm:$0xff] }
 0x7ed   : > { %v4085_v16 = vpop.f32.mrf.mxu3 }
 0x7ee   : > { %v4095_v0 = vadd.f32 %v4085_v16, %v3999_v11  ;;  %v9073_v11 = vld [vmem:[%s10181_s27 + $0xf8] sm:$0xff] }
 0x7ef   : > { %v3992_v8 = vpop.f32.mrf.mxu1 }
 0x7f0   : > { %v4000_v45 = vadd.f32 %v3992_v8, %v3904_v31  ;;  %v4103_v52 = vadd.f32 %v9952_v60, %v4095_v0  ;;  %v9081_v31 = vld [vmem:[%s10181_s27 + $0x120] sm:$0xff]  ;;  %v9067_v0 = vld [vmem:[%s10181_s27 + $0xc8] sm:$0xff] }
 0x7f2   : > { %v4107_v10 = vmax.f32 %v4103_v52, 0.0  ;;  %v9094_v52 = vld [vmem:[%s10181_s27 + $0x170] sm:$0xff] }
 0x7f5   : > { %v4088_v23 = vpop.f32.mrf.mxu3 }
 0x7f6   : > { %v4096_v33 = vadd.f32 %v4088_v23, %v4000_v45  ;;  %v9084_v23 = vld [vmem:[%s10181_s27 + $0x138] sm:$0xff]  ;;  %v9077_v45 = vld [vmem:[%s10181_s27 + $0x100] sm:$0xff] }
 0x7f7   : > { %v3995_v44 = vpop.f32.mrf.mxu1 }
 0x7f8   : > { %v4001_v61 = vadd.f32 %v3995_v44, %v3905_v62  ;;  %v4104_v59 = vadd.f32 %v9952_v60, %v4096_v33  ;;  %v9064_v44 = vld [vmem:[%s10121_s21 + $0x18] sm:$0xff]  ;;  %v9078_v62 = vld [vmem:[%s10181_s27 + $0x108] sm:$0xff]  ;;  %v9072_v33 = vld [vmem:[%s10181_s27 + $0xf0] sm:$0xff] }
 0x7fa   : > { %v4108_v9 = vmax.f32 %v4104_v59, 0.0 }
 0x7fd   : > { %v4091_v51 = vpop.f32.mrf.mxu3 }
 0x7fe   : > { %v4097_v42 = vadd.f32 %v4091_v51, %v4001_v61  ;;  %v9071_v61 = vld [vmem:[%s10181_s27 + $0xe8] sm:$0xff]  ;;  %v9070_v51 = vld [vmem:[%s10181_s27 + $0xe0] sm:$0xff] }
 0x800   : > { %v4105_v32 = vadd.f32 %v9952_v60, %v4097_v42  ;;  %v9068_v60 = vld [vmem:[%s10181_s27 + $0xd0] sm:$0xff]  ;;  %v9066_v42 = vld [vmem:[%s10181_s27 + $0xc0] sm:$0xff] }
 0x802   : > { %v4109_v18 = vmax.f32 %v4105_v32, 0.0 }
 0x804   : > { %4126 = vmatpush.msra.mxu0 %v4109_v18  ;;  %4151 = vmatpush.msrb.mxu1 %v4109_v18 }
 0x805   : > { %4177 = vmatpush.msra.mxu2 %v4109_v18  ;;  %4203 = vmatpush.msrb.mxu3 %v4109_v18  ;;  %v9093_v18 = vld [vmem:[%s10181_s27 + $0x168] sm:$0xff] }
 0x806   : > { %4127 = vmatpush.msra.mxu0 %v4108_v9  ;;  %4152 = vmatpush.msrb.mxu1 %v4108_v9 }
 0x807   : > { %4178 = vmatpush.msra.mxu2 %v4108_v9  ;;  %4204 = vmatpush.msrb.mxu3 %v4108_v9  ;;  %v9075_v9 = vld [vmem:[%s10121_s21 + $0x20] sm:$0xff] }
 0x808   : > { %4128 = vmatpush.msra.mxu0 %v4107_v10  ;;  %4153 = vmatpush.msrb.mxu1 %v4107_v10 }
 0x809   : > { %4179 = vmatpush.msra.mxu2 %v4107_v10  ;;  %4205 = vmatpush.msrb.mxu3 %v4107_v10  ;;  %v9091_v10 = vld [vmem:[%s10181_s27 + $0x158] sm:$0xff] }
 0x80a   : > { %4129 = vmatpush.msra.mxu0 %v4106_v35  ;;  %4154 = vmatpush.msrb.mxu1 %v4106_v35 }
 0x80b   : > { %4180 = vmatpush.msra.mxu2 %v4106_v35  ;;  %4206 = vmatpush.msrb.mxu3 %v4106_v35 }
 0x80c   : > { %9037 = vmatmul.msk.f32.vlgmr.msra.gmra.mxu2 %vm3247_vm2, %v9036_v21  ;;  %9039 = vmatmul.msk.f32.vlgmr.msrb.gmra.mxu3 %vm3247_vm2, %v9038_v17  ;;  %v9090_v21 = vld [vmem:[%s10181_s27 + $0x150] sm:$0xff]  ;;  %v9089_v17 = vld [vmem:[%s10181_s27 + $0x148] sm:$0xff] }
 0x80d   : > { %9033 = vmatmul.msk.f32.vlgmr.msra.gmra.mxu0 %vm3247_vm2, %v4110_v54  ;;  %9035 = vmatmul.msk.f32.vlgmr.msrb.gmra.mxu1 %vm3247_vm2, %v9034_v2  ;;  %v9088_v54 = vld [vmem:[%s10181_s27 + $0x140] sm:$0xff]  ;;  %v9086_v2 = vld [vmem:[%s10121_s21 + $0x28] sm:$0xff] }
 0x80e   : > { %4314 = vmatpush.msra.mxu3 %v4244_v26  ;;  %4291 = vmatpush.msrb.mxu2 %v9050_v53  ;;  %v9116_v53 = vld [vmem:[%s10181_s27 + $0x1f0] sm:$0xff] }
 0x810   : > { %4315 = vmatpush.msra.mxu3 %v4243_v29  ;;  %4292 = vmatpush.msrb.mxu2 %v9049_v14  ;;  %v9097_v29 = vld [vmem:[%s10121_s21 + $0x30] sm:$0xff]  ;;  %v9115_v14 = vld [vmem:[%s10181_s27 + $0x1e8] sm:$0xff] }
 0x812   : > { %4316 = vmatpush.msra.mxu3 %v4242_v43  ;;  %4293 = vmatpush.msrb.mxu2 %v9048_v25  ;;  %v9106_v43 = vld [vmem:[%s10181_s27 + $0x1b8] sm:$0xff] }
 0x814   : > { %4317 = vmatpush.msra.mxu3 %v4241_v39  ;;  %4294 = vmatpush.msrb.mxu2 %v9047_v15  ;;  %v9105_v39 = vld [vmem:[%s10181_s27 + $0x1b0] sm:$0xff]  ;;  %v9113_v15 = vld [vmem:[%s10181_s27 + $0x1d8] sm:$0xff] }
 0x816   : > { %4318 = vmatpush.msra.mxu3 %v4240_v27  ;;  %4295 = vmatpush.msrb.mxu2 %v9046_v22  ;;  %v9104_v27 = vld [vmem:[%s10181_s27 + $0x1a8] sm:$0xff]  ;;  %v9127_v22 = vld [vmem:[%s10181_s27 + $0x230] sm:$0xff] }
 0x818   : > { %4319 = vmatpush.msra.mxu3 %v4239_v28  ;;  %4296 = vmatpush.msrb.mxu2 %v9045_v13  ;;  %v9103_v28 = vld [vmem:[%s10181_s27 + $0x1a0] sm:$0xff]  ;;  %v9126_v13 = vld [vmem:[%s10181_s27 + $0x228] sm:$0xff] }
 0x81a   : > { %4320 = vmatpush.msra.mxu3 %v4238_v36  ;;  %4297 = vmatpush.msrb.mxu2 %v9044_v55  ;;  %v9102_v36 = vld [vmem:[%s10181_s27 + $0x198] sm:$0xff] }
 0x81b   : > { %v9124_v55 = vld [vmem:[%s10181_s27 + $0x218] sm:$0xff] }
 0x81c   : > { %4321 = vmatpush.msra.mxu3 %v4237_v48  ;;  %4298 = vmatpush.msrb.mxu2 %v9043_v3  ;;  %v9101_v48 = vld [vmem:[%s10181_s27 + $0x190] sm:$0xff]  ;;  %v9150_v3 = vld [vmem:[%s10191_s24 + $0xe8] sm:$0xff] }
 0x81e   : > { %4429 = vmatpush.msra.mxu2 %v9073_v11  ;;  %v9149_v11 = vld [vmem:[%s10191_s24 + $0xe0] sm:$0xff] }
 0x820   : > { %4430 = vmatpush.msra.mxu2 %v9072_v33 }
 0x822   : > { %4431 = vmatpush.msra.mxu2 %v9071_v61  ;;  %v9148_v61 = vld [vmem:[%s10191_s24 + $0xd8] sm:$0xff] }
 0x824   : > { %4432 = vmatpush.msra.mxu2 %v9070_v51 }
 0x826   : > { %4433 = vmatpush.msra.mxu2 %v9069_v6  ;;  %v9147_v6 = vld [vmem:[%s10191_s24 + $0xd0] sm:$0xff] }
 0x828   : > { %4434 = vmatpush.msra.mxu2 %v9068_v60 }
 0x82a   : > { %4435 = vmatpush.msra.mxu2 %v9067_v0 }
 0x82c   : > { %4436 = vmatpush.msra.mxu2 %v9066_v42  ;;  %v9146_v42 = vld [vmem:[%s10191_s24 + $0xc8] sm:$0xff] }
 0x88a   : > { %v4131_v20 = vpop.f32.mrf.mxu0  ;;  %v4156_v1 = vpop.f32.mrf.mxu1 }
 0x88b   : > { %v4159_v19 = vmax.f32 %v4131_v20, %v4156_v1  ;;  %v9100_v20 = vld [vmem:[%s10181_s27 + $0x188] sm:$0xff]  ;;  %v9099_v1 = vld [vmem:[%s10181_s27 + $0x180] sm:$0xff] }
 0x88f   : > { %v4182_v30 = vpop.f32.mrf.mxu2  ;;  %v4208_v16 = vpop.f32.mrf.mxu3 }
 0x890   : > { %v4185_v8 = vmax.f32 %v4159_v19, %v4182_v30  ;;  %v9117_v19 = vld [vmem:[%s10181_s27 + $0x1f8] sm:$0xff] }
 0x892   : > { %v11453_v47 = vmax.f32 %v4185_v8, %v4208_v16 }
 0x894   : > { %4232 = vmatpush.msrb.mxu0 %v11453_v47  ;;  %4265 = vmatpush.msra.mxu1 %v11453_v47 }
 0x895   : > { %4462 = vmatpush.msrb.mxu3 %v11453_v47  ;;  %9040 = vmatmul.msk.f32.vlgmr.msrb.gmra.mxu0 %vm4213_vm3, %v4212_v5  ;;  %v9119_v5 = vld [vmem:[%s10121_s21 + $0x40] sm:$0xff] }
 0x896   : > { %9042 = vmatmul.msk.f32.vlgmr.msra.gmra.mxu1 %vm4213_vm3, %v9041_v50  ;;  %4346 = vmatpush.msra.mxu0 %v11453_v47 }
 0x897   : > { %4371 = vmatpush.msrb.mxu1 %v9062_v46  ;;  %v9114_v46 = vld [vmem:[%s10181_s27 + $0x1e0] sm:$0xff] }
 0x898   : > { %4404 = vmatpush.msrb.mxu0 %v11453_v47 }
 0x899   : > { %4372 = vmatpush.msrb.mxu1 %v9061_v4  ;;  %v9128_v4 = vld [vmem:[%s10181_s27 + $0x238] sm:$0xff] }
 0x89b   : > { %4373 = vmatpush.msrb.mxu1 %v9060_v58  ;;  %v9112_v58 = vld [vmem:[%s10181_s27 + $0x1d0] sm:$0xff] }
 0x89d   : > { %4374 = vmatpush.msrb.mxu1 %v9059_v41  ;;  %9054 = vmatmul.msk.f32.vlgmr.msra.gmra.mxu0 %vm4213_vm3, %v9053_v7  ;;  %v9111_v41 = vld [vmem:[%s10181_s27 + $0x1c8] sm:$0xff]  ;;  %v9110_v7 = vld [vmem:[%s10181_s27 + $0x1c0] sm:$0xff] }
 0x89e   : > { %4487 = vmatpush.msra.mxu0 %v9084_v23  ;;  %v9125_v23 = vld [vmem:[%s10181_s27 + $0x220] sm:$0xff] }
 0x89f   : > { %4375 = vmatpush.msrb.mxu1 %v9058_v56  ;;  %v9123_v56 = vld [vmem:[%s10181_s27 + $0x210] sm:$0xff] }
 0x8a0   : > { %4488 = vmatpush.msra.mxu0 %v9083_v49  ;;  %v9122_v49 = vld [vmem:[%s10181_s27 + $0x208] sm:$0xff] }
 0x8a1   : > { %4376 = vmatpush.msrb.mxu1 %v9057_v40  ;;  %v9121_v40 = vld [vmem:[%s10181_s27 + $0x200] sm:$0xff] }
 0x8a2   : > { %4489 = vmatpush.msra.mxu0 %v9082_v24 }
 0x8a3   : > { %4377 = vmatpush.msrb.mxu1 %v9056_v57 }
 0x8a4   : > { %4490 = vmatpush.msra.mxu0 %v9081_v31 }
 0x8a5   : > { %4378 = vmatpush.msrb.mxu1 %v9055_v34  ;;  %9065 = vmatmul.msk.f32.vlgmr.msrb.gmra.mxu0 %vm4213_vm3, %v9064_v44 }
 0x8a6   : > { %4491 = vmatpush.msra.mxu0 %v9080_v38  ;;  %v9152_v38 = vld [vmem:[%s10191_s24 + $0xf8] sm:$0xff] }
 0x8a7   : > { %4520 = vmatpush.msra.mxu1 %v11453_v47 }
 0x8a8   : > { %4492 = vmatpush.msra.mxu0 %v9079_v37 }
 0x8aa   : > { %4493 = vmatpush.msra.mxu0 %v9078_v62  ;;  %v9151_v62 = vld [vmem:[%s10191_s24 + $0xf0] sm:$0xff] }
 0x8ac   : > { %4494 = vmatpush.msra.mxu0 %v9077_v45 }
 0x8ae   : > { %4636 = vmatpush.msrb.mxu0 %v11453_v47 }
 0x912   : > { %v4234_v59 = vpop.f32.mrf.mxu0 }
 0x913   : > { %v4267_v32 = vpop.f32.mrf.mxu1  ;;  %9052 = vmatmul.msk.f32.vlgmr.msra.gmra.mxu3 %vm4279_vm4, %v4234_v59 }
 0x914   : > { %9051 = vmatmul.msk.f32.vlgmr.msrb.gmra.mxu2 %vm4279_vm4, %v4267_v32  ;;  %4545 = vmatpush.msra.mxu3 %v9095_v63  ;;  %v9145_v32 = vld [vmem:[%s10191_s24 + $0xc0] sm:$0xff] }
 0x915   : > { %4603 = vmatpush.msrb.mxu2 %v9106_v43  ;;  %v4855_v43 = vld [vmem:[%s10191_s24 + $0x70] sm:$0xff] }
 0x916   : > { %4546 = vmatpush.msra.mxu3 %v9094_v52 }
 0x917   : > { %4604 = vmatpush.msrb.mxu2 %v9105_v39  ;;  %v4854_v39 = vld [vmem:[%s10191_s24 + $0x68] sm:$0xff] }
 0x918   : > { %4547 = vmatpush.msra.mxu3 %v9093_v18  ;;  %v9144_v18 = vld [vmem:[%s10191_s24 + $0xb8] sm:$0xff] }
 0x919   : > { %4605 = vmatpush.msrb.mxu2 %v9104_v27  ;;  %v9135_v27 = vld [vmem:[%s13366_s8 + $0x6] sm:$0x3] }
 0x91a   : > { %4548 = vmatpush.msra.mxu3 %v9092_v12  ;;  %v4348_v35 = vpop.f32.mrf.mxu0 }
 0x91b   : > { %9063 = vmatmul.msk.f32.vlgmr.msrb.gmra.mxu1 %vm4279_vm4, %v4348_v35  ;;  %9076 = vmatmul.msk.f32.vlgmr.msrb.gmra.mxu3 %vm4213_vm3, %v9075_v9  ;;  %v9953_v9 = vld [vmem:[%s13390_s4] ss:$0 sm:$0xff]  ;;  %s11611_s4 = sand.u32 1, %s10046_s1  }
 0x91c   : > { %4549 = vmatpush.msra.mxu3 %v9091_v10  ;;  %4578 = vmatpush.msrb.mxu1 %v11453_v47  ;;  %s8403_s12 = scalar_lea.sflag [#allocation3], %s11611_s4 }
 0x91d   : > { %4606 = vmatpush.msrb.mxu2 %v9103_v28  ;;  %v4853_v28 = vld [vmem:[%s10191_s24 + $0x60] sm:$0xff] }
 0x91e   : > { %4550 = vmatpush.msra.mxu3 %v9090_v21 }
 0x91f   : > { %4607 = vmatpush.msrb.mxu2 %v9102_v36  ;;  %v4852_v36 = vld [vmem:[%s10191_s24 + $0x58] sm:$0xff] }
 0x920   : > { %4551 = vmatpush.msra.mxu3 %v9089_v17 }
 0x921   : > { %4608 = vmatpush.msrb.mxu2 %v9101_v48  ;;  %v4851_v48 = vld [vmem:[%s10191_s24 + $0x50] sm:$0xff] }
 0x922   : > { %4552 = vmatpush.msra.mxu3 %v9088_v54  ;;  %v4406_v26 = vpop.f32.mrf.mxu0  ;;  %v4738_v54 = vld [vmem:[%s13366_s8] sm:$0x3] }
 0x923   : > { %9074 = vmatmul.msk.f32.vlgmr.msra.gmra.mxu2 %vm4279_vm4, %v4406_v26  ;;  %9087 = vmatmul.msk.f32.vlgmr.msra.gmra.mxu1 %vm4213_vm3, %v9086_v2  ;;  %v9131_v2 = vld [vmem:[%s13366_s8 + $0x2] sm:$0x3]  ;;  %v9133_v26 = vld [vmem:[%s13366_s8 + $0x4] sm:$0x3] }
 0x924   : > { %4694 = vmatpush.msrb.mxu3 %v11453_v47  ;;  %4609 = vmatpush.msrb.mxu2 %v9100_v20  ;;  %v9108_v47 = vld [vmem:[%s10121_s21 + $0x38] sm:$0xff]  ;;  %v4850_v20 = vld [vmem:[%s10191_s24 + $0x48] sm:$0xff] }
 0x925   : > { %4661 = vmatpush.msra.mxu1 %v9117_v19  ;;  %v4848_v19 = vld [vmem:[%s10191_s24 + $0x38] sm:$0xff] }
 0x926   : > { %4610 = vmatpush.msrb.mxu2 %v9099_v1  ;;  %v4849_v1 = vld [vmem:[%s10191_s24 + $0x40] sm:$0xff] }
 0x927   : > { %4662 = vmatpush.msra.mxu1 %v9116_v53  ;;  %v4847_v53 = vld [vmem:[%s10191_s24 + $0x30] sm:$0xff] }
 0x929   : > { %4663 = vmatpush.msra.mxu1 %v9115_v14  ;;  %v4846_v14 = vld [vmem:[%s10191_s24 + $0x28] sm:$0xff] }
 0x92b   : > { %9098 = vmatmul.msk.f32.vlgmr.msrb.gmra.mxu1 %vm4213_vm3, %v9097_v29  ;;  %v4856_v29 = vld [vmem:[%s10191_s24 + $0x78] sm:$0xff] }
 0x92c   : > { %4664 = vmatpush.msra.mxu1 %v9114_v46  ;;  %v4842_v46 = vld [vmem:[%s10191_s24 + $0x8] sm:$0xff] }
 0x92e   : > { %4665 = vmatpush.msra.mxu1 %v9113_v15  ;;  %v9139_v15 = vld [vmem:[%s10191_s24 + $0x90] sm:$0xff] }
 0x930   : > { %4666 = vmatpush.msra.mxu1 %v9112_v58  ;;  %v9137_v58 = vld [vmem:[%s10191_s24 + $0x80] sm:$0xff] }
 0x932   : > { %4667 = vmatpush.msra.mxu1 %v9111_v41  ;;  %v4934_v41 = vld [vmem:[%s13391_s16 + $0x70] sm:$0xff] }
 0x934   : > { %4668 = vmatpush.msra.mxu1 %v9110_v7  ;;  %v4933_v7 = vld [vmem:[%s13391_s16 + $0x68] sm:$0xff] }
 0x996   : > { %v4323_v30 = vpop.f32.mrf.mxu3 }
 0x997   : > { %v4300_v44 = vpop.f32.mrf.mxu2 }
 0x998   : > { %v4380_v16 = vpop.f32.mrf.mxu1  ;;  %v4324_v37 = vadd.f32 %v4323_v30, %v4300_v44  ;;  %v9143_v30 = vld [vmem:[%s10191_s24 + $0xb0] sm:$0xff] }
 0x99a   : > { %v4383_v33 = vadd.f32 %v4380_v16, %v4324_v37  ;;  %v4845_v16 = vld [vmem:[%s10191_s24 + $0x20] sm:$0xff] }
 0x99e   : > { %v4464_v25 = vpop.f32.mrf.mxu3 }
 0x99f   : > { %9085 = vmatmul.msk.f32.vlgmr.msra.gmra.mxu0 %vm4279_vm4, %v4464_v25  ;;  %v9142_v25 = vld [vmem:[%s10191_s24 + $0xa8] sm:$0xff] }
 0x9a0   : > { %v4522_v8 = vpop.f32.mrf.mxu1  ;;  %4719 = vmatpush.msra.mxu0 %v9128_v4  ;;  %v4841_v4 = vld [vmem:[%s10191_s24] sm:$0xff] }
 0x9a1   : > { %9096 = vmatmul.msk.f32.vlgmr.msra.gmra.mxu3 %vm4279_vm4, %v4522_v8  ;;  %v4844_v8 = vld [vmem:[%s10191_s24 + $0x18] sm:$0xff] }
 0x9a2   : > { %4720 = vmatpush.msra.mxu0 %v9127_v22  ;;  %v9138_v22 = vld [vmem:[%s10191_s24 + $0x88] sm:$0xff] }
 0x9a4   : > { %4721 = vmatpush.msra.mxu0 %v9126_v13  ;;  %v4935_v13 = vld [vmem:[%s13391_s16 + $0x78] sm:$0xff] }
 0x9a6   : > { %4722 = vmatpush.msra.mxu0 %v9125_v23  ;;  %v4438_v45 = vpop.f32.mrf.mxu2  ;;  %v4932_v23 = vld [vmem:[%s13391_s16 + $0x60] sm:$0xff] }
 0x9a7   : > { %9109 = vmatmul.msk.f32.vlgmr.msrb.gmra.mxu0 %vm4213_vm3, %v9108_v47  ;;  %v4441_v51 = vadd.f32 %v4438_v45, %v4383_v33  ;;  %v9141_v47 = vld [vmem:[%s10191_s24 + $0xa0] sm:$0xff] }
 0x9a8   : > { %v4580_v50 = vpop.f32.mrf.mxu1  ;;  %4723 = vmatpush.msra.mxu0 %v9124_v55  ;;  %v4931_v55 = vld [vmem:[%s13391_s16 + $0x58] sm:$0xff]  ;;  %v4924_v33 = vld [vmem:[%s13391_s16 + $0x20] sm:$0xff] }
 0x9a9   : > { %9107 = vmatmul.msk.f32.vlgmr.msrb.gmra.mxu2 %vm4279_vm4, %v4580_v50  ;;  %9120 = vmatmul.msk.f32.vlgmr.msrb.gmra.mxu3 %vm4213_vm3, %v9119_v5  ;;  %v4843_v5 = vld [vmem:[%s10191_s24 + $0x10] sm:$0xff]  ;;  %v9140_v50 = vld [vmem:[%s10191_s24 + $0x98] sm:$0xff] }
 0x9aa   : > { %4724 = vmatpush.msra.mxu0 %v9123_v56  ;;  %v4930_v56 = vld [vmem:[%s13391_s16 + $0x50] sm:$0xff] }
 0x9ac   : > { %4725 = vmatpush.msra.mxu0 %v9122_v49  ;;  %v4929_v49 = vld [vmem:[%s13391_s16 + $0x48] sm:$0xff] }
 0x9ae   : > { %4726 = vmatpush.msra.mxu0 %v9121_v40  ;;  %v4928_v40 = vld [vmem:[%s13391_s16 + $0x40] sm:$0xff] }
 0x9b0   : > { %4898 = vmatpush.msrb.mxu0 %v9152_v38 }
 0x9b2   : > { %4899 = vmatpush.msrb.mxu0 %v9151_v62 }
 0x9b4   : > { %4900 = vmatpush.msrb.mxu0 %v9150_v3 }
 0x9b6   : > { %4901 = vmatpush.msrb.mxu0 %v9149_v11  ;;  %v4925_v11 = vld [vmem:[%s13391_s16 + $0x28] sm:$0xff] }
 0x9b8   : > { %4902 = vmatpush.msrb.mxu0 %v9148_v61  ;;  %v4923_v61 = vld [vmem:[%s13391_s16 + $0x18] sm:$0xff] }
 0x9ba   : > { %4903 = vmatpush.msrb.mxu0 %v9147_v6  ;;  %v4921_v6 = vld [vmem:[%s13391_s16 + $0x8] sm:$0xff] }
 0x9bc   : > { %4904 = vmatpush.msrb.mxu0 %v9146_v42 }
 0x9be   : > { %4905 = vmatpush.msrb.mxu0 %v9145_v32 }
 0x9c0   : > { %4906 = vmatpush.msrb.mxu0 %v9144_v18  ;;  %v4936_v18 = vld [vmem:[%s13393_s10] sm:$0x1]  ;;  %s10092_s10 = smov 112  }
 0x9c2   : > { %4907 = vmatpush.msrb.mxu0 %v9143_v30  ;;  %v5010_v30 = vld [vmem:[%s13395_s5 + $0x40] sm:$0xff] }
 0x9c4   : > { %4908 = vmatpush.msrb.mxu0 %v9142_v25  ;;  %v5009_v25 = vld [vmem:[%s13395_s5 + $0x38] sm:$0xff] }
 0x9c6   : > { %4909 = vmatpush.msrb.mxu0 %v9141_v47  ;;  %v5008_v47 = vld [vmem:[%s13395_s5 + $0x30] sm:$0xff] }
 0x9c8   : > { %4910 = vmatpush.msrb.mxu0 %v9140_v50  ;;  %v5007_v50 = vld [vmem:[%s13395_s5 + $0x28] sm:$0xff] }
 0x9ca   : > { %4911 = vmatpush.msrb.mxu0 %v9139_v15  ;;  %v5006_v15 = vld [vmem:[%s13395_s5 + $0x20] sm:$0xff] }
 0x9cc   : > { %4912 = vmatpush.msrb.mxu0 %v9138_v22 }
 0x9ce   : > { %4913 = vmatpush.msrb.mxu0 %v9137_v58  ;;  %v5005_v58 = vld [vmem:[%s13395_s5 + $0x18] sm:$0xff] }
 0xa1c   : > { %v4496_v24 = vpop.f32.mrf.mxu0 }
 0xa1d   : > { %v4499_v60 = vadd.f32 %v4496_v24, %v4441_v51  ;;  %v4927_v24 = vld [vmem:[%s13391_s16 + $0x38] sm:$0xff]  ;;  %v4922_v51 = vld [vmem:[%s13391_s16 + $0x10] sm:$0xff] }
 0xa24   : > { %v4638_v57 = vpop.f32.mrf.mxu0  ;;  %v4554_v31 = vpop.f32.mrf.mxu3 }
 0xa25   : > { %9118 = vmatmul.msk.f32.vlgmr.msra.gmra.mxu1 %vm4279_vm4, %v4638_v57  ;;  %v4557_v63 = vadd.f32 %v4554_v31, %v4499_v60  ;;  %v4926_v57 = vld [vmem:[%s13391_s16 + $0x30] sm:$0xff]  ;;  %v4920_v60 = vld [vmem:[%s13391_s16] sm:$0xff]  ;;  %s9980_s16 = scalar_lea.hbm %s10276_s19, 2 }
 0xa2c   : > { %v4696_v34 = vpop.f32.mrf.mxu3  ;;  %v4612_v0 = vpop.f32.mrf.mxu2 }
 0xa2d   : > { %9129 = vmatmul.msk.f32.vlgmr.msra.gmra.mxu0 %vm4279_vm4, %v4696_v34  ;;  %v4615_v52 = vadd.f32 %v4612_v0, %v4557_v63  ;;  %v4840_v0 = vld [vmem:[%s13392_s15] sm:$0x1]  ;;  %s13322_s15 = scalar_lea.vmem [#allocation2], %s11611_s4 }
 0xaa2   : > { %v4670_v59 = vpop.f32.mrf.mxu1 }
 0xaa3   : > { %v4673_v12 = vadd.f32 %v4670_v59, %v4615_v52 }
 0xaaa   : > { %v4728_v10 = vpop.f32.mrf.mxu0 }
 0xaab   : > { %v4731_v35 = vadd.f32 %v4728_v10, %v4673_v12 }
 0xaad   : > { %v4736_v21 = vadd.f32 %v9953_v9, %v4731_v35 }
 0xaaf   : > { %v4737_v17 = vmax.f32 %v4736_v21, 0.0 }
 0xab1   : > { %4757 = vmatpush.msra.mxu2 %v4737_v17  ;;  %4782 = vmatpush.msra.mxu3 %v4737_v17 }
 0xab2   : > { %4808 = vmatpush.msrb.mxu1 %v4737_v17  ;;  %9130 = vmatmul.msk.f32.vlgmr.msra.gmra.mxu2 %vm4213_vm3, %v4738_v54  ;;  %v4974_v54 = vld [vmem:[%s13394_s3] sm:$0xff] }
 0xab3   : > { %9132 = vmatmul.msk.f32.vlgmr.msra.gmra.mxu3 %vm4213_vm3, %v9131_v2  ;;  %4834 = vmatpush.msrb.mxu2 %v4737_v17  ;;  %v4975_v17 = vld [vmem:[%s13394_s3 + $0x8] sm:$0xff]  ;;  %v5017_v2 = vld [vmem:[%s13395_s5 + $0x78] sm:$0xff]  ;;  %s13398_s3 = sld [smem:[#allocation26_spill]] }
 0xab4   : > { %9134 = vmatmul.msk.f32.vlgmr.msrb.gmra.mxu1 %vm4213_vm3, %v9133_v26  ;;  %4857 = vmatpush.msrb.mxu3 %v4856_v29  ;;  %v9169_v26 = vld [vmem:[%s13395_s5 + $0xf8] sm:$0xff]  ;;  %v5016_v29 = vld [vmem:[%s13395_s5 + $0x70] sm:$0xff] }
 0xab5   : > { %4937 = vmatpush.msra.mxu1 %v4935_v13  ;;  %4995 = vmatpush.msra.mxu2 %v4975_v17  ;;  %v9157_v13 = vld [vmem:[%s13395_s5 + $0x98] sm:$0xff]  ;;  %v9208_v17 = vld [vmem:[%s13400_s6 + $0x170] sm:$0xff] }
 0xab6   : > { %4858 = vmatpush.msrb.mxu3 %v4855_v43  ;;  %v9168_v43 = vld [vmem:[%s13395_s5 + $0xf0] sm:$0xff] }
 0xab7   : > { %4938 = vmatpush.msra.mxu1 %v4934_v41  ;;  %4996 = vmatpush.msra.mxu2 %v4974_v54  ;;  %v9189_v54 = vld [vmem:[%s13400_s6 + $0xf0] sm:$0xff] }
 0xab8   : > { %4859 = vmatpush.msrb.mxu3 %v4854_v39  ;;  %v5015_v39 = vld [vmem:[%s13395_s5 + $0x68] sm:$0xff] }
 0xab9   : > { %4939 = vmatpush.msra.mxu1 %v4933_v7 }
 0xaba   : > { %9136 = vmatmul.msk.f32.vlgmr.msrb.gmra.mxu2 %vm4213_vm3, %v9135_v27  ;;  %4860 = vmatpush.msrb.mxu3 %v4853_v28  ;;  %v9167_v27 = vld [vmem:[%s13395_s5 + $0xe8] sm:$0xff]  ;;  %v5014_v28 = vld [vmem:[%s13395_s5 + $0x60] sm:$0xff] }
 0xabb   : > { %4940 = vmatpush.msra.mxu1 %v4932_v23  ;;  %5019 = vmatpush.msrb.mxu2 %v5017_v2  ;;  %v5130_v2 = vld [vmem:[%s13400_s6 + $0x70] sm:$0xff] }
 0xabc   : > { %4861 = vmatpush.msrb.mxu3 %v4852_v36  ;;  %v9166_v36 = vld [vmem:[%s13395_s5 + $0xe0] sm:$0xff] }
 0xabd   : > { %4941 = vmatpush.msra.mxu1 %v4931_v55  ;;  %5020 = vmatpush.msrb.mxu2 %v5016_v29  ;;  %v9188_v29 = vld [vmem:[%s13400_s6 + $0xe8] sm:$0xff] }
 0xabe   : > { %4862 = vmatpush.msrb.mxu3 %v4851_v48  ;;  %v5013_v48 = vld [vmem:[%s13395_s5 + $0x58] sm:$0xff] }
 0xabf   : > { %4942 = vmatpush.msra.mxu1 %v4930_v56  ;;  %5021 = vmatpush.msrb.mxu2 %v5015_v39  ;;  %v5004_v56 = vld [vmem:[%s13395_s5 + $0x10] sm:$0xff]  ;;  %v9206_v39 = vld [vmem:[%s13400_s6 + $0x160] sm:$0xff] }
 0xac0   : > { %4863 = vmatpush.msrb.mxu3 %v4850_v20  ;;  %v9165_v20 = vld [vmem:[%s13395_s5 + $0xd8] sm:$0xff] }
 0xac1   : > { %4943 = vmatpush.msra.mxu1 %v4929_v49  ;;  %5022 = vmatpush.msrb.mxu2 %v5014_v28  ;;  %v9156_v49 = vld [vmem:[%s13395_s5 + $0x90] sm:$0xff]  ;;  %v5128_v28 = vld [vmem:[%s13400_s6 + $0x60] sm:$0xff] }
 0xac2   : > { %4864 = vmatpush.msrb.mxu3 %v4849_v1  ;;  %v5012_v1 = vld [vmem:[%s13395_s5 + $0x50] sm:$0xff] }
 0xac3   : > { %4944 = vmatpush.msra.mxu1 %v4928_v40  ;;  %5023 = vmatpush.msrb.mxu2 %v5013_v48  ;;  %v5003_v40 = vld [vmem:[%s13395_s5 + $0x8] sm:$0xff]  ;;  %v9186_v48 = vld [vmem:[%s13400_s6 + $0xd8] sm:$0xff] }
 0xac4   : > { %4865 = vmatpush.msrb.mxu3 %v4848_v19  ;;  %v9164_v19 = vld [vmem:[%s13395_s5 + $0xd0] sm:$0xff] }
 0xac5   : > { %4945 = vmatpush.msra.mxu1 %v4927_v24  ;;  %5024 = vmatpush.msrb.mxu2 %v5012_v1  ;;  %v9155_v24 = vld [vmem:[%s13395_s5 + $0x88] sm:$0xff]  ;;  %v9204_v1 = vld [vmem:[%s13400_s6 + $0x150] sm:$0xff] }
 0xac6   : > { %4866 = vmatpush.msrb.mxu3 %v4847_v53  ;;  %v5011_v53 = vld [vmem:[%s13395_s5 + $0x48] sm:$0xff] }
 0xac7   : > { %4946 = vmatpush.msra.mxu1 %v4926_v57  ;;  %5025 = vmatpush.msrb.mxu2 %v5011_v53  ;;  %v5002_v57 = vld [vmem:[%s13395_s5] sm:$0xff]  ;;  %v5126_v53 = vld [vmem:[%s13400_s6 + $0x50] sm:$0xff] }
 0xac8   : > { %4867 = vmatpush.msrb.mxu3 %v4846_v14  ;;  %v9163_v14 = vld [vmem:[%s13395_s5 + $0xc8] sm:$0xff] }
 0xac9   : > { %4947 = vmatpush.msra.mxu1 %v4925_v11  ;;  %5026 = vmatpush.msrb.mxu2 %v5010_v30  ;;  %v9184_v30 = vld [vmem:[%s13400_s6 + $0xc8] sm:$0xff] }
 0xaca   : > { %4868 = vmatpush.msrb.mxu3 %v4845_v16  ;;  %v9162_v16 = vld [vmem:[%s13395_s5 + $0xc0] sm:$0xff] }
 0xacb   : > { %4948 = vmatpush.msra.mxu1 %v4924_v33  ;;  %5027 = vmatpush.msrb.mxu2 %v5009_v25  ;;  %v9202_v25 = vld [vmem:[%s13400_s6 + $0x140] sm:$0xff] }
 0xacc   : > { %4869 = vmatpush.msrb.mxu3 %v4844_v8  ;;  %v9161_v8 = vld [vmem:[%s13395_s5 + $0xb8] sm:$0xff] }
 0xacd   : > { %4949 = vmatpush.msra.mxu1 %v4923_v61  ;;  %5028 = vmatpush.msrb.mxu2 %v5008_v47  ;;  %v5124_v47 = vld [vmem:[%s13400_s6 + $0x40] sm:$0xff] }
 0xace   : > { %4870 = vmatpush.msrb.mxu3 %v4843_v5  ;;  %v9160_v5 = vld [vmem:[%s13395_s5 + $0xb0] sm:$0xff] }
 0xacf   : > { %4950 = vmatpush.msra.mxu1 %v4922_v51  ;;  %5029 = vmatpush.msrb.mxu2 %v5007_v50  ;;  %v9182_v50 = vld [vmem:[%s13400_s6 + $0xb8] sm:$0xff] }
 0xad0   : > { %4871 = vmatpush.msrb.mxu3 %v4842_v46  ;;  %v9159_v46 = vld [vmem:[%s13395_s5 + $0xa8] sm:$0xff] }
 0xad1   : > { %4951 = vmatpush.msra.mxu1 %v4921_v6  ;;  %5030 = vmatpush.msrb.mxu2 %v5006_v15  ;;  %v9200_v15 = vld [vmem:[%s13400_s6 + $0x130] sm:$0xff] }
 0xad2   : > { %4872 = vmatpush.msrb.mxu3 %v4841_v4  ;;  %v9158_v4 = vld [vmem:[%s13395_s5 + $0xa0] sm:$0xff] }
 0xad3   : > { %4952 = vmatpush.msra.mxu1 %v4920_v60  ;;  %5031 = vmatpush.msrb.mxu2 %v5005_v58  ;;  %v9199_v58 = vld [vmem:[%s13400_s6 + $0x128] sm:$0xff] }
 0xad4   : > { %5058 = vmatpush.msra.mxu3 %v9169_v26  ;;  %v9207_v26 = vld [vmem:[%s13400_s6 + $0x168] sm:$0xff] }
 0xad5   : > { %5032 = vmatpush.msrb.mxu2 %v5004_v56  ;;  %v9197_v56 = vld [vmem:[%s13400_s6 + $0x118] sm:$0xff] }
 0xad6   : > { %5059 = vmatpush.msra.mxu3 %v9168_v43  ;;  %v5129_v43 = vld [vmem:[%s13400_s6 + $0x68] sm:$0xff] }
 0xad7   : > { %5033 = vmatpush.msrb.mxu2 %v5003_v40  ;;  %v5119_v40 = vld [vmem:[%s13400_s6 + $0x18] sm:$0xff] }
 0xad8   : > { %5060 = vmatpush.msra.mxu3 %v9167_v27  ;;  %v9187_v27 = vld [vmem:[%s13400_s6 + $0xe0] sm:$0xff] }
 0xad9   : > { %5034 = vmatpush.msrb.mxu2 %v5002_v57  ;;  %v9177_v57 = vld [vmem:[%s13400_s6 + $0x90] sm:$0xff] }
 0xada   : > { %5061 = vmatpush.msra.mxu3 %v9166_v36  ;;  %v9205_v36 = vld [vmem:[%s13400_s6 + $0x158] sm:$0xff] }
 0xadc   : > { %5062 = vmatpush.msra.mxu3 %v9165_v20  ;;  %v5127_v20 = vld [vmem:[%s13400_s6 + $0x58] sm:$0xff] }
 0xade   : > { %5063 = vmatpush.msra.mxu3 %v9164_v19  ;;  %v9185_v19 = vld [vmem:[%s13400_s6 + $0xd0] sm:$0xff] }
 0xae0   : > { %5064 = vmatpush.msra.mxu3 %v9163_v14  ;;  %v9203_v14 = vld [vmem:[%s13400_s6 + $0x148] sm:$0xff] }
 0xae2   : > { %5065 = vmatpush.msra.mxu3 %v9162_v16  ;;  %v5125_v16 = vld [vmem:[%s13400_s6 + $0x48] sm:$0xff] }
 0xae4   : > { %5066 = vmatpush.msra.mxu3 %v9161_v8  ;;  %v9183_v8 = vld [vmem:[%s13400_s6 + $0xc0] sm:$0xff] }
 0xae6   : > { %5067 = vmatpush.msra.mxu3 %v9160_v5  ;;  %v9201_v5 = vld [vmem:[%s13400_s6 + $0x138] sm:$0xff] }
 0xae8   : > { %5068 = vmatpush.msra.mxu3 %v9159_v46  ;;  %v5123_v46 = vld [vmem:[%s13400_s6 + $0x38] sm:$0xff] }
 0xaea   : > { %5069 = vmatpush.msra.mxu3 %v9158_v4  ;;  %v9181_v4 = vld [vmem:[%s13400_s6 + $0xb0] sm:$0xff] }
 0xaec   : > { %5070 = vmatpush.msra.mxu3 %v9157_v13  ;;  %v9180_v13 = vld [vmem:[%s13400_s6 + $0xa8] sm:$0xff] }
 0xaee   : > { %5071 = vmatpush.msra.mxu3 %v9156_v49  ;;  %v9178_v49 = vld [vmem:[%s13400_s6 + $0x98] sm:$0xff] }
 0xaf0   : > { %5072 = vmatpush.msra.mxu3 %v9155_v24  ;;  %v9196_v24 = vld [vmem:[%s13400_s6 + $0x110] sm:$0xff] }
 0xb31   : > { %v4810_v38 = vpop.f32.mrf.mxu1 }
 0xb35   : > { %v4759_v31 = vpop.f32.mrf.mxu2 }
 0xb36   : > { %v4784_v34 = vpop.f32.mrf.mxu3 }
 0xb37   : > { %v4787_v44 = vmax.f32 %v4759_v31, %v4784_v34  ;;  %v9154_v31 = vld [vmem:[%s13395_s5 + $0x80] sm:$0xff]  ;;  %s13403_s5 = sld [smem:[#allocation14_spill]] }
 0xb38   : > { %5073 = vmatpush.msra.mxu3 %v9154_v31  ;;  %v5118_v31 = vld [vmem:[%s13400_s6 + $0x10] sm:$0xff] }
 0xb39   : > { %v4813_v37 = vmax.f32 %v4787_v44, %v4810_v38 }
 0xb3d   : > { %v4836_v62 = vpop.f32.mrf.mxu2 }
 0xb3e   : > { %v4839_v45 = vmax.f32 %v4813_v37, %v4836_v62  ;;  %v5079_v62 = vlaneseq }
 0xb40   : > { %v4896_v3 = vrot.slane %v4839_v45, 1  ;;  %4873 = vmatmul.f32.vlgmr.msrb.gmra.mxu3 %v4839_v45  ;;  %v5018_v45 = vld [vmem:[%s13398_s3] sm:$0x1]  ;;  %v5080_v33 = vshrl.u32 %v5079_v62, 7 }
 0xb41   : > { %v9175_v62 = vld [vmem:[%s13400_s6 + $0x80] sm:$0xff] }
 0xb42   : > { %4914 = vmatmul.f32.vlgmr.msrb.gmra.mxu0 %v4896_v3  ;;  %v5057_v3 = vld [vmem:[%s13398_s3 + $0x1] sm:$0x1]  ;;  %vm5081_vm7 = vcmp.eq.s32.totalorder %v5080_v33, 0  ;;  %vm5085_vm8 = vcmp.eq.s32.totalorder %v5080_v33, 1  ;;  %s13402_s3 = sld [smem:[#allocation28_spill]] }
 0xbbf   : > { %v4915_v59 = vpop.f32.mrf.mxu0 }
 0xbc3   : > { %v4874_v42 = vpop.f32.mrf.mxu3 }
 0xbc4   : > { %v4877_v63 = vadd.f32 %v4874_v42, %v4840_v0 }
 0xbc6   : > { %v4918_v32 = vadd.f32 %v4915_v59, %v4877_v63 }
 0xbc8   : > { %v4919_v52 = vmax.f32 %v4918_v32, 0.0 }
 0xbca   : > { %4953 = vmatmul.f32.vlgmr.msra.gmra.mxu1 %v4919_v52 }
 0xc47   : > { %v4954_v12 = vpop.f32.mrf.mxu1 }
 0xc48   : > { %v11614_v9 = vadd.f32 %v4954_v12, %v4936_v18 }
 0xc4a   : > { %v4965_v10 = vmul.f32 0.5, %v11614_v9  ;;  %4958 = vst.msk [vmem:[%s13322_s15] sm:$0x1] %vm4957_vm5, %v11614_v9 }
 0xc4c   : > { %v4966_v35 = vmul.f32 1.442695, %v4965_v10  ;;  %v9209_v10 = vld [vmem:[%s13400_s6 + $0x178] sm:$0xff] }
 0xc4e   : > { %9958 = vpow2.f32 %v4966_v35  ;;  %v9190_v35 = vld [vmem:[%s13400_s6 + $0xf8] sm:$0xff] }
 0xc54   : > { %v9959_v21 = vpop.eup %9958 }
 0xc55   : > { %4969 = vrot.lane.b32.xlu0 %v9959_v21, %s10092_s10  ;;  %v5131_v21 = vld [vmem:[%s13400_s6 + $0x78] sm:$0xff] }
 0xc5d   : > { %4960 = vrot.lane.b32.xlu0 %v11614_v9, %s10092_s10  ;;  %s13396_s10 = sld [smem:[#allocation9_spill]] }
 0xc63   : > { %s1126_s15 = scalar_lea.vmem %s13396_s10, %s10333_s26  ;;  %s13324_s10 = scalar_lea.vmem [#allocation4], %s11611_s4 }
 0xc64   : > { %v4964_v22 = vld [vmem:[%s1126_s15] sm:$0x1]  ;;  %s13397_s15 = sld [smem:[#allocation24_spill]] }
 0xc6a   : > { %v4976_v34 = vld [vmem:[%s13397_s15] sm:$0x1]  ;;  %s13401_s15 = sld [smem:[#allocation29_spill]] }
 0xcc7   : > { %v4970_v41 = vpop.permute.xlu0 %4969 }
 0xcc8   : > { %v4972_v7 = vmul.f32 %v4970_v41, %v4964_v22  ;;  %v5122_v22 = vld [vmem:[%s13400_s6 + $0x30] sm:$0xff]  ;;  %v5121_v41 = vld [vmem:[%s13400_s6 + $0x28] sm:$0xff] }
 0xcca   : > { %v4973_v23 = vadd.f32 %v4972_v7, %v11614_v9  ;;  %v9198_v7 = vld [vmem:[%s13400_s6 + $0x120] sm:$0xff] }
 0xccc   : > { %9153 = vmatmul.msk.f32.vlgmr.msra.gmra.mxu2 %vm4977_vm6, %v4973_v23  ;;  %v9179_v23 = vld [vmem:[%s13400_s6 + $0xa0] sm:$0xff] }
 0xccf   : > { %v4961_v55 = vpop.permute.xlu0 %4960 }
 0xcd0   : > { %4963 = vst.msk [vmem:[%s13324_s10] sm:$0x1] %vm4957_vm5, %v4961_v55  ;;  %s13399_s10 = sld [smem:[#allocation11_spill]]  ;;  %v5120_v55 = vld [vmem:[%s13400_s6 + $0x20] sm:$0xff] }
 0xcd6   : > { %v5089_v18 = vld [vmem:[%s13399_s10] sm:$0x3]  ;;  %v9191_v12 = vld [vmem:[%s13399_s10 + $0x4] sm:$0x3]  ;;  %v9172_v9 = vld [vmem:[%s13399_s10 + $0x2] sm:$0x3] }
 0xd4f   : > { %v4998_v44 = vpop.f32.mrf.mxu2 }
 0xd50   : > { %v4999_v38 = vadd.f32 %v4998_v44, %v4976_v34  ;;  %v9195_v34 = vld [vmem:[%s13400_s6 + $0x108] sm:$0xff]  ;;  %v9194_v44 = vld [vmem:[%s13400_s6 + $0x100] sm:$0xff] }
 0xd52   : > { %v5001_v37 = vmax.f32 %v4999_v38, 0.0  ;;  %v9176_v38 = vld [vmem:[%s13400_s6 + $0x88] sm:$0xff] }
 0xd54   : > { %5035 = vmatmul.f32.vlgmr.msrb.gmra.mxu2 %v5001_v37  ;;  %5074 = vmatmul.f32.vlgmr.msra.gmra.mxu3 %v5001_v37  ;;  %v5117_v37 = vld [vmem:[%s13400_s6 + $0x8] sm:$0xff] }
 0xdd7   : > { %v5036_v11 = vpop.f32.mrf.mxu2  ;;  %v5075_v61 = vpop.f32.mrf.mxu3 }
 0xdd8   : > { %v5037_v51 = vadd.f32 %v5036_v11, %v5018_v45  ;;  %v5076_v6 = vadd.f32 %v5075_v61, %v5057_v3  ;;  %v5116_v45 = vld [vmem:[%s13400_s6] sm:$0xff]  ;;  %v9227_v61 = vld [vmem:[%s13401_s15 + $0xf8] sm:$0xff]  ;;  %s13406_s6 = sld [smem:[#allocation15_spill]] }
 0xdda   : > { %v5039_v60 = vmax.f32 %v5037_v51, 0.0  ;;  %v5078_v0 = vmax.f32 %v5076_v6, 0.0  ;;  %v9226_v51 = vld [vmem:[%s13401_s15 + $0xf0] sm:$0xff]  ;;  %v9246_v6 = vld [vmem:[%s13401_s15 + $0x178] sm:$0xff] }
 0xddc   : > { %v5082_v42 = vperm.slane %v5039_v60, 0  ;;  %v5086_v63 = vperm.slane %v5078_v0, 0  ;;  %v9225_v60 = vld [vmem:[%s13401_s15 + $0xe8] sm:$0xff]  ;;  %v9245_v0 = vld [vmem:[%s13401_s15 + $0x170] sm:$0xff] }
 0xdde   : > { %v5083_v59 = vsel %vm5081_vm7, %v5082_v42, 0.0  ;;  %v5087_v32 = vsel %vm5085_vm8, %v5086_v63, 0.0  ;;  %v9244_v42 = vld [vmem:[%s13401_s15 + $0x168] sm:$0xff]  ;;  %v9224_v63 = vld [vmem:[%s13401_s15 + $0xe0] sm:$0xff] }
 0xddf   : > { %v5088_v52 = vadd.f32 %v5087_v32, %v5083_v59  ;;  %v9243_v59 = vld [vmem:[%s13401_s15 + $0x160] sm:$0xff]  ;;  %v9223_v32 = vld [vmem:[%s13401_s15 + $0xd8] sm:$0xff] }
 0xde1   : > { %9170 = vmatpush.msk.msra.mxu0 %vm1363_vm0, %v5088_v52  ;;  %9173 = vmatpush.msk.msrb.mxu1 %vm1363_vm0, %v5088_v52 }
 0xde2   : > { %9192 = vmatpush.msk.msra.mxu2 %vm1363_vm0, %v5088_v52  ;;  %9171 = vmatmul.msk.f32.vlgmr.msra.gmra.mxu0 %vm1314_vm1, %v5089_v18  ;;  %v9242_v52 = vld [vmem:[%s13401_s15 + $0x158] sm:$0xff]  ;;  %v9222_v18 = vld [vmem:[%s13401_s15 + $0xd0] sm:$0xff] }
 0xde3   : > { %9193 = vmatmul.msk.f32.vlgmr.msra.gmra.mxu2 %vm1314_vm1, %v9191_v12  ;;  %9174 = vmatmul.msk.f32.vlgmr.msrb.gmra.mxu1 %vm1314_vm1, %v9172_v9  ;;  %v9241_v12 = vld [vmem:[%s13401_s15 + $0x150] sm:$0xff]  ;;  %v9221_v9 = vld [vmem:[%s13401_s15 + $0xc8] sm:$0xff] }
 0xde4   : > { %5256 = vmatpush.msrb.mxu2 %v9209_v10  ;;  %5174 = vmatpush.msrb.mxu0 %v9190_v35  ;;  %v9240_v10 = vld [vmem:[%s13401_s15 + $0x148] sm:$0xff]  ;;  %v9220_v35 = vld [vmem:[%s13401_s15 + $0xc0] sm:$0xff] }
 0xde5   : > { %5194 = vmatpush.msra.mxu1 %v5131_v21  ;;  %v9239_v21 = vld [vmem:[%s13401_s15 + $0x140] sm:$0xff] }
 0xde6   : > { %5257 = vmatpush.msrb.mxu2 %v9208_v17  ;;  %5175 = vmatpush.msrb.mxu0 %v9189_v54  ;;  %v9219_v17 = vld [vmem:[%s13401_s15 + $0xb8] sm:$0xff] }
 0xde7   : > { %5195 = vmatpush.msra.mxu1 %v5130_v2  ;;  %v9238_v54 = vld [vmem:[%s13401_s15 + $0x138] sm:$0xff]  ;;  %v9218_v2 = vld [vmem:[%s13401_s15 + $0xb0] sm:$0xff] }
 0xde8   : > { %5258 = vmatpush.msrb.mxu2 %v9207_v26  ;;  %5176 = vmatpush.msrb.mxu0 %v9188_v29  ;;  %v9237_v26 = vld [vmem:[%s13401_s15 + $0x130] sm:$0xff] }
 0xde9   : > { %5196 = vmatpush.msra.mxu1 %v5129_v43 }
 0xdea   : > { %5259 = vmatpush.msrb.mxu2 %v9206_v39  ;;  %5177 = vmatpush.msrb.mxu0 %v9187_v27  ;;  %v9217_v39 = vld [vmem:[%s13401_s15 + $0xa8] sm:$0xff] }
 0xdeb   : > { %5197 = vmatpush.msra.mxu1 %v5128_v28  ;;  %v9236_v27 = vld [vmem:[%s13401_s15 + $0x128] sm:$0xff]  ;;  %v9216_v28 = vld [vmem:[%s13401_s15 + $0xa0] sm:$0xff] }
 0xdec   : > { %5260 = vmatpush.msrb.mxu2 %v9205_v36  ;;  %5178 = vmatpush.msrb.mxu0 %v9186_v48  ;;  %v9235_v48 = vld [vmem:[%s13401_s15 + $0x120] sm:$0xff] }
 0xded   : > { %5198 = vmatpush.msra.mxu1 %v5127_v20  ;;  %v9215_v20 = vld [vmem:[%s13401_s15 + $0x98] sm:$0xff] }
 0xdee   : > { %5261 = vmatpush.msrb.mxu2 %v9204_v1  ;;  %5179 = vmatpush.msrb.mxu0 %v9185_v19  ;;  %v9954_v1 = vld [vmem:[%s13402_s3] ss:$0 sm:$0xff]  ;;  %v9234_v19 = vld [vmem:[%s13401_s15 + $0x118] sm:$0xff]  ;;  %s13405_s3 = sld [smem:[#allocation31_spill]] }
 0xdef   : > { %5199 = vmatpush.msra.mxu1 %v5126_v53 }
 0xdf0   : > { %5262 = vmatpush.msrb.mxu2 %v9203_v14  ;;  %5180 = vmatpush.msrb.mxu0 %v9184_v30  ;;  %v9214_v14 = vld [vmem:[%s13401_s15 + $0x90] sm:$0xff] }
 0xdf1   : > { %5200 = vmatpush.msra.mxu1 %v5125_v16  ;;  %v9233_v16 = vld [vmem:[%s13401_s15 + $0x110] sm:$0xff] }
 0xdf2   : > { %5263 = vmatpush.msrb.mxu2 %v9202_v25  ;;  %5181 = vmatpush.msrb.mxu0 %v9183_v8  ;;  %v9213_v25 = vld [vmem:[%s13401_s15 + $0x88] sm:$0xff] }
 0xdf3   : > { %5201 = vmatpush.msra.mxu1 %v5124_v47  ;;  %v9232_v47 = vld [vmem:[%s13401_s15 + $0x108] sm:$0xff] }
 0xdf4   : > { %5264 = vmatpush.msrb.mxu2 %v9201_v5  ;;  %5182 = vmatpush.msrb.mxu0 %v9182_v50  ;;  %v9212_v5 = vld [vmem:[%s13401_s15 + $0x80] sm:$0xff] }
 0xdf5   : > { %5202 = vmatpush.msra.mxu1 %v5123_v46  ;;  %v5283_v46 = vld [vmem:[%s13403_s5] sm:$0xff]  ;;  %s13404_s5 = sld [smem:[#allocation30_spill]] }
 0xdf6   : > { %5265 = vmatpush.msrb.mxu2 %v9200_v15  ;;  %5183 = vmatpush.msrb.mxu0 %v9181_v4  ;;  %v9282_v15 = vld [vmem:[%s13401_s15 + $0x278] sm:$0xff] }
 0xdf7   : > { %5203 = vmatpush.msra.mxu1 %v5122_v22  ;;  %v5325_v4 = vld [vmem:[%s13401_s15 + $0x78] sm:$0xff]  ;;  %v9231_v22 = vld [vmem:[%s13401_s15 + $0x100] sm:$0xff] }
 0xdf8   : > { %5266 = vmatpush.msrb.mxu2 %v9199_v58  ;;  %5184 = vmatpush.msrb.mxu0 %v9180_v13  ;;  %v9281_v58 = vld [vmem:[%s13401_s15 + $0x270] sm:$0xff]  ;;  %v9300_v13 = vld [vmem:[%s13401_s15 + $0x2f8] sm:$0xff] }
 0xdf9   : > { %5204 = vmatpush.msra.mxu1 %v5121_v41  ;;  %v5324_v41 = vld [vmem:[%s13401_s15 + $0x70] sm:$0xff] }
 0xdfa   : > { %5267 = vmatpush.msrb.mxu2 %v9198_v7  ;;  %5185 = vmatpush.msrb.mxu0 %v9179_v23  ;;  %v9280_v7 = vld [vmem:[%s13401_s15 + $0x268] sm:$0xff]  ;;  %v9299_v23 = vld [vmem:[%s13401_s15 + $0x2f0] sm:$0xff] }
 0xdfb   : > { %5205 = vmatpush.msra.mxu1 %v5120_v55  ;;  %v5323_v55 = vld [vmem:[%s13401_s15 + $0x68] sm:$0xff] }
 0xdfc   : > { %5268 = vmatpush.msrb.mxu2 %v9197_v56  ;;  %5186 = vmatpush.msrb.mxu0 %v9178_v49  ;;  %v9279_v56 = vld [vmem:[%s13401_s15 + $0x260] sm:$0xff]  ;;  %v9298_v49 = vld [vmem:[%s13401_s15 + $0x2e8] sm:$0xff] }
 0xdfd   : > { %5206 = vmatpush.msra.mxu1 %v5119_v40  ;;  %v5322_v40 = vld [vmem:[%s13401_s15 + $0x60] sm:$0xff] }
 0xdfe   : > { %5269 = vmatpush.msrb.mxu2 %v9196_v24  ;;  %5187 = vmatpush.msrb.mxu0 %v9177_v57  ;;  %v9278_v24 = vld [vmem:[%s13401_s15 + $0x258] sm:$0xff]  ;;  %v9297_v57 = vld [vmem:[%s13401_s15 + $0x2e0] sm:$0xff] }
 0xdff   : > { %5207 = vmatpush.msra.mxu1 %v5118_v31  ;;  %v5321_v31 = vld [vmem:[%s13401_s15 + $0x58] sm:$0xff] }
 0xe00   : > { %5270 = vmatpush.msrb.mxu2 %v9195_v34  ;;  %5188 = vmatpush.msrb.mxu0 %v9176_v38  ;;  %v9277_v34 = vld [vmem:[%s13401_s15 + $0x250] sm:$0xff] }
 0xe01   : > { %5208 = vmatpush.msra.mxu1 %v5117_v37  ;;  %v5320_v38 = vld [vmem:[%s13401_s15 + $0x50] sm:$0xff]  ;;  %v9276_v37 = vld [vmem:[%s13401_s15 + $0x248] sm:$0xff] }
 0xe02   : > { %5271 = vmatpush.msrb.mxu2 %v9194_v44  ;;  %5189 = vmatpush.msrb.mxu0 %v9175_v62  ;;  %v9296_v44 = vld [vmem:[%s13401_s15 + $0x2d8] sm:$0xff]  ;;  %v9295_v62 = vld [vmem:[%s13401_s15 + $0x2d0] sm:$0xff] }
 0xe03   : > { %5209 = vmatpush.msra.mxu1 %v5116_v45  ;;  %v5319_v45 = vld [vmem:[%s13401_s15 + $0x48] sm:$0xff] }
 0xe04   : > { %5364 = vmatpush.msra.mxu0 %v9227_v61  ;;  %5448 = vmatpush.msra.mxu2 %v9246_v6  ;;  %v9274_v61 = vld [vmem:[%s13401_s15 + $0x238] sm:$0xff] }
 0xe05   : > { %v5317_v6 = vld [vmem:[%s13401_s15 + $0x38] sm:$0xff] }
 0xe06   : > { %5365 = vmatpush.msra.mxu0 %v9226_v51  ;;  %5449 = vmatpush.msra.mxu2 %v9245_v0  ;;  %v9293_v51 = vld [vmem:[%s13401_s15 + $0x2c0] sm:$0xff]  ;;  %v9292_v0 = vld [vmem:[%s13401_s15 + $0x2b8] sm:$0xff] }
 0xe08   : > { %5366 = vmatpush.msra.mxu0 %v9225_v60  ;;  %5450 = vmatpush.msra.mxu2 %v9244_v42  ;;  %v9273_v60 = vld [vmem:[%s13401_s15 + $0x230] sm:$0xff] }
 0xe09   : > { %v5316_v42 = vld [vmem:[%s13401_s15 + $0x30] sm:$0xff] }
 0xe0a   : > { %5367 = vmatpush.msra.mxu0 %v9224_v63  ;;  %5451 = vmatpush.msra.mxu2 %v9243_v59  ;;  %v9272_v63 = vld [vmem:[%s13401_s15 + $0x228] sm:$0xff]  ;;  %v9291_v59 = vld [vmem:[%s13401_s15 + $0x2b0] sm:$0xff] }
 0xe0c   : > { %5368 = vmatpush.msra.mxu0 %v9223_v32  ;;  %5452 = vmatpush.msra.mxu2 %v9242_v52  ;;  %v5315_v32 = vld [vmem:[%s13401_s15 + $0x28] sm:$0xff]  ;;  %v9271_v52 = vld [vmem:[%s13401_s15 + $0x220] sm:$0xff] }
 0xe0e   : > { %5369 = vmatpush.msra.mxu0 %v9222_v18  ;;  %5453 = vmatpush.msra.mxu2 %v9241_v12  ;;  %v9290_v18 = vld [vmem:[%s13401_s15 + $0x2a8] sm:$0xff]  ;;  %v5314_v12 = vld [vmem:[%s13401_s15 + $0x20] sm:$0xff] }
 0xe10   : > { %5370 = vmatpush.msra.mxu0 %v9221_v9  ;;  %5454 = vmatpush.msra.mxu2 %v9240_v10  ;;  %v9270_v9 = vld [vmem:[%s13401_s15 + $0x218] sm:$0xff] }
 0xe11   : > { %v5313_v10 = vld [vmem:[%s13401_s15 + $0x18] sm:$0xff] }
 0xe12   : > { %5371 = vmatpush.msra.mxu0 %v9220_v35  ;;  %5455 = vmatpush.msra.mxu2 %v9239_v21  ;;  %v9269_v35 = vld [vmem:[%s13401_s15 + $0x210] sm:$0xff] }
 0xe13   : > { %v5312_v21 = vld [vmem:[%s13401_s15 + $0x10] sm:$0xff] }
 0xe14   : > { %5372 = vmatpush.msra.mxu0 %v9219_v17  ;;  %5456 = vmatpush.msra.mxu2 %v9238_v54  ;;  %v9268_v17 = vld [vmem:[%s13401_s15 + $0x208] sm:$0xff] }
 0xe15   : > { %v5311_v54 = vld [vmem:[%s13401_s15 + $0x8] sm:$0xff] }
 0xe16   : > { %5373 = vmatpush.msra.mxu0 %v9218_v2  ;;  %5457 = vmatpush.msra.mxu2 %v9237_v26  ;;  %v5310_v2 = vld [vmem:[%s13401_s15] sm:$0xff] }
 0xe17   : > { %v9267_v26 = vld [vmem:[%s13401_s15 + $0x200] sm:$0xff] }
 0xe18   : > { %5374 = vmatpush.msra.mxu0 %v9217_v39  ;;  %5458 = vmatpush.msra.mxu2 %v9236_v27  ;;  %v9287_v39 = vld [vmem:[%s13401_s15 + $0x290] sm:$0xff]  ;;  %v9286_v27 = vld [vmem:[%s13401_s15 + $0x288] sm:$0xff] }
 0xe1a   : > { %5375 = vmatpush.msra.mxu0 %v9216_v28  ;;  %5459 = vmatpush.msra.mxu2 %v9235_v48  ;;  %v9285_v28 = vld [vmem:[%s13401_s15 + $0x280] sm:$0xff] }
 0xe1c   : > { %5376 = vmatpush.msra.mxu0 %v9215_v20  ;;  %5460 = vmatpush.msra.mxu2 %v9234_v19  ;;  %v9335_v20 = vld [vmem:[%s13401_s15 + $0x3f0] sm:$0xff]  ;;  %v9333_v19 = vld [vmem:[%s13401_s15 + $0x3e0] sm:$0xff] }
 0xe1e   : > { %5377 = vmatpush.msra.mxu0 %v9214_v14  ;;  %5461 = vmatpush.msra.mxu2 %v9233_v16  ;;  %v9331_v14 = vld [vmem:[%s13401_s15 + $0x3d0] sm:$0xff]  ;;  %v9329_v16 = vld [vmem:[%s13401_s15 + $0x3c0] sm:$0xff] }
 0xe20   : > { %5378 = vmatpush.msra.mxu0 %v9213_v25  ;;  %5462 = vmatpush.msra.mxu2 %v9232_v47  ;;  %v9328_v25 = vld [vmem:[%s13401_s15 + $0x3b8] sm:$0xff]  ;;  %v9326_v47 = vld [vmem:[%s13401_s15 + $0x3a8] sm:$0xff] }
 0xe22   : > { %5379 = vmatpush.msra.mxu0 %v9212_v5  ;;  %5463 = vmatpush.msra.mxu2 %v9231_v22  ;;  %v9325_v5 = vld [vmem:[%s13401_s15 + $0x3a0] sm:$0xff]  ;;  %v9228_v22 = vld [vmem:[%s10121_s21 + $0x8] sm:$0xff] }
 0xe5f   : > { %v5113_v3 = vpop.f32.mrf.mxu0 }
 0xe60   : > { %v5154_v11 = vpop.f32.mrf.mxu1  ;;  %5210 = vmatmul.f32.vlgmr.msra.gmra.mxu1 %v5113_v3  ;;  %v9275_v3 = vld [vmem:[%s13401_s15 + $0x240] sm:$0xff] }
 0xe61   : > { %5190 = vmatmul.f32.vlgmr.msrb.gmra.mxu0 %v5154_v11  ;;  %v9294_v11 = vld [vmem:[%s13401_s15 + $0x2c8] sm:$0xff] }
 0xe62   : > { %5572 = vmatpush.msrb.mxu0 %v9282_v15  ;;  %v9322_v15 = vld [vmem:[%s13401_s15 + $0x388] sm:$0xff] }
 0xe64   : > { %5573 = vmatpush.msrb.mxu0 %v9281_v58 }
 0xe66   : > { %v5236_v33 = vpop.f32.mrf.mxu2  ;;  %5574 = vmatpush.msrb.mxu0 %v9280_v7  ;;  %v5346_v7 = vld [vmem:[%s10121_s21] sm:$0xff] }
 0xe67   : > { %5272 = vmatmul.f32.vlgmr.msrb.gmra.mxu2 %v5236_v33  ;;  %v5318_v33 = vld [vmem:[%s13401_s15 + $0x40] sm:$0xff] }
 0xe68   : > { %5634 = vmatpush.msrb.mxu2 %v9300_v13  ;;  %5575 = vmatpush.msrb.mxu0 %v9279_v56  ;;  %v9262_v56 = vld [vmem:[%s13401_s15 + $0x1e8] sm:$0xff] }
 0xe6a   : > { %5635 = vmatpush.msrb.mxu2 %v9299_v23  ;;  %5576 = vmatpush.msrb.mxu0 %v9278_v24  ;;  %v9264_v23 = vld [vmem:[%s13401_s15 + $0x1f8] sm:$0xff] }
 0xe6b   : > { %v9260_v24 = vld [vmem:[%s13401_s15 + $0x1d8] sm:$0xff] }
 0xe6c   : > { %5636 = vmatpush.msrb.mxu2 %v9298_v49  ;;  %5577 = vmatpush.msrb.mxu0 %v9277_v34  ;;  %v9261_v49 = vld [vmem:[%s13401_s15 + $0x1e0] sm:$0xff] }
 0xe6d   : > { %v9257_v34 = vld [vmem:[%s13401_s15 + $0x1c0] sm:$0xff] }
 0xe6e   : > { %5637 = vmatpush.msrb.mxu2 %v9297_v57  ;;  %5578 = vmatpush.msrb.mxu0 %v9276_v37  ;;  %v9259_v57 = vld [vmem:[%s13401_s15 + $0x1d0] sm:$0xff]  ;;  %v9254_v37 = vld [vmem:[%s13401_s15 + $0x1a8] sm:$0xff] }
 0xe70   : > { %5638 = vmatpush.msrb.mxu2 %v9296_v44  ;;  %5579 = vmatpush.msrb.mxu0 %v9275_v3  ;;  %v9256_v44 = vld [vmem:[%s13401_s15 + $0x1b8] sm:$0xff]  ;;  %v9251_v3 = vld [vmem:[%s13401_s15 + $0x190] sm:$0xff] }
 0xe72   : > { %5639 = vmatpush.msrb.mxu2 %v9295_v62  ;;  %5580 = vmatpush.msrb.mxu0 %v9274_v61  ;;  %v9253_v62 = vld [vmem:[%s13401_s15 + $0x1a0] sm:$0xff] }
 0xe74   : > { %5640 = vmatpush.msrb.mxu2 %v9294_v11  ;;  %5581 = vmatpush.msrb.mxu0 %v9273_v60  ;;  %v9250_v11 = vld [vmem:[%s13401_s15 + $0x188] sm:$0xff]  ;;  %v9265_v60 = vld [vmem:[%s10121_s21 + $0x18] sm:$0xff] }
 0xe76   : > { %5641 = vmatpush.msrb.mxu2 %v9293_v51  ;;  %5582 = vmatpush.msrb.mxu0 %v9272_v63 }
 0xe78   : > { %5642 = vmatpush.msrb.mxu2 %v9292_v0  ;;  %5583 = vmatpush.msrb.mxu0 %v9271_v52  ;;  %v9317_v52 = vld [vmem:[%s13401_s15 + $0x370] sm:$0xff] }
 0xe7a   : > { %5643 = vmatpush.msrb.mxu2 %v9291_v59  ;;  %5584 = vmatpush.msrb.mxu0 %v9270_v9  ;;  %v9283_v59 = vld [vmem:[%s10121_s21 + $0x20] sm:$0xff]  ;;  %v9301_v9 = vld [vmem:[%s10121_s21 + $0x28] sm:$0xff] }
 0xe7c   : > { %5644 = vmatpush.msrb.mxu2 %v9290_v18  ;;  %5585 = vmatpush.msrb.mxu0 %v9269_v35  ;;  %v9316_v18 = vld [vmem:[%s13401_s15 + $0x368] sm:$0xff]  ;;  %v9313_v35 = vld [vmem:[%s13401_s15 + $0x350] sm:$0xff] }
 0xe7e   : > { %5586 = vmatpush.msrb.mxu0 %v9268_v17  ;;  %v9311_v17 = vld [vmem:[%s13401_s15 + $0x340] sm:$0xff] }
 0xe80   : > { %5587 = vmatpush.msrb.mxu0 %v9267_v26  ;;  %v9308_v26 = vld [vmem:[%s13401_s15 + $0x328] sm:$0xff] }
 0xedd   : > { %v5211_v43 = vpop.f32.mrf.mxu1 }
 0xede   : > { %v5191_v29 = vpop.f32.mrf.mxu0 }
 0xedf   : > { %v5212_v36 = vadd.f32 %v5211_v43, %v5191_v29  ;;  %v9289_v29 = vld [vmem:[%s13401_s15 + $0x2a0] sm:$0xff]  ;;  %v9288_v43 = vld [vmem:[%s13401_s15 + $0x298] sm:$0xff] }
 0xee0   : > { %5645 = vmatpush.msrb.mxu2 %v9289_v29  ;;  %v9307_v29 = vld [vmem:[%s13401_s15 + $0x320] sm:$0xff] }
 0xee2   : > { %5646 = vmatpush.msrb.mxu2 %v9288_v43  ;;  %v9306_v43 = vld [vmem:[%s13401_s15 + $0x318] sm:$0xff] }
 0xee4   : > { %5647 = vmatpush.msrb.mxu2 %v9287_v39  ;;  %v9305_v39 = vld [vmem:[%s13401_s15 + $0x310] sm:$0xff] }
 0xee6   : > { %5648 = vmatpush.msrb.mxu2 %v9286_v27  ;;  %v9304_v27 = vld [vmem:[%s13401_s15 + $0x308] sm:$0xff] }
 0xee8   : > { %5649 = vmatpush.msrb.mxu2 %v9285_v28  ;;  %v9303_v28 = vld [vmem:[%s13401_s15 + $0x300] sm:$0xff] }
 0xeea   : > { %v5273_v53 = vpop.f32.mrf.mxu2 }
 0xeeb   : > { %v5276_v30 = vadd.f32 %v5273_v53, %v5212_v36  ;;  %v9336_v36 = vld [vmem:[%s13401_s15 + $0x3f8] sm:$0xff] }
 0xeec   : > { %v9332_v53 = vld [vmem:[%s13401_s15 + $0x3d8] sm:$0xff] }
 0xeed   : > { %v5281_v8 = vadd.f32 %v9954_v1, %v5276_v30  ;;  %v9334_v1 = vld [vmem:[%s13401_s15 + $0x3e8] sm:$0xff] }
 0xeee   : > { %v9330_v30 = vld [vmem:[%s13401_s15 + $0x3c8] sm:$0xff] }
 0xeef   : > { %v5282_v50 = vmax.f32 %v5281_v8, 0.0  ;;  %v9327_v8 = vld [vmem:[%s13401_s15 + $0x3b0] sm:$0xff] }
 0xef1   : > { %9210 = vmatpush.msk.msrb.mxu3 %vm1363_vm0, %v5282_v50  ;;  %v9324_v50 = vld [vmem:[%s13401_s15 + $0x398] sm:$0xff] }
 0xef2   : > { %9211 = vmatmul.msk.f32.vlgmr.msrb.gmra.mxu3 %vm1314_vm1, %v5283_v46  ;;  %v9323_v46 = vld [vmem:[%s13401_s15 + $0x390] sm:$0xff] }
 0xef3   : > { %5326 = vmatpush.msra.mxu3 %v5325_v4  ;;  %v9321_v4 = vld [vmem:[%s13401_s15 + $0x380] sm:$0xff] }
 0xef5   : > { %5327 = vmatpush.msra.mxu3 %v5324_v41 }
 0xef7   : > { %5328 = vmatpush.msra.mxu3 %v5323_v55  ;;  %v9263_v55 = vld [vmem:[%s13401_s15 + $0x1f0] sm:$0xff] }
 0xef9   : > { %5329 = vmatpush.msra.mxu3 %v5322_v40  ;;  %v9247_v40 = vld [vmem:[%s10121_s21 + $0x10] sm:$0xff] }
 0xefb   : > { %5330 = vmatpush.msra.mxu3 %v5321_v31  ;;  %v9258_v31 = vld [vmem:[%s13401_s15 + $0x1c8] sm:$0xff] }
 0xefd   : > { %5331 = vmatpush.msra.mxu3 %v5320_v38  ;;  %v9255_v38 = vld [vmem:[%s13401_s15 + $0x1b0] sm:$0xff] }
 0xeff   : > { %5332 = vmatpush.msra.mxu3 %v5319_v45  ;;  %v9252_v45 = vld [vmem:[%s13401_s15 + $0x198] sm:$0xff] }
 0xf01   : > { %5333 = vmatpush.msra.mxu3 %v5318_v33  ;;  %v9249_v33 = vld [vmem:[%s13401_s15 + $0x180] sm:$0xff] }
 0xf03   : > { %5334 = vmatpush.msra.mxu3 %v5317_v6 }
 0xf05   : > { %5335 = vmatpush.msra.mxu3 %v5316_v42 }
 0xf07   : > { %5336 = vmatpush.msra.mxu3 %v5315_v32  ;;  %v9318_v32 = vld [vmem:[%s13401_s15 + $0x378] sm:$0xff] }
 0xf09   : > { %5337 = vmatpush.msra.mxu3 %v5314_v12  ;;  %v9315_v12 = vld [vmem:[%s13401_s15 + $0x360] sm:$0xff] }
 0xf0b   : > { %5338 = vmatpush.msra.mxu3 %v5313_v10  ;;  %v9314_v10 = vld [vmem:[%s13401_s15 + $0x358] sm:$0xff] }
 0xf0d   : > { %5339 = vmatpush.msra.mxu3 %v5312_v21  ;;  %v9312_v21 = vld [vmem:[%s13401_s15 + $0x348] sm:$0xff] }
 0xf0f   : > { %5340 = vmatpush.msra.mxu3 %v5311_v54  ;;  %v9310_v54 = vld [vmem:[%s13401_s15 + $0x338] sm:$0xff] }
 0xf11   : > { %5341 = vmatpush.msra.mxu3 %v5310_v2  ;;  %v9309_v2 = vld [vmem:[%s13401_s15 + $0x330] sm:$0xff] }
 0xf75   : > { %v11809_v48 = vpop.f32.mrf.mxu3 }
 0xf76   : > { %5342 = vmatmul.f32.vlgmr.msra.gmra.mxu3 %v11809_v48  ;;  %5380 = vmatmul.f32.vlgmr.msra.gmra.mxu0 %v11809_v48 }
 0xf77   : > { %5464 = vmatmul.f32.vlgmr.msra.gmra.mxu2 %v11809_v48  ;;  %5758 = vmatpush.msra.mxu0 %v9336_v36 }
 0xf79   : > { %5759 = vmatpush.msra.mxu0 %v9335_v20 }
 0xf7b   : > { %5760 = vmatpush.msra.mxu0 %v9334_v1 }
 0xf7d   : > { %5761 = vmatpush.msra.mxu0 %v9333_v19  ;;  %v9319_v19 = vld [vmem:[%s10121_s21 + $0x30] sm:$0xff] }
 0xf7e   : > { %5588 = vmatmul.f32.vlgmr.msrb.gmra.mxu0 %v11809_v48 }
 0xf7f   : > { %5650 = vmatmul.f32.vlgmr.msrb.gmra.mxu2 %v11809_v48  ;;  %5762 = vmatpush.msra.mxu0 %v9332_v53 }
 0xf81   : > { %5763 = vmatpush.msra.mxu0 %v9331_v14  ;;  %v9354_v14 = vld [vmem:[%s13401_s15 + $0x478] sm:$0xff] }
 0xf83   : > { %5764 = vmatpush.msra.mxu0 %v9330_v30 }
 0xf85   : > { %5765 = vmatpush.msra.mxu0 %v9329_v16  ;;  %v9353_v16 = vld [vmem:[%s13401_s15 + $0x470] sm:$0xff] }
 0xf87   : > { %5766 = vmatpush.msra.mxu0 %v9328_v25  ;;  %v9352_v25 = vld [vmem:[%s13401_s15 + $0x468] sm:$0xff] }
 0xf89   : > { %5767 = vmatpush.msra.mxu0 %v9327_v8  ;;  %v9351_v8 = vld [vmem:[%s13401_s15 + $0x460] sm:$0xff] }
 0xf8b   : > { %5768 = vmatpush.msra.mxu0 %v9326_v47  ;;  %v9337_v47 = vld [vmem:[%s10121_s21 + $0x38] sm:$0xff] }
 0xf8d   : > { %5769 = vmatpush.msra.mxu0 %v9325_v5  ;;  %v9350_v5 = vld [vmem:[%s13401_s15 + $0x458] sm:$0xff] }
 0xf8f   : > { %5770 = vmatpush.msra.mxu0 %v9324_v50  ;;  %v9349_v50 = vld [vmem:[%s13401_s15 + $0x450] sm:$0xff] }
 0xf91   : > { %5771 = vmatpush.msra.mxu0 %v9323_v46  ;;  %v9348_v46 = vld [vmem:[%s13401_s15 + $0x448] sm:$0xff] }
 0xf93   : > { %5772 = vmatpush.msra.mxu0 %v9322_v15  ;;  %v9347_v15 = vld [vmem:[%s13401_s15 + $0x440] sm:$0xff] }
 0xf95   : > { %5773 = vmatpush.msra.mxu0 %v9321_v4  ;;  %v9346_v4 = vld [vmem:[%s13401_s15 + $0x438] sm:$0xff] }
 0xf96   : > { %5774 = vmatmul.f32.vlgmr.msra.gmra.mxu0 %v11809_v48 }
 0xff3   : > { %v5381_v58 = vpop.f32.mrf.mxu0 }
 0xff4   : > { %5403 = vmatpush.msrb.mxu1 %v5381_v58  ;;  %v9344_v58 = vld [vmem:[%s13401_s15 + $0x428] sm:$0xff] }
 0xff5   : > { %9229 = vmatmul.msk.f32.vlgmr.msrb.gmra.mxu1 %vm4213_vm3, %v9228_v22  ;;  %v9345_v22 = vld [vmem:[%s13401_s15 + $0x430] sm:$0xff] }
 0xff9   : > { %v5343_v13 = vpop.f32.mrf.mxu3 }
 0xffa   : > { %v5465_v41 = vpop.f32.mrf.mxu2  ;;  %5426 = vmatpush.msra.mxu1 %v5343_v13  ;;  %v9343_v13 = vld [vmem:[%s13401_s15 + $0x420] sm:$0xff] }
 0xffb   : > { %v5589_v42 = vpop.f32.mrf.mxu0 }
 0xffc   : > { %5487 = vmatpush.msrb.mxu1 %v5465_v41  ;;  %v9342_v41 = vld [vmem:[%s13401_s15 + $0x418] sm:$0xff] }
 0xffd   : > { %9230 = vmatmul.msk.f32.vlgmr.msra.gmra.mxu1 %vm4213_vm3, %v5346_v7  ;;  %v9341_v7 = vld [vmem:[%s13401_s15 + $0x410] sm:$0xff] }
 0xffe   : > { %5510 = vmatpush.msra.mxu1 %v9264_v23  ;;  %v9340_v23 = vld [vmem:[%s13401_s15 + $0x408] sm:$0xff] }
0x1000   : > { %5511 = vmatpush.msra.mxu1 %v9263_v55  ;;  %v9339_v55 = vld [vmem:[%s13401_s15 + $0x400] sm:$0xff] }
0x1002   : > { %5512 = vmatpush.msra.mxu1 %v9262_v56  ;;  %v5651_v63 = vpop.f32.mrf.mxu2 }
0x1004   : > { %5513 = vmatpush.msra.mxu1 %v9261_v49 }
0x1005   : > { %9248 = vmatmul.msk.f32.vlgmr.msrb.gmra.mxu1 %vm4213_vm3, %v9247_v40  ;;  %v9355_v40 = vld [vmem:[%s10121_s21 + $0x40] sm:$0xff] }
0x1006   : > { %5514 = vmatpush.msra.mxu1 %v9260_v24 }
0x1008   : > { %5515 = vmatpush.msra.mxu1 %v9259_v57 }
0x100a   : > { %5516 = vmatpush.msra.mxu1 %v9258_v31 }
0x100c   : > { %5517 = vmatpush.msra.mxu1 %v9257_v34 }
0x100e   : > { %5518 = vmatpush.msra.mxu1 %v9256_v44 }
0x1010   : > { %5519 = vmatpush.msra.mxu1 %v9255_v38 }
0x1012   : > { %5520 = vmatpush.msra.mxu1 %v9254_v37 }
0x1013   : > { %v5775_v30 = vpop.f32.mrf.mxu0 }
0x1014   : > { %5521 = vmatpush.msra.mxu1 %v9253_v62  ;;  %v9955_v62 = vld [vmem:[%s13404_s5] ss:$0 sm:$0xff]  ;;  %s13407_s5 = sld [smem:[#allocation32_spill]] }
0x1016   : > { %5522 = vmatpush.msra.mxu1 %v9252_v45 }
0x1018   : > { %5523 = vmatpush.msra.mxu1 %v9251_v3  ;;  %v5923_v3 = vld [vmem:[%s13405_s3 + $0x38] sm:$0xff] }
0x101a   : > { %5524 = vmatpush.msra.mxu1 %v9250_v11  ;;  %v9372_v11 = vld [vmem:[%s13405_s3 + $0x78] sm:$0xff] }
0x101b   : > { %5986 = vmatpush.msrb.mxu0 %v9372_v11 }
0x101c   : > { %5525 = vmatpush.msra.mxu1 %v9249_v33  ;;  %v5922_v33 = vld [vmem:[%s13405_s3 + $0x30] sm:$0xff] }
0x101d   : > { %5526 = vmatmul.f32.vlgmr.msra.gmra.mxu1 %v11809_v48 }
0x1072   : > { %v11855_v61 = vpop.f32.mrf.mxu1 }
0x107a   : > { %v11857_v51 = vpop.f32.mrf.mxu1 }
0x107b   : > { %v5429_v57 = vadd.f32 %v11857_v51, %v11855_v61  ;;  %v9371_v61 = vld [vmem:[%s13405_s3 + $0x70] sm:$0xff]  ;;  %v5921_v51 = vld [vmem:[%s13405_s3 + $0x28] sm:$0xff] }
0x107c   : > { %5987 = vmatpush.msrb.mxu0 %v9371_v61  ;;  %v9416_v61 = vld [vmem:[%s13405_s3 + $0xf8] sm:$0xff] }
0x1082   : > { %v11859_v6 = vpop.f32.mrf.mxu1 }
0x1083   : > { %v5492_v31 = vadd.f32 %v11859_v6, %v5429_v57  ;;  %v9370_v6 = vld [vmem:[%s13405_s3 + $0x68] sm:$0xff]  ;;  %v9512_v57 = vld [vmem:[%s13405_s3 + $0x218] sm:$0xff] }
0x1084   : > { %5988 = vmatpush.msrb.mxu0 %v9370_v6  ;;  %v9414_v6 = vld [vmem:[%s13405_s3 + $0xe8] sm:$0xff] }
0x109a   : > { %v5527_v0 = vpop.f32.mrf.mxu1 }
0x109b   : > { %5549 = vmatpush.msrb.mxu3 %v5527_v0 }
0x109c   : > { %9266 = vmatmul.msk.f32.vlgmr.msrb.gmra.mxu3 %vm4213_vm3, %v9265_v60 }
0x109d   : > { %5611 = vmatpush.msra.mxu3 %v5589_v42  ;;  %v5920_v42 = vld [vmem:[%s13405_s3 + $0x20] sm:$0xff] }
0x109f   : > { %5673 = vmatpush.msrb.mxu3 %v5651_v63 }
0x10a4   : > { %9284 = vmatmul.msk.f32.vlgmr.msra.gmra.mxu3 %vm4213_vm3, %v9283_v59  ;;  %v5871_v59 = vld [vmem:[%s13406_s6] sm:$0xff] }
0x10a5   : > { %5696 = vmatpush.msra.mxu3 %v9318_v32  ;;  %v9369_v32 = vld [vmem:[%s13405_s3 + $0x60] sm:$0xff] }
0x10a6   : > { %5989 = vmatpush.msrb.mxu0 %v9369_v32  ;;  %v9412_v32 = vld [vmem:[%s13405_s3 + $0xd8] sm:$0xff] }
0x10a7   : > { %5697 = vmatpush.msra.mxu3 %v9317_v52  ;;  %v5919_v52 = vld [vmem:[%s13405_s3 + $0x18] sm:$0xff] }
0x10a9   : > { %5698 = vmatpush.msra.mxu3 %v9316_v18  ;;  %v9368_v18 = vld [vmem:[%s13405_s3 + $0x58] sm:$0xff] }
0x10aa   : > { %5990 = vmatpush.msrb.mxu0 %v9368_v18  ;;  %v9410_v18 = vld [vmem:[%s13405_s3 + $0xc8] sm:$0xff] }
0x10ab   : > { %5699 = vmatpush.msra.mxu3 %v9315_v12  ;;  %v5918_v12 = vld [vmem:[%s13405_s3 + $0x10] sm:$0xff] }
0x10ac   : > { %9302 = vmatmul.msk.f32.vlgmr.msrb.gmra.mxu3 %vm4213_vm3, %v9301_v9  ;;  %v9367_v9 = vld [vmem:[%s13405_s3 + $0x50] sm:$0xff] }
0x10ad   : > { %5700 = vmatpush.msra.mxu3 %v9314_v10  ;;  %v5917_v10 = vld [vmem:[%s13405_s3 + $0x8] sm:$0xff]  ;;  %5991 = vmatpush.msrb.mxu0 %v9367_v9  ;;  %v9409_v9 = vld [vmem:[%s13405_s3 + $0xc0] sm:$0xff] }
0x10af   : > { %5701 = vmatpush.msra.mxu3 %v9313_v35  ;;  %v9366_v35 = vld [vmem:[%s13405_s3 + $0x48] sm:$0xff] }
0x10b0   : > { %5992 = vmatpush.msrb.mxu0 %v9366_v35 }
0x10b1   : > { %5702 = vmatpush.msra.mxu3 %v9312_v21  ;;  %v5872_v21 = vld [vmem:[%s13406_s6 + $0x8] sm:$0xff] }
0x10b3   : > { %5703 = vmatpush.msra.mxu3 %v9311_v17  ;;  %v5873_v17 = vld [vmem:[%s13406_s6 + $0x10] sm:$0xff] }
0x10b5   : > { %5704 = vmatpush.msra.mxu3 %v9310_v54  ;;  %v5874_v54 = vld [vmem:[%s13406_s6 + $0x18] sm:$0xff]  ;;  %s13484_s6 = scalar_lea.vmem [#allocation2], %s11611_s4 }
0x10b6   : > { %s8420_s8 = sshll.u32 %s13484_s6, 4  ;;  %s8421_s8 = int_to_ptr.vmem [resolvable:$true] %s8420_s8 }
0x10b7   : > { %5705 = vmatpush.msra.mxu3 %v9309_v2  ;;  %v5916_v2 = vld [vmem:[%s13405_s3] sm:$0xff] }
0x10b9   : > { %5706 = vmatpush.msra.mxu3 %v9308_v26  ;;  %v9365_v26 = vld [vmem:[%s13405_s3 + $0x40] sm:$0xff] }
0x10ba   : > { %5993 = vmatpush.msrb.mxu0 %v9365_v26  ;;  %v9380_v26 = vld [vmem:[%s10116_s17 + $0x38] sm:$0xff] }
0x10bb   : > { %5707 = vmatpush.msra.mxu3 %v9307_v29  ;;  %v9396_v29 = vld [vmem:[%s13405_s3 + $0xb8] sm:$0xff] }
0x10bd   : > { %5708 = vmatpush.msra.mxu3 %v9306_v43  ;;  %v9395_v43 = vld [vmem:[%s13405_s3 + $0xb0] sm:$0xff] }
0x10bf   : > { %5709 = vmatpush.msra.mxu3 %v9305_v39  ;;  %v9394_v39 = vld [vmem:[%s13405_s3 + $0xa8] sm:$0xff] }
0x10c1   : > { %5710 = vmatpush.msra.mxu3 %v9304_v27  ;;  %v9393_v27 = vld [vmem:[%s13405_s3 + $0xa0] sm:$0xff] }
0x10c3   : > { %5711 = vmatpush.msra.mxu3 %v9303_v28  ;;  %v9392_v28 = vld [vmem:[%s13405_s3 + $0x98] sm:$0xff] }
0x10c4   : > { %5712 = vmatmul.f32.vlgmr.msra.gmra.mxu3 %v11809_v48 }
0x10c5   : > { %5944 = vmatpush.msrb.mxu3 %v5923_v3 }
0x10c7   : > { %5945 = vmatpush.msrb.mxu3 %v5922_v33  ;;  %v9377_v33 = vld [vmem:[%s10116_s17 + $0x20] sm:$0xff] }
0x10c9   : > { %5946 = vmatpush.msrb.mxu3 %v5921_v51  ;;  %v9415_v51 = vld [vmem:[%s13405_s3 + $0xf0] sm:$0xff] }
0x10cb   : > { %5947 = vmatpush.msrb.mxu3 %v5920_v42  ;;  %v9413_v42 = vld [vmem:[%s13405_s3 + $0xe0] sm:$0xff] }
0x10cd   : > { %5948 = vmatpush.msrb.mxu3 %v5919_v52  ;;  %v9411_v52 = vld [vmem:[%s13405_s3 + $0xd0] sm:$0xff] }
0x10cf   : > { %5949 = vmatpush.msrb.mxu3 %v5918_v12  ;;  %v5966_v12 = vld [vmem:[%s10116_s17 + $0x8] sm:$0xff] }
0x10d1   : > { %5950 = vmatpush.msrb.mxu3 %v5917_v10  ;;  %v9379_v10 = vld [vmem:[%s10116_s17 + $0x30] sm:$0xff] }
0x10d3   : > { %5951 = vmatpush.msrb.mxu3 %v5916_v2  ;;  %v5967_v2 = vld [vmem:[%s10116_s17 + $0x10] sm:$0xff] }
0x10d5   : > { %6110 = vmatpush.msra.mxu3 %v9396_v29 }
0x10d7   : > { %6111 = vmatpush.msra.mxu3 %v9395_v43  ;;  %v9453_v43 = vld [vmem:[%s13405_s3 + $0x160] sm:$0xff] }
0x10d9   : > { %6112 = vmatpush.msra.mxu3 %v9394_v39  ;;  %v9452_v39 = vld [vmem:[%s13405_s3 + $0x158] sm:$0xff] }
0x10db   : > { %6113 = vmatpush.msra.mxu3 %v9393_v27  ;;  %v9451_v27 = vld [vmem:[%s13405_s3 + $0x150] sm:$0xff] }
0x10dd   : > { %6114 = vmatpush.msra.mxu3 %v9392_v28  ;;  %v9450_v28 = vld [vmem:[%s13405_s3 + $0x148] sm:$0xff] }
0x111f   : > { %v5551_v36 = vpop.f32.mrf.mxu3 }
0x1120   : > { %v5554_v34 = vadd.f32 %v5551_v36, %v5492_v31  ;;  %v9391_v36 = vld [vmem:[%s13405_s3 + $0x90] sm:$0xff] }
0x1121   : > { %6115 = vmatpush.msra.mxu3 %v9391_v36  ;;  %v9511_v31 = vld [vmem:[%s13405_s3 + $0x210] sm:$0xff]  ;;  %v5968_v36 = vld [vmem:[%s10116_s17 + $0x18] sm:$0xff] }
0x1127   : > { %v5613_v20 = vpop.f32.mrf.mxu3 }
0x112f   : > { %v5675_v1 = vpop.f32.mrf.mxu3 }
0x1147   : > { %v5713_v53 = vpop.f32.mrf.mxu3 }
0x1148   : > { %5735 = vmatpush.msrb.mxu1 %v5713_v53 }
0x1149   : > { %9320 = vmatmul.msk.f32.vlgmr.msrb.gmra.mxu1 %vm4213_vm3, %v9319_v19 }
0x114a   : > { %5797 = vmatpush.msra.mxu1 %v5775_v30  ;;  %v9436_v30 = vld [vmem:[%s13405_s3 + $0x138] sm:$0xff] }
0x114c   : > { %5820 = vmatpush.msrb.mxu1 %v9354_v14 }
0x114e   : > { %5821 = vmatpush.msrb.mxu1 %v9353_v16  ;;  %v9435_v16 = vld [vmem:[%s13405_s3 + $0x130] sm:$0xff] }
0x1150   : > { %5822 = vmatpush.msrb.mxu1 %v9352_v25  ;;  %v9434_v25 = vld [vmem:[%s13405_s3 + $0x128] sm:$0xff] }
0x1151   : > { %9338 = vmatmul.msk.f32.vlgmr.msra.gmra.mxu1 %vm4213_vm3, %v9337_v47 }
0x1152   : > { %5823 = vmatpush.msrb.mxu1 %v9351_v8  ;;  %v9433_v8 = vld [vmem:[%s13405_s3 + $0x120] sm:$0xff] }
0x1154   : > { %5824 = vmatpush.msrb.mxu1 %v9350_v5  ;;  %v9432_v5 = vld [vmem:[%s13405_s3 + $0x118] sm:$0xff] }
0x1156   : > { %5825 = vmatpush.msrb.mxu1 %v9349_v50  ;;  %v9431_v50 = vld [vmem:[%s13405_s3 + $0x110] sm:$0xff] }
0x1158   : > { %5826 = vmatpush.msrb.mxu1 %v9348_v46  ;;  %v9430_v46 = vld [vmem:[%s13405_s3 + $0x108] sm:$0xff] }
0x115a   : > { %5827 = vmatpush.msrb.mxu1 %v9347_v15  ;;  %v9429_v15 = vld [vmem:[%s13405_s3 + $0x100] sm:$0xff] }
0x115c   : > { %5828 = vmatpush.msrb.mxu1 %v9346_v4  ;;  %v9476_v4 = vld [vmem:[%s13405_s3 + $0x1b8] sm:$0xff] }
0x115e   : > { %5829 = vmatpush.msrb.mxu1 %v9345_v22  ;;  %v9475_v22 = vld [vmem:[%s13405_s3 + $0x1b0] sm:$0xff] }
0x1160   : > { %5830 = vmatpush.msrb.mxu1 %v9344_v58  ;;  %v9474_v58 = vld [vmem:[%s13405_s3 + $0x1a8] sm:$0xff] }
0x1162   : > { %5831 = vmatpush.msrb.mxu1 %v9343_v13  ;;  %v9473_v13 = vld [vmem:[%s13405_s3 + $0x1a0] sm:$0xff] }
0x1164   : > { %5832 = vmatpush.msrb.mxu1 %v9342_v41  ;;  %v9472_v41 = vld [vmem:[%s13405_s3 + $0x198] sm:$0xff] }
0x1166   : > { %5833 = vmatpush.msrb.mxu1 %v9341_v7  ;;  %v9471_v7 = vld [vmem:[%s13405_s3 + $0x190] sm:$0xff] }
0x1168   : > { %5834 = vmatpush.msrb.mxu1 %v9340_v23  ;;  %v9470_v23 = vld [vmem:[%s13405_s3 + $0x188] sm:$0xff] }
0x116a   : > { %5835 = vmatpush.msrb.mxu1 %v9339_v55  ;;  %v9469_v55 = vld [vmem:[%s13405_s3 + $0x180] sm:$0xff] }
0x116b   : > { %5836 = vmatmul.f32.vlgmr.msrb.gmra.mxu1 %v11809_v48  ;;  %v5616_v48 = vadd.f32 %v5613_v20, %v5554_v34  ;;  %v9390_v20 = vld [vmem:[%s13405_s3 + $0x88] sm:$0xff] }
0x116c   : > { %6116 = vmatpush.msra.mxu3 %v9390_v20  ;;  %v9510_v34 = vld [vmem:[%s13405_s3 + $0x208] sm:$0xff] }
0x116d   : > { %v5678_v44 = vadd.f32 %v5675_v1, %v5616_v48  ;;  %v9389_v1 = vld [vmem:[%s13405_s3 + $0x80] sm:$0xff] }
0x116e   : > { %6117 = vmatpush.msra.mxu3 %v9389_v1  ;;  %v9509_v48 = vld [vmem:[%s13405_s3 + $0x200] sm:$0xff] }
0x116f   : > { %v9449_v1 = vld [vmem:[%s13405_s3 + $0x140] sm:$0xff] }
0x11c6   : > { %v5737_v56 = vpop.f32.mrf.mxu1 }
0x11c7   : > { %v5740_v38 = vadd.f32 %v5737_v56, %v5678_v44  ;;  %v9516_v56 = vld [vmem:[%s13405_s3 + $0x238] sm:$0xff] }
0x11ce   : > { %v5799_v49 = vpop.f32.mrf.mxu1 }
0x11cf   : > { %v5802_v37 = vadd.f32 %v5799_v49, %v5740_v38  ;;  %v9515_v49 = vld [vmem:[%s13405_s3 + $0x230] sm:$0xff] }
0x11e8   : > { %v5837_v24 = vpop.f32.mrf.mxu1 }
0x11e9   : > { %5859 = vmatpush.msra.mxu2 %v5837_v24  ;;  %v9513_v24 = vld [vmem:[%s13405_s3 + $0x220] sm:$0xff] }
0x11ea   : > { %9356 = vmatmul.msk.f32.vlgmr.msra.gmra.mxu2 %vm4213_vm3, %v9355_v40  ;;  %v9514_v40 = vld [vmem:[%s13405_s3 + $0x228] sm:$0xff] }
0x126d   : > { %v5861_v45 = vpop.f32.mrf.mxu2 }
0x126e   : > { %v5864_v60 = vadd.f32 %v5861_v45, %v5802_v37 }
0x1270   : > { %v5869_v0 = vadd.f32 %v9955_v62, %v5864_v60 }
0x1272   : > { %v5870_v63 = vmax.f32 %v5869_v0, 0.0  ;;  %v5965_v0 = vld [vmem:[%s10116_s17] sm:$0xff] }
0x1274   : > { %5902 = vmatpush.msrb.mxu2 %v5870_v63  ;;  %v9378_v63 = vld [vmem:[%s10116_s17 + $0x28] sm:$0xff] }
0x1275   : > { %9357 = vmatmul.msk.f32.vlgmr.msrb.gmra.mxu2 %vm4213_vm3, %v5871_v59 }
0x127d   : > { %9358 = vmatmul.msk.f32.gmra.mxu2 %vm4213_vm3, %v5872_v21  ;;  %v9456_v21 = vld [vmem:[%s13405_s3 + $0x178] sm:$0xff] }
0x1285   : > { %9359 = vmatmul.msk.f32.gmra.mxu2 %vm4213_vm3, %v5873_v17  ;;  %v9455_v17 = vld [vmem:[%s13405_s3 + $0x170] sm:$0xff] }
0x128d   : > { %9360 = vmatmul.msk.f32.gmra.mxu2 %vm4213_vm3, %v5874_v54  ;;  %v9454_v54 = vld [vmem:[%s13405_s3 + $0x168] sm:$0xff] }
0x12f8   : > { %v11943_v19 = vpop.f32.mrf.mxu2 }
0x12f9   : > { %9361 = vmatmul.msk.f32.vlgmr.msrb.gmra.mxu3 %vm4279_vm4, %v11943_v19  ;;  %9373 = vmatmul.msk.f32.vlgmr.msrb.gmra.mxu0 %vm4279_vm4, %v11943_v19 }
0x12fa   : > { %6284 = vmatpush.msrb.mxu3 %v9436_v30  ;;  %v9401_v30 = vld [vmem:[%s10116_s17 + $0x40] sm:$0xff] }
0x12fc   : > { %6285 = vmatpush.msrb.mxu3 %v9435_v16 }
0x12fe   : > { %6286 = vmatpush.msrb.mxu3 %v9434_v25  ;;  %v9402_v25 = vld [vmem:[%s10116_s17 + $0x48] sm:$0xff] }
0x1300   : > { %v11949_v53 = vpop.f32.mrf.mxu2  ;;  %6287 = vmatpush.msrb.mxu3 %v9433_v8 }
0x1301   : > { %9362 = vmatmul.msk.f32.gmra.mxu3 %vm4279_vm4, %v11949_v53  ;;  %9374 = vmatmul.msk.f32.gmra.mxu0 %vm4279_vm4, %v11949_v53 }
0x1302   : > { %6288 = vmatpush.msrb.mxu3 %v9432_v5  ;;  %v9496_v5 = vld [vmem:[%s13405_s3 + $0x1f8] sm:$0xff] }
0x1304   : > { %6289 = vmatpush.msrb.mxu3 %v9431_v50  ;;  %v9495_v50 = vld [vmem:[%s13405_s3 + $0x1f0] sm:$0xff] }
0x1306   : > { %6290 = vmatpush.msrb.mxu3 %v9430_v46  ;;  %v9494_v46 = vld [vmem:[%s13405_s3 + $0x1e8] sm:$0xff] }
0x1308   : > { %v11955_v14 = vpop.f32.mrf.mxu2  ;;  %6291 = vmatpush.msrb.mxu3 %v9429_v15  ;;  %v9403_v15 = vld [vmem:[%s10116_s17 + $0x50] sm:$0xff] }
0x1309   : > { %9363 = vmatmul.msk.f32.gmra.mxu3 %vm4279_vm4, %v11955_v14  ;;  %9375 = vmatmul.msk.f32.gmra.mxu0 %vm4279_vm4, %v11955_v14 }
0x1310   : > { %v11965_v47 = vpop.f32.mrf.mxu2 }
0x1311   : > { %9364 = vmatmul.msk.f32.gmra.mxu3 %vm4279_vm4, %v11965_v47  ;;  %9376 = vmatmul.msk.f32.gmra.mxu0 %vm4279_vm4, %v11965_v47 }
0x1319   : > { %9397 = vmatmul.msk.f32.vlgmr.msra.gmra.mxu3 %vm4279_vm4, %v11943_v19 }
0x131a   : > { %6458 = vmatpush.msra.mxu3 %v9476_v4 }
0x131c   : > { %6459 = vmatpush.msra.mxu3 %v9475_v22  ;;  %v9493_v22 = vld [vmem:[%s13405_s3 + $0x1e0] sm:$0xff] }
0x131e   : > { %6460 = vmatpush.msra.mxu3 %v9474_v58  ;;  %v9492_v58 = vld [vmem:[%s13405_s3 + $0x1d8] sm:$0xff] }
0x1320   : > { %6461 = vmatpush.msra.mxu3 %v9473_v13  ;;  %v9491_v13 = vld [vmem:[%s13405_s3 + $0x1d0] sm:$0xff] }
0x1321   : > { %9398 = vmatmul.msk.f32.gmra.mxu3 %vm4279_vm4, %v11949_v53 }
0x1322   : > { %6462 = vmatpush.msra.mxu3 %v9472_v41  ;;  %v9490_v41 = vld [vmem:[%s13405_s3 + $0x1c8] sm:$0xff] }
0x1324   : > { %6463 = vmatpush.msra.mxu3 %v9471_v7  ;;  %v9404_v7 = vld [vmem:[%s10116_s17 + $0x58] sm:$0xff] }
0x1326   : > { %6464 = vmatpush.msra.mxu3 %v9470_v23 }
0x1328   : > { %6465 = vmatpush.msra.mxu3 %v9469_v55  ;;  %v9489_v55 = vld [vmem:[%s13405_s3 + $0x1c0] sm:$0xff]  ;;  %s13408_s3 = sld [smem:[#allocation16_spill]] }
0x1329   : > { %9399 = vmatmul.msk.f32.gmra.mxu3 %vm4279_vm4, %v11955_v14 }
0x1331   : > { %9400 = vmatmul.msk.f32.gmra.mxu3 %vm4279_vm4, %v11965_v47 }
0x1339   : > { %9437 = vmatmul.msk.f32.vlgmr.msrb.gmra.mxu3 %vm4279_vm4, %v11943_v19 }
0x133a   : > { %6632 = vmatpush.msrb.mxu3 %v9516_v56 }
0x133c   : > { %6633 = vmatpush.msrb.mxu3 %v9515_v49 }
0x133e   : > { %6634 = vmatpush.msrb.mxu3 %v9514_v40 }
0x1340   : > { %6635 = vmatpush.msrb.mxu3 %v9513_v24 }
0x1341   : > { %9438 = vmatmul.msk.f32.gmra.mxu3 %vm4279_vm4, %v11949_v53 }
0x1342   : > { %6636 = vmatpush.msrb.mxu3 %v9512_v57  ;;  %v9441_v57 = vld [vmem:[%s10116_s17 + $0x80] sm:$0xff] }
0x1344   : > { %6637 = vmatpush.msrb.mxu3 %v9511_v31 }
0x1346   : > { %6638 = vmatpush.msrb.mxu3 %v9510_v34 }
0x1348   : > { %6639 = vmatpush.msrb.mxu3 %v9509_v48 }
0x1349   : > { %9439 = vmatmul.msk.f32.gmra.mxu3 %vm4279_vm4, %v11955_v14 }
0x1351   : > { %9440 = vmatmul.msk.f32.gmra.mxu3 %vm4279_vm4, %v11965_v47 }
0x1359   : > { %9477 = vmatmul.msk.f32.vlgmr.msra.gmra.mxu3 %vm4279_vm4, %v11943_v19 }
0x1361   : > { %9478 = vmatmul.msk.f32.gmra.mxu3 %vm4279_vm4, %v11949_v53 }
0x1369   : > { %9479 = vmatmul.msk.f32.gmra.mxu3 %vm4279_vm4, %v11955_v14 }
0x1371   : > { %9480 = vmatmul.msk.f32.gmra.mxu3 %vm4279_vm4, %v11965_v47 }
0x1376   : > { %v5995_v44 = vpop.f32.mrf.mxu0 }
0x1379   : > { %9517 = vmatmul.msk.f32.vlgmr.msrb.gmra.mxu3 %vm4279_vm4, %v11943_v19 }
0x137c   : > { %v5953_v38 = vpop.f32.mrf.mxu3 }
0x137e   : > { %v5998_v37 = vpop.f32.mrf.mxu0 }
0x1381   : > { %9518 = vmatmul.msk.f32.gmra.mxu3 %vm4279_vm4, %v11949_v53 }
0x1384   : > { %v5956_v62 = vpop.f32.mrf.mxu3 }
0x1386   : > { %v6001_v45 = vpop.f32.mrf.mxu0 }
0x1389   : > { %9519 = vmatmul.msk.f32.gmra.mxu3 %vm4279_vm4, %v11955_v14 }
0x138c   : > { %v5959_v3 = vpop.f32.mrf.mxu3 }
0x138e   : > { %v6004_v11 = vpop.f32.mrf.mxu0 }
0x138f   : > { %6035 = vmatpush.msra.mxu1 %v6004_v11 }
0x1391   : > { %6036 = vmatpush.msra.mxu1 %v6001_v45  ;;  %9520 = vmatmul.msk.f32.gmra.mxu3 %vm4279_vm4, %v11965_v47  ;;  %v9442_v45 = vld [vmem:[%s10116_s17 + $0x88] sm:$0xff] }
0x1393   : > { %6037 = vmatpush.msra.mxu1 %v5998_v37 }
0x1394   : > { %v5962_v60 = vpop.f32.mrf.mxu3 }
0x1395   : > { %6038 = vmatpush.msra.mxu1 %v5995_v44  ;;  %6076 = vmatpush.msra.mxu2 %v5962_v60  ;;  %v9444_v60 = vld [vmem:[%s10116_s17 + $0x98] sm:$0xff] }
0x1396   : > { %9381 = vmatmul.msk.f32.vlgmr.msra.gmra.mxu1 %vm3247_vm2, %v9377_v33  ;;  %v9421_v33 = vld [vmem:[%s10116_s17 + $0x60] sm:$0xff] }
0x1397   : > { %6077 = vmatpush.msra.mxu2 %v5959_v3  ;;  %6197 = vmatpush.msrb.mxu1 %v9416_v61  ;;  %v9443_v3 = vld [vmem:[%s10116_s17 + $0x90] sm:$0xff] }
0x1399   : > { %6078 = vmatpush.msra.mxu2 %v5956_v62  ;;  %6198 = vmatpush.msrb.mxu1 %v9415_v51  ;;  %v9422_v51 = vld [vmem:[%s10116_s17 + $0x68] sm:$0xff] }
0x139b   : > { %6079 = vmatpush.msra.mxu2 %v5953_v38  ;;  %6199 = vmatpush.msrb.mxu1 %v9414_v6  ;;  %v9481_v6 = vld [vmem:[%s10116_s17 + $0xc0] sm:$0xff] }
0x139c   : > { %9385 = vmatmul.msk.f32.vlgmr.msra.gmra.mxu2 %vm3247_vm2, %v5965_v0  ;;  %v6119_v59 = vpop.f32.mrf.mxu3 }
0x139d   : > { %6200 = vmatpush.msrb.mxu1 %v9413_v42  ;;  %v9423_v42 = vld [vmem:[%s10116_s17 + $0x70] sm:$0xff] }
0x139e   : > { %9382 = vmatmul.msk.f32.gmra.mxu1 %vm3247_vm2, %v9378_v63  ;;  %v9482_v63 = vld [vmem:[%s10116_s17 + $0xc8] sm:$0xff] }
0x139f   : > { %6201 = vmatpush.msrb.mxu1 %v9412_v32  ;;  %v9424_v32 = vld [vmem:[%s10116_s17 + $0x78] sm:$0xff] }
0x13a1   : > { %6202 = vmatpush.msrb.mxu1 %v9411_v52  ;;  %v9483_v52 = vld [vmem:[%s10116_s17 + $0xd0] sm:$0xff] }
0x13a3   : > { %6203 = vmatpush.msrb.mxu1 %v9410_v18 }
0x13a4   : > { %9386 = vmatmul.msk.f32.gmra.mxu2 %vm3247_vm2, %v5966_v12  ;;  %v6122_v35 = vpop.f32.mrf.mxu3  ;;  %v9461_v12 = vld [vmem:[%s10116_s17 + $0xa0] sm:$0xff] }
0x13a5   : > { %6204 = vmatpush.msrb.mxu1 %v9409_v9  ;;  %v9484_v9 = vld [vmem:[%s10116_s17 + $0xd8] sm:$0xff] }
0x13a6   : > { %9383 = vmatmul.msk.f32.gmra.mxu1 %vm3247_vm2, %v9379_v10 }
0x13a7   : > { %6371 = vmatpush.msra.mxu1 %v9456_v21  ;;  %v9521_v21 = vld [vmem:[%s10116_s17 + $0x100] sm:$0xff] }
0x13a9   : > { %6372 = vmatpush.msra.mxu1 %v9455_v17 }
0x13ab   : > { %6373 = vmatpush.msra.mxu1 %v9454_v54  ;;  %v9463_v54 = vld [vmem:[%s10116_s17 + $0xb0] sm:$0xff] }
0x13ac   : > { %9387 = vmatmul.msk.f32.gmra.mxu2 %vm3247_vm2, %v5967_v2  ;;  %v6125_v29 = vpop.f32.mrf.mxu3  ;;  %v9522_v2 = vld [vmem:[%s10116_s17 + $0x108] sm:$0xff] }
0x13ad   : > { %6374 = vmatpush.msra.mxu1 %v9453_v43  ;;  %v9523_v43 = vld [vmem:[%s10116_s17 + $0x110] sm:$0xff] }
0x13ae   : > { %9384 = vmatmul.msk.f32.gmra.mxu1 %vm3247_vm2, %v9380_v26 }
0x13af   : > { %6375 = vmatpush.msra.mxu1 %v9452_v39 }
0x13b1   : > { %6376 = vmatpush.msra.mxu1 %v9451_v27  ;;  %v9501_v27 = vld [vmem:[%s10116_s17 + $0xe0] sm:$0xff] }
0x13b3   : > { %6377 = vmatpush.msra.mxu1 %v9450_v28  ;;  %v9524_v28 = vld [vmem:[%s10116_s17 + $0x118] sm:$0xff] }
0x13b4   : > { %9388 = vmatmul.msk.f32.gmra.mxu2 %vm3247_vm2, %v5968_v36  ;;  %v6128_v20 = vpop.f32.mrf.mxu3  ;;  %v9502_v36 = vld [vmem:[%s10116_s17 + $0xe8] sm:$0xff] }
0x13b5   : > { %6159 = vmatpush.msra.mxu0 %v6128_v20  ;;  %6378 = vmatpush.msra.mxu1 %v9449_v1  ;;  %v9503_v1 = vld [vmem:[%s10116_s17 + $0xf0] sm:$0xff] }
0x13b6   : > { %9417 = vmatmul.msk.f32.vlgmr.msrb.gmra.mxu1 %vm4279_vm4, %v11943_v19 }
0x13b7   : > { %6160 = vmatpush.msra.mxu0 %v6125_v29  ;;  %6545 = vmatpush.msrb.mxu1 %v9496_v5  ;;  %v9464_v29 = vld [vmem:[%s10116_s17 + $0xb8] sm:$0xff] }
0x13b9   : > { %6161 = vmatpush.msra.mxu0 %v6122_v35  ;;  %6546 = vmatpush.msrb.mxu1 %v9495_v50  ;;  %v9462_v35 = vld [vmem:[%s10116_s17 + $0xa8] sm:$0xff] }
0x13bb   : > { %6162 = vmatpush.msra.mxu0 %v6119_v59  ;;  %6547 = vmatpush.msrb.mxu1 %v9494_v46 }
0x13bc   : > { %9405 = vmatmul.msk.f32.vlgmr.msra.gmra.mxu0 %vm3247_vm2, %v9401_v30  ;;  %v6293_v16 = vpop.f32.mrf.mxu3 }
0x13bd   : > { %6548 = vmatpush.msrb.mxu1 %v9493_v22 }
0x13be   : > { %9418 = vmatmul.msk.f32.gmra.mxu1 %vm4279_vm4, %v11949_v53 }
0x13bf   : > { %6549 = vmatpush.msrb.mxu1 %v9492_v58 }
0x13c1   : > { %6550 = vmatpush.msrb.mxu1 %v9491_v13 }
0x13c3   : > { %6551 = vmatpush.msrb.mxu1 %v9490_v41 }
0x13c4   : > { %9406 = vmatmul.msk.f32.gmra.mxu0 %vm3247_vm2, %v9402_v25  ;;  %v6296_v8 = vpop.f32.mrf.mxu3 }
0x13c5   : > { %6552 = vmatpush.msrb.mxu1 %v9489_v55 }
0x13c6   : > { %9419 = vmatmul.msk.f32.gmra.mxu1 %vm4279_vm4, %v11955_v14 }
0x13cc   : > { %9407 = vmatmul.msk.f32.gmra.mxu0 %vm3247_vm2, %v9403_v15  ;;  %v6299_v4 = vpop.f32.mrf.mxu3 }
0x13ce   : > { %9420 = vmatmul.msk.f32.gmra.mxu1 %vm4279_vm4, %v11965_v47 }
0x13d4   : > { %9408 = vmatmul.msk.f32.gmra.mxu0 %vm3247_vm2, %v9404_v7  ;;  %v6302_v23 = vpop.f32.mrf.mxu3 }
0x13d5   : > { %6333 = vmatpush.msrb.mxu0 %v6302_v23 }
0x13d6   : > { %9457 = vmatmul.msk.f32.vlgmr.msra.gmra.mxu1 %vm4279_vm4, %v11943_v19 }
0x13d7   : > { %6334 = vmatpush.msrb.mxu0 %v6299_v4 }
0x13d9   : > { %6335 = vmatpush.msrb.mxu0 %v6296_v8 }
0x13db   : > { %6336 = vmatpush.msrb.mxu0 %v6293_v16  ;;  %v9504_v16 = vld [vmem:[%s10116_s17 + $0xf8] sm:$0xff] }
0x13dc   : > { %v6467_v56 = vpop.f32.mrf.mxu3  ;;  %9445 = vmatmul.msk.f32.vlgmr.msrb.gmra.mxu0 %vm3247_vm2, %v9441_v57 }
0x13de   : > { %9458 = vmatmul.msk.f32.gmra.mxu1 %vm4279_vm4, %v11949_v53 }
0x13e4   : > { %v6470_v49 = vpop.f32.mrf.mxu3  ;;  %9446 = vmatmul.msk.f32.gmra.mxu0 %vm3247_vm2, %v9442_v45 }
0x13e6   : > { %9459 = vmatmul.msk.f32.gmra.mxu1 %vm4279_vm4, %v11955_v14 }
0x13ec   : > { %v6473_v40 = vpop.f32.mrf.mxu3  ;;  %9447 = vmatmul.msk.f32.gmra.mxu0 %vm3247_vm2, %v9443_v3 }
0x13ee   : > { %9460 = vmatmul.msk.f32.gmra.mxu1 %vm4279_vm4, %v11965_v47 }
0x13f4   : > { %v6476_v24 = vpop.f32.mrf.mxu3  ;;  %9448 = vmatmul.msk.f32.gmra.mxu0 %vm3247_vm2, %v9444_v60 }
0x13f5   : > { %6507 = vmatpush.msra.mxu0 %v6476_v24 }
0x13f6   : > { %9497 = vmatmul.msk.f32.vlgmr.msrb.gmra.mxu1 %vm4279_vm4, %v11943_v19 }
0x13f7   : > { %6508 = vmatpush.msra.mxu0 %v6473_v40 }
0x13f9   : > { %6509 = vmatpush.msra.mxu0 %v6470_v49 }
0x13fb   : > { %6510 = vmatpush.msra.mxu0 %v6467_v56 }
0x13fc   : > { %v6641_v31 = vpop.f32.mrf.mxu3  ;;  %9485 = vmatmul.msk.f32.vlgmr.msra.gmra.mxu0 %vm3247_vm2, %v9481_v6 }
0x13fe   : > { %9498 = vmatmul.msk.f32.gmra.mxu1 %vm4279_vm4, %v11949_v53 }
0x1404   : > { %v6644_v34 = vpop.f32.mrf.mxu3  ;;  %9486 = vmatmul.msk.f32.gmra.mxu0 %vm3247_vm2, %v9482_v63 }
0x1406   : > { %9499 = vmatmul.msk.f32.gmra.mxu1 %vm4279_vm4, %v11955_v14 }
0x140c   : > { %v6647_v48 = vpop.f32.mrf.mxu3  ;;  %9487 = vmatmul.msk.f32.gmra.mxu0 %vm3247_vm2, %v9483_v52 }
0x140e   : > { %9500 = vmatmul.msk.f32.gmra.mxu1 %vm4279_vm4, %v11965_v47 }
0x1413   : > { %v12097_v19 = vpop.f32.mrf.mxu1 }
0x1414   : > { %v6650_v44 = vpop.f32.mrf.mxu3  ;;  %9488 = vmatmul.msk.f32.gmra.mxu0 %vm3247_vm2, %v9484_v9 }
0x1415   : > { %6681 = vmatpush.msrb.mxu0 %v6650_v44 }
0x1417   : > { %6682 = vmatpush.msrb.mxu0 %v6647_v48 }
0x1419   : > { %6683 = vmatpush.msrb.mxu0 %v6644_v34 }
0x141b   : > { %v12099_v38 = vpop.f32.mrf.mxu1  ;;  %6684 = vmatpush.msrb.mxu0 %v6641_v31 }
0x141c   : > { %9525 = vmatmul.msk.f32.vlgmr.msrb.gmra.mxu0 %vm3247_vm2, %v9521_v21 }
0x141f   : > { %v6081_v8 = vpop.f32.mrf.mxu2 }
0x1423   : > { %v12101_v53 = vpop.f32.mrf.mxu1 }
0x1424   : > { %9526 = vmatmul.msk.f32.gmra.mxu0 %vm3247_vm2, %v9522_v2 }
0x1427   : > { %v6084_v50 = vpop.f32.mrf.mxu2 }
0x142b   : > { %v12103_v37 = vpop.f32.mrf.mxu1 }
0x142c   : > { %9527 = vmatmul.msk.f32.gmra.mxu0 %vm3247_vm2, %v9523_v43 }
0x142f   : > { %v6087_v15 = vpop.f32.mrf.mxu2 }
0x1430   : > { %v6088_v45 = vadd.f32 %v6087_v15, %v12101_v53 }
0x1433   : > { %v6206_v14 = vpop.f32.mrf.mxu1 }
0x1434   : > { %9528 = vmatmul.msk.f32.gmra.mxu0 %vm3247_vm2, %v9524_v28 }
0x1437   : > { %v6090_v22 = vpop.f32.mrf.mxu2 }
0x1438   : > { %v6091_v60 = vadd.f32 %v6090_v22, %v12103_v37  ;;  %v6714_v22 = vld [vmem:[%s13408_s3] sm:$0xff] }
0x1439   : > { %v6164_v20 = vpop.f32.mrf.mxu0 }
0x143b   : > { %v6209_v62 = vpop.f32.mrf.mxu1 }
0x1441   : > { %v6167_v30 = vpop.f32.mrf.mxu0 }
0x1443   : > { %v6212_v47 = vpop.f32.mrf.mxu1 }
0x1449   : > { %v6170_v25 = vpop.f32.mrf.mxu0 }
0x144a   : > { %v6178_v3 = vadd.f32 %v6170_v25, %v6088_v45 }
0x144b   : > { %v6215_v11 = vpop.f32.mrf.mxu1 }
0x144c   : > { %6246 = vmatpush.msrb.mxu2 %v6215_v11 }
0x144e   : > { %6247 = vmatpush.msrb.mxu2 %v6212_v47  ;;  %v6085_v47 = vadd.f32 %v6084_v50, %v12099_v38 }
0x1450   : > { %6248 = vmatpush.msrb.mxu2 %v6209_v62 }
0x1451   : > { %v6173_v5 = vpop.f32.mrf.mxu0 }
0x1452   : > { %6249 = vmatpush.msrb.mxu2 %v6206_v14 }
0x1453   : > { %9425 = vmatmul.msk.f32.vlgmr.msrb.gmra.mxu2 %vm3247_vm2, %v9421_v33  ;;  %v6380_v61 = vpop.f32.mrf.mxu1  ;;  %v6082_v33 = vadd.f32 %v6081_v8, %v12097_v19 }
0x1455   : > { %v6176_v6 = vadd.f32 %v6164_v20, %v6082_v33  ;;  %v6728_v33 = vld [vmem:[%s13408_s3 + $0x70] sm:$0xff] }
0x1459   : > { %v6338_v46 = vpop.f32.mrf.mxu0 }
0x145b   : > { %9426 = vmatmul.msk.f32.gmra.mxu2 %vm3247_vm2, %v9422_v51  ;;  %v6383_v0 = vpop.f32.mrf.mxu1 }
0x1461   : > { %v6341_v4 = vpop.f32.mrf.mxu0 }
0x1463   : > { %9427 = vmatmul.msk.f32.gmra.mxu2 %vm3247_vm2, %v9423_v42  ;;  %v6386_v59 = vpop.f32.mrf.mxu1 }
0x1469   : > { %v6344_v58 = vpop.f32.mrf.mxu0 }
0x146b   : > { %9428 = vmatmul.msk.f32.gmra.mxu2 %vm3247_vm2, %v9424_v32  ;;  %v6389_v18 = vpop.f32.mrf.mxu1 }
0x146c   : > { %6420 = vmatpush.msra.mxu2 %v6389_v18 }
0x146e   : > { %6421 = vmatpush.msra.mxu2 %v6386_v59 }
0x1470   : > { %6422 = vmatpush.msra.mxu2 %v6383_v0  ;;  %v6179_v0 = vadd.f32 %v6173_v5, %v6091_v60  ;;  %v6729_v60 = vld [vmem:[%s13408_s3 + $0x78] sm:$0xff] }
0x1471   : > { %v6347_v7 = vpop.f32.mrf.mxu0 }
0x1472   : > { %6423 = vmatpush.msra.mxu2 %v6380_v61  ;;  %v6177_v61 = vadd.f32 %v6167_v30, %v6085_v47 }
0x1473   : > { %9465 = vmatmul.msk.f32.vlgmr.msra.gmra.mxu2 %vm3247_vm2, %v9461_v12  ;;  %v6554_v10 = vpop.f32.mrf.mxu1 }
0x1479   : > { %v6512_v55 = vpop.f32.mrf.mxu0 }
0x147b   : > { %9466 = vmatmul.msk.f32.gmra.mxu2 %vm3247_vm2, %v9462_v35  ;;  %v6557_v17 = vpop.f32.mrf.mxu1 }
0x1481   : > { %v6515_v49 = vpop.f32.mrf.mxu0 }
0x1483   : > { %9467 = vmatmul.msk.f32.gmra.mxu2 %vm3247_vm2, %v9463_v54  ;;  %v6560_v26 = vpop.f32.mrf.mxu1 }
0x1489   : > { %v6518_v24 = vpop.f32.mrf.mxu0 }
0x148b   : > { %9468 = vmatmul.msk.f32.gmra.mxu2 %vm3247_vm2, %v9464_v29  ;;  %v6563_v39 = vpop.f32.mrf.mxu1 }
0x148c   : > { %6594 = vmatpush.msrb.mxu2 %v6563_v39 }
0x148e   : > { %6595 = vmatpush.msrb.mxu2 %v6560_v26 }
0x1490   : > { %6596 = vmatpush.msrb.mxu2 %v6557_v17 }
0x1491   : > { %v6521_v34 = vpop.f32.mrf.mxu0 }
0x1492   : > { %6597 = vmatpush.msrb.mxu2 %v6554_v10 }
0x1493   : > { %9505 = vmatmul.msk.f32.vlgmr.msrb.gmra.mxu2 %vm3247_vm2, %v9501_v27 }
0x1499   : > { %v6686_v44 = vpop.f32.mrf.mxu0 }
0x149b   : > { %9506 = vmatmul.msk.f32.gmra.mxu2 %vm3247_vm2, %v9502_v36  ;;  %v9956_v36 = vld [vmem:[%s13407_s5] ss:$0 sm:$0xff]  ;;  %s13409_s5 = sld [smem:[#allocation33_spill]] }
0x14a1   : > { %v6689_v62 = vpop.f32.mrf.mxu0  ;;  %v6843_v45 = vld [vmem:[%s13409_s5] sm:$0xff] }
0x14a2   : > { %v9561_v47 = vld [vmem:[%s13409_s5 + $0x20] sm:$0xff] }
0x14a3   : > { %9507 = vmatmul.msk.f32.gmra.mxu2 %vm3247_vm2, %v9503_v1 }
0x14a9   : > { %v6692_v52 = vpop.f32.mrf.mxu0 }
0x14ab   : > { %9508 = vmatmul.msk.f32.gmra.mxu2 %vm3247_vm2, %v9504_v16 }
0x14b1   : > { %v6695_v43 = vpop.f32.mrf.mxu0 }
0x14d6   : > { %v6251_v13 = vpop.f32.mrf.mxu2 }
0x14d7   : > { %v6263_v63 = vadd.f32 %v6251_v13, %v6176_v6  ;;  %v6716_v13 = vld [vmem:[%s13408_s3 + $0x10] sm:$0xff] }
0x14d9   : > { %v6350_v9 = vadd.f32 %v6338_v46, %v6263_v63 }
0x14de   : > { %v6254_v41 = vpop.f32.mrf.mxu2 }
0x14df   : > { %v6264_v42 = vadd.f32 %v6254_v41, %v6177_v61  ;;  %v6717_v41 = vld [vmem:[%s13408_s3 + $0x18] sm:$0xff] }
0x14e1   : > { %v6351_v18 = vadd.f32 %v6341_v4, %v6264_v42 }
0x14e6   : > { %v6257_v23 = vpop.f32.mrf.mxu2 }
0x14e7   : > { %v6265_v51 = vadd.f32 %v6257_v23, %v6178_v3  ;;  %v6719_v23 = vld [vmem:[%s13408_s3 + $0x28] sm:$0xff]  ;;  %v6726_v3 = vld [vmem:[%s13408_s3 + $0x60] sm:$0xff] }
0x14e9   : > { %v6352_v59 = vadd.f32 %v6344_v58, %v6265_v51  ;;  %v6715_v58 = vld [vmem:[%s13408_s3 + $0x8] sm:$0xff] }
0x14ee   : > { %v6260_v56 = vpop.f32.mrf.mxu2 }
0x14ef   : > { %v6266_v32 = vadd.f32 %v6260_v56, %v6179_v0  ;;  %v6721_v56 = vld [vmem:[%s13408_s3 + $0x38] sm:$0xff] }
0x14f1   : > { %v6353_v38 = vadd.f32 %v6347_v7, %v6266_v32  ;;  %v6718_v7 = vld [vmem:[%s13408_s3 + $0x20] sm:$0xff] }
0x14f6   : > { %v6425_v40 = vpop.f32.mrf.mxu2 }
0x14f7   : > { %v6437_v35 = vadd.f32 %v6425_v40, %v6350_v9  ;;  %v6723_v40 = vld [vmem:[%s13408_s3 + $0x48] sm:$0xff]  ;;  %v9600_v9 = vld [vmem:[%s13409_s5 + $0x58] sm:$0xff] }
0x14f9   : > { %v6524_v54 = vadd.f32 %v6512_v55, %v6437_v35  ;;  %v6720_v55 = vld [vmem:[%s13408_s3 + $0x30] sm:$0xff]  ;;  %v9597_v35 = vld [vmem:[%s13409_s5 + $0x40] sm:$0xff] }
0x14fe   : > { %v6428_v57 = vpop.f32.mrf.mxu2 }
0x14ff   : > { %v6438_v10 = vadd.f32 %v6428_v57, %v6351_v18  ;;  %v6846_v57 = vld [vmem:[%s13409_s5 + $0x18] sm:$0xff] }
0x1500   : > { %6907 = vmatpush.msra.mxu2 %v6846_v57 }
0x1501   : > { %v6525_v37 = vadd.f32 %v6515_v49, %v6438_v10  ;;  %v6722_v49 = vld [vmem:[%s13408_s3 + $0x40] sm:$0xff]  ;;  %v9598_v10 = vld [vmem:[%s13409_s5 + $0x48] sm:$0xff] }
0x1506   : > { %v6431_v31 = vpop.f32.mrf.mxu2 }
0x1507   : > { %v6439_v12 = vadd.f32 %v6431_v31, %v6352_v59  ;;  %v9564_v31 = vld [vmem:[%s13409_s5 + $0x38] sm:$0xff] }
0x1508   : > { %6993 = vmatpush.msra.mxu3 %v9564_v31 }
0x1509   : > { %v6526_v19 = vadd.f32 %v6518_v24, %v6439_v12  ;;  %v6724_v24 = vld [vmem:[%s13408_s3 + $0x50] sm:$0xff] }
0x150e   : > { %v6434_v48 = vpop.f32.mrf.mxu2 }
0x150f   : > { %v6440_v21 = vadd.f32 %v6434_v48, %v6353_v38  ;;  %v6845_v48 = vld [vmem:[%s13409_s5 + $0x10] sm:$0xff] }
0x1510   : > { %6908 = vmatpush.msra.mxu2 %v6845_v48  ;;  %v9599_v38 = vld [vmem:[%s13409_s5 + $0x50] sm:$0xff] }
0x1511   : > { %v6527_v2 = vadd.f32 %v6521_v34, %v6440_v21  ;;  %v6725_v34 = vld [vmem:[%s13408_s3 + $0x58] sm:$0xff] }
0x1516   : > { %v6599_v14 = vpop.f32.mrf.mxu2 }
0x1517   : > { %v6611_v39 = vadd.f32 %v6599_v14, %v6524_v54  ;;  %v6844_v14 = vld [vmem:[%s13409_s5 + $0x8] sm:$0xff] }
0x1518   : > { %6909 = vmatpush.msra.mxu2 %v6844_v14 }
0x1519   : > { %v6698_v30 = vadd.f32 %v6686_v44, %v6611_v39  ;;  %v9563_v44 = vld [vmem:[%s13409_s5 + $0x30] sm:$0xff] }
0x151a   : > { %6994 = vmatpush.msra.mxu3 %v9563_v44  ;;  %6910 = vmatpush.msra.mxu2 %v6843_v45 }
0x151b   : > { %v6706_v50 = vadd.f32 %v9956_v36, %v6698_v30 }
0x151c   : > { %7209 = vmatpush.msrb.mxu2 %v9600_v9 }
0x151d   : > { %v6710_v4 = vmax.f32 %v6706_v50, 0.0 }
0x151e   : > { %v6602_v11 = vpop.f32.mrf.mxu2  ;;  %7210 = vmatpush.msrb.mxu2 %v9599_v38  ;;  %v9583_v38 = vld [vmem:[%s13364_s13 + $0x90] sm:$0xff] }
0x151f   : > { %v6612_v26 = vadd.f32 %v6602_v11, %v6525_v37  ;;  %v6727_v11 = vld [vmem:[%s13408_s3 + $0x68] sm:$0xff]  ;;  %s8418_s3 = scalar_lea.hbm %s10276_s19, %s10304_s0 }
0x1520   : > { %7211 = vmatpush.msrb.mxu2 %v9598_v10  ;;  %v6962_v10 = vld [vmem:[%s13364_s13 + $0x10] sm:$0xff]  ;;  %s8422_s10 = sshll.u32 %s8418_s3, 4  ;;  %s8423_s10 = int_to_ptr.hbm [resolvable:$true] %s8422_s10 }
0x1521   : > { %v6699_v20 = vadd.f32 %v6689_v62, %v6612_v26  ;;  %v9562_v62 = vld [vmem:[%s13409_s5 + $0x28] sm:$0xff]  ;;  %s9974_s15 = sshra.s32 %s8423_s10, 4  ;;  %s9975_s15 = int_to_ptr.hbm [resolvable:$true] %s9974_s15 }
0x1522   : > { %6995 = vmatpush.msra.mxu3 %v9562_v62  ;;  %7212 = vmatpush.msrb.mxu2 %v9597_v35  ;;  %p9981_p0 = scmp.lt.s32.totalorder %s9975_s15, %s10276_s19 }
0x1523   : > { %v6707_v8 = vadd.f32 %v9956_v36, %v6699_v20 }
0x1524   : > { %6996 = vmatpush.msra.mxu3 %v9561_v47  ;;  %v9581_v47 = vld [vmem:[%s13364_s13 + $0x80] sm:$0xff] }
0x1525   : > { %v6711_v15 = vmax.f32 %v6707_v8, 0.0 }
0x1526   : > { %v6605_v53 = vpop.f32.mrf.mxu2 }
0x1527   : > { %v6613_v17 = vadd.f32 %v6605_v53, %v6526_v19 }
0x1529   : > { %v6700_v27 = vadd.f32 %v6692_v52, %v6613_v17 }
0x152b   : > { %v6708_v16 = vadd.f32 %v9956_v36, %v6700_v27 }
0x152d   : > { %v6712_v46 = vmax.f32 %v6708_v16, 0.0 }
0x152e   : > { %v6608_v29 = vpop.f32.mrf.mxu2 }
0x152f   : > { %v6614_v28 = vadd.f32 %v6608_v29, %v6527_v2 }
0x1531   : > { %v6701_v1 = vadd.f32 %v6695_v43, %v6614_v28 }
0x1533   : > { %v6709_v25 = vadd.f32 %v9956_v36, %v6701_v1 }
0x1535   : > { %v6713_v5 = vmax.f32 %v6709_v25, 0.0 }
0x1537   : > { %6790 = vmatpush.msra.mxu1 %v6713_v5 }
0x1539   : > { %6791 = vmatpush.msra.mxu1 %v6712_v46 }
0x153b   : > { %6792 = vmatpush.msra.mxu1 %v6711_v15 }
0x153d   : > { %6793 = vmatpush.msra.mxu1 %v6710_v4 }
0x153e   : > { %9529 = vmatmul.msk.f32.vlgmr.msra.gmra.mxu1 %vm3247_vm2, %v6714_v22 }
0x1546   : > { %9530 = vmatmul.msk.f32.gmra.mxu1 %vm3247_vm2, %v6715_v58 }
0x154e   : > { %9531 = vmatmul.msk.f32.gmra.mxu1 %vm3247_vm2, %v6716_v13  ;;  %v9672_v13 = vld [vmem:[%s13409_s5 + $0x98] sm:$0xff] }
0x1556   : > { %9532 = vmatmul.msk.f32.gmra.mxu1 %vm3247_vm2, %v6717_v41  ;;  %v9671_v41 = vld [vmem:[%s13409_s5 + $0x90] sm:$0xff] }
0x155e   : > { %9533 = vmatmul.msk.f32.gmra.mxu1 %vm3247_vm2, %v6718_v7 }
0x1566   : > { %9534 = vmatmul.msk.f32.gmra.mxu1 %vm3247_vm2, %v6719_v23 }
0x156e   : > { %9535 = vmatmul.msk.f32.gmra.mxu1 %vm3247_vm2, %v6720_v55  ;;  %v9670_v55 = vld [vmem:[%s13409_s5 + $0x88] sm:$0xff] }
0x1576   : > { %9536 = vmatmul.msk.f32.gmra.mxu1 %vm3247_vm2, %v6721_v56  ;;  %v9669_v56 = vld [vmem:[%s13409_s5 + $0x80] sm:$0xff] }
0x157e   : > { %9537 = vmatmul.msk.f32.gmra.mxu1 %vm3247_vm2, %v6722_v49 }
0x1586   : > { %9538 = vmatmul.msk.f32.gmra.mxu1 %vm3247_vm2, %v6723_v40 }
0x158e   : > { %9539 = vmatmul.msk.f32.gmra.mxu1 %vm3247_vm2, %v6724_v24 }
0x1596   : > { %9540 = vmatmul.msk.f32.gmra.mxu1 %vm3247_vm2, %v6725_v34 }
0x159e   : > { %9541 = vmatmul.msk.f32.gmra.mxu1 %vm3247_vm2, %v6726_v3  ;;  %v6960_v3 = vld [vmem:[%s13364_s13] sm:$0xff] }
0x15a6   : > { %9542 = vmatmul.msk.f32.gmra.mxu1 %vm3247_vm2, %v6727_v11 }
0x15ae   : > { %9543 = vmatmul.msk.f32.gmra.mxu1 %vm3247_vm2, %v6728_v33  ;;  %v9582_v33 = vld [vmem:[%s13364_s13 + $0x88] sm:$0xff] }
0x15b6   : > { %9544 = vmatmul.msk.f32.gmra.mxu1 %vm3247_vm2, %v6729_v60  ;;  %v6961_v60 = vld [vmem:[%s13364_s13 + $0x8] sm:$0xff] }
0x15bb   : > { %v12196_v61 = vpop.f32.mrf.mxu1 }
0x15bc   : > { %9545 = vmatmul.msk.f32.vlgmr.msra.gmra.mxu2 %vm3247_vm2, %v12196_v61  ;;  %9565 = vmatmul.msk.f32.vlgmr.msra.gmra.mxu3 %vm3247_vm2, %v12196_v61 }
0x15bd   : > { %7543 = vmatpush.msra.mxu2 %v9672_v13  ;;  %v9741_v13 = vld [vmem:[%s13409_s5 + $0xc0] sm:$0xff] }
0x15bf   : > { %7544 = vmatpush.msra.mxu2 %v9671_v41  ;;  %v9590_v41 = vld [vmem:[%s13364_s13 + $0xc8] sm:$0xff] }
0x15c1   : > { %7545 = vmatpush.msra.mxu2 %v9670_v55  ;;  %v9591_v55 = vld [vmem:[%s13364_s13 + $0xd0] sm:$0xff] }
0x15c3   : > { %v12202_v51 = vpop.f32.mrf.mxu1  ;;  %7546 = vmatpush.msra.mxu2 %v9669_v56  ;;  %v6970_v56 = vld [vmem:[%s13364_s13 + $0x50] sm:$0xff] }
0x15c4   : > { %9546 = vmatmul.msk.f32.gmra.mxu2 %vm3247_vm2, %v12202_v51  ;;  %9566 = vmatmul.msk.f32.gmra.mxu3 %vm3247_vm2, %v12202_v51 }
0x15cb   : > { %v12208_v6 = vpop.f32.mrf.mxu1 }
0x15cc   : > { %9547 = vmatmul.msk.f32.gmra.mxu2 %vm3247_vm2, %v12208_v6  ;;  %9567 = vmatmul.msk.f32.gmra.mxu3 %vm3247_vm2, %v12208_v6 }
0x15d3   : > { %v12214_v0 = vpop.f32.mrf.mxu1 }
0x15d4   : > { %9548 = vmatmul.msk.f32.gmra.mxu2 %vm3247_vm2, %v12214_v0  ;;  %9568 = vmatmul.msk.f32.gmra.mxu3 %vm3247_vm2, %v12214_v0 }
0x15db   : > { %v12220_v42 = vpop.f32.mrf.mxu1 }
0x15dc   : > { %9549 = vmatmul.msk.f32.gmra.mxu2 %vm3247_vm2, %v12220_v42  ;;  %9569 = vmatmul.msk.f32.gmra.mxu3 %vm3247_vm2, %v12220_v42 }
0x15e3   : > { %v12226_v63 = vpop.f32.mrf.mxu1 }
0x15e4   : > { %9550 = vmatmul.msk.f32.gmra.mxu2 %vm3247_vm2, %v12226_v63  ;;  %9570 = vmatmul.msk.f32.gmra.mxu3 %vm3247_vm2, %v12226_v63 }
0x15eb   : > { %v12232_v59 = vpop.f32.mrf.mxu1 }
0x15ec   : > { %9551 = vmatmul.msk.f32.gmra.mxu2 %vm3247_vm2, %v12232_v59  ;;  %9571 = vmatmul.msk.f32.gmra.mxu3 %vm3247_vm2, %v12232_v59 }
0x15f3   : > { %v12238_v32 = vpop.f32.mrf.mxu1 }
0x15f4   : > { %9552 = vmatmul.msk.f32.gmra.mxu2 %vm3247_vm2, %v12238_v32  ;;  %9572 = vmatmul.msk.f32.gmra.mxu3 %vm3247_vm2, %v12238_v32 }
0x15fb   : > { %v12244_v52 = vpop.f32.mrf.mxu1 }
0x15fc   : > { %9553 = vmatmul.msk.f32.gmra.mxu2 %vm3247_vm2, %v12244_v52  ;;  %9573 = vmatmul.msk.f32.gmra.mxu3 %vm3247_vm2, %v12244_v52 }
0x1603   : > { %v12250_v18 = vpop.f32.mrf.mxu1 }
0x1604   : > { %9554 = vmatmul.msk.f32.gmra.mxu2 %vm3247_vm2, %v12250_v18  ;;  %9574 = vmatmul.msk.f32.gmra.mxu3 %vm3247_vm2, %v12250_v18 }
0x160b   : > { %v12256_v12 = vpop.f32.mrf.mxu1 }
0x160c   : > { %9555 = vmatmul.msk.f32.gmra.mxu2 %vm3247_vm2, %v12256_v12  ;;  %9575 = vmatmul.msk.f32.gmra.mxu3 %vm3247_vm2, %v12256_v12 }
0x1613   : > { %v12262_v53 = vpop.f32.mrf.mxu1 }
0x1614   : > { %9556 = vmatmul.msk.f32.gmra.mxu2 %vm3247_vm2, %v12262_v53  ;;  %9576 = vmatmul.msk.f32.gmra.mxu3 %vm3247_vm2, %v12262_v53 }
0x161b   : > { %v12272_v19 = vpop.f32.mrf.mxu1 }
0x161c   : > { %9557 = vmatmul.msk.f32.gmra.mxu2 %vm3247_vm2, %v12272_v19  ;;  %9577 = vmatmul.msk.f32.gmra.mxu3 %vm3247_vm2, %v12272_v19 }
0x1623   : > { %v12278_v21 = vpop.f32.mrf.mxu1 }
0x1624   : > { %9558 = vmatmul.msk.f32.gmra.mxu2 %vm3247_vm2, %v12278_v21  ;;  %9578 = vmatmul.msk.f32.gmra.mxu3 %vm3247_vm2, %v12278_v21 }
0x162b   : > { %v12284_v37 = vpop.f32.mrf.mxu1 }
0x162c   : > { %9559 = vmatmul.msk.f32.gmra.mxu2 %vm3247_vm2, %v12284_v37  ;;  %9579 = vmatmul.msk.f32.gmra.mxu3 %vm3247_vm2, %v12284_v37 }
0x1633   : > { %v12290_v17 = vpop.f32.mrf.mxu1 }
0x1634   : > { %9560 = vmatmul.msk.f32.gmra.mxu2 %vm3247_vm2, %v12290_v17  ;;  %9580 = vmatmul.msk.f32.gmra.mxu3 %vm3247_vm2, %v12290_v17 }
0x163c   : > { %9601 = vmatmul.msk.f32.vlgmr.msrb.gmra.mxu2 %vm3247_vm2, %v12196_v61 }
0x163f   : > { %v12298_v54 = vpop.f32.mrf.mxu2  ;;  %v12300_v2 = vpop.f32.mrf.mxu3 }
0x1644   : > { %9602 = vmatmul.msk.f32.gmra.mxu2 %vm3247_vm2, %v12202_v51 }
0x1647   : > { %v12304_v26 = vpop.f32.mrf.mxu2  ;;  %v12306_v29 = vpop.f32.mrf.mxu3 }
0x164c   : > { %9603 = vmatmul.msk.f32.gmra.mxu2 %vm3247_vm2, %v12208_v6 }
0x164f   : > { %v12310_v43 = vpop.f32.mrf.mxu2  ;;  %v12312_v39 = vpop.f32.mrf.mxu3 }
0x1654   : > { %9604 = vmatmul.msk.f32.gmra.mxu2 %vm3247_vm2, %v12214_v0 }
0x1657   : > { %v12316_v27 = vpop.f32.mrf.mxu2  ;;  %v12318_v28 = vpop.f32.mrf.mxu3 }
0x165c   : > { %9605 = vmatmul.msk.f32.gmra.mxu2 %vm3247_vm2, %v12220_v42 }
0x165f   : > { %v12322_v36 = vpop.f32.mrf.mxu2  ;;  %v12324_v20 = vpop.f32.mrf.mxu3 }
0x1664   : > { %9606 = vmatmul.msk.f32.gmra.mxu2 %vm3247_vm2, %v12226_v63 }
0x1667   : > { %v12328_v1 = vpop.f32.mrf.mxu2  ;;  %v7013_v30 = vpop.f32.mrf.mxu3 }
0x166c   : > { %9607 = vmatmul.msk.f32.gmra.mxu2 %vm3247_vm2, %v12232_v59 }
0x166f   : > { %v6930_v16 = vpop.f32.mrf.mxu2  ;;  %v7016_v25 = vpop.f32.mrf.mxu3 }
0x1674   : > { %9608 = vmatmul.msk.f32.gmra.mxu2 %vm3247_vm2, %v12238_v32 }
0x1677   : > { %v6933_v8 = vpop.f32.mrf.mxu2  ;;  %v7019_v5 = vpop.f32.mrf.mxu3 }
0x167c   : > { %9609 = vmatmul.msk.f32.gmra.mxu2 %vm3247_vm2, %v12244_v52 }
0x167f   : > { %v6936_v50 = vpop.f32.mrf.mxu2  ;;  %v7022_v46 = vpop.f32.mrf.mxu3 }
0x1684   : > { %9610 = vmatmul.msk.f32.gmra.mxu2 %vm3247_vm2, %v12250_v18 }
0x1687   : > { %v6939_v15 = vpop.f32.mrf.mxu2  ;;  %v7025_v4 = vpop.f32.mrf.mxu3 }
0x168c   : > { %9611 = vmatmul.msk.f32.gmra.mxu2 %vm3247_vm2, %v12256_v12 }
0x168f   : > { %v6942_v22 = vpop.f32.mrf.mxu2  ;;  %v7028_v58 = vpop.f32.mrf.mxu3 }
0x1694   : > { %9612 = vmatmul.msk.f32.gmra.mxu2 %vm3247_vm2, %v12262_v53 }
0x1697   : > { %v6945_v7 = vpop.f32.mrf.mxu2  ;;  %v7031_v23 = vpop.f32.mrf.mxu3 }
0x169c   : > { %9613 = vmatmul.msk.f32.gmra.mxu2 %vm3247_vm2, %v12272_v19 }
0x169f   : > { %v6948_v49 = vpop.f32.mrf.mxu2  ;;  %v7034_v40 = vpop.f32.mrf.mxu3 }
0x16a4   : > { %9614 = vmatmul.msk.f32.gmra.mxu2 %vm3247_vm2, %v12278_v21 }
0x16a7   : > { %v6951_v24 = vpop.f32.mrf.mxu2  ;;  %v7037_v57 = vpop.f32.mrf.mxu3 }
0x16ac   : > { %9615 = vmatmul.msk.f32.gmra.mxu2 %vm3247_vm2, %v12284_v37 }
0x16af   : > { %v6954_v31 = vpop.f32.mrf.mxu2  ;;  %v7040_v34 = vpop.f32.mrf.mxu3 }
0x16b4   : > { %9616 = vmatmul.msk.f32.gmra.mxu2 %vm3247_vm2, %v12290_v17 }
0x16b7   : > { %v6957_v48 = vpop.f32.mrf.mxu2  ;;  %v7043_v44 = vpop.f32.mrf.mxu3 }
0x16b8   : > { %7062 = vmatpush.msra.mxu0 %v7043_v44  ;;  %7127 = vmatpush.msrb.mxu1 %v6957_v48  ;;  %v6972_v48 = vld [vmem:[%s13364_s13 + $0x60] sm:$0xff]  ;;  %v9634_v44 = vld [vmem:[%s13409_s5 + $0x68] sm:$0xff] }
0x16ba   : > { %7063 = vmatpush.msra.mxu0 %v7040_v34  ;;  %7128 = vmatpush.msrb.mxu1 %v6954_v31  ;;  %v9635_v31 = vld [vmem:[%s13409_s5 + $0x70] sm:$0xff]  ;;  %v9593_v34 = vld [vmem:[%s13364_s13 + $0xe0] sm:$0xff] }
0x16bc   : > { %7064 = vmatpush.msra.mxu0 %v7037_v57  ;;  %7129 = vmatpush.msrb.mxu1 %v6951_v24  ;;  %v6971_v24 = vld [vmem:[%s13364_s13 + $0x58] sm:$0xff] }
0x16bd   : > { %9673 = vmatmul.msk.f32.vlgmr.msra.gmra.mxu2 %vm3247_vm2, %v12196_v61 }
0x16be   : > { %7065 = vmatpush.msra.mxu0 %v7034_v40  ;;  %7130 = vmatpush.msrb.mxu1 %v6948_v49  ;;  %v9592_v40 = vld [vmem:[%s13364_s13 + $0xd8] sm:$0xff] }
0x16bf   : > { %v12356_v14 = vpop.f32.mrf.mxu2 }
0x16c0   : > { %7066 = vmatpush.msra.mxu0 %v7031_v23  ;;  %7131 = vmatpush.msrb.mxu1 %v6945_v7  ;;  %v6969_v7 = vld [vmem:[%s13364_s13 + $0x48] sm:$0xff] }
0x16c2   : > { %7067 = vmatpush.msra.mxu0 %v7028_v58  ;;  %7132 = vmatpush.msrb.mxu1 %v6942_v22  ;;  %v9636_v22 = vld [vmem:[%s13409_s5 + $0x78] sm:$0xff]  ;;  %v9742_v58 = vld [vmem:[%s13409_s5 + $0xc8] sm:$0xff] }
0x16c4   : > { %7068 = vmatpush.msra.mxu0 %v7025_v4  ;;  %7133 = vmatpush.msrb.mxu1 %v6939_v15  ;;  %v9743_v4 = vld [vmem:[%s13409_s5 + $0xd0] sm:$0xff] }
0x16c5   : > { %9674 = vmatmul.msk.f32.gmra.mxu2 %vm3247_vm2, %v12202_v51 }
0x16c6   : > { %7069 = vmatpush.msra.mxu0 %v7022_v46  ;;  %7134 = vmatpush.msrb.mxu1 %v6936_v50  ;;  %v6968_v50 = vld [vmem:[%s13364_s13 + $0x40] sm:$0xff]  ;;  %v9744_v46 = vld [vmem:[%s13409_s5 + $0xd8] sm:$0xff] }
0x16c7   : > { %v12360_v62 = vpop.f32.mrf.mxu2  ;;  %7877 = vmatpush.msrb.mxu2 %v9744_v46 }
0x16c8   : > { %7070 = vmatpush.msra.mxu0 %v7019_v5  ;;  %7135 = vmatpush.msrb.mxu1 %v6933_v8  ;;  %v9589_v5 = vld [vmem:[%s13364_s13 + $0xc0] sm:$0xff] }
0x16c9   : > { %7878 = vmatpush.msrb.mxu2 %v9743_v4 }
0x16ca   : > { %7071 = vmatpush.msra.mxu0 %v7016_v25  ;;  %7136 = vmatpush.msrb.mxu1 %v6930_v16  ;;  %v9588_v16 = vld [vmem:[%s13364_s13 + $0xb8] sm:$0xff] }
0x16cb   : > { %v6967_v25 = vld [vmem:[%s13364_s13 + $0x38] sm:$0xff]  ;;  %7879 = vmatpush.msrb.mxu2 %v9742_v58 }
0x16cc   : > { %7072 = vmatpush.msra.mxu0 %v7013_v30  ;;  %7137 = vmatpush.msrb.mxu1 %v12328_v1  ;;  %v6966_v1 = vld [vmem:[%s13364_s13 + $0x30] sm:$0xff]  ;;  %v9624_v58 = vld [vmem:[%s13364_s13 + $0x138] sm:$0xff] }
0x16cd   : > { %9675 = vmatmul.msk.f32.gmra.mxu2 %vm3247_vm2, %v12208_v6 }
0x16ce   : > { %7073 = vmatpush.msra.mxu0 %v12324_v20  ;;  %7138 = vmatpush.msrb.mxu1 %v12322_v36  ;;  %v9587_v20 = vld [vmem:[%s13364_s13 + $0xb0] sm:$0xff] }
0x16cf   : > { %v12367_v45 = vpop.f32.mrf.mxu2  ;;  %7880 = vmatpush.msrb.mxu2 %v9741_v13 }
0x16d0   : > { %7074 = vmatpush.msra.mxu0 %v12318_v28  ;;  %7139 = vmatpush.msrb.mxu1 %v12316_v27  ;;  %v9586_v27 = vld [vmem:[%s13364_s13 + $0xa8] sm:$0xff] }
0x16d1   : > { %v6965_v28 = vld [vmem:[%s13364_s13 + $0x28] sm:$0xff] }
0x16d2   : > { %7075 = vmatpush.msra.mxu0 %v12312_v39  ;;  %7140 = vmatpush.msrb.mxu1 %v12310_v43  ;;  %v6964_v43 = vld [vmem:[%s13364_s13 + $0x20] sm:$0xff] }
0x16d4   : > { %7076 = vmatpush.msra.mxu0 %v12306_v29  ;;  %7141 = vmatpush.msrb.mxu1 %v12304_v26  ;;  %v9585_v29 = vld [vmem:[%s13364_s13 + $0xa0] sm:$0xff] }
0x16d5   : > { %9676 = vmatmul.msk.f32.gmra.mxu2 %vm3247_vm2, %v12214_v0 }
0x16d6   : > { %7077 = vmatpush.msra.mxu0 %v12300_v2  ;;  %7142 = vmatpush.msrb.mxu1 %v12298_v54  ;;  %v9584_v54 = vld [vmem:[%s13364_s13 + $0x98] sm:$0xff] }
0x16d7   : > { %7078 = vmatmul.f32.vlgmr.msra.gmra.mxu0 %v9581_v47  ;;  %7143 = vmatmul.f32.vlgmr.msrb.gmra.mxu1 %v6960_v3  ;;  %v12381_v11 = vpop.f32.mrf.mxu2  ;;  %v6963_v2 = vld [vmem:[%s13364_s13 + $0x18] sm:$0xff]  ;;  %v9633_v47 = vld [vmem:[%s13409_s5 + $0x60] sm:$0xff] }
0x16d8   : > { %7376 = vmatpush.msrb.mxu0 %v9636_v22 }
0x16da   : > { %7377 = vmatpush.msrb.mxu0 %v9635_v31  ;;  %v9626_v31 = vld [vmem:[%s13364_s13 + $0x148] sm:$0xff] }
0x16dc   : > { %7378 = vmatpush.msrb.mxu0 %v9634_v44  ;;  %v9627_v44 = vld [vmem:[%s13364_s13 + $0x150] sm:$0xff] }
0x16dd   : > { %9677 = vmatmul.msk.f32.gmra.mxu2 %vm3247_vm2, %v12220_v42 }
0x16de   : > { %7379 = vmatpush.msrb.mxu0 %v9633_v47 }
0x16df   : > { %7081 = vmatmul.f32.gmra.mxu0 %v9582_v33  ;;  %7146 = vmatmul.f32.gmra.mxu1 %v6961_v60  ;;  %v12387_v9 = vpop.f32.mrf.mxu2  ;;  %v9594_v33 = vld [vmem:[%s13364_s13 + $0xe8] sm:$0xff] }
0x16e0   : > { %v6973_v60 = vld [vmem:[%s13364_s13 + $0x68] sm:$0xff] }
0x16e5   : > { %9678 = vmatmul.msk.f32.gmra.mxu2 %vm3247_vm2, %v12226_v63 }
0x16e7   : > { %7084 = vmatmul.f32.gmra.mxu0 %v9583_v38  ;;  %7149 = vmatmul.f32.gmra.mxu1 %v6962_v10  ;;  %v12393_v35 = vpop.f32.mrf.mxu2  ;;  %v9595_v10 = vld [vmem:[%s13364_s13 + $0xf0] sm:$0xff] }
0x16ed   : > { %9679 = vmatmul.msk.f32.gmra.mxu2 %vm3247_vm2, %v12232_v59 }
0x16ef   : > { %7087 = vmatmul.f32.gmra.mxu0 %v9584_v54  ;;  %7152 = vmatmul.f32.gmra.mxu1 %v6963_v2  ;;  %v12399_v26 = vpop.f32.mrf.mxu2  ;;  %v6974_v54 = vld [vmem:[%s13364_s13 + $0x70] sm:$0xff] }
0x16f5   : > { %9680 = vmatmul.msk.f32.gmra.mxu2 %vm3247_vm2, %v12238_v32 }
0x16f7   : > { %7090 = vmatmul.f32.gmra.mxu0 %v9585_v29  ;;  %7155 = vmatmul.f32.gmra.mxu1 %v6964_v43  ;;  %v12405_v39 = vpop.f32.mrf.mxu2  ;;  %v9596_v29 = vld [vmem:[%s13364_s13 + $0xf8] sm:$0xff] }
0x16f8   : > { %v6975_v43 = vld [vmem:[%s13364_s13 + $0x78] sm:$0xff] }
0x16fd   : > { %9681 = vmatmul.msk.f32.gmra.mxu2 %vm3247_vm2, %v12244_v52 }
0x16ff   : > { %7093 = vmatmul.f32.gmra.mxu0 %v9586_v27  ;;  %7158 = vmatmul.f32.gmra.mxu1 %v6965_v28  ;;  %v12411_v36 = vpop.f32.mrf.mxu2 }
0x1705   : > { %9682 = vmatmul.msk.f32.gmra.mxu2 %vm3247_vm2, %v12250_v18 }
0x1707   : > { %7096 = vmatmul.f32.gmra.mxu0 %v9587_v20  ;;  %7161 = vmatmul.f32.gmra.mxu1 %v6966_v1  ;;  %v12417_v30 = vpop.f32.mrf.mxu2  ;;  %v9620_v20 = vld [vmem:[%s13364_s13 + $0x118] sm:$0xff] }
0x170d   : > { %9683 = vmatmul.msk.f32.gmra.mxu2 %vm3247_vm2, %v12256_v12 }
0x170f   : > { %7099 = vmatmul.f32.gmra.mxu0 %v9588_v16  ;;  %7164 = vmatmul.f32.gmra.mxu1 %v6967_v25  ;;  %v7244_v8 = vpop.f32.mrf.mxu2  ;;  %v9621_v16 = vld [vmem:[%s13364_s13 + $0x120] sm:$0xff] }
0x1715   : > { %9684 = vmatmul.msk.f32.gmra.mxu2 %vm3247_vm2, %v12262_v53 }
0x1717   : > { %7102 = vmatmul.f32.gmra.mxu0 %v9589_v5  ;;  %7167 = vmatmul.f32.gmra.mxu1 %v6968_v50  ;;  %v7247_v15 = vpop.f32.mrf.mxu2  ;;  %v9622_v5 = vld [vmem:[%s13364_s13 + $0x128] sm:$0xff] }
0x171d   : > { %9685 = vmatmul.msk.f32.gmra.mxu2 %vm3247_vm2, %v12272_v19 }
0x171f   : > { %7105 = vmatmul.f32.gmra.mxu0 %v9590_v41  ;;  %7170 = vmatmul.f32.gmra.mxu1 %v6969_v7  ;;  %v7250_v23 = vpop.f32.mrf.mxu2  ;;  %v9625_v7 = vld [vmem:[%s13364_s13 + $0x140] sm:$0xff] }
0x1725   : > { %9686 = vmatmul.msk.f32.gmra.mxu2 %vm3247_vm2, %v12278_v21 }
0x1727   : > { %7108 = vmatmul.f32.gmra.mxu0 %v9591_v55  ;;  %7173 = vmatmul.f32.gmra.mxu1 %v6970_v56  ;;  %v7253_v49 = vpop.f32.mrf.mxu2  ;;  %v9815_v55 = vld [vmem:[%s13409_s5 + $0x110] sm:$0xff] }
0x172d   : > { %9687 = vmatmul.msk.f32.gmra.mxu2 %vm3247_vm2, %v12284_v37 }
0x172f   : > { %7111 = vmatmul.f32.gmra.mxu0 %v9592_v40  ;;  %7176 = vmatmul.f32.gmra.mxu1 %v6971_v24  ;;  %v7256_v57 = vpop.f32.mrf.mxu2  ;;  %v9814_v40 = vld [vmem:[%s13409_s5 + $0x108] sm:$0xff]  ;;  %v9813_v24 = vld [vmem:[%s13409_s5 + $0x100] sm:$0xff] }
0x1735   : > { %9688 = vmatmul.msk.f32.gmra.mxu2 %vm3247_vm2, %v12290_v17 }
0x1737   : > { %7114 = vmatmul.f32.gmra.mxu0 %v9593_v34  ;;  %7179 = vmatmul.f32.gmra.mxu1 %v6972_v48  ;;  %v7259_v3 = vpop.f32.mrf.mxu2 }
0x1738   : > { %7278 = vmatpush.msrb.mxu3 %v7259_v3 }
0x173a   : > { %7279 = vmatpush.msrb.mxu3 %v7256_v57 }
0x173c   : > { %7280 = vmatpush.msrb.mxu3 %v7253_v49  ;;  %v9708_v49 = vld [vmem:[%s13409_s5 + $0xb8] sm:$0xff] }
0x173d   : > { %9745 = vmatmul.msk.f32.vlgmr.msrb.gmra.mxu2 %vm3247_vm2, %v12196_v61  ;;  %7710 = vmatpush.msra.mxu0 %v9708_v49 }
0x173e   : > { %7281 = vmatpush.msrb.mxu3 %v7250_v23  ;;  %v9816_v23 = vld [vmem:[%s13409_s5 + $0x118] sm:$0xff] }
0x173f   : > { %7117 = vmatmul.f32.gmra.mxu0 %v9594_v33  ;;  %7182 = vmatmul.f32.gmra.mxu1 %v6973_v60  ;;  %v9628_v33 = vld [vmem:[%s13364_s13 + $0x158] sm:$0xff] }
0x1740   : > { %v12455_v38 = vpop.f32.mrf.mxu2  ;;  %7282 = vmatpush.msrb.mxu3 %v7247_v15  ;;  %v9623_v15 = vld [vmem:[%s13364_s13 + $0x130] sm:$0xff]  ;;  %8211 = vmatpush.msra.mxu2 %v9816_v23 }
0x1742   : > { %7283 = vmatpush.msrb.mxu3 %v7244_v8  ;;  %8212 = vmatpush.msra.mxu2 %v9815_v55 }
0x1744   : > { %7284 = vmatpush.msrb.mxu3 %v12417_v30  ;;  %8213 = vmatpush.msra.mxu2 %v9814_v40 }
0x1745   : > { %9746 = vmatmul.msk.f32.gmra.mxu2 %vm3247_vm2, %v12202_v51 }
0x1746   : > { %7285 = vmatpush.msrb.mxu3 %v12411_v36  ;;  %8214 = vmatpush.msra.mxu2 %v9813_v24 }
0x1747   : > { %7120 = vmatmul.f32.gmra.mxu0 %v9595_v10  ;;  %7185 = vmatmul.f32.gmra.mxu1 %v6974_v54  ;;  %v9707_v10 = vld [vmem:[%s13409_s5 + $0xb0] sm:$0xff] }
0x1748   : > { %v12463_v2 = vpop.f32.mrf.mxu2  ;;  %7286 = vmatpush.msrb.mxu3 %v12405_v39  ;;  %v9619_v39 = vld [vmem:[%s13364_s13 + $0x110] sm:$0xff]  ;;  %7711 = vmatpush.msra.mxu0 %v9707_v10 }
0x174a   : > { %7287 = vmatpush.msrb.mxu3 %v12399_v26 }
0x174c   : > { %7288 = vmatpush.msrb.mxu3 %v12393_v35  ;;  %v9617_v35 = vld [vmem:[%s13364_s13 + $0x100] sm:$0xff] }
0x174d   : > { %9747 = vmatmul.msk.f32.gmra.mxu2 %vm3247_vm2, %v12208_v6 }
0x174e   : > { %7289 = vmatpush.msrb.mxu3 %v12387_v9 }
0x174f   : > { %7123 = vmatmul.f32.gmra.mxu0 %v9596_v29  ;;  %7188 = vmatmul.f32.gmra.mxu1 %v6975_v43  ;;  %v9629_v29 = vld [vmem:[%s13364_s13 + $0x160] sm:$0xff]  ;;  %v9706_v43 = vld [vmem:[%s13409_s5 + $0xa8] sm:$0xff] }
0x1750   : > { %v12473_v27 = vpop.f32.mrf.mxu2  ;;  %7290 = vmatpush.msrb.mxu3 %v12381_v11  ;;  %7712 = vmatpush.msra.mxu0 %v9706_v43 }
0x1752   : > { %7291 = vmatpush.msrb.mxu3 %v12367_v45  ;;  %v9618_v45 = vld [vmem:[%s13364_s13 + $0x108] sm:$0xff] }
0x1754   : > { %v12477_v26 = vpop.f32.mrf.mxu0  ;;  %7292 = vmatpush.msrb.mxu3 %v12360_v62 }
0x1755   : > { %9748 = vmatmul.msk.f32.gmra.mxu2 %vm3247_vm2, %v12214_v0 }
0x1756   : > { %7293 = vmatpush.msrb.mxu3 %v12356_v14 }
0x1757   : > { %7294 = vmatmul.f32.vlgmr.msrb.gmra.mxu3 %v9617_v35  ;;  %9637 = vmatmul.msk.f32.vlgmr.msrb.gmra.mxu0 %vm3247_vm2, %v12196_v61  ;;  %v9705_v35 = vld [vmem:[%s13409_s5 + $0xa0] sm:$0xff] }
0x1758   : > { %v12486_v9 = vpop.f32.mrf.mxu2  ;;  %7713 = vmatpush.msra.mxu0 %v9705_v35 }
0x175c   : > { %v12488_v11 = vpop.f32.mrf.mxu0 }
0x175d   : > { %9749 = vmatmul.msk.f32.gmra.mxu2 %vm3247_vm2, %v12220_v42 }
0x175f   : > { %7297 = vmatmul.f32.gmra.mxu3 %v9618_v45  ;;  %9638 = vmatmul.msk.f32.gmra.mxu0 %vm3247_vm2, %v12202_v51 }
0x1760   : > { %v12495_v62 = vpop.f32.mrf.mxu2 }
0x1764   : > { %v12497_v14 = vpop.f32.mrf.mxu0 }
0x1765   : > { %9750 = vmatmul.msk.f32.gmra.mxu2 %vm3247_vm2, %v12226_v63 }
0x1767   : > { %7300 = vmatmul.f32.gmra.mxu3 %v9619_v39  ;;  %9639 = vmatmul.msk.f32.gmra.mxu0 %vm3247_vm2, %v12208_v6 }
0x1768   : > { %v12504_v28 = vpop.f32.mrf.mxu2 }
0x176c   : > { %v12506_v36 = vpop.f32.mrf.mxu0 }
0x176d   : > { %9751 = vmatmul.msk.f32.gmra.mxu2 %vm3247_vm2, %v12232_v59 }
0x176f   : > { %7303 = vmatmul.f32.gmra.mxu3 %v9620_v20  ;;  %9640 = vmatmul.msk.f32.gmra.mxu0 %vm3247_vm2, %v12214_v0  ;;  %v9630_v20 = vld [vmem:[%s13364_s13 + $0x168] sm:$0xff] }
0x1770   : > { %v12513_v1 = vpop.f32.mrf.mxu2 }
0x1774   : > { %v12515_v30 = vpop.f32.mrf.mxu0 }
0x1775   : > { %9752 = vmatmul.msk.f32.gmra.mxu2 %vm3247_vm2, %v12238_v32 }
0x1777   : > { %7306 = vmatmul.f32.gmra.mxu3 %v9621_v16  ;;  %9641 = vmatmul.msk.f32.gmra.mxu0 %vm3247_vm2, %v12220_v42 }
0x1778   : > { %v12522_v25 = vpop.f32.mrf.mxu2 }
0x177c   : > { %v12524_v8 = vpop.f32.mrf.mxu0 }
0x177d   : > { %9753 = vmatmul.msk.f32.gmra.mxu2 %vm3247_vm2, %v12244_v52 }
0x177f   : > { %7309 = vmatmul.f32.gmra.mxu3 %v9622_v5  ;;  %9642 = vmatmul.msk.f32.gmra.mxu0 %vm3247_vm2, %v12226_v63 }
0x1780   : > { %v12531_v50 = vpop.f32.mrf.mxu2 }
0x1784   : > { %v12533_v46 = vpop.f32.mrf.mxu0 }
0x1785   : > { %9754 = vmatmul.msk.f32.gmra.mxu2 %vm3247_vm2, %v12250_v18 }
0x1787   : > { %7312 = vmatmul.f32.gmra.mxu3 %v9623_v15  ;;  %9643 = vmatmul.msk.f32.gmra.mxu0 %vm3247_vm2, %v12232_v59  ;;  %v9631_v15 = vld [vmem:[%s13364_s13 + $0x170] sm:$0xff] }
0x1788   : > { %v12540_v4 = vpop.f32.mrf.mxu2 }
0x178c   : > { %v12542_v22 = vpop.f32.mrf.mxu0 }
0x178d   : > { %9755 = vmatmul.msk.f32.gmra.mxu2 %vm3247_vm2, %v12256_v12 }
0x178f   : > { %7315 = vmatmul.f32.gmra.mxu3 %v9624_v58  ;;  %9644 = vmatmul.msk.f32.gmra.mxu0 %vm3247_vm2, %v12238_v32 }
0x1790   : > { %v7578_v13 = vpop.f32.mrf.mxu2 }
0x1794   : > { %v12549_v41 = vpop.f32.mrf.mxu0 }
0x1795   : > { %13410 = vst [vmem:[#allocation38_spill] sm:$0xff] %v12549_v41  ;;  %9756 = vmatmul.msk.f32.gmra.mxu2 %vm3247_vm2, %v12262_v53 }
0x1797   : > { %7318 = vmatmul.f32.gmra.mxu3 %v9625_v7  ;;  %9645 = vmatmul.msk.f32.gmra.mxu0 %vm3247_vm2, %v12244_v52 }
0x1798   : > { %v7581_v56 = vpop.f32.mrf.mxu2 }
0x179c   : > { %v12561_v57 = vpop.f32.mrf.mxu0 }
0x179d   : > { %13411 = vst [vmem:[#allocation42_spill] sm:$0xff] %v12561_v57  ;;  %9757 = vmatmul.msk.f32.gmra.mxu2 %vm3247_vm2, %v12272_v19 }
0x179f   : > { %7321 = vmatmul.f32.gmra.mxu3 %v9626_v31  ;;  %9646 = vmatmul.msk.f32.gmra.mxu0 %vm3247_vm2, %v12250_v18 }
0x17a0   : > { %v7584_v34 = vpop.f32.mrf.mxu2 }
0x17a4   : > { %v12568_v48 = vpop.f32.mrf.mxu0 }
0x17a5   : > { %13412 = vst [vmem:[#allocation35_spill] sm:$0xff] %v12568_v48  ;;  %9758 = vmatmul.msk.f32.gmra.mxu2 %vm3247_vm2, %v12278_v21 }
0x17a7   : > { %7324 = vmatmul.f32.gmra.mxu3 %v9627_v44  ;;  %9647 = vmatmul.msk.f32.gmra.mxu0 %vm3247_vm2, %v12256_v12 }
0x17a8   : > { %v7587_v47 = vpop.f32.mrf.mxu2 }
0x17ac   : > { %v12575_v3 = vpop.f32.mrf.mxu0 }
0x17ad   : > { %13413 = vst [vmem:[#allocation37_spill] sm:$0xff] %v12575_v3  ;;  %9759 = vmatmul.msk.f32.gmra.mxu2 %vm3247_vm2, %v12284_v37  ;;  %v9659_v3 = vld [vmem:[%s13364_s13 + $0x1b0] sm:$0xff] }
0x17af   : > { %7327 = vmatmul.f32.gmra.mxu3 %v9628_v33  ;;  %9648 = vmatmul.msk.f32.gmra.mxu0 %vm3247_vm2, %v12262_v53 }
0x17b0   : > { %v7590_v60 = vpop.f32.mrf.mxu2 }
0x17b4   : > { %v12583_v54 = vpop.f32.mrf.mxu0 }
0x17b5   : > { %13414 = vst [vmem:[#allocation41_spill] sm:$0xff] %v12583_v54  ;;  %9760 = vmatmul.msk.f32.gmra.mxu2 %vm3247_vm2, %v12290_v17 }
0x17b7   : > { %7330 = vmatmul.f32.gmra.mxu3 %v9629_v29  ;;  %9649 = vmatmul.msk.f32.gmra.mxu0 %vm3247_vm2, %v12272_v19 }
0x17b8   : > { %v7593_v45 = vpop.f32.mrf.mxu2 }
0x17b9   : > { %7612 = vmatpush.msra.mxu3 %v7593_v45 }
0x17bb   : > { %7613 = vmatpush.msra.mxu3 %v7590_v60 }
0x17bc   : > { %v12592_v39 = vpop.f32.mrf.mxu0 }
0x17bd   : > { %13415 = vst [vmem:[#allocation34_spill] sm:$0xff] %v12592_v39  ;;  %7614 = vmatpush.msra.mxu3 %v7587_v47  ;;  %9817 = vmatmul.msk.f32.vlgmr.msra.gmra.mxu2 %vm3247_vm2, %v12196_v61  ;;  %v9780_v47 = vld [vmem:[%s13409_s5 + $0xf8] sm:$0xff] }
0x17be   : > { %8044 = vmatpush.msrb.mxu0 %v9780_v47  ;;  %v9777_v47 = vld [vmem:[%s13409_s5 + $0xe0] sm:$0xff] }
0x17bf   : > { %7615 = vmatpush.msra.mxu3 %v7584_v34  ;;  %9650 = vmatmul.msk.f32.gmra.mxu0 %vm3247_vm2, %v12278_v21 }
0x17c0   : > { %7333 = vmatmul.f32.gmra.mxu3 %v9630_v20  ;;  %v12599_v16 = vpop.f32.mrf.mxu2  ;;  %v9779_v20 = vld [vmem:[%s13409_s5 + $0xf0] sm:$0xff] }
0x17c1   : > { %7616 = vmatpush.msra.mxu3 %v7581_v56  ;;  %8045 = vmatpush.msrb.mxu0 %v9779_v20 }
0x17c3   : > { %7617 = vmatpush.msra.mxu3 %v7578_v13 }
0x17c4   : > { %v12601_v5 = vpop.f32.mrf.mxu0 }
0x17c5   : > { %13416 = vst [vmem:[#allocation36_spill] sm:$0xff] %v12601_v5  ;;  %7618 = vmatpush.msra.mxu3 %v12540_v4  ;;  %9818 = vmatmul.msk.f32.gmra.mxu2 %vm3247_vm2, %v12202_v51  ;;  %v9632_v4 = vld [vmem:[%s13364_s13 + $0x178] sm:$0xff] }
0x17c7   : > { %7619 = vmatpush.msra.mxu3 %v12531_v50  ;;  %9651 = vmatmul.msk.f32.gmra.mxu0 %vm3247_vm2, %v12284_v37 }
0x17c8   : > { %7336 = vmatmul.f32.gmra.mxu3 %v9631_v15  ;;  %v12610_v58 = vpop.f32.mrf.mxu2 }
0x17c9   : > { %7620 = vmatpush.msra.mxu3 %v12522_v25 }
0x17cb   : > { %7621 = vmatpush.msra.mxu3 %v12513_v1 }
0x17cc   : > { %v12614_v13 = vpop.f32.mrf.mxu0 }
0x17cd   : > { %13417 = vst [vmem:[#allocation40_spill] sm:$0xff] %v12614_v13  ;;  %7622 = vmatpush.msra.mxu3 %v12504_v28  ;;  %9819 = vmatmul.msk.f32.gmra.mxu2 %vm3247_vm2, %v12208_v6 }
0x17cf   : > { %7623 = vmatpush.msra.mxu3 %v12495_v62  ;;  %9652 = vmatmul.msk.f32.gmra.mxu0 %vm3247_vm2, %v12290_v17 }
0x17d0   : > { %7339 = vmatmul.f32.gmra.mxu3 %v9632_v4  ;;  %v12623_v50 = vpop.f32.mrf.mxu2  ;;  %v9778_v4 = vld [vmem:[%s13409_s5 + $0xe8] sm:$0xff]  ;;  %s8431_s5 = scalar_lea.hbm %s10281_s14, %s10304_s0 }
0x17d1   : > { %7624 = vmatpush.msra.mxu3 %v12486_v9  ;;  %8046 = vmatpush.msrb.mxu0 %v9778_v4 }
0x17d3   : > { %7625 = vmatpush.msra.mxu3 %v12473_v27  ;;  %8047 = vmatpush.msrb.mxu0 %v9777_v47 }
0x17d4   : > { %v12627_v1 = vpop.f32.mrf.mxu0 }
0x17d5   : > { %7626 = vmatpush.msra.mxu3 %v12463_v2  ;;  %9820 = vmatmul.msk.f32.gmra.mxu2 %vm3247_vm2, %v12214_v0 }
0x17d7   : > { %7627 = vmatpush.msra.mxu3 %v12455_v38  ;;  %9709 = vmatmul.msk.f32.vlgmr.msra.gmra.mxu0 %vm3247_vm2, %v12196_v61 }
0x17d8   : > { %v12635_v62 = vpop.f32.mrf.mxu2 }
0x17da   : > { %v12704_v35 = vpop.f32.mrf.mxu3 }
0x17dc   : > { %v12637_v28 = vpop.f32.mrf.mxu0 }
0x17dd   : > { %9821 = vmatmul.msk.f32.gmra.mxu2 %vm3247_vm2, %v12220_v42 }
0x17df   : > { %9710 = vmatmul.msk.f32.gmra.mxu0 %vm3247_vm2, %v12202_v51 }
0x17e0   : > { %v12643_v27 = vpop.f32.mrf.mxu2 }
0x17e2   : > { %v12715_v5 = vpop.f32.mrf.mxu3 }
0x17e4   : > { %v12645_v2 = vpop.f32.mrf.mxu0 }
0x17e5   : > { %9822 = vmatmul.msk.f32.gmra.mxu2 %vm3247_vm2, %v12226_v63 }
0x17e7   : > { %9711 = vmatmul.msk.f32.gmra.mxu0 %vm3247_vm2, %v12208_v6 }
0x17e8   : > { %v12651_v38 = vpop.f32.mrf.mxu2 }
0x17ea   : > { %v12721_v4 = vpop.f32.mrf.mxu3 }
0x17ec   : > { %v12653_v9 = vpop.f32.mrf.mxu0 }
0x17ed   : > { %9823 = vmatmul.msk.f32.gmra.mxu2 %vm3247_vm2, %v12232_v59 }
0x17ef   : > { %9712 = vmatmul.msk.f32.gmra.mxu0 %vm3247_vm2, %v12214_v0 }
0x17f0   : > { %v12659_v25 = vpop.f32.mrf.mxu2 }
0x17f4   : > { %v12661_v7 = vpop.f32.mrf.mxu0 }
0x17f5   : > { %9824 = vmatmul.msk.f32.gmra.mxu2 %vm3247_vm2, %v12238_v32 }
0x17f7   : > { %9713 = vmatmul.msk.f32.gmra.mxu0 %vm3247_vm2, %v12220_v42 }
0x17f8   : > { %v7903_v23 = vpop.f32.mrf.mxu2 }
0x17fc   : > { %v12667_v55 = vpop.f32.mrf.mxu0 }
0x17fd   : > { %9825 = vmatmul.msk.f32.gmra.mxu2 %vm3247_vm2, %v12244_v52 }
0x17ff   : > { %9714 = vmatmul.msk.f32.gmra.mxu0 %vm3247_vm2, %v12226_v63 }
0x1800   : > { %v7906_v56 = vpop.f32.mrf.mxu2 }
0x1804   : > { %v12673_v49 = vpop.f32.mrf.mxu0 }
0x1805   : > { %9826 = vmatmul.msk.f32.gmra.mxu2 %vm3247_vm2, %v12250_v18 }
0x1807   : > { %9715 = vmatmul.msk.f32.gmra.mxu0 %vm3247_vm2, %v12232_v59 }
0x1808   : > { %v7909_v40 = vpop.f32.mrf.mxu2 }
0x180c   : > { %v12679_v24 = vpop.f32.mrf.mxu0 }
0x180d   : > { %9827 = vmatmul.msk.f32.gmra.mxu2 %vm3247_vm2, %v12256_v12 }
0x180f   : > { %9716 = vmatmul.msk.f32.gmra.mxu0 %vm3247_vm2, %v12238_v32 }
0x1810   : > { %v7912_v31 = vpop.f32.mrf.mxu2 }
0x1814   : > { %v12685_v34 = vpop.f32.mrf.mxu0 }
0x1815   : > { %9828 = vmatmul.msk.f32.gmra.mxu2 %vm3247_vm2, %v12262_v53 }
0x1817   : > { %9717 = vmatmul.msk.f32.gmra.mxu0 %vm3247_vm2, %v12244_v52 }
0x1818   : > { %v7915_v44 = vpop.f32.mrf.mxu2 }
0x181c   : > { %v12692_v33 = vpop.f32.mrf.mxu0 }
0x181d   : > { %9829 = vmatmul.msk.f32.gmra.mxu2 %vm3247_vm2, %v12272_v19 }
0x181f   : > { %9718 = vmatmul.msk.f32.gmra.mxu0 %vm3247_vm2, %v12250_v18 }
0x1820   : > { %v7918_v60 = vpop.f32.mrf.mxu2 }
0x1824   : > { %v7411_v10 = vpop.f32.mrf.mxu0 }
0x1825   : > { %9830 = vmatmul.msk.f32.gmra.mxu2 %vm3247_vm2, %v12278_v21 }
0x1827   : > { %9719 = vmatmul.msk.f32.gmra.mxu0 %vm3247_vm2, %v12256_v12 }
0x1828   : > { %v7921_v29 = vpop.f32.mrf.mxu2 }
0x182c   : > { %v7414_v43 = vpop.f32.mrf.mxu0 }
0x182d   : > { %9831 = vmatmul.msk.f32.gmra.mxu2 %vm3247_vm2, %v12284_v37 }
0x182f   : > { %9720 = vmatmul.msk.f32.gmra.mxu0 %vm3247_vm2, %v12262_v53 }
0x1830   : > { %v7924_v45 = vpop.f32.mrf.mxu2 }
0x1834   : > { %v7417_v15 = vpop.f32.mrf.mxu0 }
0x1835   : > { %9832 = vmatmul.msk.f32.gmra.mxu2 %vm3247_vm2, %v12290_v17 }
0x1837   : > { %9721 = vmatmul.msk.f32.gmra.mxu0 %vm3247_vm2, %v12272_v19 }
0x1838   : > { %v7927_v13 = vpop.f32.mrf.mxu2 }
0x1839   : > { %7946 = vmatpush.msrb.mxu3 %v7927_v13 }
0x183b   : > { %7947 = vmatpush.msrb.mxu3 %v7924_v45  ;;  %v12731_v45 = vpop.f32.mrf.mxu3 }
0x183c   : > { %v7420_v39 = vpop.f32.mrf.mxu0 }
0x183d   : > { %7948 = vmatpush.msrb.mxu3 %v7921_v29  ;;  %v9689_v29 = vld [vmem:[%s13364_s13 + $0x200] sm:$0xff] }
0x183e   : > { %7628 = vmatmul.f32.vlgmr.msra.gmra.mxu3 %v9689_v29 }
0x183f   : > { %7949 = vmatpush.msrb.mxu3 %v7918_v60  ;;  %9722 = vmatmul.msk.f32.gmra.mxu0 %vm3247_vm2, %v12278_v21  ;;  %v12728_v60 = vpop.f32.mrf.mxu1 }
0x1840   : > { %v12719_v20 = vpop.f32.mrf.mxu2 }
0x1841   : > { %7950 = vmatpush.msrb.mxu3 %v7915_v44 }
0x1843   : > { %7951 = vmatpush.msrb.mxu3 %v7912_v31  ;;  %v9654_v31 = vld [vmem:[%s13364_s13 + $0x188] sm:$0xff] }
0x1844   : > { %v7423_v54 = vpop.f32.mrf.mxu0 }
0x1845   : > { %7952 = vmatpush.msrb.mxu3 %v7909_v40 }
0x1847   : > { %7953 = vmatpush.msrb.mxu3 %v7906_v56  ;;  %9723 = vmatmul.msk.f32.gmra.mxu0 %vm3247_vm2, %v12284_v37 }
0x1848   : > { %v12725_v13 = vpop.f32.mrf.mxu2 }
0x1849   : > { %7954 = vmatpush.msrb.mxu3 %v7903_v23  ;;  %v9690_v23 = vld [vmem:[%s13364_s13 + $0x208] sm:$0xff] }
0x184a   : > { %7631 = vmatmul.f32.gmra.mxu3 %v9690_v23 }
0x184b   : > { %7955 = vmatpush.msrb.mxu3 %v12659_v25  ;;  %v12742_v25 = vpop.f32.mrf.mxu1 }
0x184c   : > { %v7426_v44 = vpop.f32.mrf.mxu0 }
0x184d   : > { %7956 = vmatpush.msrb.mxu3 %v12651_v38  ;;  %7445 = vmatpush.msra.mxu1 %v7426_v44  ;;  %v9656_v44 = vld [vmem:[%s13364_s13 + $0x198] sm:$0xff] }
0x184f   : > { %7957 = vmatpush.msrb.mxu3 %v12643_v27  ;;  %7446 = vmatpush.msra.mxu1 %v7423_v54  ;;  %v12747_v54 = vpop.f32.mrf.mxu3 }
0x1850   : > { %9724 = vmatmul.msk.f32.gmra.mxu0 %vm3247_vm2, %v12290_v17  ;;  %v12737_v56 = vpop.f32.mrf.mxu2 }
0x1851   : > { %7958 = vmatpush.msrb.mxu3 %v12635_v62  ;;  %7447 = vmatpush.msra.mxu1 %v7420_v39 }
0x1853   : > { %7959 = vmatpush.msrb.mxu3 %v12623_v50  ;;  %7448 = vmatpush.msra.mxu1 %v7417_v15  ;;  %v9691_v50 = vld [vmem:[%s13364_s13 + $0x210] sm:$0xff] }
0x1854   : > { %v12744_v38 = vpop.f32.mrf.mxu0  ;;  %7634 = vmatmul.f32.gmra.mxu3 %v9691_v50 }
0x1855   : > { %7960 = vmatpush.msrb.mxu3 %v12610_v58  ;;  %7449 = vmatpush.msra.mxu1 %v7414_v43  ;;  %v12760_v58 = vpop.f32.mrf.mxu1 }
0x1857   : > { %7961 = vmatpush.msrb.mxu3 %v12599_v16  ;;  %7450 = vmatpush.msra.mxu1 %v7411_v10  ;;  %v9692_v16 = vld [vmem:[%s13364_s13 + $0x218] sm:$0xff]  ;;  %v12768_v27 = vpop.f32.mrf.mxu3  ;;  %v9655_v10 = vld [vmem:[%s13364_s13 + $0x190] sm:$0xff] }
0x1858   : > { %9781 = vmatmul.msk.f32.vlgmr.msrb.gmra.mxu0 %vm3247_vm2, %v12196_v61  ;;  %v12752_v39 = vpop.f32.mrf.mxu2 }
0x1859   : > { %7451 = vmatpush.msra.mxu1 %v12692_v33 }
0x185b   : > { %7452 = vmatpush.msra.mxu1 %v12685_v34 }
0x185c   : > { %v12757_v62 = vpop.f32.mrf.mxu0  ;;  %7637 = vmatmul.f32.gmra.mxu3 %v9692_v16 }
0x185d   : > { %7453 = vmatpush.msra.mxu1 %v12679_v24  ;;  %v9693_v24 = vld [vmem:[%s13364_s13 + $0x220] sm:$0xff] }
0x185f   : > { %7454 = vmatpush.msra.mxu1 %v12673_v49  ;;  %v12776_v49 = vpop.f32.mrf.mxu1 }
0x1860   : > { %9782 = vmatmul.msk.f32.gmra.mxu0 %vm3247_vm2, %v12202_v51  ;;  %v12765_v61 = vpop.f32.mrf.mxu2 }
0x1861   : > { %7455 = vmatpush.msra.mxu1 %v12667_v55  ;;  %v9653_v55 = vld [vmem:[%s13364_s13 + $0x180] sm:$0xff] }
0x1863   : > { %7456 = vmatpush.msra.mxu1 %v12661_v7  ;;  %v12785_v7 = vpop.f32.mrf.mxu3 }
0x1864   : > { %v12772_v40 = vpop.f32.mrf.mxu0  ;;  %7640 = vmatmul.f32.gmra.mxu3 %v9693_v24  ;;  %v9697_v24 = vld [vmem:[%s13364_s13 + $0x240] sm:$0xff] }
0x1865   : > { %7457 = vmatpush.msra.mxu1 %v12653_v9  ;;  %v9694_v9 = vld [vmem:[%s13364_s13 + $0x228] sm:$0xff] }
0x1867   : > { %7458 = vmatpush.msra.mxu1 %v12645_v2  ;;  %v12796_v34 = vpop.f32.mrf.mxu1 }
0x1868   : > { %9783 = vmatmul.msk.f32.gmra.mxu0 %vm3247_vm2, %v12208_v6  ;;  %v12780_v51 = vpop.f32.mrf.mxu2 }
0x1869   : > { %7459 = vmatpush.msra.mxu1 %v12637_v28 }
0x186b   : > { %7460 = vmatpush.msra.mxu1 %v12627_v1  ;;  %v12800_v33 = vpop.f32.mrf.mxu3 }
0x186c   : > { %7461 = vmatmul.f32.vlgmr.msra.gmra.mxu1 %v9653_v55  ;;  %v12788_v2 = vpop.f32.mrf.mxu0  ;;  %7643 = vmatmul.f32.gmra.mxu3 %v9694_v9 }
0x186f   : > { %v12808_v43 = vpop.f32.mrf.mxu1 }
0x1870   : > { %9784 = vmatmul.msk.f32.gmra.mxu0 %vm3247_vm2, %v12214_v0  ;;  %v12792_v6 = vpop.f32.mrf.mxu2  ;;  %v9695_v0 = vld [vmem:[%s13364_s13 + $0x230] sm:$0xff] }
0x1873   : > { %v12812_v47 = vpop.f32.mrf.mxu3 }
0x1874   : > { %7464 = vmatmul.f32.gmra.mxu1 %v9654_v31  ;;  %v12798_v28 = vpop.f32.mrf.mxu0  ;;  %7646 = vmatmul.f32.gmra.mxu3 %v9695_v0  ;;  %13418 = vst [vmem:[#allocation39_spill] sm:$0xff] %v12812_v47  ;;  %v9661_v47 = vld [vmem:[%s13364_s13 + $0x1c0] sm:$0xff] }
0x1877   : > { %v12822_v50 = vpop.f32.mrf.mxu1 }
0x1878   : > { %9785 = vmatmul.msk.f32.gmra.mxu0 %vm3247_vm2, %v12220_v42  ;;  %v12804_v1 = vpop.f32.mrf.mxu2  ;;  %v9696_v42 = vld [vmem:[%s13364_s13 + $0x238] sm:$0xff] }
0x187b   : > { %v12829_v55 = vpop.f32.mrf.mxu3 }
0x187c   : > { %7467 = vmatmul.f32.gmra.mxu1 %v9655_v10  ;;  %v12810_v15 = vpop.f32.mrf.mxu0  ;;  %7649 = vmatmul.f32.gmra.mxu3 %v9696_v42  ;;  %13419 = vst [vmem:[#allocation43_spill] sm:$0xff] %v12829_v55  ;;  %v9698_v10 = vld [vmem:[%s13364_s13 + $0x248] sm:$0xff]  ;;  %v9660_v55 = vld [vmem:[%s13364_s13 + $0x1b8] sm:$0xff] }
0x187f   : > { %v12834_v31 = vpop.f32.mrf.mxu1 }
0x1880   : > { %9786 = vmatmul.msk.f32.gmra.mxu0 %vm3247_vm2, %v12226_v63  ;;  %v12816_v29 = vpop.f32.mrf.mxu2  ;;  %v9657_v63 = vld [vmem:[%s13364_s13 + $0x1a0] sm:$0xff] }
0x1883   : > { %v12840_v42 = vpop.f32.mrf.mxu3 }
0x1884   : > { %7470 = vmatmul.f32.gmra.mxu1 %v9656_v44  ;;  %v12820_v23 = vpop.f32.mrf.mxu0  ;;  %7652 = vmatmul.f32.gmra.mxu3 %v9697_v24  ;;  %13420 = vst [vmem:[#allocation44_spill] sm:$0xff] %v12840_v42  ;;  %v9700_v42 = vld [vmem:[%s13364_s13 + $0x258] sm:$0xff] }
0x1887   : > { %v12848_v48 = vpop.f32.mrf.mxu1 }
0x1888   : > { %9787 = vmatmul.msk.f32.gmra.mxu0 %vm3247_vm2, %v12232_v59  ;;  %v12826_v16 = vpop.f32.mrf.mxu2  ;;  %v9658_v59 = vld [vmem:[%s13364_s13 + $0x1a8] sm:$0xff]  ;;  %13421 = vst [vmem:[#allocation45_spill] sm:$0xff] %v12848_v48 }
0x188c   : > { %7473 = vmatmul.f32.gmra.mxu1 %v9657_v63  ;;  %v12832_v9 = vpop.f32.mrf.mxu0  ;;  %7655 = vmatmul.f32.gmra.mxu3 %v9698_v10  ;;  %v9699_v63 = vld [vmem:[%s13364_s13 + $0x250] sm:$0xff]  ;;  %v12852_v10 = vpop.f32.mrf.mxu3 }
0x188d   : > { %13422 = vst [vmem:[#allocation46_spill] sm:$0xff] %v12852_v10  ;;  %v9701_v10 = vld [vmem:[%s13364_s13 + $0x260] sm:$0xff] }
0x1890   : > { %9788 = vmatmul.msk.f32.gmra.mxu0 %vm3247_vm2, %v12238_v32  ;;  %v8246_v0 = vpop.f32.mrf.mxu2 }
0x1894   : > { %7476 = vmatmul.f32.gmra.mxu1 %v9658_v59  ;;  %v12842_v44 = vpop.f32.mrf.mxu0  ;;  %7658 = vmatmul.f32.gmra.mxu3 %v9699_v63  ;;  %v12862_v63 = vpop.f32.mrf.mxu3 }
0x1895   : > { %13424 = vst [vmem:[#allocation48_spill] sm:$0xff] %v12862_v63  ;;  %v9662_v63 = vld [vmem:[%s13364_s13 + $0x1c8] sm:$0xff] }
0x1898   : > { %9789 = vmatmul.msk.f32.gmra.mxu0 %vm3247_vm2, %v12244_v52  ;;  %v8249_v24 = vpop.f32.mrf.mxu2  ;;  %v12858_v52 = vpop.f32.mrf.mxu1 }
0x1899   : > { %13423 = vst [vmem:[#allocation47_spill] sm:$0xff] %v12858_v52  ;;  %v9702_v52 = vld [vmem:[%s13364_s13 + $0x268] sm:$0xff] }
0x189c   : > { %7479 = vmatmul.f32.gmra.mxu1 %v9659_v3  ;;  %v12850_v32 = vpop.f32.mrf.mxu0  ;;  %7661 = vmatmul.f32.gmra.mxu3 %v9700_v42  ;;  %v12873_v48 = vpop.f32.mrf.mxu3 }
0x189d   : > { %13426 = vst [vmem:[#allocation50_spill] sm:$0xff] %v12873_v48 }
0x18a0   : > { %9790 = vmatmul.msk.f32.gmra.mxu0 %vm3247_vm2, %v12250_v18  ;;  %v8252_v59 = vpop.f32.mrf.mxu2  ;;  %v12868_v42 = vpop.f32.mrf.mxu1 }
0x18a1   : > { %13425 = vst [vmem:[#allocation49_spill] sm:$0xff] %v12868_v42  ;;  %v9663_v42 = vld [vmem:[%s13364_s13 + $0x1d0] sm:$0xff] }
0x18a4   : > { %7482 = vmatmul.f32.gmra.mxu1 %v9660_v55  ;;  %v12860_v57 = vpop.f32.mrf.mxu0  ;;  %7664 = vmatmul.f32.gmra.mxu3 %v9701_v10  ;;  %v9703_v10 = vld [vmem:[%s13364_s13 + $0x270] sm:$0xff] }
0x18a8   : > { %9791 = vmatmul.msk.f32.gmra.mxu0 %vm3247_vm2, %v12256_v12  ;;  %v8255_v3 = vpop.f32.mrf.mxu2  ;;  %v12876_v41 = vpop.f32.mrf.mxu1 }
0x18a9   : > { %13427 = vst [vmem:[#allocation51_spill] sm:$0xff] %v12876_v41  ;;  %v9775_v41 = vld [vmem:[%s13364_s13 + $0x370] sm:$0xff] }
0x18ac   : > { %7485 = vmatmul.f32.gmra.mxu1 %v9661_v47  ;;  %v7748_v18 = vpop.f32.mrf.mxu0  ;;  %7667 = vmatmul.f32.gmra.mxu3 %v9702_v52  ;;  %v9704_v52 = vld [vmem:[%s13364_s13 + $0x278] sm:$0xff] }
0x18b0   : > { %9792 = vmatmul.msk.f32.gmra.mxu0 %vm3247_vm2, %v12262_v53  ;;  %v8258_v55 = vpop.f32.mrf.mxu2  ;;  %v12882_v53 = vpop.f32.mrf.mxu3 }
0x18b1   : > { %13428 = vst [vmem:[#allocation52_spill] sm:$0xff] %v12882_v53  ;;  %v9773_v53 = vld [vmem:[%s13364_s13 + $0x360] sm:$0xff] }
0x18b4   : > { %7488 = vmatmul.f32.gmra.mxu1 %v9662_v63  ;;  %v7751_v12 = vpop.f32.mrf.mxu0  ;;  %7670 = vmatmul.f32.gmra.mxu3 %v9703_v10  ;;  %v12888_v63 = vpop.f32.mrf.mxu1 }
0x18b5   : > { %13429 = vst [vmem:[#allocation53_spill] sm:$0xff] %v12888_v63  ;;  %v9774_v63 = vld [vmem:[%s13364_s13 + $0x368] sm:$0xff] }
0x18b8   : > { %9793 = vmatmul.msk.f32.gmra.mxu0 %vm3247_vm2, %v12272_v19  ;;  %v8261_v47 = vpop.f32.mrf.mxu2  ;;  %v9664_v19 = vld [vmem:[%s13364_s13 + $0x1d8] sm:$0xff]  ;;  %v12890_v10 = vpop.f32.mrf.mxu3 }
0x18b9   : > { %8280 = vmatpush.msra.mxu3 %v8261_v47  ;;  %13430 = vst [vmem:[#allocation54_spill] sm:$0xff] %v12890_v10 }
0x18bb   : > { %8281 = vmatpush.msra.mxu3 %v8258_v55  ;;  %v9727_v55 = vld [vmem:[%s13364_s13 + $0x290] sm:$0xff] }
0x18bc   : > { %7491 = vmatmul.f32.gmra.mxu1 %v9663_v42  ;;  %v7754_v48 = vpop.f32.mrf.mxu0  ;;  %7673 = vmatmul.f32.gmra.mxu3 %v9704_v52  ;;  %v9767_v42 = vld [vmem:[%s13364_s13 + $0x330] sm:$0xff] }
0x18bd   : > { %8282 = vmatpush.msra.mxu3 %v8255_v3 }
0x18bf   : > { %8283 = vmatpush.msra.mxu3 %v8252_v59 }
0x18c0   : > { %9794 = vmatmul.msk.f32.gmra.mxu0 %vm3247_vm2, %v12278_v21  ;;  %v9761_v21 = vld [vmem:[%s13364_s13 + $0x300] sm:$0xff] }
0x18c1   : > { %8284 = vmatpush.msra.mxu3 %v8249_v24  ;;  %v9665_v24 = vld [vmem:[%s13364_s13 + $0x1e0] sm:$0xff] }
0x18c3   : > { %8285 = vmatpush.msra.mxu3 %v8246_v0  ;;  %v12900_v0 = vpop.f32.mrf.mxu1 }
0x18c4   : > { %7494 = vmatmul.f32.gmra.mxu1 %v9664_v19  ;;  %v7757_v47 = vpop.f32.mrf.mxu0  ;;  %7962 = vmatmul.f32.vlgmr.msrb.gmra.mxu3 %v9761_v21  ;;  %13431 = vst [vmem:[#allocation55_spill] sm:$0xff] %v12900_v0  ;;  %v9768_v19 = vld [vmem:[%s13364_s13 + $0x338] sm:$0xff] }
0x18c5   : > { %8286 = vmatpush.msra.mxu3 %v12826_v16  ;;  %v12903_v16 = vpop.f32.mrf.mxu3  ;;  %v9728_v21 = vld [vmem:[%s13364_s13 + $0x298] sm:$0xff] }
0x18c7   : > { %8287 = vmatpush.msra.mxu3 %v12816_v29 }
0x18c8   : > { %9795 = vmatmul.msk.f32.gmra.mxu0 %vm3247_vm2, %v12284_v37  ;;  %v9762_v37 = vld [vmem:[%s13364_s13 + $0x308] sm:$0xff] }
0x18c9   : > { %8288 = vmatpush.msra.mxu3 %v12804_v1 }
0x18cb   : > { %8289 = vmatpush.msra.mxu3 %v12792_v6  ;;  %v9666_v6 = vld [vmem:[%s13364_s13 + $0x1e8] sm:$0xff]  ;;  %v12917_v1 = vpop.f32.mrf.mxu1 }
0x18cc   : > { %7497 = vmatmul.f32.gmra.mxu1 %v9665_v24  ;;  %7965 = vmatmul.f32.gmra.mxu3 %v9762_v37  ;;  %13432 = vst [vmem:[#allocation56_spill] sm:$0xff] %v12917_v1  ;;  %v9769_v37 = vld [vmem:[%s13364_s13 + $0x340] sm:$0xff] }
0x18cd   : > { %v7760_v59 = vpop.f32.mrf.mxu0  ;;  %8290 = vmatpush.msra.mxu3 %v12780_v51 }
0x18ce   : > { %7779 = vmatpush.msrb.mxu1 %v7760_v59 }
0x18cf   : > { %8291 = vmatpush.msra.mxu3 %v12765_v61  ;;  %v12915_v61 = vpop.f32.mrf.mxu3 }
0x18d0   : > { %7780 = vmatpush.msrb.mxu1 %v7757_v47  ;;  %9796 = vmatmul.msk.f32.gmra.mxu0 %vm3247_vm2, %v12290_v17  ;;  %v9763_v17 = vld [vmem:[%s13364_s13 + $0x310] sm:$0xff] }
0x18d1   : > { %8292 = vmatpush.msra.mxu3 %v12752_v39  ;;  %v9764_v39 = vld [vmem:[%s13364_s13 + $0x318] sm:$0xff] }
0x18d2   : > { %7781 = vmatpush.msrb.mxu1 %v7754_v48  ;;  %v9667_v48 = vld [vmem:[%s13364_s13 + $0x1f0] sm:$0xff] }
0x18d3   : > { %8293 = vmatpush.msra.mxu3 %v12737_v56 }
0x18d4   : > { %7782 = vmatpush.msrb.mxu1 %v7751_v12  ;;  %7968 = vmatmul.f32.gmra.mxu3 %v9763_v17  ;;  %v9729_v17 = vld [vmem:[%s13364_s13 + $0x2a0] sm:$0xff] }
0x18d5   : > { %7500 = vmatmul.f32.gmra.mxu1 %v9666_v6  ;;  %v12912_v51 = vpop.f32.mrf.mxu0  ;;  %8294 = vmatpush.msra.mxu3 %v12725_v13 }
0x18d6   : > { %7783 = vmatpush.msrb.mxu1 %v7748_v18 }
0x18d7   : > { %8295 = vmatpush.msra.mxu3 %v12719_v20  ;;  %v12927_v56 = vpop.f32.mrf.mxu3  ;;  %v12932_v20 = vpop.f32.mrf.mxu1 }
0x18d8   : > { %7784 = vmatpush.msrb.mxu1 %v12860_v57  ;;  %13433 = vst [vmem:[#allocation57_spill] sm:$0xff] %v12932_v20  ;;  %v9668_v57 = vld [vmem:[%s13364_s13 + $0x1f8] sm:$0xff] }
0x18da   : > { %7785 = vmatpush.msrb.mxu1 %v12850_v32 }
0x18dc   : > { %7786 = vmatpush.msrb.mxu1 %v12842_v44  ;;  %7971 = vmatmul.f32.gmra.mxu3 %v9764_v39 }
0x18dd   : > { %7503 = vmatmul.f32.gmra.mxu1 %v9667_v48  ;;  %v12925_v13 = vpop.f32.mrf.mxu0 }
0x18de   : > { %7787 = vmatpush.msrb.mxu1 %v12832_v9  ;;  %v9765_v9 = vld [vmem:[%s13364_s13 + $0x320] sm:$0xff] }
0x18df   : > { %v12939_v44 = vpop.f32.mrf.mxu3 }
0x18e0   : > { %7788 = vmatpush.msrb.mxu1 %v12820_v23 }
0x18e2   : > { %7789 = vmatpush.msrb.mxu1 %v12810_v15  ;;  %v9725_v15 = vld [vmem:[%s13364_s13 + $0x280] sm:$0xff] }
0x18e4   : > { %7790 = vmatpush.msrb.mxu1 %v12798_v28  ;;  %7974 = vmatmul.f32.gmra.mxu3 %v9765_v9 }
0x18e5   : > { %7506 = vmatmul.f32.gmra.mxu1 %v9668_v57  ;;  %v12937_v29 = vpop.f32.mrf.mxu0  ;;  %v9770_v57 = vld [vmem:[%s13364_s13 + $0x348] sm:$0xff] }
0x18e6   : > { %7791 = vmatpush.msrb.mxu1 %v12788_v2  ;;  %v9766_v2 = vld [vmem:[%s13364_s13 + $0x328] sm:$0xff] }
0x18e7   : > { %v12951_v32 = vpop.f32.mrf.mxu3 }
0x18e8   : > { %7792 = vmatpush.msrb.mxu1 %v12772_v40  ;;  %v9726_v40 = vld [vmem:[%s13364_s13 + $0x288] sm:$0xff] }
0x18e9   : > { %v12944_v23 = vpop.f32.mrf.mxu1 }
0x18ea   : > { %7793 = vmatpush.msrb.mxu1 %v12757_v62 }
0x18ec   : > { %7794 = vmatpush.msrb.mxu1 %v12744_v38  ;;  %7977 = vmatmul.f32.gmra.mxu3 %v9766_v2 }
0x18ed   : > { %7795 = vmatmul.f32.vlgmr.msrb.gmra.mxu1 %v9725_v15  ;;  %v12949_v28 = vpop.f32.mrf.mxu0  ;;  %v9730_v15 = vld [vmem:[%s13364_s13 + $0x2a8] sm:$0xff] }
0x18ef   : > { %v12959_v62 = vpop.f32.mrf.mxu3 }
0x18f1   : > { %v12954_v3 = vpop.f32.mrf.mxu1 }
0x18f4   : > { %7980 = vmatmul.f32.gmra.mxu3 %v9767_v42  ;;  %v9771_v42 = vld [vmem:[%s13364_s13 + $0x350] sm:$0xff] }
0x18f5   : > { %7798 = vmatmul.f32.gmra.mxu1 %v9726_v40  ;;  %v12957_v18 = vpop.f32.mrf.mxu0 }
0x18f7   : > { %v12967_v52 = vpop.f32.mrf.mxu3 }
0x18f9   : > { %v12962_v38 = vpop.f32.mrf.mxu1 }
0x18fc   : > { %7983 = vmatmul.f32.gmra.mxu3 %v9768_v19  ;;  %v9731_v19 = vld [vmem:[%s13364_s13 + $0x2b0] sm:$0xff] }
0x18fd   : > { %7801 = vmatmul.f32.gmra.mxu1 %v9727_v55  ;;  %v12965_v12 = vpop.f32.mrf.mxu0 }
0x18ff   : > { %v12975_v59 = vpop.f32.mrf.mxu3 }
0x1900   : > { %13434 = vst [vmem:[#allocation58_spill] sm:$0xff] %v12975_v59 }
0x1901   : > { %v12970_v47 = vpop.f32.mrf.mxu1 }
0x1904   : > { %7986 = vmatmul.f32.gmra.mxu3 %v9769_v37 }
0x1905   : > { %7804 = vmatmul.f32.gmra.mxu1 %v9728_v21  ;;  %v12973_v24 = vpop.f32.mrf.mxu0 }
0x1907   : > { %v12983_v39 = vpop.f32.mrf.mxu3 }
0x1908   : > { %13435 = vst [vmem:[#allocation59_spill] sm:$0xff] %v12983_v39  ;;  %v9776_v39 = vld [vmem:[%s13364_s13 + $0x378] sm:$0xff] }
0x1909   : > { %v12978_v6 = vpop.f32.mrf.mxu1 }
0x190c   : > { %7989 = vmatmul.f32.gmra.mxu3 %v9770_v57 }
0x190d   : > { %7807 = vmatmul.f32.gmra.mxu1 %v9729_v17  ;;  %v12981_v48 = vpop.f32.mrf.mxu0  ;;  %v9772_v17 = vld [vmem:[%s13364_s13 + $0x358] sm:$0xff] }
0x190f   : > { %v12991_v40 = vpop.f32.mrf.mxu3 }
0x1910   : > { %13436 = vst [vmem:[#allocation60_spill] sm:$0xff] %v12991_v40 }
0x1911   : > { %v12986_v9 = vpop.f32.mrf.mxu1 }
0x1914   : > { %7992 = vmatmul.f32.gmra.mxu3 %v9771_v42  ;;  %v9733_v42 = vld [vmem:[%s13364_s13 + $0x2c0] sm:$0xff] }
0x1915   : > { %7810 = vmatmul.f32.gmra.mxu1 %v9730_v15  ;;  %v12989_v2 = vpop.f32.mrf.mxu0  ;;  %v9732_v15 = vld [vmem:[%s13364_s13 + $0x2b8] sm:$0xff] }
0x1917   : > { %v12997_v37 = vpop.f32.mrf.mxu3 }
0x1918   : > { %13437 = vst [vmem:[#allocation61_spill] sm:$0xff] %v12997_v37 }
0x1919   : > { %v12994_v55 = vpop.f32.mrf.mxu1 }
0x191c   : > { %7995 = vmatmul.f32.gmra.mxu3 %v9772_v17  ;;  %v9734_v17 = vld [vmem:[%s13364_s13 + $0x2c8] sm:$0xff] }
0x191d   : > { %7813 = vmatmul.f32.gmra.mxu1 %v9731_v19  ;;  %v8076_v21 = vpop.f32.mrf.mxu0 }
0x191f   : > { %v13003_v20 = vpop.f32.mrf.mxu3 }
0x1920   : > { %13438 = vst [vmem:[#allocation62_spill] sm:$0xff] %v13003_v20 }
0x1921   : > { %v13000_v57 = vpop.f32.mrf.mxu1 }
0x1924   : > { %7998 = vmatmul.f32.gmra.mxu3 %v9773_v53  ;;  %v9735_v53 = vld [vmem:[%s13364_s13 + $0x2d0] sm:$0xff] }
0x1925   : > { %7816 = vmatmul.f32.gmra.mxu1 %v9732_v15  ;;  %v8079_v10 = vpop.f32.mrf.mxu0 }
0x1927   : > { %v13009_v0 = vpop.f32.mrf.mxu3 }
0x1928   : > { %13440 = vst [vmem:[#allocation64_spill] sm:$0xff] %v13009_v0 }
0x1929   : > { %v13006_v1 = vpop.f32.mrf.mxu1 }
0x192a   : > { %13439 = vst [vmem:[#allocation63_spill] sm:$0xff] %v13006_v1  ;;  %v9833_v1 = vld [vmem:[%s13364_s13 + $0x400] sm:$0xff] }
0x192c   : > { %8001 = vmatmul.f32.gmra.mxu3 %v9774_v63  ;;  %v9736_v63 = vld [vmem:[%s13364_s13 + $0x2d8] sm:$0xff] }
0x192d   : > { %7819 = vmatmul.f32.gmra.mxu1 %v9733_v42  ;;  %v8082_v19 = vpop.f32.mrf.mxu0 }
0x192f   : > { %v13015_v20 = vpop.f32.mrf.mxu3 }
0x1930   : > { %13442 = vst [vmem:[#allocation66_spill] sm:$0xff] %v13015_v20 }
0x1931   : > { %v13012_v37 = vpop.f32.mrf.mxu1 }
0x1932   : > { %13441 = vst [vmem:[#allocation65_spill] sm:$0xff] %v13012_v37 }
0x1934   : > { %8004 = vmatmul.f32.gmra.mxu3 %v9775_v41 }
0x1935   : > { %7822 = vmatmul.f32.gmra.mxu1 %v9734_v17  ;;  %v8085_v15 = vpop.f32.mrf.mxu0 }
0x1937   : > { %v13021_v0 = vpop.f32.mrf.mxu3 }
0x1938   : > { %13444 = vst [vmem:[#allocation68_spill] sm:$0xff] %v13021_v0  ;;  %v9834_v0 = vld [vmem:[%s13364_s13 + $0x408] sm:$0xff] }
0x1939   : > { %v13018_v40 = vpop.f32.mrf.mxu1 }
0x193a   : > { %13443 = vst [vmem:[#allocation67_spill] sm:$0xff] %v13018_v40  ;;  %v9737_v40 = vld [vmem:[%s13364_s13 + $0x2e0] sm:$0xff] }
0x193c   : > { %8007 = vmatmul.f32.gmra.mxu3 %v9776_v39  ;;  %v9738_v39 = vld [vmem:[%s13364_s13 + $0x2e8] sm:$0xff] }
0x193d   : > { %7825 = vmatmul.f32.gmra.mxu1 %v9735_v53  ;;  %v8088_v42 = vpop.f32.mrf.mxu0 }
0x193f   : > { %v13027_v20 = vpop.f32.mrf.mxu3 }
0x1940   : > { %13446 = vst [vmem:[#allocation70_spill] sm:$0xff] %v13027_v20  ;;  %v9835_v20 = vld [vmem:[%s13364_s13 + $0x410] sm:$0xff] }
0x1941   : > { %v13024_v37 = vpop.f32.mrf.mxu1 }
0x1942   : > { %13445 = vst [vmem:[#allocation69_spill] sm:$0xff] %v13024_v37 }
0x1944   : > { %8296 = vmatmul.f32.vlgmr.msra.gmra.mxu3 %v9833_v1 }
0x1945   : > { %7828 = vmatmul.f32.gmra.mxu1 %v9736_v63  ;;  %v8091_v17 = vpop.f32.mrf.mxu0 }
0x1947   : > { %v7963_v53 = vpop.f32.mrf.mxu3 }
0x1949   : > { %v13030_v59 = vpop.f32.mrf.mxu1 }
0x194c   : > { %8299 = vmatmul.f32.gmra.mxu3 %v9834_v0  ;;  %v9836_v0 = vld [vmem:[%s13364_s13 + $0x418] sm:$0xff] }
0x194d   : > { %7831 = vmatmul.f32.gmra.mxu1 %v9737_v40  ;;  %v8094_v41 = vpop.f32.mrf.mxu0  ;;  %v9739_v40 = vld [vmem:[%s13364_s13 + $0x2f0] sm:$0xff] }
0x194e   : > { %8113 = vmatpush.msra.mxu1 %v8094_v41 }
0x194f   : > { %v7966_v63 = vpop.f32.mrf.mxu3 }
0x1950   : > { %8114 = vmatpush.msra.mxu1 %v8091_v17  ;;  %v9798_v17 = vld [vmem:[%s13364_s13 + $0x388] sm:$0xff] }
0x1952   : > { %v13034_v37 = vpop.f32.mrf.mxu1  ;;  %8115 = vmatpush.msra.mxu1 %v8088_v42 }
0x1954   : > { %8116 = vmatpush.msra.mxu1 %v8085_v15  ;;  %8302 = vmatmul.f32.gmra.mxu3 %v9835_v20 }
0x1955   : > { %7834 = vmatmul.f32.gmra.mxu1 %v9738_v39  ;;  %v9839_v39 = vld [vmem:[%s13364_s13 + $0x430] sm:$0xff] }
0x1956   : > { %8117 = vmatpush.msra.mxu1 %v8082_v19  ;;  %v7145_v19 = vadd.f32 %v12728_v60, %v12477_v26  ;;  %v7148_v26 = vadd.f32 %v12742_v25, %v12488_v11  ;;  %v9838_v25 = vld [vmem:[%s13364_s13 + $0x428] sm:$0xff] }
0x1957   : > { %v7969_v42 = vpop.f32.mrf.mxu3 }
0x1958   : > { %8118 = vmatpush.msra.mxu1 %v8079_v10  ;;  %v9740_v10 = vld [vmem:[%s13364_s13 + $0x2f8] sm:$0xff]  ;;  %v7343_v20 = vadd.f32 %v12704_v35, %v7145_v19  ;;  %v9797_v35 = vld [vmem:[%s13364_s13 + $0x380] sm:$0xff] }
0x195a   : > { %v13038_v1 = vpop.f32.mrf.mxu1  ;;  %8119 = vmatpush.msra.mxu1 %v8076_v21 }
0x195c   : > { %8120 = vmatpush.msra.mxu1 %v12989_v2  ;;  %8305 = vmatmul.f32.gmra.mxu3 %v9836_v0  ;;  %v7510_v2 = vadd.f32 %v12944_v23, %v7343_v20  ;;  %v7344_v23 = vadd.f32 %v12715_v5, %v7148_v26  ;;  %v9800_v20 = vld [vmem:[%s13364_s13 + $0x398] sm:$0xff]  ;;  %v9841_v26 = vld [vmem:[%s13364_s13 + $0x440] sm:$0xff] }
0x195d   : > { %7837 = vmatmul.f32.gmra.mxu1 %v9739_v40  ;;  %v9799_v40 = vld [vmem:[%s13364_s13 + $0x390] sm:$0xff] }
0x195e   : > { %8121 = vmatpush.msra.mxu1 %v12981_v48  ;;  %v7677_v60 = vadd.f32 %v12903_v16, %v7510_v2  ;;  %v7151_v16 = vadd.f32 %v12760_v58, %v12497_v14  ;;  %v7154_v14 = vadd.f32 %v12776_v49, %v12506_v36  ;;  %v7157_v36 = vadd.f32 %v12796_v34, %v12515_v30 }
0x195f   : > { %v7972_v48 = vpop.f32.mrf.mxu3  ;;  %v7160_v30 = vadd.f32 %v12808_v43, %v12524_v8  ;;  %v7163_v8 = vadd.f32 %v12822_v50, %v12533_v46  ;;  %v7166_v46 = vadd.f32 %v12834_v31, %v12542_v22  ;;  %v13449_v31 = vld [vmem:[#allocation58_spill] sm:$0xff] }
0x1960   : > { %8122 = vmatpush.msra.mxu1 %v12973_v24  ;;  %v9837_v24 = vld [vmem:[%s13364_s13 + $0x420] sm:$0xff]  ;;  %v7345_v5 = vadd.f32 %v12721_v4, %v7151_v16  ;;  %v7346_v4 = vadd.f32 %v12731_v45, %v7154_v14  ;;  %v7347_v45 = vadd.f32 %v12747_v54, %v7157_v36  ;;  %v9843_v16 = vld [vmem:[%s13364_s13 + $0x450] sm:$0xff]  ;;  %v9804_v14 = vld [vmem:[%s13364_s13 + $0x3b8] sm:$0xff] }
0x1961   : > { %v7348_v54 = vadd.f32 %v12768_v27, %v7160_v30  ;;  %v7349_v27 = vadd.f32 %v12785_v7, %v7163_v8  ;;  %v7350_v7 = vadd.f32 %v12800_v33, %v7166_v46  ;;  %v13456_v30 = vld [vmem:[#allocation65_spill] sm:$0xff] }
0x1962   : > { %v13047_v15 = vpop.f32.mrf.mxu1  ;;  %8123 = vmatpush.msra.mxu1 %v12965_v12 }
0x1964   : > { %8124 = vmatpush.msra.mxu1 %v12957_v18  ;;  %8308 = vmatmul.f32.gmra.mxu3 %v9837_v24 }
0x1965   : > { %7840 = vmatmul.f32.gmra.mxu1 %v9740_v10  ;;  %v9840_v10 = vld [vmem:[%s13364_s13 + $0x438] sm:$0xff] }
0x1966   : > { %8125 = vmatpush.msra.mxu1 %v12949_v28  ;;  %v7511_v28 = vadd.f32 %v12954_v3, %v7344_v23  ;;  %v7512_v3 = vadd.f32 %v12962_v38, %v7345_v5  ;;  %v7513_v38 = vadd.f32 %v12970_v47, %v7346_v4  ;;  %v7514_v47 = vadd.f32 %v12978_v6, %v7347_v45  ;;  %v9842_v23 = vld [vmem:[%s13364_s13 + $0x448] sm:$0xff]  ;;  %v9805_v45 = vld [vmem:[%s13364_s13 + $0x3c0] sm:$0xff] }
0x1967   : > { %v7975_v11 = vpop.f32.mrf.mxu3  ;;  %v7515_v6 = vadd.f32 %v12986_v9, %v7348_v54  ;;  %v7516_v9 = vadd.f32 %v12994_v55, %v7349_v27  ;;  %v7517_v55 = vadd.f32 %v13000_v57, %v7350_v7  ;;  %v13457_v54 = vld [vmem:[#allocation35_spill] sm:$0xff] }
0x1968   : > { %8126 = vmatpush.msra.mxu1 %v12937_v29  ;;  %v7679_v58 = vadd.f32 %v12927_v56, %v7512_v3  ;;  %v7680_v49 = vadd.f32 %v12939_v44, %v7513_v38  ;;  %v7681_v34 = vadd.f32 %v12951_v32, %v7514_v47  ;;  %v13447_v3 = vld [vmem:[#allocation38_spill] sm:$0xff] }
0x1969   : > { %v7682_v43 = vadd.f32 %v12959_v62, %v7515_v6  ;;  %v7683_v50 = vadd.f32 %v12967_v52, %v7516_v9  ;;  %v7684_v52 = vadd.f32 %v13449_v31, %v7517_v55  ;;  %v9845_v38 = vld [vmem:[%s13364_s13 + $0x460] sm:$0xff]  ;;  %v13461_v9 = vld [vmem:[#allocation67_spill] sm:$0xff] }
0x196a   : > { %v7796_v12 = vpop.f32.mrf.mxu1  ;;  %8127 = vmatpush.msra.mxu1 %v12925_v13  ;;  %v7678_v13 = vadd.f32 %v12915_v61, %v7511_v28 }
0x196b   : > { %v7844_v18 = vadd.f32 %v7796_v12, %v7677_v60  ;;  %v9801_v60 = vld [vmem:[%s13364_s13 + $0x3a0] sm:$0xff] }
0x196c   : > { %8128 = vmatpush.msra.mxu1 %v12912_v51  ;;  %8311 = vmatmul.f32.gmra.mxu3 %v9838_v25 }
0x196d   : > { %v13065_v29 = vadd.f32 %v7963_v53, %v7844_v18  ;;  %8129 = vmatmul.f32.vlgmr.msra.gmra.mxu1 %v9797_v35  ;;  %v9802_v18 = vld [vmem:[%s13364_s13 + $0x3a8] sm:$0xff] }
0x196f   : > { %v7978_v53 = vpop.f32.mrf.mxu3 }
0x1972   : > { %v7799_v21 = vpop.f32.mrf.mxu1 }
0x1973   : > { %v7845_v51 = vadd.f32 %v7799_v21, %v7678_v13  ;;  %v9803_v13 = vld [vmem:[%s13364_s13 + $0x3b0] sm:$0xff] }
0x1974   : > { %8314 = vmatmul.f32.gmra.mxu3 %v9839_v39 }
0x1975   : > { %v13074_v41 = vadd.f32 %v7966_v63, %v7845_v51  ;;  %8132 = vmatmul.f32.gmra.mxu1 %v9798_v17  ;;  %v9844_v51 = vld [vmem:[%s13364_s13 + $0x458] sm:$0xff] }
0x1977   : > { %v7981_v19 = vpop.f32.mrf.mxu3 }
0x197a   : > { %v7802_v61 = vpop.f32.mrf.mxu1 }
0x197b   : > { %v7846_v0 = vadd.f32 %v7802_v61, %v7679_v58  ;;  %v13450_v58 = vld [vmem:[#allocation39_spill] sm:$0xff] }
0x197c   : > { %8317 = vmatmul.f32.gmra.mxu3 %v9840_v10  ;;  %v13453_v10 = vld [vmem:[#allocation47_spill] sm:$0xff] }
0x197d   : > { %v13083_v63 = vadd.f32 %v7969_v42, %v7846_v0  ;;  %8135 = vmatmul.f32.gmra.mxu1 %v9799_v40  ;;  %v13451_v40 = vld [vmem:[#allocation63_spill] sm:$0xff] }
0x197f   : > { %v7984_v24 = vpop.f32.mrf.mxu3 }
0x1982   : > { %v7805_v56 = vpop.f32.mrf.mxu1 }
0x1983   : > { %v7847_v2 = vadd.f32 %v7805_v56, %v7680_v49  ;;  %v13454_v49 = vld [vmem:[#allocation59_spill] sm:$0xff] }
0x1984   : > { %8320 = vmatmul.f32.gmra.mxu3 %v9841_v26 }
0x1985   : > { %v13092_v42 = vadd.f32 %v7972_v48, %v7847_v2  ;;  %8138 = vmatmul.f32.gmra.mxu1 %v9800_v20  ;;  %v13455_v2 = vld [vmem:[#allocation43_spill] sm:$0xff] }
0x1987   : > { %v7987_v35 = vpop.f32.mrf.mxu3 }
0x198a   : > { %v7808_v44 = vpop.f32.mrf.mxu1 }
0x198b   : > { %v7848_v12 = vadd.f32 %v7808_v44, %v7681_v34 }
0x198c   : > { %8323 = vmatmul.f32.gmra.mxu3 %v9842_v23  ;;  %v13459_v23 = vld [vmem:[#allocation60_spill] sm:$0xff] }
0x198d   : > { %v13101_v48 = vadd.f32 %v7975_v11, %v7848_v12  ;;  %8141 = vmatmul.f32.gmra.mxu1 %v9801_v60  ;;  %v9846_v60 = vld [vmem:[%s13364_s13 + $0x468] sm:$0xff]  ;;  %v13458_v12 = vld [vmem:[#allocation49_spill] sm:$0xff] }
0x198e   : > { %v7175_v6 = vadd.f32 %v13458_v12, %v13457_v54  ;;  %v9809_v54 = vld [vmem:[%s13364_s13 + $0x3e0] sm:$0xff] }
0x198f   : > { %v7990_v25 = vpop.f32.mrf.mxu3  ;;  %v13474_v12 = vld [vmem:[#allocation50_spill] sm:$0xff] }
0x1992   : > { %v7811_v32 = vpop.f32.mrf.mxu1 }
0x1993   : > { %v7849_v28 = vadd.f32 %v7811_v32, %v7682_v43  ;;  %v9806_v32 = vld [vmem:[%s13364_s13 + $0x3c8] sm:$0xff] }
0x1994   : > { %8326 = vmatmul.f32.gmra.mxu3 %v9843_v16 }
0x1995   : > { %v13110_v11 = vadd.f32 %v7978_v53, %v7849_v28  ;;  %8144 = vmatmul.f32.gmra.mxu1 %v9802_v18  ;;  %v13448_v53 = vld [vmem:[#allocation45_spill] sm:$0xff]  ;;  %v13460_v18 = vld [vmem:[#allocation44_spill] sm:$0xff] }
0x1996   : > { %v7169_v22 = vadd.f32 %v13448_v53, %v13447_v3  ;;  %v7353_v27 = vadd.f32 %v13460_v18, %v7175_v6  ;;  %v9807_v3 = vld [vmem:[%s13364_s13 + $0x3d0] sm:$0xff]  ;;  %v13465_v53 = vld [vmem:[#allocation46_spill] sm:$0xff] }
0x1997   : > { %v7993_v5 = vpop.f32.mrf.mxu3 }
0x1998   : > { %v7351_v33 = vadd.f32 %v13450_v58, %v7169_v22  ;;  %v7520_v16 = vadd.f32 %v13461_v9, %v7353_v27  ;;  %v9848_v58 = vld [vmem:[%s13364_s13 + $0x478] sm:$0xff]  ;;  %v13477_v27 = vld [vmem:[#allocation66_spill] sm:$0xff] }
0x199a   : > { %v7814_v62 = vpop.f32.mrf.mxu1  ;;  %v7518_v57 = vadd.f32 %v13451_v40, %v7351_v33  ;;  %v13467_v33 = vld [vmem:[#allocation41_spill] sm:$0xff] }
0x199b   : > { %v7850_v21 = vadd.f32 %v7814_v62, %v7683_v50  ;;  %v9847_v50 = vld [vmem:[%s13364_s13 + $0x470] sm:$0xff]  ;;  %v13462_v62 = vld [vmem:[#allocation37_spill] sm:$0xff] }
0x199c   : > { %8329 = vmatmul.f32.gmra.mxu3 %v9844_v51  ;;  %v7685_v56 = vadd.f32 %v13454_v49, %v7518_v57  ;;  %v13469_v57 = vld [vmem:[#allocation62_spill] sm:$0xff] }
0x199d   : > { %v13119_v17 = vadd.f32 %v7981_v19, %v7850_v21  ;;  %8147 = vmatmul.f32.gmra.mxu1 %v9803_v13  ;;  %v13452_v19 = vld [vmem:[#allocation42_spill] sm:$0xff]  ;;  %v13463_v13 = vld [vmem:[#allocation51_spill] sm:$0xff]  ;;  %v13464_v21 = vld [vmem:[#allocation61_spill] sm:$0xff] }
0x199e   : > { %v7172_v36 = vadd.f32 %v13453_v10, %v13452_v19  ;;  %v7178_v7 = vadd.f32 %v13463_v13, %v13462_v62  ;;  %v7687_v55 = vadd.f32 %v13464_v21, %v7520_v16  ;;  %v9808_v10 = vld [vmem:[%s13364_s13 + $0x3d8] sm:$0xff]  ;;  %v9810_v16 = vld [vmem:[%s13364_s13 + $0x3e8] sm:$0xff] }
0x199f   : > { %v7996_v0 = vpop.f32.mrf.mxu3 }
0x19a0   : > { %v7352_v47 = vadd.f32 %v13455_v2, %v7172_v36  ;;  %v7354_v22 = vadd.f32 %v13465_v53, %v7178_v7  ;;  %v13470_v36 = vld [vmem:[#allocation48_spill] sm:$0xff]  ;;  %v13471_v2 = vld [vmem:[#allocation34_spill] sm:$0xff] }
0x19a2   : > { %v7817_v39 = vpop.f32.mrf.mxu1  ;;  %v7519_v34 = vadd.f32 %v13456_v30, %v7352_v47  ;;  %v13472_v47 = vld [vmem:[#allocation55_spill] sm:$0xff]  ;;  %v13473_v30 = vld [vmem:[#allocation64_spill] sm:$0xff] }
0x19a3   : > { %v7851_v61 = vadd.f32 %v7817_v39, %v7684_v52  ;;  %v13466_v52 = vld [vmem:[#allocation69_spill] sm:$0xff] }
0x19a4   : > { %8332 = vmatmul.f32.gmra.mxu3 %v9845_v38  ;;  %v7686_v8 = vadd.f32 %v13459_v23, %v7519_v34  ;;  %v7521_v39 = vadd.f32 %v13466_v52, %v7354_v22  ;;  %v13482_v52 = vld [vmem:[#allocation54_spill] sm:$0xff] }
0x19a5   : > { %v13128_v4 = vadd.f32 %v7984_v24, %v7851_v61  ;;  %8150 = vmatmul.f32.gmra.mxu1 %v9804_v14  ;;  %v13468_v61 = vld [vmem:[#allocation53_spill] sm:$0xff] }
0x19a6   : > { %v7181_v40 = vadd.f32 %v13468_v61, %v13467_v33  ;;  %v7688_v38 = vadd.f32 %v13469_v57, %v7521_v39  ;;  %v13483_v61 = vld [vmem:[#allocation70_spill] sm:$0xff] }
0x19a7   : > { %v7999_v44 = vpop.f32.mrf.mxu3 }
0x19a8   : > { %v7355_v49 = vadd.f32 %v13470_v36, %v7181_v40 }
0x19aa   : > { %v7820_v20 = vpop.f32.mrf.mxu1 }
0x19ab   : > { %v7852_v26 = vadd.f32 %v7820_v20, %v7685_v56  ;;  %v7522_v20 = vadd.f32 %v13030_v59, %v7355_v49 }
0x19ac   : > { %8335 = vmatmul.f32.gmra.mxu3 %v9846_v60 }
0x19ad   : > { %v13137_v24 = vadd.f32 %v7987_v35, %v7852_v26  ;;  %8153 = vmatmul.f32.gmra.mxu1 %v9805_v45  ;;  %v7184_v26 = vadd.f32 %v13472_v47, %v13471_v2  ;;  %v7689_v34 = vadd.f32 %v13473_v30, %v7522_v20 }
0x19af   : > { %v8002_v46 = vpop.f32.mrf.mxu3  ;;  %v7356_v6 = vadd.f32 %v13474_v12, %v7184_v26 }
0x19b2   : > { %v7823_v43 = vpop.f32.mrf.mxu1 }
0x19b3   : > { %v7853_v28 = vadd.f32 %v7823_v43, %v7686_v8  ;;  %v7523_v8 = vadd.f32 %v13034_v37, %v7356_v6 }
0x19b4   : > { %8338 = vmatmul.f32.gmra.mxu3 %v9847_v50  ;;  %v13478_v50 = vld [vmem:[#allocation52_spill] sm:$0xff] }
0x19b5   : > { %v13146_v35 = vadd.f32 %v7990_v25, %v7853_v28  ;;  %8156 = vmatmul.f32.gmra.mxu1 %v9806_v32  ;;  %v13476_v32 = vld [vmem:[#allocation56_spill] sm:$0xff]  ;;  %v7690_v28 = vadd.f32 %v13477_v27, %v7523_v8 }
0x19b7   : > { %v8005_v25 = vpop.f32.mrf.mxu3 }
0x19ba   : > { %v7826_v51 = vpop.f32.mrf.mxu1 }
0x19bb   : > { %v7854_v31 = vadd.f32 %v7826_v51, %v7687_v55  ;;  %v13480_v55 = vld [vmem:[#allocation57_spill] sm:$0xff] }
0x19bc   : > { %8341 = vmatmul.f32.gmra.mxu3 %v9848_v58 }
0x19bd   : > { %v13155_v14 = vadd.f32 %v7993_v5, %v7854_v31  ;;  %8159 = vmatmul.f32.gmra.mxu1 %v9807_v3  ;;  %v13481_v3 = vld [vmem:[#allocation68_spill] sm:$0xff] }
0x19be   : > { %v9811_v31 = vld [vmem:[%s13364_s13 + $0x3f0] sm:$0xff] }
0x19bf   : > { %v8008_v5 = vpop.f32.mrf.mxu3 }
0x19c2   : > { %v7829_v19 = vpop.f32.mrf.mxu1 }
0x19c3   : > { %v7855_v56 = vadd.f32 %v7829_v19, %v7688_v38  ;;  %v9812_v38 = vld [vmem:[%s13364_s13 + $0x3f8] sm:$0xff]  ;;  %s9976_s13 = scalar_lea.hbm %s9975_s15, 1 }
0x19c4   : > { %p9977_p11 = scmp.ne.s32.totalorder %s9975_s15, %s9976_s13  ;;  %p9982_p1 = scmp.lt.s32.totalorder %s9980_s16, %s9976_s13 }
0x19c5   : > { %v13164_v45 = vadd.f32 %v7996_v0, %v7855_v56  ;;  %8162 = vmatmul.f32.gmra.mxu1 %v9808_v10  ;;  %v13475_v0 = vld [vmem:[#allocation36_spill] sm:$0xff] }
0x19c6   : > { %v7187_v18 = vadd.f32 %v13476_v32, %v13475_v0  ;;  %p9978_p12 = pnand %p9977_p11, %p10321_p5  ;;  %p9983_p2 = por %p9982_p1, %p9981_p0 }
0x19c7   : > { %v8297_v59 = vpop.f32.mrf.mxu3 }
0x19c8   : > { %v7357_v62 = vadd.f32 %v13478_v50, %v7187_v18  ;;  %p9979_p13 = pneg %p9978_p12 }
0x19ca   : > { %v7832_v60 = vpop.f32.mrf.mxu1  ;;  %v7524_v7 = vadd.f32 %v13038_v1, %v7357_v62  ;;  %p9984_p3 = pnand %p9983_p2, %p9979_p13 }
0x19cb   : > { %v7856_v23 = vadd.f32 %v7832_v60, %v7689_v34 }
0x19cc   : > { %v7691_v53 = vadd.f32 %v13481_v3, %v7524_v7 }
0x19cd   : > { %v13172_v43 = vadd.f32 %v7999_v44, %v7856_v23  ;;  %8165 = vmatmul.f32.gmra.mxu1 %v9809_v54  ;;  %v13479_v44 = vld [vmem:[#allocation40_spill] sm:$0xff] }
0x19ce   : > { %v7190_v51 = vadd.f32 %v13480_v55, %v13479_v44 }
0x19cf   : > { %v13182_v37 = vpop.f32.mrf.mxu3 }
0x19d0   : > { %v7358_v1 = vadd.f32 %v13482_v52, %v7190_v51 }
0x19d2   : > { %v7835_v9 = vpop.f32.mrf.mxu1 }
0x19d3   : > { %v7857_v13 = vadd.f32 %v7835_v9, %v7690_v28 }
0x19d5   : > { %v13180_v21 = vadd.f32 %v8002_v46, %v7857_v13  ;;  %8168 = vmatmul.f32.gmra.mxu1 %v9810_v16  ;;  %v7525_v46 = vadd.f32 %v13047_v15, %v7358_v1 }
0x19d7   : > { %v8303_v33 = vpop.f32.mrf.mxu3  ;;  %v7692_v40 = vadd.f32 %v13483_v61, %v7525_v46 }
0x19da   : > { %v7838_v22 = vpop.f32.mrf.mxu1 }
0x19db   : > { %v7858_v39 = vadd.f32 %v7838_v22, %v7691_v53 }
0x19dd   : > { %v13190_v58 = vadd.f32 %v8005_v25, %v7858_v39  ;;  %8171 = vmatmul.f32.gmra.mxu1 %v9811_v31 }
0x19df   : > { %v8306_v25 = vpop.f32.mrf.mxu3 }
0x19e2   : > { %v7841_v57 = vpop.f32.mrf.mxu1 }
0x19e3   : > { %v7859_v19 = vadd.f32 %v7841_v57, %v7692_v40 }
0x19e5   : > { %v13194_v10 = vadd.f32 %v8008_v5, %v7859_v19  ;;  %8174 = vmatmul.f32.gmra.mxu1 %v9812_v38 }
0x19ea   : > { %v8130_v15 = vpop.f32.mrf.mxu1 }
0x19eb   : > { %9987 = shalt.err (!%p9984_p3)
}
0x19ec   : > { %9870 = dma.vmem_to_hbm [thread:$0]  (%p10321_p5), %s8421_s8, 16, %s8423_s10, %s8403_s12   ;;  %v8178_v36 = vadd.f32 %v8130_v15, %v13065_v29  ;;  %v13211_v49 = vld [vmem:[%s10266_s25] ss:$0 sm:$0xff] }
0x19ed   : > { %s13485_s6 = scalar_lea.vmem [#allocation4], %s11611_s4  ;;  %s8435_s15 = sshll.u32 %s8431_s5, 4  ;;  %s8436_s15 = int_to_ptr.hbm [resolvable:$true] %s8435_s15 }
0x19ee   : > { %s8433_s0 = sshll.u32 %s13485_s6, 4  ;;  %v8345_v56 = vadd.f32 %v8297_v59, %v8178_v36  ;;  %s8407_s13 = scalar_lea.sflag [#allocation5], %s11611_s4  ;;  %s8434_s0 = int_to_ptr.vmem [resolvable:$true] %s8433_s0 }
0x19ef   : > { %s10002_s16 = sshra.s32 %s8436_s15, 4  ;;  %s10008_s8 = scalar_lea.hbm %s10281_s14, 2  ;;  %s10003_s16 = int_to_ptr.hbm [resolvable:$true] %s10002_s16 }
0x19f0   : > { %s10004_s3 = scalar_lea.hbm %s10003_s16, 1  ;;  %p10009_p9 = scmp.lt.s32.totalorder %s10003_s16, %s10281_s14 }
0x19f1   : > { %p10005_p4 = scmp.ne.s32.totalorder %s10003_s16, %s10004_s3  ;;  %p10010_p10 = scmp.lt.s32.totalorder %s10008_s8, %s10004_s3 }
0x19f3   : > { %p10006_p7 = pnand %p10005_p4, %p10321_p5  ;;  %p10011_p11 = por %p10010_p10, %p10009_p9 }
0x19f5   : > { %p10007_p8 = pneg %p10006_p7 }
0x19f7   : > { %p10012_p12 = pnand %p10011_p11, %p10007_p8 }
0x19f9   : > { %10015 = shalt.err (!%p10012_p12)
}
0x19fa   : > { %9871 = dma.vmem_to_hbm [thread:$0]  (%p10321_p5), %s8434_s0, 16, %s8436_s15, %s8407_s13   ;;  %v8365_v29 = vadd.f32 %v13211_v49, %v8345_v56  ;;  %v8133_v20 = vpop.f32.mrf.mxu1  ;;  %v8309_v2 = vpop.f32.mrf.mxu3 }
0x19fb   : > { %s13486_s12 = sshll.u32 %s10333_s26, 7  ;;  %v8179_v5 = vadd.f32 %v8133_v20, %v13074_v41 }
0x19fc   : > { %s13225_s4 = scalar_lea.vmem %s10271_s9, %s13486_s12 }
0x19fd   : > { %8381 = vst.msk [vmem:[%s13225_s4] sm:$0xff] %vm1314_vm1, %v8365_v29  ;;  %v8346_v47 = vadd.f32 %v13182_v37, %v8179_v5 }
0x19ff   : > { %v8366_v26 = vadd.f32 %v13211_v49, %v8346_v47 }
0x1a01   : > { %8382 = vst.msk [vmem:[%s13225_s4 + $0x8] sm:$0xff] %vm1314_vm1, %v8366_v26 }
0x1a02   : > { %v8136_v30 = vpop.f32.mrf.mxu1  ;;  %v8312_v54 = vpop.f32.mrf.mxu3 }
0x1a03   : > { %v8180_v34 = vadd.f32 %v8136_v30, %v13083_v63 }
0x1a05   : > { %v8347_v60 = vadd.f32 %v8303_v33, %v8180_v34 }
0x1a07   : > { %v8367_v12 = vadd.f32 %v13211_v49, %v8347_v60 }
0x1a09   : > { %8383 = vst.msk [vmem:[%s13225_s4 + $0x10] sm:$0xff] %vm1314_vm1, %v8367_v12 }
0x1a0a   : > { %v8139_v6 = vpop.f32.mrf.mxu1  ;;  %v8315_v59 = vpop.f32.mrf.mxu3 }
0x1a0b   : > { %v8181_v41 = vadd.f32 %v8139_v6, %v13092_v42 }
0x1a0d   : > { %v8348_v23 = vadd.f32 %v8306_v25, %v8181_v41 }
0x1a0f   : > { %v8368_v8 = vadd.f32 %v13211_v49, %v8348_v23 }
0x1a11   : > { %8384 = vst.msk [vmem:[%s13225_s4 + $0x18] sm:$0xff] %vm1314_vm1, %v8368_v8 }
0x1a12   : > { %v8142_v0 = vpop.f32.mrf.mxu1  ;;  %v8318_v28 = vpop.f32.mrf.mxu3 }
0x1a13   : > { %v8182_v63 = vadd.f32 %v8142_v0, %v13101_v48 }
0x1a15   : > { %v8349_v32 = vadd.f32 %v8309_v2, %v8182_v63 }
0x1a17   : > { %v8369_v18 = vadd.f32 %v13211_v49, %v8349_v32 }
0x1a19   : > { %8385 = vst.msk [vmem:[%s13225_s4 + $0x20] sm:$0xff] %vm1314_vm1, %v8369_v18 }
0x1a1a   : > { %v8145_v27 = vpop.f32.mrf.mxu1  ;;  %v8321_v48 = vpop.f32.mrf.mxu3 }
0x1a1b   : > { %v8183_v42 = vadd.f32 %v8145_v27, %v13110_v11 }
0x1a1d   : > { %v8350_v9 = vadd.f32 %v8312_v54, %v8183_v42 }
0x1a1f   : > { %v8370_v16 = vadd.f32 %v13211_v49, %v8350_v9 }
0x1a21   : > { %8386 = vst.msk [vmem:[%s13225_s4 + $0x28] sm:$0xff] %vm1314_vm1, %v8370_v16 }
0x1a22   : > { %v8148_v50 = vpop.f32.mrf.mxu1  ;;  %v8324_v55 = vpop.f32.mrf.mxu3 }
0x1a23   : > { %v8184_v62 = vadd.f32 %v8148_v50, %v13119_v17 }
0x1a25   : > { %v8351_v13 = vadd.f32 %v8315_v59, %v8184_v62 }
0x1a27   : > { %v8371_v7 = vadd.f32 %v13211_v49, %v8351_v13 }
0x1a29   : > { %8387 = vst.msk [vmem:[%s13225_s4 + $0x30] sm:$0xff] %vm1314_vm1, %v8371_v7 }
0x1a2a   : > { %v8151_v37 = vpop.f32.mrf.mxu1  ;;  %v8327_v31 = vpop.f32.mrf.mxu3 }
0x1a2b   : > { %v8185_v44 = vadd.f32 %v8151_v37, %v13128_v4 }
0x1a2d   : > { %v8352_v11 = vadd.f32 %v8318_v28, %v8185_v44 }
0x1a2f   : > { %v8372_v51 = vadd.f32 %v13211_v49, %v8352_v11 }
0x1a31   : > { %8388 = vst.msk [vmem:[%s13225_s4 + $0x38] sm:$0xff] %vm1314_vm1, %v8372_v51 }
0x1a32   : > { %v8154_v3 = vpop.f32.mrf.mxu1  ;;  %v8330_v33 = vpop.f32.mrf.mxu3 }
0x1a33   : > { %v8186_v17 = vadd.f32 %v8154_v3, %v13137_v24 }
0x1a35   : > { %v8353_v53 = vadd.f32 %v8321_v48, %v8186_v17 }
0x1a37   : > { %v8373_v22 = vadd.f32 %v13211_v49, %v8353_v53 }
0x1a39   : > { %8389 = vst.msk [vmem:[%s13225_s4 + $0x40] sm:$0xff] %vm1314_vm1, %v8373_v22 }
0x1a3a   : > { %v8157_v52 = vpop.f32.mrf.mxu1 }
0x1a3b   : > { %v8187_v4 = vadd.f32 %v8157_v52, %v13146_v35  ;;  %v8333_v35 = vpop.f32.mrf.mxu3 }
0x1a3d   : > { %v8354_v1 = vadd.f32 %v8324_v55, %v8187_v4 }
0x1a3f   : > { %v8374_v39 = vadd.f32 %v13211_v49, %v8354_v1 }
0x1a41   : > { %8390 = vst.msk [vmem:[%s13225_s4 + $0x48] sm:$0xff] %vm1314_vm1, %v8374_v39 }
0x1a42   : > { %v8160_v46 = vpop.f32.mrf.mxu1 }
0x1a43   : > { %v8188_v24 = vadd.f32 %v8160_v46, %v13155_v14  ;;  %v8336_v56 = vpop.f32.mrf.mxu3 }
0x1a45   : > { %v8355_v61 = vadd.f32 %v8327_v31, %v8188_v24 }
0x1a47   : > { %v8375_v40 = vadd.f32 %v13211_v49, %v8355_v61 }
0x1a49   : > { %8391 = vst.msk [vmem:[%s13225_s4 + $0x50] sm:$0xff] %vm1314_vm1, %v8375_v40 }
0x1a4a   : > { %v8163_v57 = vpop.f32.mrf.mxu1 }
0x1a4b   : > { %v8189_v38 = vadd.f32 %v8163_v57, %v13164_v45  ;;  %v8339_v47 = vpop.f32.mrf.mxu3 }
0x1a4d   : > { %v8356_v19 = vadd.f32 %v8330_v33, %v8189_v38 }
0x1a4f   : > { %v8376_v15 = vadd.f32 %v13211_v49, %v8356_v19 }
0x1a51   : > { %8392 = vst.msk [vmem:[%s13225_s4 + $0x58] sm:$0xff] %vm1314_vm1, %v8376_v15 }
0x1a52   : > { %v8166_v25 = vpop.f32.mrf.mxu1 }
0x1a53   : > { %v8190_v36 = vadd.f32 %v8166_v25, %v13172_v43  ;;  %v8342_v54 = vpop.f32.mrf.mxu3 }
0x1a55   : > { %v8357_v14 = vadd.f32 %v8333_v35, %v8190_v36 }
0x1a57   : > { %v8377_v29 = vadd.f32 %v13211_v49, %v8357_v14 }
0x1a59   : > { %8393 = vst.msk [vmem:[%s13225_s4 + $0x60] sm:$0xff] %vm1314_vm1, %v8377_v29 }
0x1a5a   : > { %v8169_v20 = vpop.f32.mrf.mxu1 }
0x1a5b   : > { %v8191_v45 = vadd.f32 %v8169_v20, %v13180_v21 }
0x1a5d   : > { %v8358_v5 = vadd.f32 %v8336_v56, %v8191_v45 }
0x1a5f   : > { %v8378_v2 = vadd.f32 %v13211_v49, %v8358_v5 }
0x1a61   : > { %8394 = vst.msk [vmem:[%s13225_s4 + $0x68] sm:$0xff] %vm1314_vm1, %v8378_v2 }
0x1a62   : > { %v8172_v26 = vpop.f32.mrf.mxu1 }
0x1a63   : > { %v8192_v30 = vadd.f32 %v8172_v26, %v13190_v58 }
0x1a65   : > { %v8359_v43 = vadd.f32 %v8339_v47, %v8192_v30 }
0x1a67   : > { %v8379_v34 = vadd.f32 %v13211_v49, %v8359_v43 }
0x1a69   : > { %8395 = vst.msk [vmem:[%s13225_s4 + $0x70] sm:$0xff] %vm1314_vm1, %v8379_v34 }
0x1a6a   : > { %v8175_v60 = vpop.f32.mrf.mxu1 }
0x1a6b   : > { %v8193_v12 = vadd.f32 %v8175_v60, %v13194_v10 }
0x1a6d   : > { %v8360_v6 = vadd.f32 %v8342_v54, %v8193_v12 }
0x1a6f   : > { %v8380_v21 = vadd.f32 %v13211_v49, %v8360_v6 }
0x1a71   : > { %8396 = vst.msk [vmem:[%s13225_s4 + $0x78] sm:$0xff] %vm1314_vm1, %v8380_v21 }
0x1a72 PF: > { %p9881_p5 = scmp.ge.s32.totalorder %s10054_s7, 2  ;;  %s8455_s22 = sand.u32 1, %s10042_s28  }
0x1a73   : > { %s8456_s26 = scalar_lea.sflag [#allocation3], %s8455_s22 }
0x1a74   : > { %p9875_p13 = pnand %p9881_p5, %p10325_p6 }
0x1a76   : > { %p9876_p0 = pneg %p9875_p13 }
0x1a78   : > { %10033 = dma.done.wait (%p9876_p0), %s8456_s26, 16  }
0x1a79   : > { %10035 = vsyncadd (%p9876_p0), %s8456_s26, 4294967280  ;;  %s8465_s10 = scalar_lea.sflag [#allocation5], %s8455_s22 }
0x1a7a   : > { %10037 = dma.done.wait (%p9876_p0), %s8465_s10, 16  }
0x1a7b   : > { %10039 = vsyncadd (%p9876_p0), %s8465_s10, 4294967280  ;;  %p87_p1 = scmp.ge.s32.totalorder %s10308_s11, 4   ;;  %s13487_s28 = smov %s10046_s1 }
0x1a7c   : > { %s13488_s1 = smov %s10050_s2  ;;  %s13489_s2 = smov %s10319_s18 }
0x1a7d   : > { %s13490_s7 = smov %s10308_s11  ;;  %89 = sbr.rel (!%p87_p1) target bundleno = 72 (0x48), region = 346 }
0x1a82   :  { %8470 = vsyncpa [#allocation3], 1 }
0x1a83   :  { %8472 = vsyncpa [#allocation3 + $0x1], 1 }
0x1a84   :  { %8473 = vsyncpa [#allocation5], 1 }
0x1a85   :  { %8475 = vsyncpa [#allocation5 + $0x1], 1 }

</bundles_post_ra>
